<compile_context>
chip_gen: v6e
topology: v6e:2x2x1
jax: 0.10.0
libtpu: 0.0.40
codegen_flags: <defaults>
</compile_context>

<pallas_src>
import functools
import math

import jax
import jax.numpy as jnp
from jax.experimental import pallas as pl
from jax.experimental.pallas import tpu as pltpu

_BN_EPS = 1e-5
_LANE = 128
_SLAB = 8          # point clouds per feature-kernel grid step
_CLS_TILE = 128    # max batch rows per classifier grid step


def _round_up(x, m):
    return ((x + m - 1) // m) * m


# ---------------------------------------------------------------------------
# Kernel 1: shared per-point MLP (Conv1d k=1 with folded BN) + ReLU + max-pool.
# One grid step processes a slab of `bt` point clouds as single slab-level matmuls.
# ---------------------------------------------------------------------------
def _feat_kernel(x_ref,
                 w1_ref, b1_ref, w2_ref, b2_ref, w3_ref, b3_ref,
                 feat_ref, featbf_ref, *, bt, n):
    x = x_ref[...]                                          # (bt*n, 8) bf16
    h = jnp.dot(x, w1_ref[...], preferred_element_type=jnp.float32) + b1_ref[...]
    h = jnp.maximum(h, 0.0).astype(jnp.bfloat16)            # (bt*n, 128) lane-dense
    h = jnp.dot(h, w2_ref[...], preferred_element_type=jnp.float32) + b2_ref[...]
    h = jnp.maximum(h, 0.0).astype(jnp.bfloat16)            # (bt*n, 128)
    h = jnp.dot(h, w3_ref[...], preferred_element_type=jnp.float32) + b3_ref[...]
    # (bt*n, 512) f32. ReLU commutes with max (monotone), so pool first, then ReLU:
    # the big elementwise max shrinks from (bt*n, 512) to (bt, 512).
    h = h.reshape(bt, n, h.shape[-1])
    feat = jnp.maximum(jnp.max(h, axis=1), 0.0)             # (bt, 512) f32
    feat_ref[...] = feat                                     # full (8, 512) store
    featbf_ref[...] = feat.astype(jnp.bfloat16)              # bf16 copy for classifier


# ---------------------------------------------------------------------------
# Kernel 2: classifier MLP, tiled over batch rows.
# ---------------------------------------------------------------------------
def _cls_kernel(f_ref,
                wc1_ref, bc1_ref, wc2_ref, bc2_ref, wc3_ref, bc3_ref,
                logit_ref):
    f = f_ref[...]                                           # (TB, 512) bf16
    h = jnp.dot(f, wc1_ref[...], preferred_element_type=jnp.float32) + bc1_ref[...]
    h = jnp.maximum(h, 0.0).astype(jnp.bfloat16)             # (TB, 1024)
    h = jnp.dot(h, wc2_ref[...], preferred_element_type=jnp.float32) + bc2_ref[...]
    h = jnp.maximum(h, 0.0).astype(jnp.bfloat16)             # (TB, 512)
    logit_ref[...] = (jnp.dot(h, wc3_ref[...], preferred_element_type=jnp.float32)
                      + bc3_ref[...])                        # (TB, 384) f32


# ---------------------------------------------------------------------------
# Parameter preparation: fold eval-mode BN into weights, cast to bf16, pad.
# ---------------------------------------------------------------------------
def _fold_bn(w, b, gamma, beta, mean, var):
    scale = gamma * jax.lax.rsqrt(var + _BN_EPS)              # (dout,)
    w_f = (w * scale[None, :]).astype(jnp.bfloat16)           # (din, dout)
    b_f = ((b - mean) * scale + beta).astype(jnp.float32)[None, :]
    return w_f, b_f


def prepare_params(params, num_classes):
    fp = {}
    # Layer 1 (Conv1d k=1 + BN): pad in-channels 3 -> 8 and out-channels 32 -> 128
    # (lane-dense activations). Padded out-channels are exact zeros through the ReLU
    # and contribute nothing because the matching rows of w2 are zero-padded too.
    w1, b1 = _fold_bn(params["w1"], params["b1"], params["g1"], params["be1"],
                      params["m1"], params["v1"])
    fp["w1"] = jnp.pad(w1, ((0, 8 - w1.shape[0]), (0, _LANE - w1.shape[1])))
    fp["b1"] = jnp.pad(b1, ((0, 0), (0, _LANE - b1.shape[1])))
    w2, b2 = _fold_bn(params["w2"], params["b2"], params["g2"], params["be2"],
                      params["m2"], params["v2"])
    fp["w2"] = jnp.pad(w2, ((0, _LANE - w2.shape[0]), (0, 0)))
    fp["b2"] = b2
    fp["w3"], fp["b3"] = _fold_bn(params["w3"], params["b3"], params["g3"],
                                  params["be3"], params["m3"], params["v3"])
    # Classifier layers (Linear + BN).
    for i in (1, 2):
        fp[f"wc{i}"], fp[f"bc{i}"] = _fold_bn(
            params[f"wc{i}"], params[f"bc{i}"], params[f"gc{i}"], params[f"bec{i}"],
            params[f"mc{i}"], params[f"vc{i}"])
    # Final Linear: pad num_classes lane dim to a multiple of 128 (lane-dense output).
    nc_pad = _round_up(num_classes, _LANE)
    fp["wc3"] = jnp.pad(params["wc3"],
                        ((0, 0), (0, nc_pad - num_classes))).astype(jnp.bfloat16)
    fp["bc3"] = jnp.pad(params["bc3"],
                        ((0, nc_pad - num_classes),)).astype(jnp.float32)[None, :]
    return fp


# ---------------------------------------------------------------------------
# Forward wrapper.
# ---------------------------------------------------------------------------
def dr_fr_forward(point, fp, *, num_classes):
    """point: (B, N, 3) f32 -> (feature (B, f_dim) f32, logit (B, num_classes) f32)."""
    B, N, C = point.shape
    f_dim = fp["w3"].shape[1]
    nc_pad = fp["wc3"].shape[1]

    # Pad B so both the 8-cloud feature slabs and the classifier row-tile divide it.
    bt = _SLAB
    b_pad = _round_up(B, bt)
    tb = min(b_pad, _CLS_TILE)
    b_pad = _round_up(b_pad, tb)

    # Pad xyz channels 3 -> 8, pad the batch, flatten clouds along points, cast bf16.
    x = jnp.pad(point, ((0, b_pad - B), (0, 0), (0, 8 - C)))
    x = x.reshape(b_pad * N, 8).astype(jnp.bfloat16)

    def const_spec(a):
        nd = a.ndim
        return pl.BlockSpec(a.shape, lambda i, _nd=nd: (0,) * _nd)

    feat_w = [fp[k] for k in ("w1", "b1", "w2", "b2", "w3", "b3")]
    feature, feature_bf16 = pl.pallas_call(
        functools.partial(_feat_kernel, bt=bt, n=N),
        out_shape=(jax.ShapeDtypeStruct((b_pad, f_dim), jnp.float32),
                   jax.ShapeDtypeStruct((b_pad, f_dim), jnp.bfloat16)),
        grid_spec=pltpu.PrefetchScalarGridSpec(
            num_scalar_prefetch=0,
            grid=(b_pad // bt,),
            in_specs=[pl.BlockSpec((bt * N, 8), lambda i: (i, 0))]
                     + [const_spec(a) for a in feat_w],
            out_specs=[pl.BlockSpec((bt, f_dim), lambda i: (i, 0)),
                       pl.BlockSpec((bt, f_dim), lambda i: (i, 0))],
        ),
        compiler_params=pltpu.CompilerParams(
            dimension_semantics=("parallel",),
            vmem_limit_bytes=32 * 1024 * 1024),
    )(x, *feat_w)

    cls_w = [fp[k] for k in ("wc1", "bc1", "wc2", "bc2", "wc3", "bc3")]
    logit_pad = pl.pallas_call(
        _cls_kernel,
        out_shape=jax.ShapeDtypeStruct((b_pad, nc_pad), jnp.float32),
        grid_spec=pltpu.PrefetchScalarGridSpec(
            num_scalar_prefetch=0,
            grid=(b_pad // tb,),
            in_specs=[pl.BlockSpec((tb, f_dim), lambda i: (i, 0))]
                     + [const_spec(a) for a in cls_w],
            out_specs=pl.BlockSpec((tb, nc_pad), lambda i: (i, 0)),
        ),
        compiler_params=pltpu.CompilerParams(
            dimension_semantics=("parallel",),
            vmem_limit_bytes=32 * 1024 * 1024),
    )(feature_bf16, *cls_w)

    return feature[:B], logit_pad[:B, :num_classes]


# ---------------------------------------------------------------------------
# Synthetic parameters (torch-style: conv/linear weight+bias, BN gamma/beta/mean/var).
# ---------------------------------------------------------------------------
def init_params(key, f_dim=512, num_classes=347):
    feat_dims = [3, 32, 128, f_dim]          # feat_layer_dims=[32, 128, 512]
    cls_dims = [f_dim, 1024, 512]            # classifier_layer_dims=[1024, 512]
    params = {}
    keys = iter(jax.random.split(key, 64))

    def bn_layer(prefix, din, dout):
        params[f"w{prefix}"] = (jax.random.normal(next(keys), (din, dout), jnp.float32)
                                / math.sqrt(din))
        params[f"b{prefix}"] = 0.01 * jax.random.normal(next(keys), (dout,), jnp.float32)
        params[f"g{prefix}"] = 1.0 + 0.1 * jax.random.normal(next(keys), (dout,), jnp.float32)
        params[f"be{prefix}"] = 0.1 * jax.random.normal(next(keys), (dout,), jnp.float32)
        params[f"m{prefix}"] = 0.1 * jax.random.normal(next(keys), (dout,), jnp.float32)
        params[f"v{prefix}"] = 1.0 + 0.1 * jnp.abs(
            jax.random.normal(next(keys), (dout,), jnp.float32))

    for i in range(3):
        bn_layer(str(i + 1), feat_dims[i], feat_dims[i + 1])
    for i in range(2):
        bn_layer(f"c{i + 1}", cls_dims[i], cls_dims[i + 1])
    params["wc3"] = (jax.random.normal(next(keys), (cls_dims[-1], num_classes), jnp.float32)
                     / math.sqrt(cls_dims[-1]))
    params["bc3"] = 0.01 * jax.random.normal(next(keys), (num_classes,), jnp.float32)
    return params


# ---------------------------------------------------------------------------
# References.
# ---------------------------------------------------------------------------
def reference_forward(point, p):
    """Full-precision (f32, unfolded eval-mode BN) reference of the forward pass."""
    def block(x, prefix):
        y = x @ p[f"w{prefix}"] + p[f"b{prefix}"]
        y = ((y - p[f"m{prefix}"])
             * (p[f"g{prefix}"] / jnp.sqrt(p[f"v{prefix}"] + _BN_EPS))
             + p[f"be{prefix}"])
        return jnp.maximum(y, 0.0)

    h = block(point, "1")
    h = block(h, "2")
    h = block(h, "3")
    feat = jnp.max(h, axis=1)                               # (B, 512)
    f = block(feat, "c1")
    f = block(f, "c2")
    logit = f @ p["wc3"] + p["bc3"]
    return feat, logit


def reference_forward_matched(point, fp, num_classes):
    """Plain-JAX forward with the same folded/bf16 numerics as the Pallas kernels."""
    B, N, C = point.shape
    x = jnp.pad(point, ((0, 0), (0, 0), (0, 8 - C))).astype(jnp.bfloat16)

    def layer(h, w, b):
        y = jnp.dot(h, w, preferred_element_type=jnp.float32) + b
        return jnp.maximum(y, 0.0)

    h = layer(x, fp["w1"], fp["b1"])
    h = layer(h.astype(jnp.bfloat16), fp["w2"], fp["b2"])
    h = layer(h.astype(jnp.bfloat16), fp["w3"], fp["b3"])
    feat = jnp.max(h, axis=1)                               # (B, 512) f32
    f = layer(feat.astype(jnp.bfloat16), fp["wc1"], fp["bc1"])
    f = layer(f.astype(jnp.bfloat16), fp["wc2"], fp["bc2"])
    logit = (jnp.dot(f.astype(jnp.bfloat16), fp["wc3"],
                     preferred_element_type=jnp.float32) + fp["bc3"])
    return feat, logit[:, :num_classes]


if __name__ == "__main__":
    key = jax.random.PRNGKey(0)
    k_params, k_points = jax.random.split(key)

    B, N = 2, 128          # small stand-in for point_num=962
    F_DIM, NUM_CLASSES = 512, 347

    params = init_params(k_params, f_dim=F_DIM, num_classes=NUM_CLASSES)
    fp = prepare_params(params, NUM_CLASSES)
    point = jax.random.normal(k_points, (B, N, 3), jnp.float32)

    fwd = jax.jit(dr_fr_forward, static_argnames=("num_classes",))
    feature, logit = fwd(point, fp, num_classes=NUM_CLASSES)
    jax.block_until_ready((feature, logit))

    assert feature.shape == (B, F_DIM) and logit.shape == (B, NUM_CLASSES)

    # Tight check against a plain-JAX forward using identical folded/bf16 numerics.
    m_feat, m_logit = reference_forward_matched(point, fp, NUM_CLASSES)
    assert jnp.allclose(feature, m_feat, rtol=5e-3, atol=5e-3)
    assert jnp.allclose(logit, m_logit, rtol=5e-3, atol=5e-3)

    # Loose check against the full-precision (f32, unfolded BN) reference.
    r_feat, r_logit = reference_forward(point, params)
    assert jnp.allclose(feature, r_feat, rtol=1e-1, atol=1e-1)
    assert jnp.allclose(logit, r_logit, rtol=1e-1, atol=1e-1)

    print("KERNEL_OK")
</pallas_src>

<mosaic_0001>
module attributes {stable_mosaic.version = 11 : i64} {
  func.func @_feat_kernel(%arg0: i32, %arg1: memref<1024x8xbf16, #tpu.memory_space<vmem>>, %arg2: memref<8x128xbf16, #tpu.memory_space<vmem>>, %arg3: memref<1x128xf32, #tpu.memory_space<vmem>>, %arg4: memref<128x128xbf16, #tpu.memory_space<vmem>>, %arg5: memref<1x128xf32, #tpu.memory_space<vmem>>, %arg6: memref<128x512xbf16, #tpu.memory_space<vmem>>, %arg7: memref<1x512xf32, #tpu.memory_space<vmem>>, %arg8: memref<8x512xf32, #tpu.memory_space<vmem>>, %arg9: memref<8x512xbf16, #tpu.memory_space<vmem>>) attributes {dimension_semantics = [#tpu.dimension_semantics<parallel>], iteration_bounds = array<i64: 1>, scalar_prefetch = 0 : i64, scratch_operands = 0 : i64, tpu.core_type = #tpu.core_type<tc>, window_params = [{transform_indices = @transform_0, window_bounds = array<i64: 1024, 8>}, {pipeline_mode = #tpu.pipeline_mode<synchronous>, transform_indices = @transform_1, window_bounds = array<i64: 8, 128>}, {pipeline_mode = #tpu.pipeline_mode<synchronous>, transform_indices = @transform_2, window_bounds = array<i64: 1, 128>}, {pipeline_mode = #tpu.pipeline_mode<synchronous>, transform_indices = @transform_3, window_bounds = array<i64: 128, 128>}, {pipeline_mode = #tpu.pipeline_mode<synchronous>, transform_indices = @transform_4, window_bounds = array<i64: 1, 128>}, {pipeline_mode = #tpu.pipeline_mode<synchronous>, transform_indices = @transform_5, window_bounds = array<i64: 128, 512>}, {pipeline_mode = #tpu.pipeline_mode<synchronous>, transform_indices = @transform_6, window_bounds = array<i64: 1, 512>}, {transform_indices = @transform_7, window_bounds = array<i64: 8, 512>}, {transform_indices = @transform_8, window_bounds = array<i64: 8, 512>}]} {
    %c0 = arith.constant 0 : index
    %c0_0 = arith.constant 0 : index
    %0 = vector.load %arg1[%c0, %c0_0] : memref<1024x8xbf16, #tpu.memory_space<vmem>>, vector<1024x8xbf16>
    %c0_1 = arith.constant 0 : index
    %c0_2 = arith.constant 0 : index
    %1 = vector.load %arg2[%c0_1, %c0_2] : memref<8x128xbf16, #tpu.memory_space<vmem>>, vector<8x128xbf16>
    %cst = arith.constant dense<0.000000e+00> : vector<1024x128xf32>
    %2 = tpu.matmul %0, %1, %cst {dimension_numbers = #tpu.dot_dimension_numbers<[1], [0], [0], [1], [0, 0, 1, 1], [], []>} : vector<1024x8xbf16>, vector<8x128xbf16>, vector<1024x128xf32> -> vector<1024x128xf32>
    %c0_3 = arith.constant 0 : index
    %c0_4 = arith.constant 0 : index
    %3 = vector.load %arg3[%c0_3, %c0_4] : memref<1x128xf32, #tpu.memory_space<vmem>>, vector<1x128xf32>
    %4 = vector.broadcast %3 : vector<1x128xf32> to vector<1024x128xf32>
    %5 = arith.addf %2, %4 : vector<1024x128xf32>
    %cst_5 = arith.constant 0.000000e+00 : f32
    %6 = vector.broadcast %cst_5 : f32 to vector<1024x128xf32>
    %7 = arith.maximumf %5, %6 : vector<1024x128xf32>
    %8 = arith.truncf %7 : vector<1024x128xf32> to vector<1024x128xbf16>
    %c0_6 = arith.constant 0 : index
    %c0_7 = arith.constant 0 : index
    %9 = vector.load %arg4[%c0_6, %c0_7] : memref<128x128xbf16, #tpu.memory_space<vmem>>, vector<128x128xbf16>
    %cst_8 = arith.constant dense<0.000000e+00> : vector<1024x128xf32>
    %10 = tpu.matmul %8, %9, %cst_8 {dimension_numbers = #tpu.dot_dimension_numbers<[1], [0], [0], [1], [0, 0, 1, 1], [], []>} : vector<1024x128xbf16>, vector<128x128xbf16>, vector<1024x128xf32> -> vector<1024x128xf32>
    %c0_9 = arith.constant 0 : index
    %c0_10 = arith.constant 0 : index
    %11 = vector.load %arg5[%c0_9, %c0_10] : memref<1x128xf32, #tpu.memory_space<vmem>>, vector<1x128xf32>
    %12 = vector.broadcast %11 : vector<1x128xf32> to vector<1024x128xf32>
    %13 = arith.addf %10, %12 : vector<1024x128xf32>
    %cst_11 = arith.constant 0.000000e+00 : f32
    %14 = vector.broadcast %cst_11 : f32 to vector<1024x128xf32>
    %15 = arith.maximumf %13, %14 : vector<1024x128xf32>
    %16 = arith.truncf %15 : vector<1024x128xf32> to vector<1024x128xbf16>
    %c0_12 = arith.constant 0 : index
    %c0_13 = arith.constant 0 : index
    %17 = vector.load %arg6[%c0_12, %c0_13] : memref<128x512xbf16, #tpu.memory_space<vmem>>, vector<128x512xbf16>
    %cst_14 = arith.constant dense<0.000000e+00> : vector<1024x512xf32>
    %18 = tpu.matmul %16, %17, %cst_14 {dimension_numbers = #tpu.dot_dimension_numbers<[1], [0], [0], [1], [0, 0, 1, 1], [], []>} : vector<1024x128xbf16>, vector<128x512xbf16>, vector<1024x512xf32> -> vector<1024x512xf32>
    %c0_15 = arith.constant 0 : index
    %c0_16 = arith.constant 0 : index
    %19 = vector.load %arg7[%c0_15, %c0_16] : memref<1x512xf32, #tpu.memory_space<vmem>>, vector<1x512xf32>
    %20 = vector.broadcast %19 : vector<1x512xf32> to vector<1024x512xf32>
    %21 = arith.addf %18, %20 : vector<1024x512xf32>
    %22 = vector.shape_cast %21 : vector<1024x512xf32> to vector<8x128x512xf32>
    %cst_17 = arith.constant dense<0xFF800000> : vector<8x512xf32>
    %23 = vector.multi_reduction <maximumf>, %22, %cst_17 [1] : vector<8x128x512xf32> to vector<8x512xf32>
    %cst_18 = arith.constant 0.000000e+00 : f32
    %24 = vector.broadcast %cst_18 : f32 to vector<8x512xf32>
    %25 = arith.maximumf %23, %24 : vector<8x512xf32>
    %c0_19 = arith.constant 0 : index
    %c0_20 = arith.constant 0 : index
    %26 = vector.load %arg8[%c0_19, %c0_20] : memref<8x512xf32, #tpu.memory_space<vmem>>, vector<8x512xf32>
    tpu.vector_store %arg8[%c0_19, %c0_20], %25 {strides = array<i32>} : memref<8x512xf32, #tpu.memory_space<vmem>>, vector<8x512xf32>,
    %27 = arith.truncf %25 : vector<8x512xf32> to vector<8x512xbf16>
    %c0_21 = arith.constant 0 : index
    %c0_22 = arith.constant 0 : index
    %28 = vector.load %arg9[%c0_21, %c0_22] : memref<8x512xbf16, #tpu.memory_space<vmem>>, vector<8x512xbf16>
    tpu.vector_store %arg9[%c0_21, %c0_22], %27 {strides = array<i32>} : memref<8x512xbf16, #tpu.memory_space<vmem>>, vector<8x512xbf16>,
    return
  }
  func.func @transform_0(%arg0: i32) -> (i32, i32) {
    %c0_i32 = arith.constant 0 : i32
    %c0_i32_0 = arith.constant 0 : i32
    return %arg0, %c0_i32 : i32, i32
  }
  func.func @transform_1(%arg0: i32) -> (i32, i32) {
    %c0_i32 = arith.constant 0 : i32
    %c0_i32_0 = arith.constant 0 : i32
    %c0_i32_1 = arith.constant 0 : i32
    return %c0_i32, %c0_i32_0 : i32, i32
  }
  func.func @transform_2(%arg0: i32) -> (i32, i32) {
    %c0_i32 = arith.constant 0 : i32
    %c0_i32_0 = arith.constant 0 : i32
    %c0_i32_1 = arith.constant 0 : i32
    return %c0_i32, %c0_i32_0 : i32, i32
  }
  func.func @transform_3(%arg0: i32) -> (i32, i32) {
    %c0_i32 = arith.constant 0 : i32
    %c0_i32_0 = arith.constant 0 : i32
    %c0_i32_1 = arith.constant 0 : i32
    return %c0_i32, %c0_i32_0 : i32, i32
  }
  func.func @transform_4(%arg0: i32) -> (i32, i32) {
    %c0_i32 = arith.constant 0 : i32
    %c0_i32_0 = arith.constant 0 : i32
    %c0_i32_1 = arith.constant 0 : i32
    return %c0_i32, %c0_i32_0 : i32, i32
  }
  func.func @transform_5(%arg0: i32) -> (i32, i32) {
    %c0_i32 = arith.constant 0 : i32
    %c0_i32_0 = arith.constant 0 : i32
    %c0_i32_1 = arith.constant 0 : i32
    return %c0_i32, %c0_i32_0 : i32, i32
  }
  func.func @transform_6(%arg0: i32) -> (i32, i32) {
    %c0_i32 = arith.constant 0 : i32
    %c0_i32_0 = arith.constant 0 : i32
    %c0_i32_1 = arith.constant 0 : i32
    return %c0_i32, %c0_i32_0 : i32, i32
  }
  func.func @transform_7(%arg0: i32) -> (i32, i32) {
    %c0_i32 = arith.constant 0 : i32
    %c0_i32_0 = arith.constant 0 : i32
    return %arg0, %c0_i32 : i32, i32
  }
  func.func @transform_8(%arg0: i32) -> (i32, i32) {
    %c0_i32 = arith.constant 0 : i32
    %c0_i32_0 = arith.constant 0 : i32
    return %arg0, %c0_i32 : i32, i32
  }
}

module attributes {stable_mosaic.version = 11 : i64} {
  func.func @_cls_kernel(%arg0: i32, %arg1: memref<8x512xbf16, #tpu.memory_space<vmem>>, %arg2: memref<512x1024xbf16, #tpu.memory_space<vmem>>, %arg3: memref<1x1024xf32, #tpu.memory_space<vmem>>, %arg4: memref<1024x512xbf16, #tpu.memory_space<vmem>>, %arg5: memref<1x512xf32, #tpu.memory_space<vmem>>, %arg6: memref<512x384xbf16, #tpu.memory_space<vmem>>, %arg7: memref<1x384xf32, #tpu.memory_space<vmem>>, %arg8: memref<8x384xf32, #tpu.memory_space<vmem>>) attributes {dimension_semantics = [#tpu.dimension_semantics<parallel>], iteration_bounds = array<i64: 1>, scalar_prefetch = 0 : i64, scratch_operands = 0 : i64, tpu.core_type = #tpu.core_type<tc>, window_params = [{transform_indices = @transform_0, window_bounds = array<i64: 8, 512>}, {pipeline_mode = #tpu.pipeline_mode<synchronous>, transform_indices = @transform_1, window_bounds = array<i64: 512, 1024>}, {pipeline_mode = #tpu.pipeline_mode<synchronous>, transform_indices = @transform_2, window_bounds = array<i64: 1, 1024>}, {pipeline_mode = #tpu.pipeline_mode<synchronous>, transform_indices = @transform_3, window_bounds = array<i64: 1024, 512>}, {pipeline_mode = #tpu.pipeline_mode<synchronous>, transform_indices = @transform_4, window_bounds = array<i64: 1, 512>}, {pipeline_mode = #tpu.pipeline_mode<synchronous>, transform_indices = @transform_5, window_bounds = array<i64: 512, 384>}, {pipeline_mode = #tpu.pipeline_mode<synchronous>, transform_indices = @transform_6, window_bounds = array<i64: 1, 384>}, {transform_indices = @transform_7, window_bounds = array<i64: 8, 384>}]} {
    %c0 = arith.constant 0 : index
    %c0_0 = arith.constant 0 : index
    %0 = vector.load %arg1[%c0, %c0_0] : memref<8x512xbf16, #tpu.memory_space<vmem>>, vector<8x512xbf16>
    %c0_1 = arith.constant 0 : index
    %c0_2 = arith.constant 0 : index
    %1 = vector.load %arg2[%c0_1, %c0_2] : memref<512x1024xbf16, #tpu.memory_space<vmem>>, vector<512x1024xbf16>
    %cst = arith.constant dense<0.000000e+00> : vector<8x1024xf32>
    %2 = tpu.matmul %0, %1, %cst {dimension_numbers = #tpu.dot_dimension_numbers<[1], [0], [0], [1], [0, 0, 1, 1], [], []>} : vector<8x512xbf16>, vector<512x1024xbf16>, vector<8x1024xf32> -> vector<8x1024xf32>
    %c0_3 = arith.constant 0 : index
    %c0_4 = arith.constant 0 : index
    %3 = vector.load %arg3[%c0_3, %c0_4] : memref<1x1024xf32, #tpu.memory_space<vmem>>, vector<1x1024xf32>
    %4 = vector.broadcast %3 : vector<1x1024xf32> to vector<8x1024xf32>
    %5 = arith.addf %2, %4 : vector<8x1024xf32>
    %cst_5 = arith.constant 0.000000e+00 : f32
    %6 = vector.broadcast %cst_5 : f32 to vector<8x1024xf32>
    %7 = arith.maximumf %5, %6 : vector<8x1024xf32>
    %8 = arith.truncf %7 : vector<8x1024xf32> to vector<8x1024xbf16>
    %c0_6 = arith.constant 0 : index
    %c0_7 = arith.constant 0 : index
    %9 = vector.load %arg4[%c0_6, %c0_7] : memref<1024x512xbf16, #tpu.memory_space<vmem>>, vector<1024x512xbf16>
    %cst_8 = arith.constant dense<0.000000e+00> : vector<8x512xf32>
    %10 = tpu.matmul %8, %9, %cst_8 {dimension_numbers = #tpu.dot_dimension_numbers<[1], [0], [0], [1], [0, 0, 1, 1], [], []>} : vector<8x1024xbf16>, vector<1024x512xbf16>, vector<8x512xf32> -> vector<8x512xf32>
    %c0_9 = arith.constant 0 : index
    %c0_10 = arith.constant 0 : index
    %11 = vector.load %arg5[%c0_9, %c0_10] : memref<1x512xf32, #tpu.memory_space<vmem>>, vector<1x512xf32>
    %12 = vector.broadcast %11 : vector<1x512xf32> to vector<8x512xf32>
    %13 = arith.addf %10, %12 : vector<8x512xf32>
    %cst_11 = arith.constant 0.000000e+00 : f32
    %14 = vector.broadcast %cst_11 : f32 to vector<8x512xf32>
    %15 = arith.maximumf %13, %14 : vector<8x512xf32>
    %16 = arith.truncf %15 : vector<8x512xf32> to vector<8x512xbf16>
    %c0_12 = arith.constant 0 : index
    %c0_13 = arith.constant 0 : index
    %17 = vector.load %arg6[%c0_12, %c0_13] : memref<512x384xbf16, #tpu.memory_space<vmem>>, vector<512x384xbf16>
    %cst_14 = arith.constant dense<0.000000e+00> : vector<8x384xf32>
    %18 = tpu.matmul %16, %17, %cst_14 {dimension_numbers = #tpu.dot_dimension_numbers<[1], [0], [0], [1], [0, 0, 1, 1], [], []>} : vector<8x512xbf16>, vector<512x384xbf16>, vector<8x384xf32> -> vector<8x384xf32>
    %c0_15 = arith.constant 0 : index
    %c0_16 = arith.constant 0 : index
    %19 = vector.load %arg7[%c0_15, %c0_16] : memref<1x384xf32, #tpu.memory_space<vmem>>, vector<1x384xf32>
    %20 = vector.broadcast %19 : vector<1x384xf32> to vector<8x384xf32>
    %21 = arith.addf %18, %20 : vector<8x384xf32>
    %c0_17 = arith.constant 0 : index
    %c0_18 = arith.constant 0 : index
    %22 = vector.load %arg8[%c0_17, %c0_18] : memref<8x384xf32, #tpu.memory_space<vmem>>, vector<8x384xf32>
    tpu.vector_store %arg8[%c0_17, %c0_18], %21 {strides = array<i32>} : memref<8x384xf32, #tpu.memory_space<vmem>>, vector<8x384xf32>,
    return
  }
  func.func @transform_0(%arg0: i32) -> (i32, i32) {
    %c0_i32 = arith.constant 0 : i32
    %c0_i32_0 = arith.constant 0 : i32
    return %arg0, %c0_i32 : i32, i32
  }
  func.func @transform_1(%arg0: i32) -> (i32, i32) {
    %c0_i32 = arith.constant 0 : i32
    %c0_i32_0 = arith.constant 0 : i32
    %c0_i32_1 = arith.constant 0 : i32
    return %c0_i32, %c0_i32_0 : i32, i32
  }
  func.func @transform_2(%arg0: i32) -> (i32, i32) {
    %c0_i32 = arith.constant 0 : i32
    %c0_i32_0 = arith.constant 0 : i32
    %c0_i32_1 = arith.constant 0 : i32
    return %c0_i32, %c0_i32_0 : i32, i32
  }
  func.func @transform_3(%arg0: i32) -> (i32, i32) {
    %c0_i32 = arith.constant 0 : i32
    %c0_i32_0 = arith.constant 0 : i32
    %c0_i32_1 = arith.constant 0 : i32
    return %c0_i32, %c0_i32_0 : i32, i32
  }
  func.func @transform_4(%arg0: i32) -> (i32, i32) {
    %c0_i32 = arith.constant 0 : i32
    %c0_i32_0 = arith.constant 0 : i32
    %c0_i32_1 = arith.constant 0 : i32
    return %c0_i32, %c0_i32_0 : i32, i32
  }
  func.func @transform_5(%arg0: i32) -> (i32, i32) {
    %c0_i32 = arith.constant 0 : i32
    %c0_i32_0 = arith.constant 0 : i32
    %c0_i32_1 = arith.constant 0 : i32
    return %c0_i32, %c0_i32_0 : i32, i32
  }
  func.func @transform_6(%arg0: i32) -> (i32, i32) {
    %c0_i32 = arith.constant 0 : i32
    %c0_i32_0 = arith.constant 0 : i32
    %c0_i32_1 = arith.constant 0 : i32
    return %c0_i32, %c0_i32_0 : i32, i32
  }
  func.func @transform_7(%arg0: i32) -> (i32, i32) {
    %c0_i32 = arith.constant 0 : i32
    %c0_i32_0 = arith.constant 0 : i32
    return %arg0, %c0_i32 : i32, i32
  }
}

</mosaic_0001>

<bundles_post_ra>
// kernel: dr_fr_forward.2
= control target key start
LH: loop header
LB: loop body
LE: loop exit
PB: predicated region body
PF: predicated region fallthrough
CT: control target
= control target key end

     0   :  { %vm678_vm0 = vcmask 1043456   ;;  %vm485_vm1 = vcmask 64512   ;;  %vm4523_vm2 = vcmask 1041409   ;;  %vm4525_vm3 = vcmask 1042434   ;;  %s7595_s1 = inlined_call_operand.vmem [shape: bf16[8,128], index: 1, kind: input, shape index: {}]   ;;  %s7596_s0 = inlined_call_operand.vmem [shape: bf16[1024,8], index: 0, kind: input, shape index: {}]   ;;  %s7597_s5 = inlined_call_operand.vmem [shape: bf16[128,512], index: 5, kind: input, shape index: {}]   ;;  %s7598_s3 = inlined_call_operand.vmem [shape: bf16[128,128], index: 3, kind: input, shape index: {}]   ;;  %s7599_s2 = inlined_call_operand.vmem [shape: f32[1,128], index: 2, kind: input, shape index: {}]   ;;  %s7600_s4 = inlined_call_operand.vmem [shape: f32[1,128], index: 4, kind: input, shape index: {}]   ;;  %s7601_s6 = inlined_call_operand.vmem [shape: f32[1,512], index: 6, kind: input, shape index: {}]   ;;  %s7602_s7 = inlined_call_operand.vmem [shape: f32[8,512], index: 7, kind: output, shape index: {0}]   ;;  %s7603_s8 = inlined_call_operand.vmem [shape: bf16[8,512], index: 8, kind: output, shape index: {1}]  }
   0x1   :  { %v157_v0 = vld [vmem:[%s7595_s1] sm:$0xf]  ;;  %v5384_v3 = vld [vmem:[%s7596_s0 + $0x8] sm:$0xff]   ;;  %v5385_v4 = vld [vmem:[%s7596_s0 + $0x10] sm:$0xff]   ;;  %vm4527_vm4 = vcmask 1043459   ;;  %vm4529_vm5 = vcmask 1044484  }
   0x2   :  { %5381 = vmatprep.subr.msk.bf16.mxu0 %vm678_vm0, %v157_v0  ;;  %v680_v1 = vsel %vm678_vm0, %v157_v0, 0  ;;  %v5383_v2 = vld [vmem:[%s7596_s0] sm:$0xff]   ;;  %v5386_v5 = vld [vmem:[%s7596_s0 + $0x18] sm:$0xff]   ;;  %v5388_v7 = vld [vmem:[%s7596_s0 + $0x28] sm:$0xff]   ;;  %vm4531_vm6 = vcmask 1045509   ;;  %vm4533_vm7 = vcmask 1046534  }
   0x3   :  { %5092 = vmatpush3.bf16.msra.mxu0 %v680_v1  ;;  %5093 = vmatprep.mubr.msk.bf16.mxu0 %vm485_vm1, %v5383_v2  ;;  %v5387_v6 = vld [vmem:[%s7596_s0 + $0x20] sm:$0xff]   ;;  %v5389_v8 = vld [vmem:[%s7596_s0 + $0x30] sm:$0xff]   ;;  %v5390_v9 = vld [vmem:[%s7596_s0 + $0x38] sm:$0xff]   ;;  %vm4535_vm8 = vcmask 1047559  }
   0x4   :  { %v5391_v10 = vld [vmem:[%s7596_s0 + $0x40] sm:$0xff]   ;;  %v5392_v11 = vld [vmem:[%s7596_s0 + $0x48] sm:$0xff]   ;;  %v5393_v12 = vld [vmem:[%s7596_s0 + $0x50] sm:$0xff]  }
   0x5   :  { %v5394_v13 = vld [vmem:[%s7596_s0 + $0x58] sm:$0xff]   ;;  %v5423_v14 = vld [vmem:[%s7597_s5 + $0xe0] ss:$16 sps:$4 sm:$0xff]   ;;  %v5425_v15 = vld [vmem:[%s7597_s5 + $0xe4] ss:$16 sps:$4 sm:$0xff]  }
   0x6   :  { %5094 = vmatmul.mubr.msk.bf16.vlgmr.msra.gmra.mxu0 %vm485_vm1, %v5384_v3  ;;  %v5395_v16 = vld [vmem:[%s7596_s0 + $0x60] sm:$0xff]   ;;  %2441 = vmatprep.subr.bf16.mxu0 %v5425_v15  ;;  %v5430_v17 = vld [vmem:[%s7598_s3 + $0x38] sm:$0xff]   ;;  %v5396_v18 = vld [vmem:[%s7596_s0 + $0x68] sm:$0xff]  }
   0x7   :  { %5097 = vmatprep.mubr.msk.bf16.mxu0 %vm485_vm1, %v5385_v4  ;;  %2442 = vmatpush1.bf16.msra.mxu0 %v5423_v14  ;;  %v5397_v19 = vld [vmem:[%s7596_s0 + $0x70] sm:$0xff]   ;;  %v5434_v21 = vld [vmem:[%s7598_s3 + $0x28] sm:$0xff]   ;;  %v5398_v22 = vld [vmem:[%s7596_s0 + $0x78] sm:$0xff]  }
   0x8   :  { %5221 = vmatprep.subr.bf16.mxu1 %v5430_v17  ;;  %v5433_v20 = vld [vmem:[%s7598_s3 + $0x30] sm:$0xff]   ;;  %v5399_v23 = vld [vmem:[%s7596_s0 + $0x80] sm:$0xff]   ;;  %v5441_v27 = vld [vmem:[%s7598_s3 + $0x18] sm:$0xff]  }
   0x9   :  { %5222 = vmatpush3.bf16.msra.mxu1 %v5430_v17  ;;  %v5437_v24 = vld [vmem:[%s7598_s3 + $0x20] sm:$0xff]   ;;  %v5400_v28 = vld [vmem:[%s7596_s0 + $0x88] sm:$0xff]   ;;  %v5401_v29 = vld [vmem:[%s7596_s0 + $0x90] sm:$0xff]  }
   0xa   :  { %5223 = vmatprep.subr.bf16.mxu1 %v5433_v20  ;;  %v5438_v25 = vld [vmem:[%s7597_s5 + $0xc0] ss:$16 sps:$4 sm:$0xff]   ;;  %v5440_v26 = vld [vmem:[%s7597_s5 + $0xc4] ss:$16 sps:$4 sm:$0xff]   ;;  %v5402_v31 = vld [vmem:[%s7596_s0 + $0x98] sm:$0xff]  }
   0xb   :  { %2443 = vmatprep.subr.bf16.mxu0 %v5440_v26  ;;  %v5444_v30 = vld [vmem:[%s7598_s3 + $0x10] sm:$0xff]   ;;  %v5445_v32 = vld [vmem:[%s7598_s3 + $0x8] sm:$0xff]   ;;  %v5403_v33 = vld [vmem:[%s7596_s0 + $0xa0] sm:$0xff]  }
   0xc   :  { %2444 = vmatpush1.bf16.msra.mxu0 %v5438_v25  ;;  %v5448_v34 = vld [vmem:[%s7598_s3] sm:$0xff]   ;;  %v5404_v35 = vld [vmem:[%s7596_s0 + $0xa8] sm:$0xff]   ;;  %v5405_v36 = vld [vmem:[%s7596_s0 + $0xb0] sm:$0xff]  }
   0xd   :  { %5224 = vmatpush3.bf16.msra.mxu1 %v5433_v20  ;;  %v5685_v37 = vld [vmem:[%s7597_s5 + $0xec] ss:$16 sps:$4 sm:$0xff]   ;;  %v5407_v39 = vld [vmem:[%s7596_s0 + $0xc0] sm:$0xff]   ;;  %v5409_v41 = vld [vmem:[%s7596_s0 + $0xd0] sm:$0xff]  }
   0xe   :  { %5098 = vmatmul.mubr.msk.bf16.gmra.mxu0 %vm485_vm1, %v5386_v5  ;;  %5225 = vmatprep.subr.bf16.mxu1 %v5434_v21  ;;  %v5406_v38 = vld [vmem:[%s7596_s0 + $0xb8] sm:$0xff]   ;;  %v5408_v40 = vld [vmem:[%s7596_s0 + $0xc8] sm:$0xff]   ;;  %v5456_v42 = vld [vmem:[%s7597_s5 + $0xa0] ss:$16 sps:$4 sm:$0xff]  }
   0xf   :  { %5101 = vmatprep.mubr.msk.bf16.mxu0 %vm485_vm1, %v5387_v6  ;;  %v5458_v43 = vld [vmem:[%s7597_s5 + $0xa4] ss:$16 sps:$4 sm:$0xff]   ;;  %v5410_v44 = vld [vmem:[%s7596_s0 + $0xd8] sm:$0xff]   ;;  %v5412_v46 = vld [vmem:[%s7596_s0 + $0xe8] sm:$0xff]  }
  0x10   :  { %2445 = vmatprep.subr.bf16.mxu0 %v5458_v43  ;;  %v5411_v45 = vld [vmem:[%s7596_s0 + $0xe0] sm:$0xff]   ;;  %v5413_v47 = vld [vmem:[%s7596_s0 + $0xf0] sm:$0xff]   ;;  %v5414_v48 = vld [vmem:[%s7596_s0 + $0xf8] sm:$0xff]  }
  0x11   :  { %5226 = vmatpush3.bf16.msra.mxu1 %v5434_v21  ;;  %2446 = vmatpush1.bf16.msra.mxu0 %v5456_v42  ;;  %v5415_v49 = vld [vmem:[%s7596_s0 + $0x100] sm:$0xff]   ;;  %v5416_v50 = vld [vmem:[%s7596_s0 + $0x108] sm:$0xff]   ;;  %v5417_v51 = vld [vmem:[%s7596_s0 + $0x110] sm:$0xff]  }
  0x12   :  { %5227 = vmatprep.subr.bf16.mxu1 %v5437_v24  ;;  %v5470_v52 = vld [vmem:[%s7597_s5 + $0x80] ss:$16 sps:$4 sm:$0xff]   ;;  %v5472_v53 = vld [vmem:[%s7597_s5 + $0x84] ss:$16 sps:$4 sm:$0xff]   ;;  %v5418_v54 = vld [vmem:[%s7596_s0 + $0x118] sm:$0xff]  }
  0x13   :  { %2447 = vmatprep.subr.bf16.mxu0 %v5472_v53  ;;  %v5419_v55 = vld [vmem:[%s7596_s0 + $0x120] sm:$0xff]   ;;  %v5420_v56 = vld [vmem:[%s7596_s0 + $0x128] sm:$0xff]   ;;  %v5421_v57 = vld [vmem:[%s7596_s0 + $0x130] sm:$0xff]  }
  0x14   :  { %v5422_v58 = vld [vmem:[%s7596_s0 + $0x138] sm:$0xff]   ;;  %v5426_v59 = vld [vmem:[%s7596_s0 + $0x140] sm:$0xff]   ;;  %v5427_v60 = vld [vmem:[%s7596_s0 + $0x148] sm:$0xff]  }
  0x15   :  { %5228 = vmatpush3.bf16.msra.mxu1 %v5437_v24  ;;  %2448 = vmatpush1.bf16.msra.mxu0 %v5470_v52  ;;  %v5428_v61 = vld [vmem:[%s7596_s0 + $0x150] sm:$0xff]   ;;  %v5429_v0 = vld [vmem:[%s7596_s0 + $0x158] sm:$0xff]   ;;  %v5431_v1 = vld [vmem:[%s7596_s0 + $0x160] sm:$0xff]  }
  0x16   :  { %5102 = vmatmul.mubr.msk.bf16.gmra.mxu0 %vm485_vm1, %v5388_v7  ;;  %5229 = vmatprep.subr.bf16.mxu1 %v5441_v27  ;;  %v5476_v62 = vld [vmem:[%s7597_s5 + $0x60] ss:$16 sps:$4 sm:$0xff]   ;;  %v5478_v63 = vld [vmem:[%s7597_s5 + $0x64] ss:$16 sps:$4 sm:$0xff]   ;;  %v5432_v2 = vld [vmem:[%s7596_s0 + $0x168] sm:$0xff]  }
  0x17   :  { %5105 = vmatprep.mubr.msk.bf16.mxu0 %vm485_vm1, %v5389_v8  ;;  %2449 = vmatprep.subr.bf16.mxu0 %v5478_v63  ;;  %v5435_v3 = vld [vmem:[%s7596_s0 + $0x170] sm:$0xff]   ;;  %v5436_v4 = vld [vmem:[%s7596_s0 + $0x178] sm:$0xff]   ;;  %v5442_v5 = vld [vmem:[%s7596_s0 + $0x180] sm:$0xff]  }
  0x18   :  { %v5443_v6 = vld [vmem:[%s7596_s0 + $0x188] sm:$0xff]   ;;  %v5446_v7 = vld [vmem:[%s7596_s0 + $0x190] sm:$0xff]   ;;  %v5447_v14 = vld [vmem:[%s7596_s0 + $0x198] sm:$0xff]  }
  0x19   :  { %5230 = vmatpush3.bf16.msra.mxu1 %v5441_v27  ;;  %2450 = vmatpush1.bf16.msra.mxu0 %v5476_v62  ;;  %v5482_v8 = vld [vmem:[%s7597_s5 + $0x40] ss:$16 sps:$4 sm:$0xff]   ;;  %v5872_v43 = vld [vmem:[%s7597_s5 + $0xac] ss:$16 sps:$4 sm:$0xff]  }
  0x1a   :  { %5231 = vmatprep.subr.bf16.mxu1 %v5444_v30  ;;  %v5452_v17 = vld [vmem:[%s7596_s0 + $0x1a0] sm:$0xff]   ;;  %v5455_v52 = vld [vmem:[%s7596_s0 + $0x1b8] sm:$0xff]  }
  0x1b   :  { %v5888_v53 = vld [vmem:[%s7597_s5 + $0x8c] ss:$16 sps:$4 sm:$0xff]  }
  0x1c   :  { %v5908_v63 = vld [vmem:[%s7597_s5 + $0x6c] ss:$16 sps:$4 sm:$0xff]  }
  0x1d   :  { %5232 = vmatpush3.bf16.msra.mxu1 %v5444_v30 }
  0x1e   :  { %5106 = vmatmul.mubr.msk.bf16.gmra.mxu0 %vm485_vm1, %v5390_v9  ;;  %5233 = vmatprep.subr.bf16.mxu1 %v5445_v32  ;;  %v5484_v9 = vld [vmem:[%s7597_s5 + $0x44] ss:$16 sps:$4 sm:$0xff]  }
  0x1f   :  { %5109 = vmatprep.mubr.msk.bf16.mxu0 %vm485_vm1, %v5391_v10  ;;  %2451 = vmatprep.subr.bf16.mxu0 %v5484_v9 }
  0x20   :  { %2452 = vmatpush1.bf16.msra.mxu0 %v5482_v8  ;;  %v5460_v8 = vld [vmem:[%s7596_s0 + $0x1c8] sm:$0xff]  }
  0x21   :  { %5234 = vmatpush3.bf16.msra.mxu1 %v5445_v32  ;;  %v5852_v32 = vld [vmem:[%s7597_s5 + $0xcc] ss:$16 sps:$4 sm:$0xff]  }
  0x22   :  { %5235 = vmatprep.subr.bf16.mxu1 %v5448_v34 }
  0x25   :  { %5236 = vmatpush3.bf16.msra.mxu1 %v5448_v34 }
  0x26   :  { %5110 = vmatmul.mubr.msk.bf16.gmra.mxu0 %vm485_vm1, %v5392_v11  ;;  %5365 = vmatprep.subr.bf16.mxu1 %v5685_v37 }
  0x27   :  { %5113 = vmatprep.mubr.msk.bf16.mxu0 %vm485_vm1, %v5393_v12  ;;  %v5827_v12 = vld [vmem:[%s7599_s2] ss:$0 sm:$0xff] }
  0x2e   :  { %5114 = vmatmul.mubr.msk.bf16.gmra.mxu0 %vm485_vm1, %v5394_v13 }
  0x2f   :  { %5117 = vmatprep.mubr.msk.bf16.mxu0 %vm485_vm1, %v5395_v16 }
  0x36   :  { %5118 = vmatmul.mubr.msk.bf16.gmra.mxu0 %vm485_vm1, %v5396_v18 }
  0x37   :  { %5121 = vmatprep.mubr.msk.bf16.mxu0 %vm485_vm1, %v5397_v19 }
  0x3e   :  { %5122 = vmatmul.mubr.msk.bf16.gmra.mxu0 %vm485_vm1, %v5398_v22 }
  0x3f   :  { %5125 = vmatprep.mubr.msk.bf16.mxu0 %vm485_vm1, %v5399_v23 }
  0x46   :  { %5126 = vmatmul.mubr.msk.bf16.gmra.mxu0 %vm485_vm1, %v5400_v28  ;;  %v5844_v28 = vld [vmem:[%s7597_s5 + $0xe8] ss:$16 sps:$4 sm:$0xff]  }
  0x47   :  { %5129 = vmatprep.mubr.msk.bf16.mxu0 %vm485_vm1, %v5401_v29 }
  0x4e   :  { %5130 = vmatmul.mubr.msk.bf16.gmra.mxu0 %vm485_vm1, %v5402_v31  ;;  %v5453_v31 = vld [vmem:[%s7596_s0 + $0x1a8] sm:$0xff]  }
  0x4f   :  { %5133 = vmatprep.mubr.msk.bf16.mxu0 %vm485_vm1, %v5403_v33 }
  0x56   :  { %5134 = vmatmul.mubr.msk.bf16.gmra.mxu0 %vm485_vm1, %v5404_v35  ;;  %v5454_v35 = vld [vmem:[%s7596_s0 + $0x1b0] sm:$0xff]  }
  0x57   :  { %5137 = vmatprep.mubr.msk.bf16.mxu0 %vm485_vm1, %v5405_v36 }
  0x5e   :  { %5138 = vmatmul.mubr.msk.bf16.gmra.mxu0 %vm485_vm1, %v5406_v38 }
  0x5f   :  { %5141 = vmatprep.mubr.msk.bf16.mxu0 %vm485_vm1, %v5407_v39 }
  0x66   :  { %5142 = vmatmul.mubr.msk.bf16.gmra.mxu0 %vm485_vm1, %v5408_v40  ;;  %v5865_v40 = vld [vmem:[%s7597_s5 + $0xc8] ss:$16 sps:$4 sm:$0xff]  }
  0x67   :  { %5145 = vmatprep.mubr.msk.bf16.mxu0 %vm485_vm1, %v5409_v41 }
  0x6e   :  { %5146 = vmatmul.mubr.msk.bf16.gmra.mxu0 %vm485_vm1, %v5410_v44 }
  0x6f   :  { %5149 = vmatprep.mubr.msk.bf16.mxu0 %vm485_vm1, %v5411_v45 }
  0x76   :  { %5150 = vmatmul.mubr.msk.bf16.gmra.mxu0 %vm485_vm1, %v5412_v46 }
  0x77   :  { %5153 = vmatprep.mubr.msk.bf16.mxu0 %vm485_vm1, %v5413_v47 }
  0x7e   :  { %5154 = vmatmul.mubr.msk.bf16.gmra.mxu0 %vm485_vm1, %v5414_v48 }
  0x7f   :  { %5157 = vmatprep.mubr.msk.bf16.mxu0 %vm485_vm1, %v5415_v49  ;;  %v5879_v49 = vld [vmem:[%s7597_s5 + $0xa8] ss:$16 sps:$4 sm:$0xff]  }
  0x86   :  { %5158 = vmatmul.mubr.msk.bf16.gmra.mxu0 %vm485_vm1, %v5416_v50 }
  0x87   :  { %5161 = vmatprep.mubr.msk.bf16.mxu0 %vm485_vm1, %v5417_v51 }
  0x8e   :  { %5162 = vmatmul.mubr.msk.bf16.gmra.mxu0 %vm485_vm1, %v5418_v54 }
  0x8f   :  { %5165 = vmatprep.mubr.msk.bf16.mxu0 %vm485_vm1, %v5419_v55 }
  0x96   :  { %5166 = vmatmul.mubr.msk.bf16.gmra.mxu0 %vm485_vm1, %v5420_v56  ;;  %v5459_v56 = vld [vmem:[%s7596_s0 + $0x1c0] sm:$0xff]  }
  0x97   :  { %5169 = vmatprep.mubr.msk.bf16.mxu0 %vm485_vm1, %v5421_v57 }
  0x9e   :  { %5170 = vmatmul.mubr.msk.bf16.gmra.mxu0 %vm485_vm1, %v5422_v58 }
  0x9f   :  { %5173 = vmatprep.mubr.msk.bf16.mxu0 %vm485_vm1, %v5426_v59 }
  0xa6   :  { %5174 = vmatmul.mubr.msk.bf16.gmra.mxu0 %vm485_vm1, %v5427_v60  ;;  %v5901_v60 = vld [vmem:[%s7597_s5 + $0x88] ss:$16 sps:$4 sm:$0xff]  }
  0xa7   :  { %5177 = vmatprep.mubr.msk.bf16.mxu0 %vm485_vm1, %v5428_v61 }
  0xae   :  { %5178 = vmatmul.mubr.msk.bf16.gmra.mxu0 %vm485_vm1, %v5429_v0 }
  0xaf   :  { %5181 = vmatprep.mubr.msk.bf16.mxu0 %vm485_vm1, %v5431_v1 }
  0xb6   :  { %5182 = vmatmul.mubr.msk.bf16.gmra.mxu0 %vm485_vm1, %v5432_v2 }
  0xb7   :  { %5185 = vmatprep.mubr.msk.bf16.mxu0 %vm485_vm1, %v5435_v3 }
  0xbe   :  { %5186 = vmatmul.mubr.msk.bf16.gmra.mxu0 %vm485_vm1, %v5436_v4 }
  0xbf   :  { %5189 = vmatprep.mubr.msk.bf16.mxu0 %vm485_vm1, %v5442_v5  ;;  %v5915_v5 = vld [vmem:[%s7597_s5 + $0x68] ss:$16 sps:$4 sm:$0xff]  }
  0xc6   :  { %v5095_v10 = vpop.f32.mrf.mxu0  ;;  %5190 = vmatmul.mubr.msk.bf16.gmra.mxu0 %vm485_vm1, %v5443_v6 }
  0xc7   :  { %5193 = vmatprep.mubr.msk.bf16.mxu0 %vm485_vm1, %v5446_v7  ;;  %v725_v18 = vadd.f32 %v5095_v10, %v5827_v12 }
  0xc8   :  { %v716_v11 = vpop.f32.mrf.mxu0 }
  0xc9   :  { %v717_v15 = vadd.f32 %v5827_v12, %v716_v11  ;;  %v1229_v25 = vmax.f32 %v725_v18, 0.0  ;;  %v5461_v11 = vld [vmem:[%s7596_s0 + $0x1d0] sm:$0xff]  }
  0xca   :  { %v5096_v13 = vpop.f32.mrf.mxu0 }
  0xcb   :  { %v728_v16 = vadd.f32 %v5096_v13, %v5827_v12  ;;  %v1227_v23 = vmax.f32 %v717_v15, 0.0  ;;  %v5488_v13 = vld [vmem:[%s7597_s5 + $0x20] ss:$16 sps:$4 sm:$0xff]  }
  0xcc   :  { %v719_v19 = vpop.f32.mrf.mxu0 }
  0xcd   :  { %v720_v20 = vadd.f32 %v5827_v12, %v719_v19  ;;  %v1230_v21 = vmax.f32 %v728_v16, 0.0 }
  0xce   :  { %v5099_v22 = vpop.f32.mrf.mxu0  ;;  %5194 = vmatmul.mubr.msk.bf16.gmra.mxu0 %vm485_vm1, %v5447_v14  ;;  %v5490_v14 = vld [vmem:[%s7597_s5 + $0x24] ss:$16 sps:$4 sm:$0xff]  }
  0xcf   :  { %v1228_v24 = vmax.f32 %v720_v20, 0.0  ;;  %5197 = vmatprep.mubr.msk.bf16.mxu0 %vm485_vm1, %v5452_v17  ;;  %v1356_v29 = vpack.c.bf16 %v1230_v21, %v1229_v25  ;;  %v741_v36 = vadd.f32 %v5099_v22, %v5827_v12  ;;  %2453 = vmatprep.subr.bf16.mxu0 %v5490_v14 }
  0xd0   :  { %v732_v26 = vpop.f32.mrf.mxu0  ;;  %2454 = vmatpush1.bf16.msra.mxu0 %v5488_v13 }
  0xd1   :  { %v1355_v27 = vpack.c.bf16 %v1228_v24, %v1227_v23  ;;  %v733_v33 = vadd.f32 %v5827_v12, %v732_v26  ;;  %v1233_v46 = vmax.f32 %v741_v36, 0.0 }
  0xd2   :  { %v5100_v30 = vpop.f32.mrf.mxu0 }
  0xd3   :  { %v744_v34 = vadd.f32 %v5100_v30, %v5827_v12  ;;  %5237 = vmatprep.mubr.bf16.mxu1 %v1355_v27  ;;  %v1231_v44 = vmax.f32 %v733_v33, 0.0  ;;  %v5462_v27 = vld [vmem:[%s7596_s0 + $0x1d8] sm:$0xff]  }
  0xd4   :  { %v735_v38 = vpop.f32.mrf.mxu0  ;;  %5238 = vmatmul.mubr.bf16.vlgmr.msra.gmra.mxu1 %v1356_v29 }
  0xd5   :  { %v736_v39 = vadd.f32 %v5827_v12, %v735_v38  ;;  %5373 = vmatpush1.bf16.msra.mxu1 %v5844_v28  ;;  %v1234_v41 = vmax.f32 %v744_v34, 0.0 }
  0xd6   :  { %v5103_v42 = vpop.f32.mrf.mxu0  ;;  %5198 = vmatmul.mubr.msk.bf16.gmra.mxu0 %vm485_vm1, %v5453_v31  ;;  %5366 = vmatprep.subr.bf16.mxu1 %v5852_v32  ;;  %v5466_v31 = vld [vmem:[%s7596_s0 + $0x1e0] sm:$0xff]  }
  0xd7   :  { %v1232_v45 = vmax.f32 %v736_v39, 0.0  ;;  %5201 = vmatprep.mubr.msk.bf16.mxu0 %vm485_vm1, %v5454_v35  ;;  %v1358_v50 = vpack.c.bf16 %v1234_v41, %v1233_v46  ;;  %v757_v57 = vadd.f32 %v5103_v42, %v5827_v12 }
  0xd8   :  { %v748_v47 = vpop.f32.mrf.mxu0 }
  0xd9   :  { %v1357_v48 = vpack.c.bf16 %v1232_v45, %v1231_v44  ;;  %5374 = vmatpush1.bf16.msra.mxu1 %v5865_v40  ;;  %v749_v54 = vadd.f32 %v5827_v12, %v748_v47  ;;  %v1237_v2 = vmax.f32 %v757_v57, 0.0 }
  0xda   :  { %v5104_v51 = vpop.f32.mrf.mxu0  ;;  %5367 = vmatprep.subr.bf16.mxu1 %v5872_v43 }
  0xdb   :  { %v760_v55 = vadd.f32 %v5104_v51, %v5827_v12  ;;  %5241 = vmatprep.mubr.bf16.mxu1 %v1357_v48  ;;  %v1235_v0 = vmax.f32 %v749_v54, 0.0  ;;  %v5467_v48 = vld [vmem:[%s7596_s0 + $0x1e8] sm:$0xff]  }
  0xdc   :  { %v751_v58 = vpop.f32.mrf.mxu0  ;;  %5242 = vmatmul.mubr.bf16.gmra.mxu1 %v1358_v50 }
  0xdd   :  { %v752_v59 = vadd.f32 %v5827_v12, %v751_v58  ;;  %5375 = vmatpush1.bf16.msra.mxu1 %v5879_v49  ;;  %v1238_v61 = vmax.f32 %v760_v55, 0.0 }
  0xde   :  { %v5107_v62 = vpop.f32.mrf.mxu0  ;;  %5202 = vmatmul.mubr.msk.bf16.gmra.mxu0 %vm485_vm1, %v5455_v52  ;;  %5368 = vmatprep.subr.bf16.mxu1 %v5888_v53  ;;  %v5468_v52 = vld [vmem:[%s7596_s0 + $0x1f0] sm:$0xff]  }
  0xdf   :  { %v1236_v1 = vmax.f32 %v752_v59, 0.0  ;;  %5205 = vmatprep.mubr.msk.bf16.mxu0 %vm485_vm1, %v5459_v56  ;;  %v1360_v6 = vpack.c.bf16 %v1238_v61, %v1237_v2  ;;  %v773_v15 = vadd.f32 %v5107_v62, %v5827_v12  ;;  %v5964_v62 = vld [vmem:[%s7597_s5 + $0x48] ss:$16 sps:$4 sm:$0xff]  }
  0xe0   :  { %v764_v3 = vpop.f32.mrf.mxu0 }
  0xe1   :  { %v1359_v4 = vpack.c.bf16 %v1236_v1, %v1235_v0  ;;  %5376 = vmatpush1.bf16.msra.mxu1 %v5901_v60  ;;  %v765_v9 = vadd.f32 %v5827_v12, %v764_v3  ;;  %v1241_v22 = vmax.f32 %v773_v15, 0.0  ;;  %v5969_v0 = vld [vmem:[%s7597_s5 + $0x4c] ss:$16 sps:$4 sm:$0xff]  }
  0xe2   :  { %v5108_v7 = vpop.f32.mrf.mxu0  ;;  %5369 = vmatprep.subr.bf16.mxu1 %v5908_v63 }
  0xe3   :  { %v776_v10 = vadd.f32 %v5108_v7, %v5827_v12  ;;  %5245 = vmatprep.mubr.bf16.mxu1 %v1359_v4  ;;  %v1239_v20 = vmax.f32 %v765_v9, 0.0  ;;  %v5469_v7 = vld [vmem:[%s7596_s0 + $0x1f8] sm:$0xff]  }
  0xe4   :  { %v767_v16 = vpop.f32.mrf.mxu0  ;;  %5246 = vmatmul.mubr.bf16.gmra.mxu1 %v1360_v6 }
  0xe5   :  { %v768_v17 = vadd.f32 %v5827_v12, %v767_v16  ;;  %5377 = vmatpush1.bf16.msra.mxu1 %v5915_v5  ;;  %v1242_v18 = vmax.f32 %v776_v10, 0.0 }
  0xe6   :  { %v5111_v19 = vpop.f32.mrf.mxu0  ;;  %5206 = vmatmul.mubr.msk.bf16.gmra.mxu0 %vm485_vm1, %v5460_v8  ;;  %5370 = vmatprep.subr.bf16.mxu1 %v5969_v0 }
  0xe7   :  { %v1240_v21 = vmax.f32 %v768_v17, 0.0  ;;  %5209 = vmatprep.mubr.msk.bf16.mxu0 %vm485_vm1, %v5461_v11  ;;  %v1362_v25 = vpack.c.bf16 %v1242_v18, %v1241_v22  ;;  %v789_v33 = vadd.f32 %v5111_v19, %v5827_v12 }
  0xe8   :  { %v780_v23 = vpop.f32.mrf.mxu0 }
  0xe9   :  { %v1361_v24 = vpack.c.bf16 %v1240_v21, %v1239_v20  ;;  %v781_v29 = vadd.f32 %v5827_v12, %v780_v23  ;;  %v1245_v42 = vmax.f32 %v789_v33, 0.0  ;;  %5378 = vmatpush1.bf16.msra.mxu1 %v5964_v62 }
  0xea   :  { %v5112_v26 = vpop.f32.mrf.mxu0 }
  0xeb   :  { %v792_v30 = vadd.f32 %v5112_v26, %v5827_v12  ;;  %5249 = vmatprep.mubr.bf16.mxu1 %v1361_v24  ;;  %v1243_v39 = vmax.f32 %v781_v29, 0.0  ;;  %v5496_v26 = vld [vmem:[%s7597_s5 + $0x4] ss:$16 sps:$4 sm:$0xff]  }
  0xec   :  { %v783_v34 = vpop.f32.mrf.mxu0  ;;  %5250 = vmatmul.mubr.bf16.gmra.mxu1 %v1362_v25  ;;  %v5494_v25 = vld [vmem:[%s7597_s5] ss:$16 sps:$4 sm:$0xff]   ;;  %2455 = vmatprep.subr.bf16.mxu0 %v5496_v26 }
  0xed   :  { %v784_v35 = vadd.f32 %v5827_v12, %v783_v34  ;;  %v1246_v36 = vmax.f32 %v792_v30, 0.0  ;;  %2456 = vmatpush1.bf16.msra.mxu0 %v5494_v25 }
  0xee   :  { %v5115_v38 = vpop.f32.mrf.mxu0  ;;  %5210 = vmatmul.mubr.msk.bf16.gmra.mxu0 %vm485_vm1, %v5462_v27  ;;  %3114 = vmatprep.subr.bf16.mxu0 %v5685_v37 }
  0xef   :  { %v1244_v41 = vmax.f32 %v784_v35, 0.0  ;;  %5213 = vmatprep.mubr.msk.bf16.mxu0 %vm485_vm1, %v5466_v31  ;;  %v1364_v46 = vpack.c.bf16 %v1246_v36, %v1245_v42  ;;  %v805_v54 = vadd.f32 %v5115_v38, %v5827_v12 }
  0xf0   :  { %v796_v44 = vpop.f32.mrf.mxu0 }
  0xf1   :  { %v1363_v45 = vpack.c.bf16 %v1244_v41, %v1243_v39  ;;  %v797_v50 = vadd.f32 %v5827_v12, %v796_v44  ;;  %v1249_v1 = vmax.f32 %v805_v54, 0.0 }
  0xf2   :  { %v5116_v47 = vpop.f32.mrf.mxu0 }
  0xf3   :  { %v808_v51 = vadd.f32 %v5116_v47, %v5827_v12  ;;  %5253 = vmatprep.mubr.bf16.mxu1 %v1363_v45  ;;  %v1247_v59 = vmax.f32 %v797_v50, 0.0 }
  0xf4   :  { %v799_v55 = vpop.f32.mrf.mxu0  ;;  %5254 = vmatmul.mubr.bf16.gmra.mxu1 %v1364_v46 }
  0xf5   :  { %v800_v56 = vadd.f32 %v5827_v12, %v799_v55  ;;  %v1250_v57 = vmax.f32 %v808_v51, 0.0 }
  0xf6   :  { %v5119_v58 = vpop.f32.mrf.mxu0  ;;  %5214 = vmatmul.mubr.msk.bf16.gmra.mxu0 %vm485_vm1, %v5467_v48 }
  0xf7   :  { %v1248_v61 = vmax.f32 %v800_v56, 0.0  ;;  %5217 = vmatprep.mubr.msk.bf16.mxu0 %vm485_vm1, %v5468_v52  ;;  %v1366_v4 = vpack.c.bf16 %v1250_v57, %v1249_v1  ;;  %v821_v10 = vadd.f32 %v5119_v58, %v5827_v12 }
  0xf8   :  { %v812_v2 = vpop.f32.mrf.mxu0 }
  0xf9   :  { %v1365_v3 = vpack.c.bf16 %v1248_v61, %v1247_v59  ;;  %v813_v8 = vadd.f32 %v5827_v12, %v812_v2  ;;  %v1253_v18 = vmax.f32 %v821_v10, 0.0  ;;  %v6008_v10 = vld [vmem:[%s7597_s5 + $0x2c] ss:$16 sps:$4 sm:$0xff]  }
  0xfa   :  { %v5120_v6 = vpop.f32.mrf.mxu0  ;;  %5371 = vmatprep.subr.bf16.mxu1 %v6008_v10 }
  0xfb   :  { %v824_v9 = vadd.f32 %v5120_v6, %v5827_v12  ;;  %5257 = vmatprep.mubr.bf16.mxu1 %v1365_v3  ;;  %v1251_v16 = vmax.f32 %v813_v8, 0.0 }
  0xfc   :  { %v815_v11 = vpop.f32.mrf.mxu0  ;;  %5258 = vmatmul.mubr.bf16.gmra.mxu1 %v1366_v4 }
  0xfd   :  { %v816_v13 = vadd.f32 %v5827_v12, %v815_v11  ;;  %v1254_v14 = vmax.f32 %v824_v9, 0.0  ;;  %v6003_v9 = vld [vmem:[%s7597_s5 + $0x28] ss:$16 sps:$4 sm:$0xff]  }
  0xfe   :  { %v5123_v15 = vpop.f32.mrf.mxu0  ;;  %5218 = vmatmul.mubr.msk.bf16.gmra.mxu0 %vm485_vm1, %v5469_v7  ;;  %5379 = vmatpush1.bf16.msra.mxu1 %v6003_v9 }
  0xff   :  { %v1252_v17 = vmax.f32 %v816_v13, 0.0  ;;  %v1368_v21 = vpack.c.bf16 %v1254_v14, %v1253_v18  ;;  %v837_v27 = vadd.f32 %v5123_v15, %v5827_v12 }
 0x100   :  { %v828_v19 = vpop.f32.mrf.mxu0 }
 0x101   :  { %v1367_v20 = vpack.c.bf16 %v1252_v17, %v1251_v16  ;;  %v829_v23 = vadd.f32 %v5827_v12, %v828_v19  ;;  %v1257_v36 = vmax.f32 %v837_v27, 0.0 }
 0x102   :  { %v5124_v22 = vpop.f32.mrf.mxu0 }
 0x103   :  { %v840_v24 = vadd.f32 %v5124_v22, %v5827_v12  ;;  %5261 = vmatprep.mubr.bf16.mxu1 %v1367_v20  ;;  %v1255_v34 = vmax.f32 %v829_v23, 0.0 }
 0x104   :  { %v831_v29 = vpop.f32.mrf.mxu0  ;;  %5262 = vmatmul.mubr.bf16.gmra.mxu1 %v1368_v21 }
 0x105   :  { %v832_v30 = vadd.f32 %v5827_v12, %v831_v29  ;;  %v1258_v31 = vmax.f32 %v840_v24, 0.0 }
 0x106   :  { %v5127_v33 = vpop.f32.mrf.mxu0 }
 0x107   :  { %v1256_v35 = vmax.f32 %v832_v30, 0.0  ;;  %v1370_v41 = vpack.c.bf16 %v1258_v31, %v1257_v36  ;;  %v853_v46 = vadd.f32 %v5127_v33, %v5827_v12  ;;  %v7605_v30 = vmov 0  }
 0x108   :  { %v844_v38 = vpop.f32.mrf.mxu0  ;;  %2473 = vmatprep.mubr.bf16.mxu0 %v7605_v30 }
 0x109   :  { %v1369_v39 = vpack.c.bf16 %v1256_v35, %v1255_v34  ;;  %v845_v44 = vadd.f32 %v5827_v12, %v844_v38  ;;  %v1261_v54 = vmax.f32 %v853_v46, 0.0 }
 0x10a   :  { %v5128_v42 = vpop.f32.mrf.mxu0 }
 0x10b   :  { %v856_v45 = vadd.f32 %v5128_v42, %v5827_v12  ;;  %5265 = vmatprep.mubr.bf16.mxu1 %v1369_v39  ;;  %v1259_v52 = vmax.f32 %v845_v44, 0.0 }
 0x10c   :  { %v847_v47 = vpop.f32.mrf.mxu0  ;;  %5266 = vmatmul.mubr.bf16.gmra.mxu1 %v1370_v41 }
 0x10d   :  { %v848_v48 = vadd.f32 %v5827_v12, %v847_v47  ;;  %v1262_v50 = vmax.f32 %v856_v45, 0.0 }
 0x10e   :  { %v5131_v51 = vpop.f32.mrf.mxu0 }
 0x10f   :  { %v1260_v37 = vmax.f32 %v848_v48, 0.0  ;;  %v1372_v57 = vpack.c.bf16 %v1262_v50, %v1261_v54  ;;  %v869_v1 = vadd.f32 %v5131_v51, %v5827_v12 }
 0x110   :  { %v860_v55 = vpop.f32.mrf.mxu0 }
 0x111   :  { %v1371_v56 = vpack.c.bf16 %v1260_v37, %v1259_v52  ;;  %v861_v59 = vadd.f32 %v5827_v12, %v860_v55  ;;  %v1265_v11 = vmax.f32 %v869_v1, 0.0 }
 0x112   :  { %v5132_v58 = vpop.f32.mrf.mxu0 }
 0x113   :  { %v872_v61 = vadd.f32 %v5132_v58, %v5827_v12  ;;  %5269 = vmatprep.mubr.bf16.mxu1 %v1371_v56  ;;  %v1263_v7 = vmax.f32 %v861_v59, 0.0 }
 0x114   :  { %v863_v2 = vpop.f32.mrf.mxu0  ;;  %5270 = vmatmul.mubr.bf16.gmra.mxu1 %v1372_v57 }
 0x115   :  { %v864_v3 = vadd.f32 %v5827_v12, %v863_v2  ;;  %v1266_v4 = vmax.f32 %v872_v61, 0.0 }
 0x116   :  { %v5135_v6 = vpop.f32.mrf.mxu0 }
 0x117   :  { %v1264_v8 = vmax.f32 %v864_v3, 0.0  ;;  %v1374_v15 = vpack.c.bf16 %v1266_v4, %v1265_v11  ;;  %v885_v19 = vadd.f32 %v5135_v6, %v5827_v12 }
 0x118   :  { %v876_v13 = vpop.f32.mrf.mxu0 }
 0x119   :  { %v1373_v14 = vpack.c.bf16 %v1264_v8, %v1263_v7  ;;  %v877_v17 = vadd.f32 %v5827_v12, %v876_v13  ;;  %v1269_v26 = vmax.f32 %v885_v19, 0.0  ;;  %v6032_v19 = vld [vmem:[%s7597_s5 + $0x8] ss:$16 sps:$4 sm:$0xff]  }
 0x11a   :  { %v5136_v16 = vpop.f32.mrf.mxu0 }
 0x11b   :  { %v888_v18 = vadd.f32 %v5136_v16, %v5827_v12  ;;  %5273 = vmatprep.mubr.bf16.mxu1 %v1373_v14  ;;  %v1267_v24 = vmax.f32 %v877_v17, 0.0 }
 0x11c   :  { %v879_v20 = vpop.f32.mrf.mxu0  ;;  %5274 = vmatmul.mubr.bf16.gmra.mxu1 %v1374_v15 }
 0x11d   :  { %v880_v21 = vadd.f32 %v5827_v12, %v879_v20  ;;  %v1270_v22 = vmax.f32 %v888_v18, 0.0  ;;  %v6037_v20 = vld [vmem:[%s7597_s5 + $0xc] ss:$16 sps:$4 sm:$0xff]  }
 0x11e   :  { %v5139_v23 = vpop.f32.mrf.mxu0  ;;  %5372 = vmatprep.subr.bf16.mxu1 %v6037_v20 }
 0x11f   :  { %v1268_v25 = vmax.f32 %v880_v21, 0.0  ;;  %v1376_v31 = vpack.c.bf16 %v1270_v22, %v1269_v26  ;;  %v901_v36 = vadd.f32 %v5139_v23, %v5827_v12  ;;  %5380 = vmatpush1.bf16.msra.mxu1 %v6032_v19 }
 0x120   :  { %v892_v27 = vpop.f32.mrf.mxu0 }
 0x121   :  { %v1375_v29 = vpack.c.bf16 %v1268_v25, %v1267_v24  ;;  %v893_v34 = vadd.f32 %v5827_v12, %v892_v27  ;;  %v1273_v46 = vmax.f32 %v901_v36, 0.0 }
 0x122   :  { %v5140_v33 = vpop.f32.mrf.mxu0 }
 0x123   :  { %v904_v35 = vadd.f32 %v5140_v33, %v5827_v12  ;;  %5277 = vmatprep.mubr.bf16.mxu1 %v1375_v29  ;;  %v1271_v44 = vmax.f32 %v893_v34, 0.0 }
 0x124   :  { %v895_v38 = vpop.f32.mrf.mxu0  ;;  %5278 = vmatmul.mubr.bf16.gmra.mxu1 %v1376_v31 }
 0x125   :  { %v896_v39 = vadd.f32 %v5827_v12, %v895_v38  ;;  %v1274_v41 = vmax.f32 %v904_v35, 0.0 }
 0x126   :  { %v5143_v42 = vpop.f32.mrf.mxu0 }
 0x127   :  { %v1272_v45 = vmax.f32 %v896_v39, 0.0  ;;  %v1378_v50 = vpack.c.bf16 %v1274_v41, %v1273_v46  ;;  %v917_v54 = vadd.f32 %v5143_v42, %v5827_v12 }
 0x128   :  { %v908_v47 = vpop.f32.mrf.mxu0 }
 0x129   :  { %v1377_v48 = vpack.c.bf16 %v1272_v45, %v1271_v44  ;;  %v909_v52 = vadd.f32 %v5827_v12, %v908_v47  ;;  %v1277_v1 = vmax.f32 %v917_v54, 0.0 }
 0x12a   :  { %v5144_v51 = vpop.f32.mrf.mxu0 }
 0x12b   :  { %v920_v37 = vadd.f32 %v5144_v51, %v5827_v12  ;;  %5281 = vmatprep.mubr.bf16.mxu1 %v1377_v48  ;;  %v1275_v59 = vmax.f32 %v909_v52, 0.0 }
 0x12c   :  { %v911_v55 = vpop.f32.mrf.mxu0  ;;  %5282 = vmatmul.mubr.bf16.gmra.mxu1 %v1378_v50 }
 0x12d   :  { %v912_v56 = vadd.f32 %v5827_v12, %v911_v55  ;;  %v1278_v57 = vmax.f32 %v920_v37, 0.0 }
 0x12e   :  { %v5147_v58 = vpop.f32.mrf.mxu0 }
 0x12f   :  { %v1276_v61 = vmax.f32 %v912_v56, 0.0  ;;  %v1380_v4 = vpack.c.bf16 %v1278_v57, %v1277_v1  ;;  %v933_v11 = vadd.f32 %v5147_v58, %v5827_v12 }
 0x130   :  { %v924_v2 = vpop.f32.mrf.mxu0 }
 0x131   :  { %v1379_v3 = vpack.c.bf16 %v1276_v61, %v1275_v59  ;;  %v925_v7 = vadd.f32 %v5827_v12, %v924_v2  ;;  %v1281_v21 = vmax.f32 %v933_v11, 0.0 }
 0x132   :  { %v5148_v6 = vpop.f32.mrf.mxu0 }
 0x133   :  { %v936_v8 = vadd.f32 %v5148_v6, %v5827_v12  ;;  %5285 = vmatprep.mubr.bf16.mxu1 %v1379_v3  ;;  %v1279_v17 = vmax.f32 %v925_v7, 0.0 }
 0x134   :  { %v927_v13 = vpop.f32.mrf.mxu0  ;;  %5286 = vmatmul.mubr.bf16.gmra.mxu1 %v1380_v4 }
 0x135   :  { %v928_v14 = vadd.f32 %v5827_v12, %v927_v13  ;;  %v1282_v15 = vmax.f32 %v936_v8, 0.0 }
 0x136   :  { %v5151_v16 = vpop.f32.mrf.mxu0 }
 0x137   :  { %v1280_v18 = vmax.f32 %v928_v14, 0.0  ;;  %v1382_v24 = vpack.c.bf16 %v1282_v15, %v1281_v21  ;;  %v949_v29 = vadd.f32 %v5151_v16, %v5827_v12 }
 0x138   :  { %v940_v22 = vpop.f32.mrf.mxu0 }
 0x139   :  { %v1381_v23 = vpack.c.bf16 %v1280_v18, %v1279_v17  ;;  %v941_v26 = vadd.f32 %v5827_v12, %v940_v22  ;;  %v1285_v39 = vmax.f32 %v949_v29, 0.0 }
 0x13a   :  { %v5152_v25 = vpop.f32.mrf.mxu0 }
 0x13b   :  { %v952_v27 = vadd.f32 %v5152_v25, %v5827_v12  ;;  %5289 = vmatprep.mubr.bf16.mxu1 %v1381_v23  ;;  %v1283_v36 = vmax.f32 %v941_v26, 0.0 }
 0x13c   :  { %v943_v31 = vpop.f32.mrf.mxu0  ;;  %5290 = vmatmul.mubr.bf16.gmra.mxu1 %v1382_v24 }
 0x13d   :  { %v944_v33 = vadd.f32 %v5827_v12, %v943_v31  ;;  %v1286_v34 = vmax.f32 %v952_v27, 0.0 }
 0x13e   :  { %v5155_v35 = vpop.f32.mrf.mxu0 }
 0x13f   :  { %v1284_v38 = vmax.f32 %v944_v33, 0.0  ;;  %v1384_v44 = vpack.c.bf16 %v1286_v34, %v1285_v39  ;;  %v965_v48 = vadd.f32 %v5155_v35, %v5827_v12 }
 0x140   :  { %v956_v41 = vpop.f32.mrf.mxu0 }
 0x141   :  { %v1383_v42 = vpack.c.bf16 %v1284_v38, %v1283_v36  ;;  %v957_v46 = vadd.f32 %v5827_v12, %v956_v41  ;;  %v1289_v56 = vmax.f32 %v965_v48, 0.0 }
 0x142   :  { %v5156_v45 = vpop.f32.mrf.mxu0 }
 0x143   :  { %v968_v47 = vadd.f32 %v5156_v45, %v5827_v12  ;;  %5293 = vmatprep.mubr.bf16.mxu1 %v1383_v42  ;;  %v1287_v54 = vmax.f32 %v957_v46, 0.0 }
 0x144   :  { %v959_v50 = vpop.f32.mrf.mxu0  ;;  %5294 = vmatmul.mubr.bf16.gmra.mxu1 %v1384_v44 }
 0x145   :  { %v960_v51 = vadd.f32 %v5827_v12, %v959_v50  ;;  %v1290_v52 = vmax.f32 %v968_v47, 0.0 }
 0x146   :  { %v5159_v37 = vpop.f32.mrf.mxu0 }
 0x147   :  { %v1288_v55 = vmax.f32 %v960_v51, 0.0  ;;  %v1386_v59 = vpack.c.bf16 %v1290_v52, %v1289_v56  ;;  %v981_v3 = vadd.f32 %v5159_v37, %v5827_v12 }
 0x148   :  { %v972_v57 = vpop.f32.mrf.mxu0 }
 0x149   :  { %v1385_v58 = vpack.c.bf16 %v1288_v55, %v1287_v54  ;;  %v973_v1 = vadd.f32 %v5827_v12, %v972_v57  ;;  %v1293_v14 = vmax.f32 %v981_v3, 0.0 }
 0x14a   :  { %v5160_v61 = vpop.f32.mrf.mxu0 }
 0x14b   :  { %v984_v2 = vadd.f32 %v5160_v61, %v5827_v12  ;;  %5297 = vmatprep.mubr.bf16.mxu1 %v1385_v58  ;;  %v1291_v11 = vmax.f32 %v973_v1, 0.0 }
 0x14c   :  { %v975_v4 = vpop.f32.mrf.mxu0  ;;  %5298 = vmatmul.mubr.bf16.gmra.mxu1 %v1386_v59 }
 0x14d   :  { %v976_v6 = vadd.f32 %v5827_v12, %v975_v4  ;;  %v1294_v7 = vmax.f32 %v984_v2, 0.0 }
 0x14e   :  { %v5163_v8 = vpop.f32.mrf.mxu0 }
 0x14f   :  { %v1292_v13 = vmax.f32 %v976_v6, 0.0  ;;  %v1388_v17 = vpack.c.bf16 %v1294_v7, %v1293_v14  ;;  %v997_v23 = vadd.f32 %v5163_v8, %v5827_v12 }
 0x150   :  { %v988_v15 = vpop.f32.mrf.mxu0 }
 0x151   :  { %v1387_v16 = vpack.c.bf16 %v1292_v13, %v1291_v11  ;;  %v989_v21 = vadd.f32 %v5827_v12, %v988_v15  ;;  %v1297_v33 = vmax.f32 %v997_v23, 0.0 }
 0x152   :  { %v5164_v18 = vpop.f32.mrf.mxu0 }
 0x153   :  { %v1000_v22 = vadd.f32 %v5164_v18, %v5827_v12  ;;  %5301 = vmatprep.mubr.bf16.mxu1 %v1387_v16  ;;  %v1295_v29 = vmax.f32 %v989_v21, 0.0 }
 0x154   :  { %v991_v24 = vpop.f32.mrf.mxu0  ;;  %5302 = vmatmul.mubr.bf16.gmra.mxu1 %v1388_v17 }
 0x155   :  { %v992_v25 = vadd.f32 %v5827_v12, %v991_v24  ;;  %v1298_v26 = vmax.f32 %v1000_v22, 0.0 }
 0x156   :  { %v5167_v27 = vpop.f32.mrf.mxu0 }
 0x157   :  { %v1296_v31 = vmax.f32 %v992_v25, 0.0  ;;  %v1390_v36 = vpack.c.bf16 %v1298_v26, %v1297_v33  ;;  %v1013_v42 = vadd.f32 %v5167_v27, %v5827_v12 }
 0x158   :  { %v1004_v34 = vpop.f32.mrf.mxu0 }
 0x159   :  { %v1389_v35 = vpack.c.bf16 %v1296_v31, %v1295_v29  ;;  %v1005_v39 = vadd.f32 %v5827_v12, %v1004_v34  ;;  %v1301_v51 = vmax.f32 %v1013_v42, 0.0 }
 0x15a   :  { %v5168_v38 = vpop.f32.mrf.mxu0 }
 0x15b   :  { %v1016_v41 = vadd.f32 %v5168_v38, %v5827_v12  ;;  %5305 = vmatprep.mubr.bf16.mxu1 %v1389_v35  ;;  %v1299_v48 = vmax.f32 %v1005_v39, 0.0 }
 0x15c   :  { %v1007_v44 = vpop.f32.mrf.mxu0  ;;  %5306 = vmatmul.mubr.bf16.gmra.mxu1 %v1390_v36 }
 0x15d   :  { %v1008_v45 = vadd.f32 %v5827_v12, %v1007_v44  ;;  %v1302_v46 = vmax.f32 %v1016_v41, 0.0 }
 0x15e   :  { %v5171_v47 = vpop.f32.mrf.mxu0 }
 0x15f   :  { %v1300_v50 = vmax.f32 %v1008_v45, 0.0  ;;  %v1392_v54 = vpack.c.bf16 %v1302_v46, %v1301_v51  ;;  %v1029_v58 = vadd.f32 %v5171_v47, %v5827_v12 }
 0x160   :  { %v1020_v52 = vpop.f32.mrf.mxu0 }
 0x161   :  { %v1391_v37 = vpack.c.bf16 %v1300_v50, %v1299_v48  ;;  %v1021_v56 = vadd.f32 %v5827_v12, %v1020_v52  ;;  %v1305_v6 = vmax.f32 %v1029_v58, 0.0 }
 0x162   :  { %v5172_v55 = vpop.f32.mrf.mxu0 }
 0x163   :  { %v1032_v57 = vadd.f32 %v5172_v55, %v5827_v12  ;;  %5309 = vmatprep.mubr.bf16.mxu1 %v1391_v37  ;;  %v1303_v3 = vmax.f32 %v1021_v56, 0.0 }
 0x164   :  { %v1023_v59 = vpop.f32.mrf.mxu0  ;;  %5310 = vmatmul.mubr.bf16.gmra.mxu1 %v1392_v54 }
 0x165   :  { %v1024_v61 = vadd.f32 %v5827_v12, %v1023_v59  ;;  %v1306_v1 = vmax.f32 %v1032_v57, 0.0 }
 0x166   :  { %v5175_v2 = vpop.f32.mrf.mxu0 }
 0x167   :  { %v1304_v4 = vmax.f32 %v1024_v61, 0.0  ;;  %v1394_v11 = vpack.c.bf16 %v1306_v1, %v1305_v6  ;;  %v1045_v16 = vadd.f32 %v5175_v2, %v5827_v12 }
 0x168   :  { %v1036_v7 = vpop.f32.mrf.mxu0 }
 0x169   :  { %v1393_v8 = vpack.c.bf16 %v1304_v4, %v1303_v3  ;;  %v1037_v14 = vadd.f32 %v5827_v12, %v1036_v7  ;;  %v1309_v25 = vmax.f32 %v1045_v16, 0.0 }
 0x16a   :  { %v5176_v13 = vpop.f32.mrf.mxu0 }
 0x16b   :  { %v1048_v15 = vadd.f32 %v5176_v13, %v5827_v12  ;;  %5313 = vmatprep.mubr.bf16.mxu1 %v1393_v8  ;;  %v1307_v23 = vmax.f32 %v1037_v14, 0.0 }
 0x16c   :  { %v1039_v17 = vpop.f32.mrf.mxu0  ;;  %5314 = vmatmul.mubr.bf16.gmra.mxu1 %v1394_v11 }
 0x16d   :  { %v1040_v18 = vadd.f32 %v5827_v12, %v1039_v17  ;;  %v1310_v21 = vmax.f32 %v1048_v15, 0.0 }
 0x16e   :  { %v5179_v22 = vpop.f32.mrf.mxu0 }
 0x16f   :  { %v1308_v24 = vmax.f32 %v1040_v18, 0.0  ;;  %v1396_v29 = vpack.c.bf16 %v1310_v21, %v1309_v25  ;;  %v1061_v35 = vadd.f32 %v5179_v22, %v5827_v12 }
 0x170   :  { %v1052_v26 = vpop.f32.mrf.mxu0 }
 0x171   :  { %v1395_v27 = vpack.c.bf16 %v1308_v24, %v1307_v23  ;;  %v1053_v33 = vadd.f32 %v5827_v12, %v1052_v26  ;;  %v1313_v45 = vmax.f32 %v1061_v35, 0.0 }
 0x172   :  { %v5180_v31 = vpop.f32.mrf.mxu0 }
 0x173   :  { %v1064_v34 = vadd.f32 %v5180_v31, %v5827_v12  ;;  %5317 = vmatprep.mubr.bf16.mxu1 %v1395_v27  ;;  %v1311_v42 = vmax.f32 %v1053_v33, 0.0 }
 0x174   :  { %v1055_v36 = vpop.f32.mrf.mxu0  ;;  %5318 = vmatmul.mubr.bf16.gmra.mxu1 %v1396_v29 }
 0x175   :  { %v1056_v38 = vadd.f32 %v5827_v12, %v1055_v36  ;;  %v1314_v39 = vmax.f32 %v1064_v34, 0.0 }
 0x176   :  { %v5183_v41 = vpop.f32.mrf.mxu0 }
 0x177   :  { %v1312_v44 = vmax.f32 %v1056_v38, 0.0  ;;  %v1398_v48 = vpack.c.bf16 %v1314_v39, %v1313_v45  ;;  %v1077_v37 = vadd.f32 %v5183_v41, %v5827_v12 }
 0x178   :  { %v1068_v46 = vpop.f32.mrf.mxu0 }
 0x179   :  { %v1397_v47 = vpack.c.bf16 %v1312_v44, %v1311_v42  ;;  %v1069_v51 = vadd.f32 %v5827_v12, %v1068_v46  ;;  %v1317_v61 = vmax.f32 %v1077_v37, 0.0 }
 0x17a   :  { %v5184_v50 = vpop.f32.mrf.mxu0 }
 0x17b   :  { %v1080_v52 = vadd.f32 %v5184_v50, %v5827_v12  ;;  %5321 = vmatprep.mubr.bf16.mxu1 %v1397_v47  ;;  %v1315_v58 = vmax.f32 %v1069_v51, 0.0 }
 0x17c   :  { %v1071_v54 = vpop.f32.mrf.mxu0  ;;  %5322 = vmatmul.mubr.bf16.gmra.mxu1 %v1398_v48 }
 0x17d   :  { %v1072_v55 = vadd.f32 %v5827_v12, %v1071_v54  ;;  %v1318_v56 = vmax.f32 %v1080_v52, 0.0 }
 0x17e   :  { %v5187_v57 = vpop.f32.mrf.mxu0 }
 0x17f   :  { %v1316_v59 = vmax.f32 %v1072_v55, 0.0  ;;  %v1400_v3 = vpack.c.bf16 %v1318_v56, %v1317_v61  ;;  %v1093_v8 = vadd.f32 %v5187_v57, %v5827_v12 }
 0x180   :  { %v1084_v1 = vpop.f32.mrf.mxu0 }
 0x181   :  { %v1399_v2 = vpack.c.bf16 %v1316_v59, %v1315_v58  ;;  %v1085_v6 = vadd.f32 %v5827_v12, %v1084_v1  ;;  %v1321_v18 = vmax.f32 %v1093_v8, 0.0  ;;  %v6092_v58 = vld [vmem:[%s7600_s4] ss:$0 sm:$0xff] }
 0x182   :  { %v5188_v4 = vpop.f32.mrf.mxu0 }
 0x183   :  { %v1096_v7 = vadd.f32 %v5188_v4, %v5827_v12  ;;  %5325 = vmatprep.mubr.bf16.mxu1 %v1399_v2  ;;  %v1319_v16 = vmax.f32 %v1085_v6, 0.0 }
 0x184   :  { %v1087_v11 = vpop.f32.mrf.mxu0  ;;  %5326 = vmatmul.mubr.bf16.gmra.mxu1 %v1400_v3 }
 0x185   :  { %v1088_v13 = vadd.f32 %v5827_v12, %v1087_v11  ;;  %v1322_v14 = vmax.f32 %v1096_v7, 0.0 }
 0x186   :  { %v5191_v15 = vpop.f32.mrf.mxu0 }
 0x187   :  { %v1320_v17 = vmax.f32 %v1088_v13, 0.0  ;;  %v1402_v23 = vpack.c.bf16 %v1322_v14, %v1321_v18  ;;  %v1109_v27 = vadd.f32 %v5191_v15, %v5827_v12 }
 0x188   :  { %v1100_v21 = vpop.f32.mrf.mxu0 }
 0x189   :  { %v1401_v22 = vpack.c.bf16 %v1320_v17, %v1319_v16  ;;  %v1101_v25 = vadd.f32 %v5827_v12, %v1100_v21  ;;  %v1325_v38 = vmax.f32 %v1109_v27, 0.0 }
 0x18a   :  { %v5192_v24 = vpop.f32.mrf.mxu0 }
 0x18b   :  { %v1112_v26 = vadd.f32 %v5192_v24, %v5827_v12  ;;  %5329 = vmatprep.mubr.bf16.mxu1 %v1401_v22  ;;  %v1323_v35 = vmax.f32 %v1101_v25, 0.0 }
 0x18c   :  { %v1103_v29 = vpop.f32.mrf.mxu0  ;;  %5330 = vmatmul.mubr.bf16.gmra.mxu1 %v1402_v23 }
 0x18d   :  { %v1104_v31 = vadd.f32 %v5827_v12, %v1103_v29  ;;  %v1326_v33 = vmax.f32 %v1112_v26, 0.0 }
 0x18e   :  { %v5195_v34 = vpop.f32.mrf.mxu0 }
 0x18f   :  { %v1324_v36 = vmax.f32 %v1104_v31, 0.0  ;;  %v1404_v42 = vpack.c.bf16 %v1326_v33, %v1325_v38  ;;  %v1125_v47 = vadd.f32 %v5195_v34, %v5827_v12 }
 0x190   :  { %v1116_v39 = vpop.f32.mrf.mxu0 }
 0x191   :  { %v1403_v41 = vpack.c.bf16 %v1324_v36, %v1323_v35  ;;  %v1117_v45 = vadd.f32 %v5827_v12, %v1116_v39  ;;  %v1329_v57 = vmax.f32 %v1125_v47, 0.0 }
 0x192   :  { %v5196_v44 = vpop.f32.mrf.mxu0 }
 0x193   :  { %v1128_v46 = vadd.f32 %v5196_v44, %v5827_v12  ;;  %5333 = vmatprep.mubr.bf16.mxu1 %v1403_v41  ;;  %v1327_v55 = vmax.f32 %v1117_v45, 0.0  ;;  %v6112_v41 = vld [vmem:[%s7599_s2] ss:$0 sm:$0xff] }
 0x194   :  { %v1119_v48 = vpop.f32.mrf.mxu0  ;;  %v5239_v50 = vpop.f32.mrf.mxu1  ;;  %5334 = vmatmul.mubr.bf16.gmra.mxu1 %v1404_v42 }
 0x195   :  { %v1120_v51 = vadd.f32 %v5827_v12, %v1119_v48  ;;  %v1330_v52 = vmax.f32 %v1128_v46, 0.0  ;;  %v1533_v34 = vadd.f32 %v5239_v50, %v6092_v58 }
 0x196   :  { %v5199_v37 = vpop.f32.mrf.mxu0  ;;  %v1524_v54 = vpop.f32.mrf.mxu1 }
 0x197   :  { %v1328_v56 = vmax.f32 %v1120_v51, 0.0  ;;  %v1525_v1 = vadd.f32 %v6092_v58, %v1524_v54  ;;  %v1406_v3 = vpack.c.bf16 %v1330_v52, %v1329_v57  ;;  %v1141_v13 = vadd.f32 %v5199_v37, %v5827_v12 }
 0x198   :  { %v1132_v59 = vpop.f32.mrf.mxu0  ;;  %v5240_v61 = vpop.f32.mrf.mxu1 }
 0x199   :  { %v1405_v2 = vpack.c.bf16 %v1328_v56, %v1327_v55  ;;  %v1133_v7 = vadd.f32 %v5827_v12, %v1132_v59  ;;  %v2035_v16 = vmax.f32 %v1525_v1, 0.0  ;;  %v1536_v25 = vadd.f32 %v5240_v61, %v6092_v58 }
 0x19a   :  { %v5200_v4 = vpop.f32.mrf.mxu0  ;;  %v1527_v6 = vpop.f32.mrf.mxu1  ;;  %v1333_v29 = vmax.f32 %v1141_v13, 0.0 }
 0x19b   :  { %v1144_v8 = vadd.f32 %v5200_v4, %v5827_v12  ;;  %v1528_v11 = vadd.f32 %v6092_v58, %v1527_v6  ;;  %5337 = vmatprep.mubr.bf16.mxu1 %v1405_v2  ;;  %v1331_v24 = vmax.f32 %v1133_v7, 0.0  ;;  %v2038_v39 = vmax.f32 %v1536_v25, 0.0 }
 0x19c   :  { %v1135_v14 = vpop.f32.mrf.mxu0  ;;  %v6099_v15 = vpop.f32.mrf.mxu1  ;;  %5338 = vmatmul.mubr.bf16.gmra.mxu1 %v1406_v3 }
 0x19d   :  { %v2036_v17 = vmax.f32 %v1528_v11, 0.0  ;;  %v1136_v18 = vadd.f32 %v5827_v12, %v1135_v14  ;;  %v1334_v21 = vmax.f32 %v1144_v8, 0.0 }
 0x19e   :  { %v5203_v22 = vpop.f32.mrf.mxu0  ;;  %v1540_v23 = vpop.f32.mrf.mxu1 }
 0x19f   :  { %v6103_v26 = vpack.c.bf16 %v2036_v17, %v2035_v16  ;;  %v1332_v27 = vmax.f32 %v1136_v18, 0.0  ;;  %v1408_v36 = vpack.c.bf16 %v1334_v21, %v1333_v29  ;;  %v1157_v45 = vadd.f32 %v6112_v41, %v5203_v22 }
 0x1a0   :  { %v1148_v31 = vpop.f32.mrf.mxu0  ;;  %v5244_v33 = vpop.f32.mrf.mxu1  ;;  %v1541_v61 = vadd.f32 %v6092_v58, %v1540_v23 }
 0x1a1   :  { %7622 = vst [vmem:[#allocation2_spill] sm:$0xff] %v6103_v26  ;;  %2474 = vmatmul.mubr.bf16.vlgmr.msra.gmra.mxu0 %v6103_v26  ;;  %v1407_v35 = vpack.c.bf16 %v1332_v27, %v1331_v24  ;;  %v1149_v42 = vadd.f32 %v6112_v41, %v1148_v31  ;;  %v1337_v56 = vmax.f32 %v1157_v45, 0.0  ;;  %v1552_v18 = vadd.f32 %v5244_v33, %v6092_v58 }
 0x1a2   :  { %v5204_v38 = vpop.f32.mrf.mxu0  ;;  %v1543_v12 = vpop.f32.mrf.mxu1  ;;  %3115 = vmatpush1.bf16.msra.mxu0 %v5844_v28  ;;  %2483 = vmatprep.mubr.bf16.mxu0 %v7605_v30  ;;  %v2037_v28 = vmax.f32 %v1533_v34, 0.0  ;;  %v2039_v13 = vmax.f32 %v1541_v61, 0.0  ;;  %v1549_v27 = vadd.f32 %v6099_v15, %v6092_v58 }
 0x1a3   :  { %v1160_v44 = vadd.f32 %v6112_v41, %v5204_v38  ;;  %5341 = vmatprep.mubr.bf16.mxu1 %v1407_v35  ;;  %3116 = vmatprep.subr.bf16.mxu0 %v5852_v32  ;;  %v1335_v54 = vmax.f32 %v1149_v42, 0.0  ;;  %v1544_v32 = vadd.f32 %v6092_v58, %v1543_v12  ;;  %v2042_v33 = vmax.f32 %v1552_v18, 0.0 }
 0x1a4   :  { %v1151_v46 = vpop.f32.mrf.mxu0  ;;  %v6118_v47 = vpop.f32.mrf.mxu1  ;;  %5342 = vmatmul.mubr.bf16.gmra.mxu1 %v1408_v36  ;;  %v6124_v37 = vpack.c.bf16 %v2038_v39, %v2037_v28  ;;  %v2041_v12 = vmax.f32 %v1549_v27, 0.0 }
 0x1a5   :  { %v1152_v48 = vadd.f32 %v6112_v41, %v1151_v46  ;;  %v1338_v50 = vmax.f32 %v1160_v44, 0.0  ;;  %v2040_v4 = vmax.f32 %v1544_v32, 0.0 }
 0x1a6   :  { %v5207_v51 = vpop.f32.mrf.mxu0  ;;  %v6121_v52 = vpop.f32.mrf.mxu1  ;;  %3117 = vmatpush1.bf16.msra.mxu0 %v5865_v40  ;;  %v6167_v45 = vpack.c.bf16 %v2042_v33, %v2041_v12 }
 0x1a7   :  { %v1336_v55 = vmax.f32 %v1152_v48, 0.0  ;;  %3118 = vmatprep.subr.bf16.mxu0 %v5872_v43  ;;  %v1410_v2 = vpack.c.bf16 %v1338_v50, %v1337_v56  ;;  %v1173_v7 = vadd.f32 %v6112_v41, %v5207_v51  ;;  %v6145_v21 = vpack.c.bf16 %v2040_v4, %v2039_v13 }
 0x1a8   :  { %v1164_v57 = vpop.f32.mrf.mxu0  ;;  %v6128_v59 = vpop.f32.mrf.mxu1 }
 0x1a9   :  { %2484 = vmatmul.mubr.bf16.gmra.mxu0 %v6124_v37  ;;  %v1409_v1 = vpack.c.bf16 %v1336_v55, %v1335_v54  ;;  %v1165_v6 = vadd.f32 %v6112_v41, %v1164_v57  ;;  %v1341_v23 = vmax.f32 %v1173_v7, 0.0  ;;  %v1557_v54 = vadd.f32 %v6092_v58, %v6121_v52 }
 0x1aa   :  { %v5208_v3 = vpop.f32.mrf.mxu0  ;;  %v1559_v40 = vpop.f32.mrf.mxu1  ;;  %2493 = vmatprep.mubr.bf16.mxu0 %v7605_v30  ;;  %3119 = vmatpush1.bf16.msra.mxu0 %v5879_v49 }
 0x1ab   :  { %v1176_v43 = vadd.f32 %v6112_v41, %v5208_v3  ;;  %5345 = vmatprep.mubr.bf16.mxu1 %v1409_v1  ;;  %3120 = vmatprep.subr.bf16.mxu0 %v5888_v53  ;;  %v1339_v53 = vmax.f32 %v1165_v6, 0.0  ;;  %v1560_v46 = vadd.f32 %v6092_v58, %v1559_v40  ;;  %v2043_v3 = vmax.f32 %v1557_v54, 0.0 }
 0x1ac   :  { %v1167_v8 = vpop.f32.mrf.mxu0  ;;  %v6138_v11 = vpop.f32.mrf.mxu1  ;;  %5346 = vmatmul.mubr.bf16.gmra.mxu1 %v1410_v2 }
 0x1ad   :  { %v1168_v14 = vadd.f32 %v6112_v41, %v1167_v8  ;;  %v1342_v16 = vmax.f32 %v1176_v43, 0.0  ;;  %v2044_v57 = vmax.f32 %v1560_v46, 0.0  ;;  %v1568_v43 = vadd.f32 %v6128_v59, %v6092_v58 }
 0x1ae   :  { %v5211_v17 = vpop.f32.mrf.mxu0  ;;  %v6141_v49 = vpop.f32.mrf.mxu1  ;;  %3121 = vmatpush1.bf16.msra.mxu0 %v5901_v60 }
 0x1af   :  { %v1340_v22 = vmax.f32 %v1168_v14, 0.0  ;;  %3122 = vmatprep.subr.bf16.mxu0 %v5908_v63  ;;  %v1412_v31 = vpack.c.bf16 %v1342_v16, %v1341_v23  ;;  %v1189_v15 = vadd.f32 %v6112_v41, %v5211_v17  ;;  %v6192_v7 = vpack.c.bf16 %v2044_v57, %v2043_v3 }
 0x1b0   :  { %v1180_v24 = vpop.f32.mrf.mxu0  ;;  %v6148_v25 = vpop.f32.mrf.mxu1  ;;  %v1565_v17 = vadd.f32 %v6118_v47, %v6092_v58  ;;  %v2046_v59 = vmax.f32 %v1568_v43, 0.0 }
 0x1b1   :  { %2494 = vmatmul.mubr.bf16.gmra.mxu0 %v6145_v21  ;;  %v1411_v29 = vpack.c.bf16 %v1340_v22, %v1339_v53  ;;  %v1181_v63 = vadd.f32 %v6112_v41, %v1180_v24  ;;  %v1345_v48 = vmax.f32 %v1189_v15, 0.0 }
 0x1b2   :  { %v5212_v60 = vpop.f32.mrf.mxu0  ;;  %v6153_v34 = vpop.f32.mrf.mxu1  ;;  %2503 = vmatprep.mubr.bf16.mxu0 %v7605_v30  ;;  %3123 = vmatpush1.bf16.msra.mxu0 %v5915_v5  ;;  %v2045_v47 = vmax.f32 %v1565_v17, 0.0 }
 0x1b3   :  { %v1192_v35 = vadd.f32 %v6112_v41, %v5212_v60  ;;  %5349 = vmatprep.mubr.bf16.mxu1 %v1411_v29  ;;  %3124 = vmatprep.subr.bf16.mxu0 %v5969_v0  ;;  %v1343_v0 = vmax.f32 %v1181_v63, 0.0  ;;  %v1576_v15 = vadd.f32 %v6092_v58, %v6153_v34 }
 0x1b4   :  { %v1183_v36 = vpop.f32.mrf.mxu0  ;;  %v6161_v38 = vpop.f32.mrf.mxu1  ;;  %5350 = vmatmul.mubr.bf16.gmra.mxu1 %v1412_v31 }
 0x1b5   :  { %v1184_v39 = vadd.f32 %v6112_v41, %v1183_v36  ;;  %v1346_v42 = vmax.f32 %v1192_v35, 0.0  ;;  %v6210_v35 = vpack.c.bf16 %v2046_v59, %v2045_v47 }
 0x1b6   :  { %v5215_v44 = vpop.f32.mrf.mxu0  ;;  %v6164_v5 = vpop.f32.mrf.mxu1  ;;  %3125 = vmatpush1.bf16.msra.mxu0 %v5964_v62 }
 0x1b7   :  { %v1344_v28 = vmax.f32 %v1184_v39, 0.0  ;;  %3126 = vmatprep.subr.bf16.mxu0 %v6008_v10  ;;  %v1414_v55 = vpack.c.bf16 %v1346_v42, %v1345_v48  ;;  %v1205_v52 = vadd.f32 %v6112_v41, %v5215_v44  ;;  %v1573_v44 = vadd.f32 %v6092_v58, %v6141_v49 }
 0x1b8   :  { %v1196_v50 = vpop.f32.mrf.mxu0  ;;  %v6171_v51 = vpop.f32.mrf.mxu1  ;;  %v1584_v49 = vadd.f32 %v6148_v25, %v6092_v58 }
 0x1b9   :  { %2504 = vmatmul.mubr.bf16.gmra.mxu0 %v6167_v45  ;;  %v1413_v32 = vpack.c.bf16 %v1344_v28, %v1343_v0  ;;  %v1197_v10 = vadd.f32 %v6112_v41, %v1196_v50  ;;  %v1349_v13 = vmax.f32 %v1205_v52, 0.0  ;;  %v2048_v28 = vmax.f32 %v1576_v15, 0.0 }
 0x1ba   :  { %v5216_v62 = vpop.f32.mrf.mxu0  ;;  %v6176_v56 = vpop.f32.mrf.mxu1  ;;  %2513 = vmatprep.mubr.bf16.mxu0 %v7605_v30  ;;  %3127 = vmatpush1.bf16.msra.mxu0 %v6003_v9  ;;  %v2047_v34 = vmax.f32 %v1573_v44, 0.0 }
 0x1bb   :  { %v1208_v61 = vadd.f32 %v6112_v41, %v5216_v62  ;;  %5353 = vmatprep.mubr.bf16.mxu1 %v1413_v32  ;;  %3128 = vmatprep.subr.bf16.mxu0 %v6037_v20  ;;  %v1347_v20 = vmax.f32 %v1197_v10, 0.0  ;;  %v1581_v62 = vadd.f32 %v6138_v11, %v6092_v58 }
 0x1bc   :  { %v1199_v1 = vpop.f32.mrf.mxu0  ;;  %v6184_v2 = vpop.f32.mrf.mxu1  ;;  %5354 = vmatmul.mubr.bf16.gmra.mxu1 %v1414_v55  ;;  %v6227_v54 = vpack.c.bf16 %v2048_v28, %v2047_v34 }
 0x1bd   :  { %v1200_v40 = vadd.f32 %v6112_v41, %v1199_v1  ;;  %v1350_v4 = vmax.f32 %v1208_v61, 0.0  ;;  %v2050_v61 = vmax.f32 %v1584_v49, 0.0  ;;  %v2049_v3 = vmax.f32 %v1581_v62, 0.0 }
 0x1be   :  { %v5219_v6 = vpop.f32.mrf.mxu0  ;;  %v6187_v9 = vpop.f32.mrf.mxu1  ;;  %3129 = vmatpush1.bf16.msra.mxu0 %v6032_v19 }
 0x1bf   :  { %v1348_v8 = vmax.f32 %v1200_v40, 0.0  ;;  %v1416_v53 = vpack.c.bf16 %v1350_v4, %v1349_v13  ;;  %v1221_v27 = vadd.f32 %v6112_v41, %v5219_v6  ;;  %v6241_v4 = vpack.c.bf16 %v2050_v61, %v2049_v3 }
 0x1c0   :  { %v1212_v14 = vpop.f32.mrf.mxu0  ;;  %v6194_v16 = vpop.f32.mrf.mxu1  ;;  %v1592_v6 = vadd.f32 %v6092_v58, %v6176_v56 }
 0x1c1   :  { %2514 = vmatmul.mubr.bf16.gmra.mxu0 %v6192_v7  ;;  %v1415_v18 = vpack.c.bf16 %v1348_v8, %v1347_v20  ;;  %v1213_v23 = vadd.f32 %v6112_v41, %v1212_v14  ;;  %v1353_v39 = vmax.f32 %v1221_v27, 0.0  ;;  %v1589_v8 = vadd.f32 %v6092_v58, %v6164_v5 }
 0x1c2   :  { %v5220_v22 = vpop.f32.mrf.mxu0  ;;  %v6199_v19 = vpop.f32.mrf.mxu1  ;;  %2523 = vmatprep.mubr.bf16.mxu0 %v7605_v30  ;;  %v2052_v17 = vmax.f32 %v1592_v6, 0.0 }
 0x1c3   :  { %v1224_v24 = vadd.f32 %v6112_v41, %v5220_v22  ;;  %5357 = vmatprep.mubr.bf16.mxu1 %v1415_v18  ;;  %v1351_v36 = vmax.f32 %v1213_v23, 0.0  ;;  %v2051_v59 = vmax.f32 %v1589_v8, 0.0  ;;  %v1608_v62 = vadd.f32 %v6092_v58, %v6199_v19 }
 0x1c4   :  { %v1215_v29 = vpop.f32.mrf.mxu0  ;;  %v6205_v31 = vpop.f32.mrf.mxu1  ;;  %5358 = vmatmul.mubr.bf16.gmra.mxu1 %v1416_v53 }
 0x1c5   :  { %v1216_v60 = vadd.f32 %v6112_v41, %v1215_v29  ;;  %v1354_v33 = vmax.f32 %v1224_v24, 0.0  ;;  %v1600_v29 = vadd.f32 %v6171_v51, %v6092_v58  ;;  %v6259_v47 = vpack.c.bf16 %v2052_v17, %v2051_v59 }
 0x1c6   :  { %v6208_v63 = vpop.f32.mrf.mxu1  ;;  %v1616_v17 = vadd.f32 %v6194_v16, %v6092_v58 }
 0x1c7   :  { %v1352_v12 = vmax.f32 %v1216_v60, 0.0  ;;  %v1418_v41 = vpack.c.bf16 %v1354_v33, %v1353_v39  ;;  %v2054_v51 = vmax.f32 %v1600_v29, 0.0 }
 0x1c8   :  { %v6214_v42 = vpop.f32.mrf.mxu1  ;;  %v2058_v16 = vmax.f32 %v1616_v17, 0.0 }
 0x1c9   :  { %2524 = vmatmul.mubr.bf16.gmra.mxu0 %v6210_v35  ;;  %v1417_v46 = vpack.c.bf16 %v1352_v12, %v1351_v36 }
 0x1ca   :  { %v6219_v0 = vpop.f32.mrf.mxu1  ;;  %2533 = vmatprep.mubr.bf16.mxu0 %v7605_v30 }
 0x1cb   :  { %5361 = vmatprep.mubr.bf16.mxu1 %v1417_v46 }
 0x1cc   :  { %v5267_v48 = vpop.f32.mrf.mxu1  ;;  %5362 = vmatmul.mubr.bf16.gmra.mxu1 %v1418_v41 }
 0x1cd   :  { %3156 = vmatprep.mubr.bf16.mxu1 %v7605_v30  ;;  %v1645_v32 = vadd.f32 %v5267_v48, %v6092_v58 }
 0x1ce   :  { %v6223_v50 = vpop.f32.mrf.mxu1 }
 0x1cf   :  { %v2065_v52 = vmax.f32 %v1645_v32, 0.0 }
 0x1d0   :  { %v5268_v55 = vpop.f32.mrf.mxu1 }
 0x1d1   :  { %v1648_v57 = vadd.f32 %v5268_v55, %v6092_v58  ;;  %2534 = vmatmul.mubr.bf16.gmra.mxu0 %v6227_v54 }
 0x1d2   :  { %v6234_v10 = vpop.f32.mrf.mxu1  ;;  %2543 = vmatprep.mubr.bf16.mxu0 %v7605_v30 }
 0x1d3   :  { %v2066_v1 = vmax.f32 %v1648_v57, 0.0 }
 0x1d4   :  { %v5271_v25 = vpop.f32.mrf.mxu1  ;;  %3157 = vmatmul.mubr.bf16.vlgmr.msra.gmra.mxu1 %v6124_v37 }
 0x1d5   :  { %v6238_v40 = vpack.c.bf16 %v2066_v1, %v2065_v52  ;;  %3166 = vmatprep.mubr.bf16.mxu1 %v7605_v30  ;;  %v1661_v43 = vadd.f32 %v5271_v25, %v6092_v58 }
 0x1d6   :  { %v1652_v11 = vpop.f32.mrf.mxu1 }
 0x1d7   :  { %v1653_v13 = vadd.f32 %v6092_v58, %v1652_v11  ;;  %v2069_v18 = vmax.f32 %v1661_v43, 0.0  ;;  %v2056_v11 = vmax.f32 %v1608_v62, 0.0 }
 0x1d8   :  { %v5272_v20 = vpop.f32.mrf.mxu1 }
 0x1d9   :  { %v1664_v37 = vadd.f32 %v5272_v20, %v6092_v58  ;;  %2544 = vmatmul.mubr.bf16.gmra.mxu0 %v6241_v4  ;;  %v2067_v23 = vmax.f32 %v1653_v13, 0.0 }
 0x1da   :  { %v1655_v14 = vpop.f32.mrf.mxu1  ;;  %2553 = vmatprep.mubr.bf16.mxu0 %v7605_v30 }
 0x1db   :  { %v2070_v53 = vmax.f32 %v1664_v37, 0.0  ;;  %v1656_v56 = vadd.f32 %v6092_v58, %v1655_v14 }
 0x1dc   :  { %v5275_v22 = vpop.f32.mrf.mxu1  ;;  %3167 = vmatmul.mubr.bf16.gmra.mxu1 %v6145_v21  ;;  %v1597_v21 = vadd.f32 %v6161_v38, %v6092_v58 }
 0x1dd   :  { %v6254_v5 = vpack.c.bf16 %v2070_v53, %v2069_v18  ;;  %v2068_v24 = vmax.f32 %v1656_v56, 0.0  ;;  %3176 = vmatprep.mubr.bf16.mxu1 %v7605_v30  ;;  %v1677_v33 = vadd.f32 %v5275_v22, %v6092_v58 }
 0x1de   :  { %v1668_v27 = vpop.f32.mrf.mxu1  ;;  %v2053_v48 = vmax.f32 %v1597_v21, 0.0 }
 0x1df   :  { %v6261_v60 = vpack.c.bf16 %v2068_v24, %v2067_v23  ;;  %v1669_v36 = vadd.f32 %v6092_v58, %v1668_v27  ;;  %v2073_v44 = vmax.f32 %v1677_v33, 0.0 }
 0x1e0   :  { %v5276_v15 = vpop.f32.mrf.mxu1  ;;  %v6275_v55 = vpack.c.bf16 %v2054_v51, %v2053_v48 }
 0x1e1   :  { %v1680_v12 = vadd.f32 %v5276_v15, %v6092_v58  ;;  %2554 = vmatmul.mubr.bf16.gmra.mxu0 %v6259_v47  ;;  %v2071_v34 = vmax.f32 %v1669_v36, 0.0 }
 0x1e2   :  { %v1671_v39 = vpop.f32.mrf.mxu1  ;;  %2563 = vmatprep.mubr.bf16.mxu0 %v7605_v30 }
 0x1e3   :  { %v2074_v46 = vmax.f32 %v1680_v12, 0.0  ;;  %v1672_v41 = vadd.f32 %v6092_v58, %v1671_v39 }
 0x1e4   :  { %v5279_v28 = vpop.f32.mrf.mxu1  ;;  %3177 = vmatmul.mubr.bf16.gmra.mxu1 %v6167_v45  ;;  %v1605_v45 = vadd.f32 %v6092_v58, %v6187_v9 }
 0x1e5   :  { %v6272_v38 = vpack.c.bf16 %v2074_v46, %v2073_v44  ;;  %v2072_v49 = vmax.f32 %v1672_v41, 0.0  ;;  %3186 = vmatprep.mubr.bf16.mxu1 %v7605_v30  ;;  %v1693_v61 = vadd.f32 %v5279_v28, %v6092_v58  ;;  %v1624_v44 = vadd.f32 %v6092_v58, %v6219_v0 }
 0x1e6   :  { %v1684_v32 = vpop.f32.mrf.mxu1  ;;  %v2055_v8 = vmax.f32 %v1605_v45, 0.0 }
 0x1e7   :  { %v6279_v57 = vpack.c.bf16 %v2072_v49, %v2071_v34  ;;  %v1685_v1 = vadd.f32 %v6092_v58, %v1684_v32  ;;  %v2077_v6 = vmax.f32 %v1693_v61, 0.0  ;;  %v2060_v32 = vmax.f32 %v1624_v44, 0.0 }
 0x1e8   :  { %v5280_v52 = vpop.f32.mrf.mxu1  ;;  %v6295_v18 = vpack.c.bf16 %v2056_v11, %v2055_v8  ;;  %v1632_v11 = vadd.f32 %v6214_v42, %v6092_v58 }
 0x1e9   :  { %v1696_v25 = vadd.f32 %v5280_v52, %v6092_v58  ;;  %2564 = vmatmul.mubr.bf16.gmra.mxu0 %v6275_v55  ;;  %v2075_v13 = vmax.f32 %v1685_v1, 0.0 }
 0x1ea   :  { %v1687_v3 = vpop.f32.mrf.mxu1  ;;  %2573 = vmatprep.mubr.bf16.mxu0 %v7605_v30  ;;  %v2062_v42 = vmax.f32 %v1632_v11, 0.0 }
 0x1eb   :  { %v2078_v19 = vmax.f32 %v1696_v25, 0.0  ;;  %v1688_v43 = vadd.f32 %v6092_v58, %v1687_v3 }
 0x1ec   :  { %v5283_v20 = vpop.f32.mrf.mxu1  ;;  %3187 = vmatmul.mubr.bf16.gmra.mxu1 %v6192_v7  ;;  %v1613_v7 = vadd.f32 %v6184_v2, %v6092_v58 }
 0x1ed   :  { %v6290_v9 = vpack.c.bf16 %v2078_v19, %v2077_v6  ;;  %v2076_v37 = vmax.f32 %v1688_v43, 0.0  ;;  %3196 = vmatprep.mubr.bf16.mxu1 %v7605_v30  ;;  %v1709_v56 = vadd.f32 %v5283_v20, %v6092_v58 }
 0x1ee   :  { %v1700_v14 = vpop.f32.mrf.mxu1  ;;  %v2057_v21 = vmax.f32 %v1613_v7, 0.0 }
 0x1ef   :  { %v6297_v53 = vpack.c.bf16 %v2076_v37, %v2075_v13  ;;  %v1701_v59 = vadd.f32 %v6092_v58, %v1700_v14  ;;  %v2081_v27 = vmax.f32 %v1709_v56, 0.0 }
 0x1f0   :  { %v5284_v22 = vpop.f32.mrf.mxu1  ;;  %v6311_v51 = vpack.c.bf16 %v2058_v16, %v2057_v21 }
 0x1f1   :  { %v1712_v23 = vadd.f32 %v5284_v22, %v6092_v58  ;;  %2574 = vmatmul.mubr.bf16.gmra.mxu0 %v6295_v18  ;;  %v2079_v36 = vmax.f32 %v1701_v59, 0.0 }
 0x1f2   :  { %v1703_v24 = vpop.f32.mrf.mxu1  ;;  %2583 = vmatprep.mubr.bf16.mxu0 %v7605_v30 }
 0x1f3   :  { %v2082_v29 = vmax.f32 %v1712_v23, 0.0  ;;  %v1704_v33 = vadd.f32 %v6092_v58, %v1703_v24 }
 0x1f4   :  { %v5287_v15 = vpop.f32.mrf.mxu1  ;;  %3197 = vmatmul.mubr.bf16.gmra.mxu1 %v6210_v35  ;;  %v1621_v35 = vadd.f32 %v6092_v58, %v6208_v63 }
 0x1f5   :  { %v6308_v2 = vpack.c.bf16 %v2082_v29, %v2081_v27  ;;  %v2080_v12 = vmax.f32 %v1704_v33, 0.0  ;;  %3206 = vmatprep.mubr.bf16.mxu1 %v7605_v30  ;;  %v1725_v41 = vadd.f32 %v5287_v15, %v6092_v58  ;;  %v1640_v27 = vadd.f32 %v6092_v58, %v6234_v10 }
 0x1f6   :  { %v1716_v39 = vpop.f32.mrf.mxu1  ;;  %v2059_v45 = vmax.f32 %v1621_v35, 0.0 }
 0x1f7   :  { %v6315_v46 = vpack.c.bf16 %v2080_v12, %v2079_v36  ;;  %v1717_v48 = vadd.f32 %v6092_v58, %v1716_v39  ;;  %v2085_v62 = vmax.f32 %v1725_v41, 0.0  ;;  %v2064_v39 = vmax.f32 %v1640_v27, 0.0 }
 0x1f8   :  { %v5288_v28 = vpop.f32.mrf.mxu1  ;;  %v6331_v6 = vpack.c.bf16 %v2060_v32, %v2059_v45 }
 0x1f9   :  { %v1728_v34 = vadd.f32 %v5288_v28, %v6092_v58  ;;  %2584 = vmatmul.mubr.bf16.gmra.mxu0 %v6311_v51  ;;  %v2083_v1 = vmax.f32 %v1717_v48, 0.0 }
 0x1fa   :  { %v1719_v49 = vpop.f32.mrf.mxu1  ;;  %2593 = vmatprep.mubr.bf16.mxu0 %v7605_v30 }
 0x1fb   :  { %v2086_v0 = vmax.f32 %v1728_v34, 0.0  ;;  %v1720_v61 = vadd.f32 %v6092_v58, %v1719_v49 }
 0x1fc   :  { %v5291_v52 = vpop.f32.mrf.mxu1  ;;  %3207 = vmatmul.mubr.bf16.gmra.mxu1 %v6227_v54  ;;  %v1629_v54 = vadd.f32 %v6205_v31, %v6092_v58 }
 0x1fd   :  { %v6326_v63 = vpack.c.bf16 %v2086_v0, %v2085_v62  ;;  %v2084_v25 = vmax.f32 %v1720_v61, 0.0  ;;  %3216 = vmatprep.mubr.bf16.mxu1 %v7605_v30  ;;  %v1741_v43 = vadd.f32 %v5291_v52, %v6092_v58 }
 0x1fe   :  { %v1732_v3 = vpop.f32.mrf.mxu1  ;;  %v2061_v7 = vmax.f32 %v1629_v54, 0.0 }
 0x1ff   :  { %v6333_v19 = vpack.c.bf16 %v2084_v25, %v2083_v1  ;;  %v1733_v8 = vadd.f32 %v6092_v58, %v1732_v3  ;;  %v2089_v14 = vmax.f32 %v1741_v43, 0.0 }
 0x200   :  { %v5292_v20 = vpop.f32.mrf.mxu1  ;;  %v6347_v16 = vpack.c.bf16 %v2062_v42, %v2061_v7 }
 0x201   :  { %v1744_v13 = vadd.f32 %v5292_v20, %v6092_v58  ;;  %2594 = vmatmul.mubr.bf16.gmra.mxu0 %v6331_v6  ;;  %v2087_v59 = vmax.f32 %v1733_v8, 0.0 }
 0x202   :  { %v1735_v37 = vpop.f32.mrf.mxu1  ;;  %2603 = vmatprep.mubr.bf16.mxu0 %v7605_v30 }
 0x203   :  { %v2090_v17 = vmax.f32 %v1744_v13, 0.0  ;;  %v1736_v56 = vadd.f32 %v6092_v58, %v1735_v37 }
 0x204   :  { %v5295_v22 = vpop.f32.mrf.mxu1  ;;  %3217 = vmatmul.mubr.bf16.gmra.mxu1 %v6241_v4  ;;  %v1637_v4 = vadd.f32 %v6092_v58, %v6223_v50 }
 0x205   :  { %v6344_v31 = vpack.c.bf16 %v2090_v17, %v2089_v14  ;;  %v2088_v23 = vmax.f32 %v1736_v56, 0.0  ;;  %3226 = vmatprep.mubr.bf16.mxu1 %v7605_v30  ;;  %v1757_v33 = vadd.f32 %v5295_v22, %v6092_v58 }
 0x206   :  { %v1748_v24 = vpop.f32.mrf.mxu1  ;;  %v2063_v35 = vmax.f32 %v1637_v4, 0.0 }
 0x207   :  { %v6351_v29 = vpack.c.bf16 %v2088_v23, %v2087_v59  ;;  %v1749_v21 = vadd.f32 %v6092_v58, %v1748_v24  ;;  %v2093_v44 = vmax.f32 %v1757_v33, 0.0 }
 0x208   :  { %v5296_v15 = vpop.f32.mrf.mxu1  ;;  %v6365_v32 = vpack.c.bf16 %v2064_v39, %v2063_v35 }
 0x209   :  { %v1760_v36 = vadd.f32 %v5296_v15, %v6092_v58  ;;  %2604 = vmatmul.mubr.bf16.gmra.mxu0 %v6347_v16  ;;  %v2091_v48 = vmax.f32 %v1749_v21, 0.0 }
 0x20a   :  { %v1751_v12 = vpop.f32.mrf.mxu1  ;;  %2613 = vmatprep.mubr.bf16.mxu0 %v7605_v30 }
 0x20b   :  { %v2094_v10 = vmax.f32 %v1760_v36, 0.0  ;;  %v1752_v41 = vadd.f32 %v6092_v58, %v1751_v12 }
 0x20c   :  { %v5299_v28 = vpop.f32.mrf.mxu1  ;;  %3227 = vmatmul.mubr.bf16.gmra.mxu1 %v6259_v47 }
 0x20d   :  { %v6362_v50 = vpack.c.bf16 %v2094_v10, %v2093_v44  ;;  %v2092_v34 = vmax.f32 %v1752_v41, 0.0  ;;  %3236 = vmatprep.mubr.bf16.mxu1 %v7605_v30  ;;  %v1773_v0 = vadd.f32 %v5299_v28, %v6092_v58 }
 0x20e   :  { %v1764_v49 = vpop.f32.mrf.mxu1 }
 0x20f   :  { %v6367_v62 = vpack.c.bf16 %v2092_v34, %v2091_v48  ;;  %v1765_v52 = vadd.f32 %v6092_v58, %v1764_v49  ;;  %v2097_v1 = vmax.f32 %v1773_v0, 0.0 }
 0x210   :  { %v5300_v61 = vpop.f32.mrf.mxu1 }
 0x211   :  { %v1776_v45 = vadd.f32 %v5300_v61, %v6092_v58  ;;  %2614 = vmatmul.mubr.bf16.gmra.mxu0 %v6365_v32  ;;  %v2095_v43 = vmax.f32 %v1765_v52, 0.0 }
 0x212   :  { %v1767_v47 = vpop.f32.mrf.mxu1  ;;  %2623 = vmatprep.mubr.bf16.mxu0 %v7605_v30 }
 0x213   :  { %v2098_v25 = vmax.f32 %v1776_v45, 0.0  ;;  %v1768_v3 = vadd.f32 %v6092_v58, %v1767_v47 }
 0x214   :  { %v5303_v11 = vpop.f32.mrf.mxu1  ;;  %3237 = vmatmul.mubr.bf16.gmra.mxu1 %v6275_v55 }
 0x215   :  { %v6376_v20 = vpack.c.bf16 %v2098_v25, %v2097_v1  ;;  %v2096_v54 = vmax.f32 %v1768_v3, 0.0  ;;  %3246 = vmatprep.mubr.bf16.mxu1 %v7605_v30  ;;  %v1789_v37 = vadd.f32 %v5303_v11, %v6092_v58 }
 0x216   :  { %v1780_v8 = vpop.f32.mrf.mxu1 }
 0x217   :  { %v6379_v13 = vpack.c.bf16 %v2096_v54, %v2095_v43  ;;  %v1781_v14 = vadd.f32 %v6092_v58, %v1780_v8  ;;  %v2101_v55 = vmax.f32 %v1789_v37, 0.0 }
 0x218   :  { %v5304_v42 = vpop.f32.mrf.mxu1 }
 0x219   :  { %v1792_v17 = vadd.f32 %v5304_v42, %v6092_v58  ;;  %2624 = vmatmul.mubr.bf16.gmra.mxu0 %v6238_v40  ;;  %v2099_v23 = vmax.f32 %v1781_v14, 0.0 }
 0x21a   :  { %v1783_v56 = vpop.f32.mrf.mxu1  ;;  %2633 = vmatprep.mubr.bf16.mxu0 %v7605_v30 }
 0x21b   :  { %v2102_v22 = vmax.f32 %v1792_v17, 0.0  ;;  %v1784_v7 = vadd.f32 %v6092_v58, %v1783_v56 }
 0x21c   :  { %v5307_v59 = vpop.f32.mrf.mxu1  ;;  %3247 = vmatmul.mubr.bf16.gmra.mxu1 %v6295_v18 }
 0x21d   :  { %v6388_v24 = vpack.c.bf16 %v2102_v22, %v2101_v55  ;;  %v2100_v27 = vmax.f32 %v1784_v7, 0.0  ;;  %3256 = vmatprep.mubr.bf16.mxu1 %v7605_v30  ;;  %v1805_v4 = vadd.f32 %v5307_v59, %v6092_v58 }
 0x21e   :  { %v1796_v33 = vpop.f32.mrf.mxu1 }
 0x21f   :  { %v6391_v15 = vpack.c.bf16 %v2100_v27, %v2099_v23  ;;  %v1797_v36 = vadd.f32 %v6092_v58, %v1796_v33  ;;  %v2105_v18 = vmax.f32 %v1805_v4, 0.0 }
 0x220   :  { %v5308_v21 = vpop.f32.mrf.mxu1 }
 0x221   :  { %v1808_v12 = vadd.f32 %v5308_v21, %v6092_v58  ;;  %2634 = vmatmul.mubr.bf16.gmra.mxu0 %v6261_v60  ;;  %v2103_v28 = vmax.f32 %v1797_v36, 0.0 }
 0x222   :  { %v1799_v39 = vpop.f32.mrf.mxu1  ;;  %2643 = vmatprep.mubr.bf16.mxu0 %v7605_v30 }
 0x223   :  { %v2106_v44 = vmax.f32 %v1808_v12, 0.0  ;;  %v1800_v10 = vadd.f32 %v6092_v58, %v1799_v39 }
 0x224   :  { %v5311_v41 = vpop.f32.mrf.mxu1  ;;  %3257 = vmatmul.mubr.bf16.gmra.mxu1 %v6311_v51 }
 0x225   :  { %v6400_v35 = vpack.c.bf16 %v2106_v44, %v2105_v18  ;;  %v2104_v48 = vmax.f32 %v1800_v10, 0.0  ;;  %3266 = vmatprep.mubr.bf16.mxu1 %v7605_v30  ;;  %v1821_v0 = vadd.f32 %v5311_v41, %v6092_v58 }
 0x226   :  { %v1812_v34 = vpop.f32.mrf.mxu1 }
 0x227   :  { %v6403_v49 = vpack.c.bf16 %v2104_v48, %v2103_v28  ;;  %v1813_v52 = vadd.f32 %v6092_v58, %v1812_v34  ;;  %v2109_v51 = vmax.f32 %v1821_v0, 0.0 }
 0x228   :  { %v5312_v61 = vpop.f32.mrf.mxu1 }
 0x229   :  { %v1824_v45 = vadd.f32 %v5312_v61, %v6092_v58  ;;  %2644 = vmatmul.mubr.bf16.gmra.mxu0 %v6254_v5  ;;  %v2107_v11 = vmax.f32 %v1813_v52, 0.0 }
 0x22a   :  { %v1815_v47 = vpop.f32.mrf.mxu1  ;;  %2653 = vmatprep.mubr.bf16.mxu0 %v7605_v30 }
 0x22b   :  { %v2110_v1 = vmax.f32 %v1824_v45, 0.0  ;;  %v1816_v25 = vadd.f32 %v6092_v58, %v1815_v47 }
 0x22c   :  { %v5315_v3 = vpop.f32.mrf.mxu1  ;;  %3267 = vmatmul.mubr.bf16.gmra.mxu1 %v6331_v6 }
 0x22d   :  { %v6412_v43 = vpack.c.bf16 %v2110_v1, %v2109_v51  ;;  %v2108_v54 = vmax.f32 %v1816_v25, 0.0  ;;  %3276 = vmatprep.mubr.bf16.mxu1 %v7605_v30  ;;  %v1837_v42 = vadd.f32 %v5315_v3, %v6092_v58 }
 0x22e   :  { %v1828_v8 = vpop.f32.mrf.mxu1 }
 0x22f   :  { %v6415_v37 = vpack.c.bf16 %v2108_v54, %v2107_v11  ;;  %v1829_v17 = vadd.f32 %v6092_v58, %v1828_v8  ;;  %v2113_v6 = vmax.f32 %v1837_v42, 0.0 }
 0x230   :  { %v5316_v14 = vpop.f32.mrf.mxu1 }
 0x231   :  { %v1840_v56 = vadd.f32 %v5316_v14, %v6092_v58  ;;  %2654 = vmatmul.mubr.bf16.gmra.mxu0 %v6279_v57  ;;  %v2111_v23 = vmax.f32 %v1829_v17, 0.0 }
 0x232   :  { %v1831_v55 = vpop.f32.mrf.mxu1  ;;  %2663 = vmatprep.mubr.bf16.mxu0 %v7605_v30 }
 0x233   :  { %v2114_v22 = vmax.f32 %v1840_v56, 0.0  ;;  %v1832_v7 = vadd.f32 %v6092_v58, %v1831_v55 }
 0x234   :  { %v5319_v59 = vpop.f32.mrf.mxu1  ;;  %3277 = vmatmul.mubr.bf16.gmra.mxu1 %v6347_v16 }
 0x235   :  { %v6424_v27 = vpack.c.bf16 %v2114_v22, %v2113_v6  ;;  %v2112_v33 = vmax.f32 %v1832_v7, 0.0  ;;  %3286 = vmatprep.mubr.bf16.mxu1 %v7605_v30  ;;  %v1853_v36 = vadd.f32 %v5319_v59, %v6092_v58 }
 0x236   :  { %v1844_v4 = vpop.f32.mrf.mxu1 }
 0x237   :  { %v6427_v21 = vpack.c.bf16 %v2112_v33, %v2111_v23  ;;  %v1845_v39 = vadd.f32 %v6092_v58, %v1844_v4  ;;  %v2117_v16 = vmax.f32 %v1853_v36, 0.0 }
 0x238   :  { %v5320_v12 = vpop.f32.mrf.mxu1 }
 0x239   :  { %v1856_v18 = vadd.f32 %v5320_v12, %v6092_v58  ;;  %2664 = vmatmul.mubr.bf16.gmra.mxu0 %v6272_v38  ;;  %v2115_v48 = vmax.f32 %v1845_v39, 0.0 }
 0x23a   :  { %v1847_v44 = vpop.f32.mrf.mxu1  ;;  %2673 = vmatprep.mubr.bf16.mxu0 %v7605_v30 }
 0x23b   :  { %v2118_v10 = vmax.f32 %v1856_v18, 0.0  ;;  %v1848_v41 = vadd.f32 %v6092_v58, %v1847_v44 }
 0x23c   :  { %v5323_v28 = vpop.f32.mrf.mxu1  ;;  %3287 = vmatmul.mubr.bf16.gmra.mxu1 %v6365_v32 }
 0x23d   :  { %v6436_v34 = vpack.c.bf16 %v2118_v10, %v2117_v16  ;;  %v2116_v0 = vmax.f32 %v1848_v41, 0.0  ;;  %3296 = vmatprep.mubr.bf16.mxu1 %v7605_v30  ;;  %v1869_v45 = vadd.f32 %v5323_v28, %v6092_v58  ;;  %v6468_v16 = vld [vmem:[%s7600_s4] ss:$0 sm:$0xff] }
 0x23e   :  { %v1860_v61 = vpop.f32.mrf.mxu1 }
 0x23f   :  { %v6439_v52 = vpack.c.bf16 %v2116_v0, %v2115_v48  ;;  %v1861_v51 = vadd.f32 %v6092_v58, %v1860_v61  ;;  %v2121_v32 = vmax.f32 %v1869_v45, 0.0 }
 0x240   :  { %v5324_v47 = vpop.f32.mrf.mxu1 }
 0x241   :  { %v1872_v1 = vadd.f32 %v5324_v47, %v6092_v58  ;;  %2674 = vmatmul.mubr.bf16.gmra.mxu0 %v6297_v53  ;;  %v2119_v8 = vmax.f32 %v1861_v51, 0.0 }
 0x242   :  { %v1863_v25 = vpop.f32.mrf.mxu1  ;;  %2683 = vmatprep.mubr.bf16.mxu0 %v7605_v30 }
 0x243   :  { %v2122_v3 = vmax.f32 %v1872_v1, 0.0  ;;  %v1864_v11 = vadd.f32 %v6092_v58, %v1863_v25 }
 0x244   :  { %v5327_v54 = vpop.f32.mrf.mxu1  ;;  %3297 = vmatmul.mubr.bf16.gmra.mxu1 %v6238_v40 }
 0x245   :  { %v6448_v42 = vpack.c.bf16 %v2122_v3, %v2121_v32  ;;  %v2120_v14 = vmax.f32 %v1864_v11, 0.0  ;;  %3306 = vmatprep.mubr.bf16.mxu1 %v7605_v30  ;;  %v1885_v55 = vadd.f32 %v5327_v54, %v6092_v58  ;;  %v2261_v32 = vlaneseq }
 0x246   :  { %v1876_v17 = vpop.f32.mrf.mxu1 }
 0x247   :  { %v6451_v56 = vpack.c.bf16 %v2120_v14, %v2119_v8  ;;  %v1877_v22 = vadd.f32 %v6092_v58, %v1876_v17  ;;  %v2125_v40 = vmax.f32 %v1885_v55, 0.0  ;;  %v6487_v17 = vshrl.u32 %v2261_v32, 7 }
 0x248   :  { %v5328_v6 = vpop.f32.mrf.mxu1 }
 0x249   :  { %v1888_v7 = vadd.f32 %v5328_v6, %v6092_v58  ;;  %2684 = vmatmul.mubr.bf16.gmra.mxu0 %v6290_v9  ;;  %v2123_v36 = vmax.f32 %v1877_v22, 0.0 }
 0x24a   :  { %v1879_v59 = vpop.f32.mrf.mxu1  ;;  %2693 = vmatprep.mubr.bf16.mxu0 %v7605_v30 }
 0x24b   :  { %v2126_v23 = vmax.f32 %v1888_v7, 0.0  ;;  %v1880_v33 = vadd.f32 %v6092_v58, %v1879_v59 }
 0x24c   :  { %v5331_v4 = vpop.f32.mrf.mxu1  ;;  %3307 = vmatmul.mubr.bf16.gmra.mxu1 %v6261_v60 }
 0x24d   :  { %v6460_v12 = vpack.c.bf16 %v2126_v23, %v2125_v40  ;;  %v2124_v39 = vmax.f32 %v1880_v33, 0.0  ;;  %3316 = vmatprep.mubr.bf16.mxu1 %v7605_v30  ;;  %v1901_v10 = vadd.f32 %v6468_v16, %v5331_v4  ;;  %v2263_v4 = vsub.s32 0, %v6487_v17 }
 0x24e   :  { %v1892_v18 = vpop.f32.mrf.mxu1 }
 0x24f   :  { %v6463_v44 = vpack.c.bf16 %v2124_v39, %v2123_v36  ;;  %v1893_v41 = vadd.f32 %v6468_v16, %v1892_v18  ;;  %v2129_v48 = vmax.f32 %v1901_v10, 0.0  ;;  %v6501_v18 = vld [vmem:[%s7601_s6] sm:$0xf] }
 0x250   :  { %v5332_v58 = vpop.f32.mrf.mxu1 }
 0x251   :  { %v1904_v60 = vadd.f32 %v6468_v16, %v5332_v58  ;;  %2694 = vmatmul.mubr.bf16.gmra.mxu0 %v6315_v46  ;;  %v2127_v47 = vmax.f32 %v1893_v41, 0.0 }
 0x252   :  { %v1895_v28 = vpop.f32.mrf.mxu1  ;;  %2703 = vmatprep.mubr.bf16.mxu0 %v7605_v30 }
 0x253   :  { %v2130_v0 = vmax.f32 %v1904_v60, 0.0  ;;  %v1896_v61 = vadd.f32 %v6468_v16, %v1895_v28  ;;  %v6508_v28 = vrot.slane %v6501_v18, %v2263_v4 }
 0x254   :  { %v5335_v45 = vpop.f32.mrf.mxu1  ;;  %3317 = vmatmul.mubr.bf16.gmra.mxu1 %v6254_v5 }
 0x255   :  { %v6477_v51 = vpack.c.bf16 %v2130_v0, %v2129_v48  ;;  %v2128_v1 = vmax.f32 %v1896_v61, 0.0  ;;  %3326 = vmatprep.mubr.bf16.mxu1 %v7605_v30  ;;  %v1917_v11 = vadd.f32 %v6468_v16, %v5335_v45 }
 0x256   :  { %v1908_v25 = vpop.f32.mrf.mxu1 }
 0x257   :  { %v6480_v3 = vpack.c.bf16 %v2128_v1, %v2127_v47  ;;  %v1909_v8 = vadd.f32 %v6468_v16, %v1908_v25  ;;  %v2133_v55 = vmax.f32 %v1917_v11, 0.0 }
 0x258   :  { %v5336_v54 = vpop.f32.mrf.mxu1 }
 0x259   :  { %v1920_v14 = vadd.f32 %v6468_v16, %v5336_v54  ;;  %2704 = vmatmul.mubr.bf16.gmra.mxu0 %v6308_v2  ;;  %v2131_v59 = vmax.f32 %v1909_v8, 0.0 }
 0x25a   :  { %v1911_v5 = vpop.f32.mrf.mxu1  ;;  %2713 = vmatprep.mubr.bf16.mxu0 %v7605_v30 }
 0x25b   :  { %v2134_v6 = vmax.f32 %v1920_v14, 0.0  ;;  %v1912_v22 = vadd.f32 %v6468_v16, %v1911_v5 }
 0x25c   :  { %v5339_v7 = vpop.f32.mrf.mxu1  ;;  %3327 = vmatmul.mubr.bf16.gmra.mxu1 %v6279_v57  ;;  %v2267_v57 = vsub.s32 1, %v6487_v17 }
 0x25d   :  { %v6491_v40 = vpack.c.bf16 %v2134_v6, %v2133_v55  ;;  %v2132_v23 = vmax.f32 %v1912_v22, 0.0  ;;  %3336 = vmatprep.mubr.bf16.mxu1 %v7605_v30  ;;  %v1933_v39 = vadd.f32 %v6468_v16, %v5339_v7 }
 0x25e   :  { %v1924_v33 = vpop.f32.mrf.mxu1  ;;  %v6513_v1 = vrot.slane %v6501_v18, %v2267_v57 }
 0x25f   :  { %v6495_v36 = vpack.c.bf16 %v2132_v23, %v2131_v59  ;;  %v1925_v58 = vadd.f32 %v6468_v16, %v1924_v33  ;;  %v2137_v0 = vmax.f32 %v1933_v39, 0.0 }
 0x260   :  { %v5340_v10 = vpop.f32.mrf.mxu1 }
 0x261   :  { %v1936_v41 = vadd.f32 %v6468_v16, %v5340_v10  ;;  %v2475_v60 = vpop.f32.mrf.mxu0  ;;  %2714 = vmatmul.mubr.bf16.gmra.mxu0 %v6333_v19  ;;  %v2135_v32 = vmax.f32 %v1925_v58, 0.0 }
 0x262   :  { %v1927_v48 = vpop.f32.mrf.mxu1  ;;  %2723 = vmatprep.mubr.bf16.mxu0 %v7605_v30  ;;  %v2476_v14 = vadd.f32 %v2475_v60, %v6508_v28 }
 0x263   :  { %v2138_v61 = vmax.f32 %v1936_v41, 0.0  ;;  %v1928_v45 = vadd.f32 %v6468_v16, %v1927_v48  ;;  %v2477_v47 = vpop.f32.mrf.mxu0 }
 0x264   :  { %v5343_v25 = vpop.f32.mrf.mxu1  ;;  %3337 = vmatmul.mubr.bf16.gmra.mxu1 %v6272_v38  ;;  %v2478_v59 = vadd.f32 %v2477_v47, %v6513_v1 }
 0x265   :  { %v6516_v11 = vpack.c.bf16 %v2138_v61, %v2137_v0  ;;  %v2136_v54 = vmax.f32 %v1928_v45, 0.0  ;;  %v2479_v8 = vpop.f32.mrf.mxu0  ;;  %3346 = vmatprep.mubr.bf16.mxu1 %v7605_v30  ;;  %v1949_v22 = vadd.f32 %v6468_v16, %v5343_v25 }
 0x266   :  { %v2480_v5 = vadd.f32 %v2479_v8, %v6508_v28  ;;  %v1940_v55 = vpop.f32.mrf.mxu1 }
 0x267   :  { %v6521_v6 = vpack.c.bf16 %v2136_v54, %v2135_v32  ;;  %v2481_v7 = vpop.f32.mrf.mxu0  ;;  %v1941_v4 = vadd.f32 %v6468_v16, %v1940_v55  ;;  %v2141_v60 = vmax.f32 %v1949_v22, 0.0 }
 0x268   :  { %v3787_v38 = vmax.f32 %v2476_v14, %v2480_v5  ;;  %v2482_v23 = vadd.f32 %v2481_v7, %v6513_v1  ;;  %v5344_v33 = vpop.f32.mrf.mxu1 }
 0x269   :  { %v1952_v39 = vadd.f32 %v6468_v16, %v5344_v33  ;;  %v2485_v10 = vpop.f32.mrf.mxu0  ;;  %2724 = vmatmul.mubr.bf16.gmra.mxu0 %v6326_v63  ;;  %v2139_v32 = vmax.f32 %v1941_v4, 0.0 }
 0x26a   :  { %v3808_v57 = vmax.f32 %v2478_v59, %v2482_v23  ;;  %v2486_v58 = vadd.f32 %v2485_v10, %v6508_v28  ;;  %v1943_v41 = vpop.f32.mrf.mxu1  ;;  %2733 = vmatprep.mubr.bf16.mxu0 %v7605_v30 }
 0x26b   :  { %v2142_v48 = vmax.f32 %v1952_v39, 0.0  ;;  %v1944_v0 = vadd.f32 %v6468_v16, %v1943_v41  ;;  %v2487_v61 = vpop.f32.mrf.mxu0 }
 0x26c   :  { %v3788_v45 = vmax.f32 %v3787_v38, %v2486_v58  ;;  %v2488_v47 = vadd.f32 %v2487_v61, %v6513_v1  ;;  %v5347_v25 = vpop.f32.mrf.mxu1  ;;  %3347 = vmatmul.mubr.bf16.gmra.mxu1 %v6297_v53 }
 0x26d   :  { %v6534_v54 = vpack.c.bf16 %v2142_v48, %v2141_v60  ;;  %v2140_v8 = vmax.f32 %v1944_v0, 0.0  ;;  %v2489_v14 = vpop.f32.mrf.mxu0  ;;  %3356 = vmatprep.mubr.bf16.mxu1 %v7605_v30  ;;  %v1965_v59 = vadd.f32 %v6468_v16, %v5347_v25 }
 0x26e   :  { %v3809_v5 = vmax.f32 %v3808_v57, %v2488_v47  ;;  %v2490_v55 = vadd.f32 %v2489_v14, %v6508_v28  ;;  %v1956_v22 = vpop.f32.mrf.mxu1 }
 0x26f   :  { %v6538_v7 = vpack.c.bf16 %v2140_v8, %v2139_v32  ;;  %v2491_v38 = vpop.f32.mrf.mxu0  ;;  %v1957_v4 = vadd.f32 %v6468_v16, %v1956_v22  ;;  %v2145_v60 = vmax.f32 %v1965_v59, 0.0 }
 0x270   :  { %v3789_v23 = vmax.f32 %v3788_v45, %v2490_v55  ;;  %v2492_v33 = vadd.f32 %v2491_v38, %v6513_v1  ;;  %v5348_v53 = vpop.f32.mrf.mxu1 }
 0x271   :  { %v1968_v39 = vadd.f32 %v6468_v16, %v5348_v53  ;;  %v2495_v10 = vpop.f32.mrf.mxu0  ;;  %2734 = vmatmul.mubr.bf16.gmra.mxu0 %v6351_v29  ;;  %v2143_v32 = vmax.f32 %v1957_v4, 0.0 }
 0x272   :  { %v3810_v57 = vmax.f32 %v3809_v5, %v2492_v33  ;;  %v2496_v58 = vadd.f32 %v2495_v10, %v6508_v28  ;;  %v1959_v41 = vpop.f32.mrf.mxu1  ;;  %2743 = vmatprep.mubr.bf16.mxu0 %v7605_v30 }
 0x273   :  { %v2146_v48 = vmax.f32 %v1968_v39, 0.0  ;;  %v1960_v0 = vadd.f32 %v6468_v16, %v1959_v41  ;;  %v2497_v61 = vpop.f32.mrf.mxu0 }
 0x274   :  { %v3790_v45 = vmax.f32 %v3789_v23, %v2496_v58  ;;  %v2498_v47 = vadd.f32 %v2497_v61, %v6513_v1  ;;  %v5351_v25 = vpop.f32.mrf.mxu1  ;;  %3357 = vmatmul.mubr.bf16.gmra.mxu1 %v6290_v9 }
 0x275   :  { %v6550_v8 = vpack.c.bf16 %v2146_v48, %v2145_v60  ;;  %v2144_v14 = vmax.f32 %v1960_v0, 0.0  ;;  %v2499_v5 = vpop.f32.mrf.mxu0  ;;  %3366 = vmatprep.mubr.bf16.mxu1 %v7605_v30  ;;  %v1981_v23 = vadd.f32 %v6468_v16, %v5351_v25 }
 0x276   :  { %v3811_v55 = vmax.f32 %v3810_v57, %v2498_v47  ;;  %v2500_v22 = vadd.f32 %v2499_v5, %v6508_v28  ;;  %v1972_v59 = vpop.f32.mrf.mxu1 }
 0x277   :  { %v6554_v38 = vpack.c.bf16 %v2144_v14, %v2143_v32  ;;  %v2501_v33 = vpop.f32.mrf.mxu0  ;;  %v1973_v4 = vadd.f32 %v6468_v16, %v1972_v59  ;;  %v2149_v48 = vmax.f32 %v1981_v23, 0.0 }
 0x278   :  { %v3791_v53 = vmax.f32 %v3790_v45, %v2500_v22  ;;  %v2502_v39 = vadd.f32 %v2501_v33, %v6513_v1  ;;  %v5352_v9 = vpop.f32.mrf.mxu1 }
 0x279   :  { %v1984_v10 = vadd.f32 %v6468_v16, %v5352_v9  ;;  %v2505_v58 = vpop.f32.mrf.mxu0  ;;  %2744 = vmatmul.mubr.bf16.gmra.mxu0 %v6344_v31  ;;  %v2147_v14 = vmax.f32 %v1973_v4, 0.0 }
 0x27a   :  { %v3812_v57 = vmax.f32 %v3811_v55, %v2502_v39  ;;  %v2506_v41 = vadd.f32 %v2505_v58, %v6508_v28  ;;  %v1975_v60 = vpop.f32.mrf.mxu1  ;;  %2753 = vmatprep.mubr.bf16.mxu0 %v7605_v30 }
 0x27b   :  { %v2150_v0 = vmax.f32 %v1984_v10, 0.0  ;;  %v1976_v61 = vadd.f32 %v6468_v16, %v1975_v60  ;;  %v2507_v45 = vpop.f32.mrf.mxu0 }
 0x27c   :  { %v3792_v47 = vmax.f32 %v3791_v53, %v2506_v41  ;;  %v2508_v25 = vadd.f32 %v2507_v45, %v6513_v1  ;;  %v5355_v32 = vpop.f32.mrf.mxu1  ;;  %3367 = vmatmul.mubr.bf16.gmra.mxu1 %v6315_v46 }
 0x27d   :  { %v6566_v5 = vpack.c.bf16 %v2150_v0, %v2149_v48  ;;  %v2148_v55 = vmax.f32 %v1976_v61, 0.0  ;;  %v2509_v22 = vpop.f32.mrf.mxu0  ;;  %3376 = vmatprep.mubr.bf16.mxu1 %v7605_v30  ;;  %v1997_v53 = vadd.f32 %v6468_v16, %v5355_v32 }
 0x27e   :  { %v3813_v59 = vmax.f32 %v3812_v57, %v2508_v25  ;;  %v2510_v23 = vadd.f32 %v2509_v22, %v6508_v28  ;;  %v1988_v33 = vpop.f32.mrf.mxu1 }
 0x27f   :  { %v6570_v39 = vpack.c.bf16 %v2148_v55, %v2147_v14  ;;  %v2511_v9 = vpop.f32.mrf.mxu0  ;;  %v1989_v4 = vadd.f32 %v6468_v16, %v1988_v33  ;;  %v2153_v61 = vmax.f32 %v1997_v53, 0.0 }
 0x280   :  { %v3793_v10 = vmax.f32 %v3792_v47, %v2510_v23  ;;  %v2512_v58 = vadd.f32 %v2511_v9, %v6513_v1  ;;  %v5356_v46 = vpop.f32.mrf.mxu1 }
 0x281   :  { %v2000_v41 = vadd.f32 %v6468_v16, %v5356_v46  ;;  %v2515_v60 = vpop.f32.mrf.mxu0  ;;  %2754 = vmatmul.mubr.bf16.gmra.mxu0 %v6367_v62  ;;  %v2151_v22 = vmax.f32 %v1989_v4, 0.0 }
 0x282   :  { %v3814_v57 = vmax.f32 %v3813_v59, %v2512_v58  ;;  %v2516_v48 = vadd.f32 %v2515_v60, %v6508_v28  ;;  %v1991_v0 = vpop.f32.mrf.mxu1  ;;  %2763 = vmatprep.mubr.bf16.mxu0 %v7605_v30 }
 0x283   :  { %v2154_v45 = vmax.f32 %v2000_v41, 0.0  ;;  %v1992_v47 = vadd.f32 %v6468_v16, %v1991_v0  ;;  %v2517_v25 = vpop.f32.mrf.mxu0 }
 0x284   :  { %v3794_v32 = vmax.f32 %v3793_v10, %v2516_v48  ;;  %v2518_v14 = vadd.f32 %v2517_v25, %v6513_v1  ;;  %v5359_v55 = vpop.f32.mrf.mxu1  ;;  %3377 = vmatmul.mubr.bf16.gmra.mxu1 %v6308_v2 }
 0x285   :  { %v6582_v23 = vpack.c.bf16 %v2154_v45, %v2153_v61  ;;  %v2152_v59 = vmax.f32 %v1992_v47, 0.0  ;;  %v2519_v33 = vpop.f32.mrf.mxu0  ;;  %3386 = vmatprep.mubr.bf16.mxu1 %v7605_v30  ;;  %v2013_v10 = vadd.f32 %v6468_v16, %v5359_v55 }
 0x286   :  { %v3815_v9 = vmax.f32 %v3814_v57, %v2518_v14  ;;  %v2520_v53 = vadd.f32 %v2519_v33, %v6508_v28  ;;  %v2004_v58 = vpop.f32.mrf.mxu1 }
 0x287   :  { %v6586_v46 = vpack.c.bf16 %v2152_v59, %v2151_v22  ;;  %v2521_v41 = vpop.f32.mrf.mxu0  ;;  %v2005_v4 = vadd.f32 %v6468_v16, %v2004_v58  ;;  %v2157_v25 = vmax.f32 %v2013_v10, 0.0 }
 0x288   :  { %v3795_v60 = vmax.f32 %v3794_v32, %v2520_v53  ;;  %v2522_v48 = vadd.f32 %v2521_v41, %v6513_v1  ;;  %v5360_v2 = vpop.f32.mrf.mxu1 }
 0x289   :  { %v2016_v0 = vadd.f32 %v6468_v16, %v5360_v2  ;;  %v2525_v61 = vpop.f32.mrf.mxu0  ;;  %2764 = vmatmul.mubr.bf16.gmra.mxu0 %v6362_v50  ;;  %v2155_v53 = vmax.f32 %v2005_v4, 0.0 }
 0x28a   :  { %v3816_v57 = vmax.f32 %v3815_v9, %v2522_v48  ;;  %v2526_v45 = vadd.f32 %v2525_v61, %v6508_v28  ;;  %v2007_v47 = vpop.f32.mrf.mxu1  ;;  %2773 = vmatprep.mubr.bf16.mxu0 %v7605_v30 }
 0x28b   :  { %v2158_v14 = vmax.f32 %v2016_v0, 0.0  ;;  %v2008_v32 = vadd.f32 %v6468_v16, %v2007_v47  ;;  %v2527_v55 = vpop.f32.mrf.mxu0 }
 0x28c   :  { %v3796_v22 = vmax.f32 %v3795_v60, %v2526_v45  ;;  %v2528_v59 = vadd.f32 %v2527_v55, %v6513_v1  ;;  %v5363_v33 = vpop.f32.mrf.mxu1  ;;  %3387 = vmatmul.mubr.bf16.gmra.mxu1 %v6333_v19 }
 0x28d   :  { %v6598_v58 = vpack.c.bf16 %v2158_v14, %v2157_v25  ;;  %v2156_v9 = vmax.f32 %v2008_v32, 0.0  ;;  %v2529_v41 = vpop.f32.mrf.mxu0  ;;  %3396 = vmatprep.mubr.bf16.mxu1 %v7605_v30  ;;  %v2029_v60 = vadd.f32 %v6468_v16, %v5363_v33 }
 0x28e   :  { %v3817_v48 = vmax.f32 %v3816_v57, %v2528_v59  ;;  %v2530_v10 = vadd.f32 %v2529_v41, %v6508_v28  ;;  %v2020_v2 = vpop.f32.mrf.mxu1  ;;  %v2271_v57 = vsub.s32 2, %v6487_v17  ;;  %v2275_v41 = vsub.s32 3, %v6487_v17 }
 0x28f   :  { %v6602_v0 = vpack.c.bf16 %v2156_v9, %v2155_v53  ;;  %v2531_v61 = vpop.f32.mrf.mxu0  ;;  %v2021_v4 = vadd.f32 %v6468_v16, %v2020_v2  ;;  %v2161_v33 = vmax.f32 %v2029_v60, 0.0 }
 0x290   :  { %v3797_v45 = vmax.f32 %v3796_v22, %v2530_v10  ;;  %v2532_v47 = vadd.f32 %v2531_v61, %v6513_v1  ;;  %v5364_v19 = vpop.f32.mrf.mxu1 }
 0x291   :  { %v2032_v25 = vadd.f32 %v6468_v16, %v5364_v19  ;;  %v2535_v14 = vpop.f32.mrf.mxu0  ;;  %2774 = vmatmul.mubr.bf16.gmra.mxu0 %v6379_v13  ;;  %v2159_v19 = vmax.f32 %v2021_v4, 0.0 }
 0x292   :  { %v3818_v32 = vmax.f32 %v3817_v48, %v2532_v47  ;;  %v2536_v55 = vadd.f32 %v2535_v14, %v6508_v28  ;;  %v2023_v59 = vpop.f32.mrf.mxu1  ;;  %2783 = vmatprep.mubr.bf16.mxu0 %v7605_v30  ;;  %v6619_v14 = vrot.slane %v6501_v18, %v2271_v57 }
 0x293   :  { %v2162_v22 = vmax.f32 %v2032_v25, 0.0  ;;  %v2024_v53 = vadd.f32 %v6468_v16, %v2023_v59  ;;  %v2537_v9 = vpop.f32.mrf.mxu0 }
 0x294   :  { %v3798_v10 = vmax.f32 %v3797_v45, %v2536_v55  ;;  %v2538_v2 = vadd.f32 %v2537_v9, %v6513_v1  ;;  %v3158_v61 = vpop.f32.mrf.mxu1  ;;  %3397 = vmatmul.mubr.bf16.gmra.mxu1 %v6326_v63  ;;  %v6626_v55 = vrot.slane %v6501_v18, %v2275_v41 }
 0x295   :  { %v6616_v48 = vpack.c.bf16 %v2162_v22, %v2161_v33  ;;  %v2160_v47 = vmax.f32 %v2024_v53, 0.0  ;;  %v2539_v60 = vpop.f32.mrf.mxu0  ;;  %3406 = vmatprep.mubr.bf16.mxu1 %v7605_v30  ;;  %v3159_v57 = vadd.f32 %v3158_v61, %v6619_v14 }
 0x296   :  { %v3819_v16 = vmax.f32 %v3818_v32, %v2538_v2  ;;  %v2540_v25 = vadd.f32 %v2539_v60, %v6508_v28  ;;  %v3160_v17 = vpop.f32.mrf.mxu1 }
 0x297   :  { %7623 = vst [vmem:[#allocation3_spill] sm:$0xff] %v6616_v48  ;;  %v6623_v45 = vpack.c.bf16 %v2160_v47, %v2159_v19  ;;  %v2541_v63 = vpop.f32.mrf.mxu0  ;;  %v3161_v18 = vadd.f32 %v3160_v17, %v6626_v55 }
 0x298   :  { %v3799_v4 = vmax.f32 %v3798_v10, %v2540_v25  ;;  %v2542_v59 = vadd.f32 %v2541_v63, %v6513_v1  ;;  %v3162_v33 = vpop.f32.mrf.mxu1 }
 0x299   :  { %v3163_v22 = vadd.f32 %v3162_v33, %v6619_v14  ;;  %v2545_v53 = vpop.f32.mrf.mxu0  ;;  %2784 = vmatmul.mubr.bf16.gmra.mxu0 %v6376_v20 }
 0x29a   :  { %v3820_v32 = vmax.f32 %v3819_v16, %v2542_v59  ;;  %v2546_v9 = vadd.f32 %v2545_v53, %v6508_v28  ;;  %v3164_v2 = vpop.f32.mrf.mxu1  ;;  %2793 = vmatprep.mubr.bf16.mxu0 %v7605_v30 }
 0x29b   :  { %v3830_v41 = vmax.f32 %v3163_v22, %v3159_v57  ;;  %v3165_v10 = vadd.f32 %v3164_v2, %v6626_v55  ;;  %v2547_v19 = vpop.f32.mrf.mxu0 }
 0x29c   :  { %v3800_v47 = vmax.f32 %v3799_v4, %v2546_v9  ;;  %v2548_v61 = vadd.f32 %v2547_v19, %v6513_v1  ;;  %v3168_v60 = vpop.f32.mrf.mxu1  ;;  %3407 = vmatmul.mubr.bf16.gmra.mxu1 %v6351_v29 }
 0x29d   :  { %v3851_v25 = vmax.f32 %v3165_v10, %v3161_v18  ;;  %v3169_v16 = vadd.f32 %v3168_v60, %v6619_v14  ;;  %v2549_v63 = vpop.f32.mrf.mxu0  ;;  %3416 = vmatprep.mubr.bf16.mxu1 %v7605_v30 }
 0x29e   :  { %v3821_v59 = vmax.f32 %v3820_v32, %v2548_v61  ;;  %v2550_v33 = vadd.f32 %v2549_v63, %v6508_v28  ;;  %v3170_v17 = vpop.f32.mrf.mxu1 }
 0x29f   :  { %v3831_v57 = vmax.f32 %v3830_v41, %v3169_v16  ;;  %v3171_v22 = vadd.f32 %v3170_v17, %v6626_v55  ;;  %v2551_v53 = vpop.f32.mrf.mxu0 }
 0x2a0   :  { %v3801_v4 = vmax.f32 %v3800_v47, %v2550_v33  ;;  %v2552_v9 = vadd.f32 %v2551_v53, %v6513_v1  ;;  %v3172_v2 = vpop.f32.mrf.mxu1 }
 0x2a1   :  { %v3852_v19 = vmax.f32 %v3851_v25, %v3171_v22  ;;  %v3173_v29 = vadd.f32 %v3172_v2, %v6619_v14  ;;  %v2555_v18 = vpop.f32.mrf.mxu0  ;;  %2794 = vmatmul.mubr.bf16.gmra.mxu0 %v6391_v15 }
 0x2a2   :  { %v3802_v10 = vrot.slane %v3801_v4, 4  ;;  %v3822_v60 = vmax.f32 %v3821_v59, %v2552_v9  ;;  %v3174_v32 = vpop.f32.mrf.mxu1  ;;  %2803 = vmatprep.mubr.bf16.mxu0 %v7605_v30  ;;  %v2556_v9 = vadd.f32 %v2555_v18, %v6508_v28 }
 0x2a3   :  { %v3832_v61 = vmax.f32 %v3831_v57, %v3173_v29  ;;  %v3175_v41 = vadd.f32 %v3174_v32, %v6626_v55  ;;  %v2557_v16 = vpop.f32.mrf.mxu0 }
 0x2a4   :  { %v3803_v63 = vmax.f32 %v3801_v4, %v3802_v10  ;;  %v3823_v47 = vrot.slane %v3822_v60, 4  ;;  %v3178_v33 = vpop.f32.mrf.mxu1  ;;  %3417 = vmatmul.mubr.bf16.gmra.mxu1 %v6344_v31  ;;  %v2558_v29 = vadd.f32 %v2557_v16, %v6513_v1 }
 0x2a5   :  { %v3853_v25 = vmax.f32 %v3852_v19, %v3175_v41  ;;  %v3179_v17 = vadd.f32 %v3178_v33, %v6619_v14  ;;  %v2559_v22 = vpop.f32.mrf.mxu0  ;;  %3426 = vmatprep.mubr.bf16.mxu1 %v7605_v30 }
 0x2a6   :  { %v3804_v53 = vrot.slane %v3803_v63, 2  ;;  %v3824_v59 = vmax.f32 %v3822_v60, %v3823_v47  ;;  %v2560_v57 = vadd.f32 %v2559_v22, %v6508_v28  ;;  %v3180_v2 = vpop.f32.mrf.mxu1 }
 0x2a7   :  { %v3833_v4 = vmax.f32 %v3832_v61, %v3179_v17  ;;  %v3181_v10 = vadd.f32 %v3180_v2, %v6626_v55  ;;  %v2561_v32 = vpop.f32.mrf.mxu0  ;;  %v7624_v17 = vmov 0  }
 0x2a8   :  { %v3805_v31 = vmax.f32 %v3803_v63, %v3804_v53  ;;  %v3825_v19 = vrot.slane %v3824_v59, 2  ;;  %v3871_v41 = vmax.f32 %v2556_v9, %v2560_v57  ;;  %v2562_v33 = vadd.f32 %v2561_v32, %v6513_v1  ;;  %v3182_v26 = vpop.f32.mrf.mxu1 }
 0x2a9   :  { %v3854_v30 = vmax.f32 %v3853_v25, %v3181_v10  ;;  %v3183_v60 = vadd.f32 %v3182_v26, %v6619_v14  ;;  %v2565_v47 = vpop.f32.mrf.mxu0  ;;  %2804 = vmatmul.mubr.bf16.gmra.mxu0 %v6388_v24 }
 0x2aa   :  { %v3806_v18 = vrot.slane %v3805_v31, 1  ;;  %v3826_v22 = vmax.f32 %v3824_v59, %v3825_v19  ;;  %v3892_v48 = vmax.f32 %v2558_v29, %v2562_v33  ;;  %v2566_v61 = vadd.f32 %v2565_v47, %v6508_v28  ;;  %v3184_v16 = vpop.f32.mrf.mxu1  ;;  %2813 = vmatprep.mubr.bf16.mxu0 %v7624_v17 }
 0x2ab   :  { %v3834_v63 = vmax.f32 %v3833_v4, %v3183_v60  ;;  %v3185_v53 = vadd.f32 %v3184_v16, %v6626_v55  ;;  %v2567_v9 = vpop.f32.mrf.mxu0 }
 0x2ac   :  { %v6660_v57 = vmax.f32 %v3805_v31, %v3806_v18  ;;  %v3827_v25 = vrot.slane %v3826_v22, 1  ;;  %v3872_v2 = vmax.f32 %v3871_v41, %v2566_v61  ;;  %v2568_v26 = vadd.f32 %v2567_v9, %v6513_v1  ;;  %v3188_v10 = vpop.f32.mrf.mxu1  ;;  %3427 = vmatmul.mubr.bf16.gmra.mxu1 %v6367_v62 }
 0x2ad   :  { %v3855_v59 = vmax.f32 %v3854_v30, %v3185_v53  ;;  %v3189_v29 = vadd.f32 %v3188_v10, %v6619_v14  ;;  %v2569_v32 = vpop.f32.mrf.mxu0  ;;  %3436 = vmatprep.mubr.bf16.mxu1 %v7624_v17 }
 0x2ae   :  { %v6666_v19 = vmax.f32 %v3826_v22, %v3827_v25  ;;  %v3893_v4 = vmax.f32 %v3892_v48, %v2568_v26  ;;  %v2570_v33 = vadd.f32 %v2569_v32, %v6508_v28  ;;  %v3190_v31 = vpop.f32.mrf.mxu1  ;;  %v7609_v18 = vmax.f32 %v6660_v57, 0.0 }
 0x2af   :  { %v3835_v60 = vmax.f32 %v3834_v63, %v3189_v29  ;;  %v3191_v41 = vadd.f32 %v3190_v31, %v6626_v55  ;;  %v2571_v47 = vpop.f32.mrf.mxu0 }
 0x2b0   :  { %v7608_v62 = vmax.f32 %v6666_v19, 0.0  ;;  %v3873_v30 = vmax.f32 %v3872_v2, %v2570_v33  ;;  %v2572_v61 = vadd.f32 %v2571_v47, %v6513_v1  ;;  %v3192_v16 = vpop.f32.mrf.mxu1 }
 0x2b1   :  { %v3856_v53 = vmax.f32 %v3855_v59, %v3191_v41  ;;  %v3193_v22 = vadd.f32 %v3192_v16, %v6619_v14  ;;  %v2575_v9 = vpop.f32.mrf.mxu0  ;;  %2814 = vmatmul.mubr.bf16.gmra.mxu0 %v6403_v49 }
 0x2b2   :  { %v6679_v48 = vpack.c.bf16 %v7608_v62, %v7609_v18  ;;  %v3894_v63 = vmax.f32 %v3893_v4, %v2572_v61  ;;  %v2576_v25 = vadd.f32 %v2575_v9, %v6508_v28  ;;  %v3194_v26 = vpop.f32.mrf.mxu1  ;;  %2823 = vmatprep.mubr.bf16.mxu0 %v7624_v17 }
 0x2b3   :  { %v3836_v2 = vmax.f32 %v3835_v60, %v3193_v22  ;;  %v3195_v10 = vadd.f32 %v3194_v26, %v6626_v55  ;;  %v2577_v59 = vpop.f32.mrf.mxu0 }
 0x2b4   :  { %v3874_v29 = vmax.f32 %v3873_v30, %v2576_v25  ;;  %v2578_v32 = vadd.f32 %v2577_v59, %v6513_v1  ;;  %v3198_v33 = vpop.f32.mrf.mxu1  ;;  %3437 = vmatmul.mubr.bf16.gmra.mxu1 %v6362_v50 }
 0x2b5   :  { %v3857_v31 = vmax.f32 %v3856_v53, %v3195_v10  ;;  %v3199_v41 = vadd.f32 %v3198_v33, %v6619_v14  ;;  %v2579_v47 = vpop.f32.mrf.mxu0  ;;  %3446 = vmatprep.mubr.bf16.mxu1 %v7624_v17 }
 0x2b6   :  { %v3895_v4 = vmax.f32 %v3894_v63, %v2578_v32  ;;  %v2580_v61 = vadd.f32 %v2579_v47, %v6508_v28  ;;  %v3200_v16 = vpop.f32.mrf.mxu1 }
 0x2b7   :  { %v3837_v60 = vmax.f32 %v3836_v2, %v3199_v41  ;;  %v3201_v22 = vadd.f32 %v3200_v16, %v6626_v55  ;;  %v2581_v9 = vpop.f32.mrf.mxu0 }
 0x2b8   :  { %v3875_v30 = vmax.f32 %v3874_v29, %v2580_v61  ;;  %v2582_v25 = vadd.f32 %v2581_v9, %v6513_v1  ;;  %v3202_v26 = vpop.f32.mrf.mxu1 }
 0x2b9   :  { %v3858_v59 = vmax.f32 %v3857_v31, %v3201_v22  ;;  %v3203_v50 = vadd.f32 %v3202_v26, %v6619_v14  ;;  %v2585_v53 = vpop.f32.mrf.mxu0  ;;  %2824 = vmatmul.mubr.bf16.gmra.mxu0 %v6400_v35 }
 0x2ba   :  { %v3896_v10 = vmax.f32 %v3895_v4, %v2582_v25  ;;  %v2586_v63 = vadd.f32 %v2585_v53, %v6508_v28  ;;  %v3204_v32 = vpop.f32.mrf.mxu1  ;;  %2833 = vmatprep.mubr.bf16.mxu0 %v7624_v17 }
 0x2bb   :  { %v3838_v2 = vmax.f32 %v3837_v60, %v3203_v50  ;;  %v3205_v33 = vadd.f32 %v3204_v32, %v6626_v55  ;;  %v2587_v41 = vpop.f32.mrf.mxu0 }
 0x2bc   :  { %v3876_v29 = vmax.f32 %v3875_v30, %v2586_v63  ;;  %v2588_v47 = vadd.f32 %v2587_v41, %v6513_v1  ;;  %v3208_v61 = vpop.f32.mrf.mxu1  ;;  %3447 = vmatmul.mubr.bf16.gmra.mxu1 %v6379_v13 }
 0x2bd   :  { %v3859_v31 = vmax.f32 %v3858_v59, %v3205_v33  ;;  %v3209_v16 = vadd.f32 %v3208_v61, %v6619_v14  ;;  %v2589_v22 = vpop.f32.mrf.mxu0  ;;  %3456 = vmatprep.mubr.bf16.mxu1 %v7624_v17 }
 0x2be   :  { %v3897_v4 = vmax.f32 %v3896_v10, %v2588_v47  ;;  %v2590_v9 = vadd.f32 %v2589_v22, %v6508_v28  ;;  %v3210_v25 = vpop.f32.mrf.mxu1 }
 0x2bf   :  { %v3839_v60 = vmax.f32 %v3838_v2, %v3209_v16  ;;  %v3211_v26 = vadd.f32 %v3210_v25, %v6626_v55  ;;  %v2591_v50 = vpop.f32.mrf.mxu0 }
 0x2c0   :  { %v3877_v30 = vmax.f32 %v3876_v29, %v2590_v9  ;;  %v2592_v53 = vadd.f32 %v2591_v50, %v6513_v1  ;;  %v3212_v63 = vpop.f32.mrf.mxu1 }
 0x2c1   :  { %v3860_v32 = vmax.f32 %v3859_v31, %v3211_v26  ;;  %v3213_v13 = vadd.f32 %v3212_v63, %v6619_v14  ;;  %v2595_v59 = vpop.f32.mrf.mxu0  ;;  %2834 = vmatmul.mubr.bf16.gmra.mxu0 %v6415_v37 }
 0x2c2   :  { %v3898_v33 = vmax.f32 %v3897_v4, %v2592_v53  ;;  %v2596_v10 = vadd.f32 %v2595_v59, %v6508_v28  ;;  %v3214_v41 = vpop.f32.mrf.mxu1  ;;  %2843 = vmatprep.mubr.bf16.mxu0 %v7624_v17 }
 0x2c3   :  { %v3840_v2 = vmax.f32 %v3839_v60, %v3213_v13  ;;  %v3215_v47 = vadd.f32 %v3214_v41, %v6626_v55  ;;  %v2597_v61 = vpop.f32.mrf.mxu0 }
 0x2c4   :  { %v3878_v29 = vmax.f32 %v3877_v30, %v2596_v10  ;;  %v2598_v16 = vadd.f32 %v2597_v61, %v6513_v1  ;;  %v3218_v22 = vpop.f32.mrf.mxu1  ;;  %3457 = vmatmul.mubr.bf16.gmra.mxu1 %v6376_v20 }
 0x2c5   :  { %v3861_v31 = vmax.f32 %v3860_v32, %v3215_v47  ;;  %v3219_v9 = vadd.f32 %v3218_v22, %v6619_v14  ;;  %v2599_v25 = vpop.f32.mrf.mxu0  ;;  %3466 = vmatprep.mubr.bf16.mxu1 %v7624_v17 }
 0x2c6   :  { %v3899_v4 = vmax.f32 %v3898_v33, %v2598_v16  ;;  %v2600_v26 = vadd.f32 %v2599_v25, %v6508_v28  ;;  %v3220_v50 = vpop.f32.mrf.mxu1 }
 0x2c7   :  { %v6713_v60 = vmax.f32 %v3840_v2, %v3219_v9  ;;  %v3221_v53 = vadd.f32 %v3220_v50, %v6626_v55  ;;  %v2601_v30 = vpop.f32.mrf.mxu0 }
 0x2c8   :  { %v3879_v63 = vmax.f32 %v3878_v29, %v2600_v26  ;;  %v2602_v13 = vadd.f32 %v2601_v30, %v6513_v1  ;;  %v3222_v59 = vpop.f32.mrf.mxu1 }
 0x2c9   :  { %v6717_v20 = vmax.f32 %v3861_v31, %v3221_v53  ;;  %v6720_v32 = vadd.f32 %v3222_v59, %v6619_v14  ;;  %v2605_v10 = vpop.f32.mrf.mxu0  ;;  %2844 = vmatmul.mubr.bf16.gmra.mxu0 %v6412_v43 }
 0x2ca   :  { %v3900_v33 = vmax.f32 %v3899_v4, %v2602_v13  ;;  %v2606_v41 = vadd.f32 %v2605_v10, %v6508_v28  ;;  %v3224_v2 = vpop.f32.mrf.mxu1  ;;  %2853 = vmatprep.mubr.bf16.mxu0 %v7624_v17 }
 0x2cb   :  { %v6728_v61 = vadd.f32 %v3224_v2, %v6626_v55  ;;  %v2607_v29 = vpop.f32.mrf.mxu0 }
 0x2cc   :  { %v3880_v16 = vmax.f32 %v3879_v63, %v2606_v41  ;;  %v2608_v22 = vadd.f32 %v2607_v29, %v6513_v1  ;;  %v3228_v31 = vpop.f32.mrf.mxu1  ;;  %3467 = vmatmul.mubr.bf16.gmra.mxu1 %v6391_v15 }
 0x2cd   :  { %v2609_v25 = vpop.f32.mrf.mxu0  ;;  %3476 = vmatprep.mubr.bf16.mxu1 %v7624_v17  ;;  %v3229_v59 = vadd.f32 %v3228_v31, %v6619_v14 }
 0x2ce   :  { %v3901_v4 = vmax.f32 %v3900_v33, %v2608_v22  ;;  %v2610_v26 = vadd.f32 %v2609_v25, %v6508_v28  ;;  %v3230_v50 = vpop.f32.mrf.mxu1 }
 0x2cf   :  { %v2611_v53 = vpop.f32.mrf.mxu0  ;;  %v3231_v33 = vadd.f32 %v3230_v50, %v6626_v55 }
 0x2d0   :  { %v3881_v30 = vmax.f32 %v3880_v16, %v2610_v26  ;;  %v2612_v13 = vadd.f32 %v2611_v53, %v6513_v1  ;;  %v3232_v63 = vpop.f32.mrf.mxu1 }
 0x2d1   :  { %v3233_v10 = vadd.f32 %v3232_v63, %v6619_v14  ;;  %v2615_v15 = vpop.f32.mrf.mxu0  ;;  %2854 = vmatmul.mubr.bf16.gmra.mxu0 %v6427_v21 }
 0x2d2   :  { %v3902_v41 = vmax.f32 %v3901_v4, %v2612_v13  ;;  %v2616_v2 = vadd.f32 %v2615_v15, %v6508_v28  ;;  %v3234_v29 = vpop.f32.mrf.mxu1  ;;  %2863 = vmatprep.mubr.bf16.mxu0 %v7624_v17 }
 0x2d3   :  { %v3913_v22 = vmax.f32 %v3229_v59, %v3233_v10  ;;  %v3235_v16 = vadd.f32 %v3234_v29, %v6626_v55  ;;  %v2617_v25 = vpop.f32.mrf.mxu0 }
 0x2d4   :  { %v3882_v26 = vmax.f32 %v3881_v30, %v2616_v2  ;;  %v2618_v31 = vadd.f32 %v2617_v25, %v6513_v1  ;;  %v3238_v53 = vpop.f32.mrf.mxu1  ;;  %3477 = vmatmul.mubr.bf16.gmra.mxu1 %v6388_v24 }
 0x2d5   :  { %v3934_v63 = vmax.f32 %v3231_v33, %v3235_v16  ;;  %v3239_v4 = vadd.f32 %v3238_v53, %v6619_v14  ;;  %v2619_v13 = vpop.f32.mrf.mxu0  ;;  %3486 = vmatprep.mubr.bf16.mxu1 %v7624_v17 }
 0x2d6   :  { %v3903_v15 = vmax.f32 %v3902_v41, %v2618_v31  ;;  %v2620_v9 = vadd.f32 %v2619_v13, %v6508_v28  ;;  %v3240_v50 = vpop.f32.mrf.mxu1 }
 0x2d7   :  { %v3914_v59 = vmax.f32 %v3913_v22, %v3239_v4  ;;  %v3241_v10 = vadd.f32 %v3240_v50, %v6626_v55  ;;  %v2621_v29 = vpop.f32.mrf.mxu0 }
 0x2d8   :  { %v3883_v30 = vmax.f32 %v3882_v26, %v2620_v9  ;;  %v2622_v2 = vadd.f32 %v2621_v29, %v6513_v1  ;;  %v3242_v25 = vpop.f32.mrf.mxu1 }
 0x2d9   :  { %v3935_v47 = vmax.f32 %v3934_v63, %v3241_v10  ;;  %v3243_v24 = vadd.f32 %v3242_v25, %v6619_v14  ;;  %v2625_v33 = vpop.f32.mrf.mxu0  ;;  %2864 = vmatmul.mubr.bf16.gmra.mxu0 %v6424_v27 }
 0x2da   :  { %v3904_v16 = vmax.f32 %v3903_v15, %v2622_v2  ;;  %v2626_v41 = vadd.f32 %v2625_v33, %v6508_v28  ;;  %v3244_v31 = vpop.f32.mrf.mxu1  ;;  %2873 = vmatprep.mubr.bf16.mxu0 %v7624_v17 }
 0x2db   :  { %v3915_v22 = vmax.f32 %v3914_v59, %v3243_v24  ;;  %v3245_v53 = vadd.f32 %v3244_v31, %v6626_v55  ;;  %v2627_v4 = vpop.f32.mrf.mxu0 }
 0x2dc   :  { %v3884_v9 = vmax.f32 %v3883_v30, %v2626_v41  ;;  %v2628_v26 = vadd.f32 %v2627_v4, %v6513_v1  ;;  %v3248_v13 = vpop.f32.mrf.mxu1  ;;  %3487 = vmatmul.mubr.bf16.gmra.mxu1 %v6403_v49 }
 0x2dd   :  { %v3936_v63 = vmax.f32 %v3935_v47, %v3245_v53  ;;  %v3249_v50 = vadd.f32 %v3248_v13, %v6619_v14  ;;  %v2629_v10 = vpop.f32.mrf.mxu0  ;;  %3496 = vmatprep.mubr.bf16.mxu1 %v7624_v17 }
 0x2de   :  { %v3905_v15 = vmax.f32 %v3904_v16, %v2628_v26  ;;  %v2630_v29 = vadd.f32 %v2629_v10, %v6508_v28  ;;  %v3250_v2 = vpop.f32.mrf.mxu1 }
 0x2df   :  { %v3916_v59 = vmax.f32 %v3915_v22, %v3249_v50  ;;  %v3251_v25 = vadd.f32 %v3250_v2, %v6626_v55  ;;  %v2631_v24 = vpop.f32.mrf.mxu0 }
 0x2e0   :  { %v3885_v30 = vmax.f32 %v3884_v9, %v2630_v29  ;;  %v2632_v33 = vadd.f32 %v2631_v24, %v6513_v1  ;;  %v3252_v41 = vpop.f32.mrf.mxu1 }
 0x2e1   :  { %v3937_v31 = vmax.f32 %v3936_v63, %v3251_v25  ;;  %v3253_v49 = vadd.f32 %v3252_v41, %v6619_v14  ;;  %v2635_v47 = vpop.f32.mrf.mxu0  ;;  %2874 = vmatmul.mubr.bf16.gmra.mxu0 %v6439_v52 }
 0x2e2   :  { %v3886_v53 = vrot.slane %v3885_v30, 4  ;;  %v3906_v4 = vmax.f32 %v3905_v15, %v2632_v33  ;;  %v3254_v16 = vpop.f32.mrf.mxu1  ;;  %2883 = vmatprep.mubr.bf16.mxu0 %v7624_v17  ;;  %v2636_v24 = vadd.f32 %v2635_v47, %v6508_v28 }
 0x2e3   :  { %v3917_v26 = vmax.f32 %v3916_v59, %v3253_v49  ;;  %v3255_v22 = vadd.f32 %v3254_v16, %v6626_v55  ;;  %v2637_v13 = vpop.f32.mrf.mxu0 }
 0x2e4   :  { %v3887_v50 = vmax.f32 %v3885_v30, %v3886_v53  ;;  %v3907_v9 = vrot.slane %v3906_v4, 4  ;;  %v3258_v10 = vpop.f32.mrf.mxu1  ;;  %3497 = vmatmul.mubr.bf16.gmra.mxu1 %v6400_v35  ;;  %v2638_v41 = vadd.f32 %v2637_v13, %v6513_v1 }
 0x2e5   :  { %v3938_v63 = vmax.f32 %v3937_v31, %v3255_v22  ;;  %v3259_v29 = vadd.f32 %v3258_v10, %v6619_v14  ;;  %v2639_v2 = vpop.f32.mrf.mxu0  ;;  %3506 = vmatprep.mubr.bf16.mxu1 %v7624_v17 }
 0x2e6   :  { %v3888_v25 = vrot.slane %v3887_v50, 2  ;;  %v3908_v15 = vmax.f32 %v3906_v4, %v3907_v9  ;;  %v2640_v59 = vadd.f32 %v2639_v2, %v6508_v28  ;;  %v3260_v33 = vpop.f32.mrf.mxu1 }
 0x2e7   :  { %v3918_v30 = vmax.f32 %v3917_v26, %v3259_v29  ;;  %v3261_v49 = vadd.f32 %v3260_v33, %v6626_v55  ;;  %v2641_v53 = vpop.f32.mrf.mxu0 }
 0x2e8   :  { %v3889_v35 = vmax.f32 %v3887_v50, %v3888_v25  ;;  %v3909_v31 = vrot.slane %v3908_v15, 2  ;;  %v3955_v16 = vmax.f32 %v2636_v24, %v2640_v59  ;;  %v2642_v22 = vadd.f32 %v2641_v53, %v6513_v1  ;;  %v3262_v10 = vpop.f32.mrf.mxu1 }
 0x2e9   :  { %v3939_v62 = vmax.f32 %v3938_v63, %v3261_v49  ;;  %v3263_v4 = vadd.f32 %v3262_v10, %v6619_v14  ;;  %v2645_v9 = vpop.f32.mrf.mxu0  ;;  %2884 = vmatmul.mubr.bf16.gmra.mxu0 %v6436_v34 }
 0x2ea   :  { %v3890_v47 = vrot.slane %v3889_v35, 1  ;;  %v3910_v2 = vmax.f32 %v3908_v15, %v3909_v31  ;;  %v3976_v18 = vmax.f32 %v2638_v41, %v2642_v22  ;;  %v2646_v26 = vadd.f32 %v2645_v9, %v6508_v28  ;;  %v3264_v13 = vpop.f32.mrf.mxu1  ;;  %2893 = vmatprep.mubr.bf16.mxu0 %v7624_v17 }
 0x2eb   :  { %v3919_v50 = vmax.f32 %v3918_v30, %v3263_v4  ;;  %v3265_v29 = vadd.f32 %v3264_v13, %v6626_v55  ;;  %v2647_v25 = vpop.f32.mrf.mxu0 }
 0x2ec   :  { %v3891_v24 = vmax.f32 %v3889_v35, %v3890_v47  ;;  %v3911_v59 = vrot.slane %v3910_v2, 1  ;;  %v3956_v63 = vmax.f32 %v3955_v16, %v2646_v26  ;;  %v2648_v33 = vadd.f32 %v2647_v25, %v6513_v1  ;;  %v3268_v49 = vpop.f32.mrf.mxu1  ;;  %3507 = vmatmul.mubr.bf16.gmra.mxu1 %v6415_v37 }
 0x2ed   :  { %v3940_v15 = vmax.f32 %v3939_v62, %v3265_v29  ;;  %v3269_v41 = vadd.f32 %v3268_v49, %v6619_v14  ;;  %v2649_v53 = vpop.f32.mrf.mxu0  ;;  %3516 = vmatprep.mubr.bf16.mxu1 %v7624_v17  ;;  %v7625_v47 = vmax.f32 %v6660_v57, 0.0 }
 0x2ee   :  { %v4463_v31 = vmax.f32 %v3891_v24, 0.0  ;;  %v3912_v30 = vmax.f32 %v3910_v2, %v3911_v59  ;;  %v3977_v22 = vmax.f32 %v3976_v18, %v2648_v33  ;;  %v2650_v10 = vadd.f32 %v2649_v53, %v6508_v28  ;;  %v3270_v35 = vpop.f32.mrf.mxu1 }
 0x2ef   :  { %v3920_v4 = vmax.f32 %v3919_v50, %v3269_v41  ;;  %v3271_v16 = vadd.f32 %v3270_v35, %v6626_v55  ;;  %v2651_v9 = vpop.f32.mrf.mxu0  ;;  %v7626_v50 = vmax.f32 %v6666_v19, 0.0 }
 0x2f0   :  { %v6789_v37 = vsel %vm4523_vm2, %v4463_v31, %v7625_v47  ;;  %v4464_v62 = vmax.f32 %v3912_v30, 0.0  ;;  %v3957_v26 = vmax.f32 %v3956_v63, %v2650_v10  ;;  %v2652_v13 = vadd.f32 %v2651_v9, %v6513_v1  ;;  %v3272_v29 = vpop.f32.mrf.mxu1 }
 0x2f1   :  { %v3941_v25 = vmax.f32 %v3940_v15, %v3271_v16  ;;  %v3273_v18 = vadd.f32 %v3272_v29, %v6619_v14  ;;  %v2655_v2 = vpop.f32.mrf.mxu0  ;;  %2894 = vmatmul.mubr.bf16.gmra.mxu0 %v6451_v56  ;;  %v4678_v63 = vunpack.c.l.b16 %v6679_v48  ;;  %v4679_v15 = vunpack.c.h.b16 %v6679_v48 }
 0x2f2   :  { %v6797_v24 = vsel %vm4523_vm2, %v4464_v62, %v7626_v50  ;;  %v4940_v57 = vpack.c.bf16 %v4464_v62, %v4463_v31  ;;  %v3978_v59 = vmax.f32 %v3977_v22, %v2652_v13  ;;  %v2656_v33 = vadd.f32 %v2655_v2, %v6508_v28  ;;  %v3274_v49 = vpop.f32.mrf.mxu1  ;;  %2903 = vmatprep.mubr.bf16.mxu0 %v7624_v17 }
 0x2f3   :  { %v3921_v41 = vmax.f32 %v3920_v4, %v3273_v18  ;;  %v3275_v53 = vadd.f32 %v3274_v49, %v6626_v55  ;;  %v2657_v30 = vpop.f32.mrf.mxu0 }
 0x2f4   :  { %v4682_v10 = vunpack.c.l.b16 %v4940_v57  ;;  %v4683_v19 = vunpack.c.h.b16 %v4940_v57  ;;  %v3958_v35 = vmax.f32 %v3957_v26, %v2656_v33  ;;  %v2658_v16 = vadd.f32 %v2657_v30, %v6513_v1  ;;  %v3278_v31 = vpop.f32.mrf.mxu1  ;;  %3517 = vmatmul.mubr.bf16.gmra.mxu1 %v6412_v43 }
 0x2f5   :  { %v3942_v22 = vmax.f32 %v3941_v25, %v3275_v53  ;;  %v3279_v9 = vadd.f32 %v3278_v31, %v6619_v14  ;;  %v2659_v47 = vpop.f32.mrf.mxu0  ;;  %3526 = vmatprep.mubr.bf16.mxu1 %v7624_v17 }
 0x2f6   :  { %v6809_v48 = vsel %vm4523_vm2, %v4682_v10, %v4678_v63  ;;  %v6812_v4 = vsel %vm4523_vm2, %v4683_v19, %v4679_v15  ;;  %v3979_v62 = vmax.f32 %v3978_v59, %v2658_v16  ;;  %v2660_v26 = vadd.f32 %v2659_v47, %v6508_v28  ;;  %v3280_v13 = vpop.f32.mrf.mxu1 }
 0x2f7   :  { %v3922_v29 = vmax.f32 %v3921_v41, %v3279_v9  ;;  %v3281_v18 = vadd.f32 %v3280_v13, %v6626_v55  ;;  %v2661_v43 = vpop.f32.mrf.mxu0 }
 0x2f8   :  { %v3959_v25 = vmax.f32 %v3958_v35, %v2660_v26  ;;  %v2662_v2 = vadd.f32 %v2661_v43, %v6513_v1  ;;  %v3282_v50 = vpop.f32.mrf.mxu1 }
 0x2f9   :  { %v3943_v57 = vmax.f32 %v3942_v22, %v3281_v18  ;;  %v3283_v33 = vadd.f32 %v3282_v50, %v6619_v14  ;;  %v2665_v49 = vpop.f32.mrf.mxu0  ;;  %2904 = vmatmul.mubr.bf16.gmra.mxu0 %v6448_v42 }
 0x2fa   :  { %v3980_v63 = vmax.f32 %v3979_v62, %v2662_v2  ;;  %v2666_v59 = vadd.f32 %v2665_v49, %v6508_v28  ;;  %v3284_v15 = vpop.f32.mrf.mxu1  ;;  %2913 = vmatprep.mubr.bf16.mxu0 %v7624_v17 }
 0x2fb   :  { %v3923_v41 = vmax.f32 %v3922_v29, %v3283_v33  ;;  %v3285_v53 = vadd.f32 %v3284_v15, %v6626_v55  ;;  %v2667_v30 = vpop.f32.mrf.mxu0 }
 0x2fc   :  { %v3960_v10 = vmax.f32 %v3959_v25, %v2666_v59  ;;  %v2668_v19 = vadd.f32 %v2667_v30, %v6513_v1  ;;  %v3288_v35 = vpop.f32.mrf.mxu1  ;;  %3527 = vmatmul.mubr.bf16.gmra.mxu1 %v6427_v21 }
 0x2fd   :  { %v3944_v16 = vmax.f32 %v3943_v57, %v3285_v53  ;;  %v3289_v31 = vadd.f32 %v3288_v35, %v6619_v14  ;;  %v2669_v22 = vpop.f32.mrf.mxu0  ;;  %3536 = vmatprep.mubr.bf16.mxu1 %v7624_v17 }
 0x2fe   :  { %v3981_v9 = vmax.f32 %v3980_v63, %v2668_v19  ;;  %v2670_v47 = vadd.f32 %v2669_v22, %v6508_v28  ;;  %v3290_v62 = vpop.f32.mrf.mxu1 }
 0x2ff   :  { %v3924_v26 = vmax.f32 %v3923_v41, %v3289_v31  ;;  %v3291_v13 = vadd.f32 %v3290_v62, %v6626_v55  ;;  %v2671_v29 = vpop.f32.mrf.mxu0 }
 0x300   :  { %v3961_v18 = vmax.f32 %v3960_v10, %v2670_v47  ;;  %v2672_v43 = vadd.f32 %v2671_v29, %v6513_v1  ;;  %v3292_v25 = vpop.f32.mrf.mxu1 }
 0x301   :  { %v3945_v2 = vmax.f32 %v3944_v16, %v3291_v13  ;;  %v3293_v21 = vadd.f32 %v3292_v25, %v6619_v14  ;;  %v2675_v50 = vpop.f32.mrf.mxu0  ;;  %2914 = vmatmul.mubr.bf16.gmra.mxu0 %v6463_v44 }
 0x302   :  { %v3982_v57 = vmax.f32 %v3981_v9, %v2672_v43  ;;  %v2676_v33 = vadd.f32 %v2675_v50, %v6508_v28  ;;  %v3294_v49 = vpop.f32.mrf.mxu1  ;;  %2923 = vmatprep.mubr.bf16.mxu0 %v7624_v17 }
 0x303   :  { %v3925_v63 = vmax.f32 %v3924_v26, %v3293_v21  ;;  %v3295_v59 = vadd.f32 %v3294_v49, %v6626_v55  ;;  %v2677_v15 = vpop.f32.mrf.mxu0 }
 0x304   :  { %v3962_v41 = vmax.f32 %v3961_v18, %v2676_v33  ;;  %v2678_v53 = vadd.f32 %v2677_v15, %v6513_v1  ;;  %v3298_v30 = vpop.f32.mrf.mxu1  ;;  %3537 = vmatmul.mubr.bf16.gmra.mxu1 %v6424_v27 }
 0x305   :  { %v3946_v10 = vmax.f32 %v3945_v2, %v3295_v59  ;;  %v3299_v19 = vadd.f32 %v3298_v30, %v6619_v14  ;;  %v2679_v35 = vpop.f32.mrf.mxu0  ;;  %3546 = vmatprep.mubr.bf16.mxu1 %v7624_v17 }
 0x306   :  { %v3983_v16 = vmax.f32 %v3982_v57, %v2678_v53  ;;  %v2680_v31 = vadd.f32 %v2679_v35, %v6508_v28  ;;  %v3300_v22 = vpop.f32.mrf.mxu1 }
 0x307   :  { %v3926_v9 = vmax.f32 %v3925_v63, %v3299_v19  ;;  %v3301_v47 = vadd.f32 %v3300_v22, %v6626_v55  ;;  %v2681_v62 = vpop.f32.mrf.mxu0 }
 0x308   :  { %v3963_v26 = vmax.f32 %v3962_v41, %v2680_v31  ;;  %v2682_v13 = vadd.f32 %v2681_v62, %v6513_v1  ;;  %v3302_v29 = vpop.f32.mrf.mxu1 }
 0x309   :  { %v3947_v18 = vmax.f32 %v3946_v10, %v3301_v47  ;;  %v3303_v27 = vadd.f32 %v3302_v29, %v6619_v14  ;;  %v2685_v43 = vpop.f32.mrf.mxu0  ;;  %2924 = vmatmul.mubr.bf16.gmra.mxu0 %v6460_v12 }
 0x30a   :  { %v3984_v25 = vmax.f32 %v3983_v16, %v2682_v13  ;;  %v2686_v2 = vadd.f32 %v2685_v43, %v6508_v28  ;;  %v3304_v21 = vpop.f32.mrf.mxu1  ;;  %2933 = vmatprep.mubr.bf16.mxu0 %v7624_v17 }
 0x30b   :  { %v3927_v50 = vmax.f32 %v3926_v9, %v3303_v27  ;;  %v3305_v57 = vadd.f32 %v3304_v21, %v6626_v55  ;;  %v2687_v33 = vpop.f32.mrf.mxu0 }
 0x30c   :  { %v3964_v49 = vmax.f32 %v3963_v26, %v2686_v2  ;;  %v2688_v63 = vadd.f32 %v2687_v33, %v6513_v1  ;;  %v3308_v59 = vpop.f32.mrf.mxu1  ;;  %3547 = vmatmul.mubr.bf16.gmra.mxu1 %v6439_v52 }
 0x30d   :  { %v3928_v15 = vrot.slane %v3927_v50, 4  ;;  %v3948_v41 = vmax.f32 %v3947_v18, %v3305_v57  ;;  %v2689_v53 = vpop.f32.mrf.mxu0  ;;  %3556 = vmatprep.mubr.bf16.mxu1 %v7624_v17  ;;  %v3309_v52 = vadd.f32 %v3308_v59, %v6619_v14 }
 0x30e   :  { %v3985_v30 = vmax.f32 %v3984_v25, %v2688_v63  ;;  %v2690_v10 = vadd.f32 %v2689_v53, %v6508_v28  ;;  %v3310_v19 = vpop.f32.mrf.mxu1 }
 0x30f   :  { %v3929_v35 = vmax.f32 %v3927_v50, %v3928_v15  ;;  %v3949_v16 = vrot.slane %v3948_v41, 4  ;;  %v2691_v31 = vpop.f32.mrf.mxu0  ;;  %v3311_v18 = vadd.f32 %v3310_v19, %v6626_v55 }
 0x310   :  { %v3965_v22 = vmax.f32 %v3964_v49, %v2690_v10  ;;  %v2692_v9 = vadd.f32 %v2691_v31, %v6513_v1  ;;  %v3312_v47 = vpop.f32.mrf.mxu1 }
 0x311   :  { %v3930_v62 = vrot.slane %v3929_v35, 2  ;;  %v3950_v26 = vmax.f32 %v3948_v41, %v3949_v16  ;;  %v3313_v13 = vadd.f32 %v3312_v47, %v6619_v14  ;;  %v2695_v29 = vpop.f32.mrf.mxu0  ;;  %2934 = vmatmul.mubr.bf16.gmra.mxu0 %v6480_v3 }
 0x312   :  { %v3986_v27 = vmax.f32 %v3985_v30, %v2692_v9  ;;  %v2696_v43 = vadd.f32 %v2695_v29, %v6508_v28  ;;  %v3314_v25 = vpop.f32.mrf.mxu1  ;;  %2943 = vmatprep.mubr.bf16.mxu0 %v7624_v17 }
 0x313   :  { %v3931_v2 = vmax.f32 %v3929_v35, %v3930_v62  ;;  %v3951_v21 = vrot.slane %v3950_v26, 2  ;;  %v3997_v50 = vmax.f32 %v3309_v52, %v3313_v13  ;;  %v3315_v57 = vadd.f32 %v3314_v25, %v6626_v55  ;;  %v2697_v33 = vpop.f32.mrf.mxu0 }
 0x314   :  { %v3966_v49 = vmax.f32 %v3965_v22, %v2696_v43  ;;  %v2698_v63 = vadd.f32 %v2697_v33, %v6513_v1  ;;  %v3318_v59 = vpop.f32.mrf.mxu1  ;;  %3557 = vmatmul.mubr.bf16.gmra.mxu1 %v6436_v34 }
 0x315   :  { %v3932_v15 = vrot.slane %v3931_v2, 1  ;;  %v3952_v41 = vmax.f32 %v3950_v26, %v3951_v21  ;;  %v4018_v53 = vmax.f32 %v3311_v18, %v3315_v57  ;;  %v3319_v30 = vadd.f32 %v3318_v59, %v6619_v14  ;;  %v2699_v10 = vpop.f32.mrf.mxu0  ;;  %3566 = vmatprep.mubr.bf16.mxu1 %v7624_v17 }
 0x316   :  { %v3987_v19 = vmax.f32 %v3986_v27, %v2698_v63  ;;  %v2700_v35 = vadd.f32 %v2699_v10, %v6508_v28  ;;  %v3320_v16 = vpop.f32.mrf.mxu1 }
 0x317   :  { %v6863_v31 = vmax.f32 %v3931_v2, %v3932_v15  ;;  %v3953_v22 = vrot.slane %v3952_v41, 1  ;;  %v3998_v9 = vmax.f32 %v3997_v50, %v3319_v30  ;;  %v3321_v47 = vadd.f32 %v3320_v16, %v6626_v55  ;;  %v2701_v62 = vpop.f32.mrf.mxu0 }
 0x318   :  { %v3967_v34 = vmax.f32 %v3966_v49, %v2700_v35  ;;  %v2702_v26 = vadd.f32 %v2701_v62, %v6513_v1  ;;  %v3322_v52 = vpop.f32.mrf.mxu1 }
 0x319   :  { %v6867_v13 = vmax.f32 %v3952_v41, %v3953_v22  ;;  %v4019_v29 = vmax.f32 %v4018_v53, %v3321_v47  ;;  %v3323_v18 = vadd.f32 %v3322_v52, %v6619_v14  ;;  %v2705_v27 = vpop.f32.mrf.mxu0  ;;  %2944 = vmatmul.mubr.bf16.gmra.mxu0 %v6477_v51  ;;  %v7621_v21 = vmax.f32 %v6863_v31, 0.0 }
 0x31a   :  { %v3988_v43 = vmax.f32 %v3987_v19, %v2702_v26  ;;  %v2706_v25 = vadd.f32 %v2705_v27, %v6508_v28  ;;  %v3324_v2 = vpop.f32.mrf.mxu1  ;;  %2953 = vmatprep.mubr.bf16.mxu0 %v7624_v17 }
 0x31b   :  { %v7616_v50 = vmax.f32 %v6867_v13, 0.0  ;;  %v3999_v57 = vmax.f32 %v3998_v9, %v3323_v18  ;;  %v3325_v33 = vadd.f32 %v3324_v2, %v6626_v55  ;;  %v2707_v49 = vpop.f32.mrf.mxu0 }
 0x31c   :  { %v3968_v63 = vmax.f32 %v3967_v34, %v2706_v25  ;;  %v2708_v59 = vadd.f32 %v2707_v49, %v6513_v1  ;;  %v3328_v15 = vpop.f32.mrf.mxu1  ;;  %3567 = vmatmul.mubr.bf16.gmra.mxu1 %v6451_v56 }
 0x31d   :  { %v6882_v41 = vpack.c.bf16 %v7616_v50, %v7621_v21  ;;  %v4020_v53 = vmax.f32 %v4019_v29, %v3325_v33  ;;  %v3329_v30 = vadd.f32 %v3328_v15, %v6619_v14  ;;  %v2709_v10 = vpop.f32.mrf.mxu0  ;;  %3576 = vmatprep.mubr.bf16.mxu1 %v7624_v17 }
 0x31e   :  { %v3989_v19 = vmax.f32 %v3988_v43, %v2708_v59  ;;  %v2710_v35 = vadd.f32 %v2709_v10, %v6508_v28  ;;  %v3330_v16 = vpop.f32.mrf.mxu1 }
 0x31f   :  { %v4000_v22 = vmax.f32 %v3999_v57, %v3329_v30  ;;  %v3331_v9 = vadd.f32 %v3330_v16, %v6626_v55  ;;  %v2711_v56 = vpop.f32.mrf.mxu0 }
 0x320   :  { %v3969_v47 = vmax.f32 %v3968_v63, %v2710_v35  ;;  %v2712_v62 = vadd.f32 %v2711_v56, %v6513_v1  ;;  %v3332_v34 = vpop.f32.mrf.mxu1 }
 0x321   :  { %v4021_v26 = vmax.f32 %v4020_v53, %v3331_v9  ;;  %v3333_v52 = vadd.f32 %v3332_v34, %v6619_v14  ;;  %v2715_v29 = vpop.f32.mrf.mxu0  ;;  %2954 = vmatmul.mubr.bf16.gmra.mxu0 %v6495_v36 }
 0x322   :  { %v3970_v18 = vrot.slane %v3969_v47, 4  ;;  %v3990_v27 = vmax.f32 %v3989_v19, %v2712_v62  ;;  %v3334_v43 = vpop.f32.mrf.mxu1  ;;  %2963 = vmatprep.mubr.bf16.mxu0 %v7624_v17  ;;  %v2716_v19 = vadd.f32 %v2715_v29, %v6508_v28 }
 0x323   :  { %v4001_v25 = vmax.f32 %v4000_v22, %v3333_v52  ;;  %v3335_v2 = vadd.f32 %v3334_v43, %v6626_v55  ;;  %v2717_v57 = vpop.f32.mrf.mxu0 }
 0x324   :  { %v3971_v33 = vmax.f32 %v3969_v47, %v3970_v18  ;;  %v3991_v49 = vrot.slane %v3990_v27, 4  ;;  %v3338_v63 = vpop.f32.mrf.mxu1  ;;  %3577 = vmatmul.mubr.bf16.gmra.mxu1 %v6448_v42  ;;  %v2718_v22 = vadd.f32 %v2717_v57, %v6513_v1 }
 0x325   :  { %v4022_v59 = vmax.f32 %v4021_v26, %v3335_v2  ;;  %v3339_v15 = vadd.f32 %v3338_v63, %v6619_v14  ;;  %v2719_v53 = vpop.f32.mrf.mxu0  ;;  %3586 = vmatprep.mubr.bf16.mxu1 %v7624_v17 }
 0x326   :  { %v3972_v30 = vrot.slane %v3971_v33, 2  ;;  %v3992_v10 = vmax.f32 %v3990_v27, %v3991_v49  ;;  %v2720_v35 = vadd.f32 %v2719_v53, %v6508_v28  ;;  %v3340_v16 = vpop.f32.mrf.mxu1 }
 0x327   :  { %v4002_v9 = vmax.f32 %v4001_v25, %v3339_v15  ;;  %v3341_v56 = vadd.f32 %v3340_v16, %v6626_v55  ;;  %v2721_v47 = vpop.f32.mrf.mxu0 }
 0x328   :  { %v3973_v42 = vmax.f32 %v3971_v33, %v3972_v30  ;;  %v3993_v62 = vrot.slane %v3992_v10, 2  ;;  %v4039_v34 = vmax.f32 %v2716_v19, %v2720_v35  ;;  %v2722_v26 = vadd.f32 %v2721_v47, %v6513_v1  ;;  %v3342_v52 = vpop.f32.mrf.mxu1 }
 0x329   :  { %v4023_v18 = vmax.f32 %v4022_v59, %v3341_v56  ;;  %v3343_v27 = vadd.f32 %v3342_v52, %v6619_v14  ;;  %v2725_v43 = vpop.f32.mrf.mxu0  ;;  %2964 = vmatmul.mubr.bf16.gmra.mxu0 %v6491_v40 }
 0x32a   :  { %v3974_v29 = vrot.slane %v3973_v42, 1  ;;  %v3994_v2 = vmax.f32 %v3992_v10, %v3993_v62  ;;  %v4060_v49 = vmax.f32 %v2718_v22, %v2722_v26  ;;  %v2726_v25 = vadd.f32 %v2725_v43, %v6508_v28  ;;  %v3344_v57 = vpop.f32.mrf.mxu1  ;;  %2973 = vmatprep.mubr.bf16.mxu0 %v7624_v17 }
 0x32b   :  { %v4003_v33 = vmax.f32 %v4002_v9, %v3343_v27  ;;  %v3345_v63 = vadd.f32 %v3344_v57, %v6626_v55  ;;  %v2727_v15 = vpop.f32.mrf.mxu0 }
 0x32c   :  { %v3975_v53 = vmax.f32 %v3973_v42, %v3974_v29  ;;  %v3995_v30 = vrot.slane %v3994_v2, 1  ;;  %v4040_v59 = vmax.f32 %v4039_v34, %v2726_v25  ;;  %v2728_v19 = vadd.f32 %v2727_v15, %v6513_v1  ;;  %v3348_v35 = vpop.f32.mrf.mxu1  ;;  %3587 = vmatmul.mubr.bf16.gmra.mxu1 %v6463_v44 }
 0x32d   :  { %v4024_v10 = vmax.f32 %v4023_v18, %v3345_v63  ;;  %v3349_v16 = vadd.f32 %v3348_v35, %v6619_v14  ;;  %v2729_v22 = vpop.f32.mrf.mxu0  ;;  %3596 = vmatprep.mubr.bf16.mxu1 %v7624_v17 }
 0x32e   :  { %v4467_v56 = vmax.f32 %v3975_v53, 0.0  ;;  %v3996_v9 = vmax.f32 %v3994_v2, %v3995_v30  ;;  %v4061_v47 = vmax.f32 %v4060_v49, %v2728_v19  ;;  %v2730_v62 = vadd.f32 %v2729_v22, %v6508_v28  ;;  %v3350_v42 = vpop.f32.mrf.mxu1 }
 0x32f   :  { %v4004_v26 = vmax.f32 %v4003_v33, %v3349_v16  ;;  %v3351_v34 = vadd.f32 %v3350_v42, %v6626_v55  ;;  %v2731_v52 = vpop.f32.mrf.mxu0 }
 0x330   :  { %v6914_v44 = vsel %vm4525_vm3, %v4467_v56, %v6789_v37  ;;  %v4468_v18 = vmax.f32 %v3996_v9, 0.0  ;;  %v4041_v27 = vmax.f32 %v4040_v59, %v2730_v62  ;;  %v2732_v43 = vadd.f32 %v2731_v52, %v6513_v1  ;;  %v3352_v29 = vpop.f32.mrf.mxu1 }
 0x331   :  { %v4025_v25 = vmax.f32 %v4024_v10, %v3351_v34  ;;  %v3353_v2 = vadd.f32 %v3352_v29, %v6619_v14  ;;  %v2735_v49 = vpop.f32.mrf.mxu0  ;;  %2974 = vmatmul.mubr.bf16.gmra.mxu0 %v6521_v6 }
 0x332   :  { %v6921_v57 = vsel %vm4525_vm3, %v4468_v18, %v6797_v24  ;;  %v4942_v33 = vpack.c.bf16 %v4468_v18, %v4467_v56  ;;  %v4062_v63 = vmax.f32 %v4061_v47, %v2732_v43  ;;  %v2736_v37 = vadd.f32 %v2735_v49, %v6508_v28  ;;  %v3354_v15 = vpop.f32.mrf.mxu1  ;;  %2983 = vmatprep.mubr.bf16.mxu0 %v7624_v17 }
 0x333   :  { %v4005_v53 = vmax.f32 %v4004_v26, %v3353_v2  ;;  %v3355_v30 = vadd.f32 %v3354_v15, %v6626_v55  ;;  %v2737_v59 = vpop.f32.mrf.mxu0 }
 0x334   :  { %v4686_v19 = vunpack.c.l.b16 %v4942_v33  ;;  %v4687_v35 = vunpack.c.h.b16 %v4942_v33  ;;  %v4042_v10 = vmax.f32 %v4041_v27, %v2736_v37  ;;  %v2738_v16 = vadd.f32 %v2737_v59, %v6513_v1  ;;  %v3358_v22 = vpop.f32.mrf.mxu1  ;;  %3597 = vmatmul.mubr.bf16.gmra.mxu1 %v6460_v12 }
 0x335   :  { %v4026_v24 = vmax.f32 %v4025_v25, %v3355_v30  ;;  %v3359_v56 = vadd.f32 %v3358_v22, %v6619_v14  ;;  %v2739_v9 = vpop.f32.mrf.mxu0  ;;  %3606 = vmatprep.mubr.bf16.mxu1 %v7624_v17 }
 0x336   :  { %v6932_v47 = vsel %vm4525_vm3, %v4686_v19, %v6809_v48  ;;  %v6936_v62 = vsel %vm4525_vm3, %v4687_v35, %v6812_v4  ;;  %v4063_v42 = vmax.f32 %v4062_v63, %v2738_v16  ;;  %v2740_v26 = vadd.f32 %v2739_v9, %v6508_v28  ;;  %v3360_v34 = vpop.f32.mrf.mxu1 }
 0x337   :  { %v4006_v52 = vmax.f32 %v4005_v53, %v3359_v56  ;;  %v3361_v12 = vadd.f32 %v3360_v34, %v6626_v55  ;;  %v2741_v18 = vpop.f32.mrf.mxu0 }
 0x338   :  { %v4043_v27 = vmax.f32 %v4042_v10, %v2740_v26  ;;  %v2742_v43 = vadd.f32 %v2741_v18, %v6513_v1  ;;  %v3362_v29 = vpop.f32.mrf.mxu1 }
 0x339   :  { %v4027_v25 = vmax.f32 %v4026_v24, %v3361_v12  ;;  %v3363_v48 = vadd.f32 %v3362_v29, %v6619_v14  ;;  %v2745_v2 = vpop.f32.mrf.mxu0  ;;  %2984 = vmatmul.mubr.bf16.gmra.mxu0 %v6516_v11 }
 0x33a   :  { %v4064_v4 = vmax.f32 %v4063_v42, %v2742_v43  ;;  %v2746_v49 = vadd.f32 %v2745_v2, %v6508_v28  ;;  %v3364_v33 = vpop.f32.mrf.mxu1  ;;  %2993 = vmatprep.mubr.bf16.mxu0 %v7624_v17 }
 0x33b   :  { %v4007_v63 = vmax.f32 %v4006_v52, %v3363_v48  ;;  %v3365_v37 = vadd.f32 %v3364_v33, %v6626_v55  ;;  %v2747_v15 = vpop.f32.mrf.mxu0 }
 0x33c   :  { %v4044_v53 = vmax.f32 %v4043_v27, %v2746_v49  ;;  %v2748_v30 = vadd.f32 %v2747_v15, %v6513_v1  ;;  %v3368_v59 = vpop.f32.mrf.mxu1  ;;  %3607 = vmatmul.mubr.bf16.gmra.mxu1 %v6480_v3 }
 0x33d   :  { %v4028_v19 = vmax.f32 %v4027_v25, %v3365_v37  ;;  %v3369_v35 = vadd.f32 %v3368_v59, %v6619_v14  ;;  %v2749_v10 = vpop.f32.mrf.mxu0  ;;  %3616 = vmatprep.mubr.bf16.mxu1 %v7624_v17 }
 0x33e   :  { %v4065_v16 = vmax.f32 %v4064_v4, %v2748_v30  ;;  %v2750_v22 = vadd.f32 %v2749_v10, %v6508_v28  ;;  %v3370_v24 = vpop.f32.mrf.mxu1 }
 0x33f   :  { %v4008_v56 = vmax.f32 %v4007_v63, %v3369_v35  ;;  %v3371_v9 = vadd.f32 %v3370_v24, %v6626_v55  ;;  %v2751_v42 = vpop.f32.mrf.mxu0 }
 0x340   :  { %v4045_v26 = vmax.f32 %v4044_v53, %v2750_v22  ;;  %v2752_v34 = vadd.f32 %v2751_v42, %v6513_v1  ;;  %v3372_v52 = vpop.f32.mrf.mxu1 }
 0x341   :  { %v4029_v12 = vmax.f32 %v4028_v19, %v3371_v9  ;;  %v3373_v3 = vadd.f32 %v3372_v52, %v6619_v14  ;;  %v2755_v18 = vpop.f32.mrf.mxu0  ;;  %2994 = vmatmul.mubr.bf16.gmra.mxu0 %v6538_v7 }
 0x342   :  { %v4066_v27 = vmax.f32 %v4065_v16, %v2752_v34  ;;  %v2756_v43 = vadd.f32 %v2755_v18, %v6508_v28  ;;  %v3374_v29 = vpop.f32.mrf.mxu1  ;;  %3003 = vmatprep.mubr.bf16.mxu0 %v7624_v17 }
 0x343   :  { %v4009_v25 = vmax.f32 %v4008_v56, %v3373_v3  ;;  %v3375_v48 = vadd.f32 %v3374_v29, %v6626_v55  ;;  %v2757_v2 = vpop.f32.mrf.mxu0 }
 0x344   :  { %v4046_v4 = vmax.f32 %v4045_v26, %v2756_v43  ;;  %v2758_v49 = vadd.f32 %v2757_v2, %v6513_v1  ;;  %v3378_v33 = vpop.f32.mrf.mxu1  ;;  %3617 = vmatmul.mubr.bf16.gmra.mxu1 %v6477_v51 }
 0x345   :  { %v4030_v63 = vmax.f32 %v4029_v12, %v3375_v48  ;;  %v3379_v37 = vadd.f32 %v3378_v33, %v6619_v14  ;;  %v2759_v15 = vpop.f32.mrf.mxu0  ;;  %3626 = vmatprep.mubr.bf16.mxu1 %v7624_v17 }
 0x346   :  { %v4067_v53 = vmax.f32 %v4066_v27, %v2758_v49  ;;  %v2760_v30 = vadd.f32 %v2759_v15, %v6508_v28  ;;  %v3380_v59 = vpop.f32.mrf.mxu1 }
 0x347   :  { %v4010_v19 = vmax.f32 %v4009_v25, %v3379_v37  ;;  %v3381_v35 = vadd.f32 %v3380_v59, %v6626_v55  ;;  %v2761_v10 = vpop.f32.mrf.mxu0 }
 0x348   :  { %v4047_v16 = vmax.f32 %v4046_v4, %v2760_v30  ;;  %v2762_v22 = vadd.f32 %v2761_v10, %v6513_v1  ;;  %v3382_v24 = vpop.f32.mrf.mxu1 }
 0x349   :  { %v4031_v56 = vmax.f32 %v4030_v63, %v3381_v35  ;;  %v3383_v51 = vadd.f32 %v3382_v24, %v6619_v14  ;;  %v2765_v9 = vpop.f32.mrf.mxu0  ;;  %3004 = vmatmul.mubr.bf16.gmra.mxu0 %v6534_v54 }
 0x34a   :  { %v4068_v42 = vmax.f32 %v4067_v53, %v2762_v22  ;;  %v2766_v26 = vadd.f32 %v2765_v9, %v6508_v28  ;;  %v3384_v34 = vpop.f32.mrf.mxu1  ;;  %3013 = vmatprep.mubr.bf16.mxu0 %v7624_v17 }
 0x34b   :  { %v4011_v52 = vmax.f32 %v4010_v19, %v3383_v51  ;;  %v3385_v12 = vadd.f32 %v3384_v34, %v6626_v55  ;;  %v2767_v3 = vpop.f32.mrf.mxu0 }
 0x34c   :  { %v4048_v18 = vmax.f32 %v4047_v16, %v2766_v26  ;;  %v2768_v27 = vadd.f32 %v2767_v3, %v6513_v1  ;;  %v3388_v43 = vpop.f32.mrf.mxu1  ;;  %3627 = vmatmul.mubr.bf16.gmra.mxu1 %v6495_v36 }
 0x34d   :  { %v4012_v29 = vrot.slane %v4011_v52, 4  ;;  %v4032_v25 = vmax.f32 %v4031_v56, %v3385_v12  ;;  %v2769_v48 = vpop.f32.mrf.mxu0  ;;  %3636 = vmatprep.mubr.bf16.mxu1 %v7624_v17  ;;  %v3389_v36 = vadd.f32 %v3388_v43, %v6619_v14 }
 0x34e   :  { %v4069_v2 = vmax.f32 %v4068_v42, %v2768_v27  ;;  %v2770_v4 = vadd.f32 %v2769_v48, %v6508_v28  ;;  %v3390_v49 = vpop.f32.mrf.mxu1 }
 0x34f   :  { %v4013_v33 = vmax.f32 %v4011_v52, %v4012_v29  ;;  %v4033_v63 = vrot.slane %v4032_v25, 4  ;;  %v2771_v37 = vpop.f32.mrf.mxu0  ;;  %v3391_v16 = vadd.f32 %v3390_v49, %v6626_v55 }
 0x350   :  { %v4049_v15 = vmax.f32 %v4048_v18, %v2770_v4  ;;  %v2772_v53 = vadd.f32 %v2771_v37, %v6513_v1  ;;  %v3392_v30 = vpop.f32.mrf.mxu1 }
 0x351   :  { %v4014_v59 = vrot.slane %v4013_v33, 2  ;;  %v4034_v19 = vmax.f32 %v4032_v25, %v4033_v63  ;;  %v3393_v35 = vadd.f32 %v3392_v30, %v6619_v14  ;;  %v2775_v10 = vpop.f32.mrf.mxu0  ;;  %3014 = vmatmul.mubr.bf16.gmra.mxu0 %v6554_v38 }
 0x352   :  { %v4070_v22 = vmax.f32 %v4069_v2, %v2772_v53  ;;  %v2776_v24 = vadd.f32 %v2775_v10, %v6508_v28  ;;  %v3394_v56 = vpop.f32.mrf.mxu1  ;;  %3023 = vmatprep.mubr.bf16.mxu0 %v7624_v17 }
 0x353   :  { %v4015_v51 = vmax.f32 %v4013_v33, %v4014_v59  ;;  %v4035_v9 = vrot.slane %v4034_v19, 2  ;;  %v4081_v42 = vmax.f32 %v3389_v36, %v3393_v35  ;;  %v3395_v26 = vadd.f32 %v3394_v56, %v6626_v55  ;;  %v2777_v34 = vpop.f32.mrf.mxu0 }
 0x354   :  { %v4050_v52 = vmax.f32 %v4049_v15, %v2776_v24  ;;  %v2778_v12 = vadd.f32 %v2777_v34, %v6513_v1  ;;  %v3398_v3 = vpop.f32.mrf.mxu1  ;;  %3637 = vmatmul.mubr.bf16.gmra.mxu1 %v6491_v40 }
 0x355   :  { %v4016_v18 = vrot.slane %v4015_v51, 1  ;;  %v4036_v27 = vmax.f32 %v4034_v19, %v4035_v9  ;;  %v4102_v43 = vmax.f32 %v3391_v16, %v3395_v26  ;;  %v3399_v29 = vadd.f32 %v3398_v3, %v6619_v14  ;;  %v2779_v25 = vpop.f32.mrf.mxu0  ;;  %3646 = vmatprep.mubr.bf16.mxu1 %v7624_v17 }
 0x356   :  { %v4071_v48 = vmax.f32 %v4070_v22, %v2778_v12  ;;  %v2780_v2 = vadd.f32 %v2779_v25, %v6508_v28  ;;  %v3400_v4 = vpop.f32.mrf.mxu1 }
 0x357   :  { %v6987_v49 = vmax.f32 %v4015_v51, %v4016_v18  ;;  %v4037_v33 = vrot.slane %v4036_v27, 1  ;;  %v4082_v63 = vmax.f32 %v4081_v42, %v3399_v29  ;;  %v3401_v37 = vadd.f32 %v3400_v4, %v6626_v55  ;;  %v2781_v15 = vpop.f32.mrf.mxu0 }
 0x358   :  { %v4051_v40 = vmax.f32 %v4050_v52, %v2780_v2  ;;  %v2782_v53 = vadd.f32 %v2781_v15, %v6513_v1  ;;  %v3402_v30 = vpop.f32.mrf.mxu1 }
 0x359   :  { %v6991_v59 = vmax.f32 %v4036_v27, %v4037_v33  ;;  %v4103_v19 = vmax.f32 %v4102_v43, %v3401_v37  ;;  %v3403_v36 = vadd.f32 %v3402_v30, %v6619_v14  ;;  %v2785_v35 = vpop.f32.mrf.mxu0  ;;  %3024 = vmatmul.mubr.bf16.gmra.mxu0 %v6550_v8  ;;  %v7620_v24 = vmax.f32 %v6987_v49, 0.0 }
 0x35a   :  { %v4072_v10 = vmax.f32 %v4071_v48, %v2782_v53  ;;  %v2786_v16 = vadd.f32 %v2785_v35, %v6508_v28  ;;  %v3404_v22 = vpop.f32.mrf.mxu1  ;;  %3033 = vmatprep.mubr.bf16.mxu0 %v7624_v17 }
 0x35b   :  { %v7614_v56 = vmax.f32 %v6991_v59, 0.0  ;;  %v4083_v51 = vmax.f32 %v4082_v63, %v3403_v36  ;;  %v3405_v9 = vadd.f32 %v3404_v22, %v6626_v55  ;;  %v2787_v42 = vpop.f32.mrf.mxu0 }
 0x35c   :  { %v4052_v26 = vmax.f32 %v4051_v40, %v2786_v16  ;;  %v2788_v34 = vadd.f32 %v2787_v42, %v6513_v1  ;;  %v3408_v52 = vpop.f32.mrf.mxu1  ;;  %3647 = vmatmul.mubr.bf16.gmra.mxu1 %v6521_v6 }
 0x35d   :  { %v7006_v12 = vpack.c.bf16 %v7614_v56, %v7620_v24  ;;  %v4104_v3 = vmax.f32 %v4103_v19, %v3405_v9  ;;  %v3409_v18 = vadd.f32 %v3408_v52, %v6619_v14  ;;  %v2789_v27 = vpop.f32.mrf.mxu0  ;;  %3656 = vmatprep.mubr.bf16.mxu1 %v7624_v17 }
 0x35e   :  { %v4073_v43 = vmax.f32 %v4072_v10, %v2788_v34  ;;  %v2790_v29 = vadd.f32 %v2789_v27, %v6508_v28  ;;  %v3410_v25 = vpop.f32.mrf.mxu1 }
 0x35f   :  { %v4084_v48 = vmax.f32 %v4083_v51, %v3409_v18  ;;  %v3411_v2 = vadd.f32 %v3410_v25, %v6626_v55  ;;  %v2791_v6 = vpop.f32.mrf.mxu0 }
 0x360   :  { %v4053_v4 = vmax.f32 %v4052_v26, %v2790_v29  ;;  %v2792_v33 = vadd.f32 %v2791_v6, %v6513_v1  ;;  %v3412_v63 = vpop.f32.mrf.mxu1 }
 0x361   :  { %v4105_v37 = vmax.f32 %v4104_v3, %v3411_v2  ;;  %v3413_v15 = vadd.f32 %v3412_v63, %v6619_v14  ;;  %v2795_v40 = vpop.f32.mrf.mxu0  ;;  %3034 = vmatmul.mubr.bf16.gmra.mxu0 %v6570_v39 }
 0x362   :  { %v4054_v53 = vrot.slane %v4053_v4, 4  ;;  %v4074_v30 = vmax.f32 %v4073_v43, %v2792_v33  ;;  %v3414_v19 = vpop.f32.mrf.mxu1  ;;  %3043 = vmatprep.mubr.bf16.mxu0 %v7624_v17  ;;  %v2796_v3 = vadd.f32 %v2795_v40, %v6508_v28 }
 0x363   :  { %v4085_v36 = vmax.f32 %v4084_v48, %v3413_v15  ;;  %v3415_v35 = vadd.f32 %v3414_v19, %v6626_v55  ;;  %v2797_v10 = vpop.f32.mrf.mxu0 }
 0x364   :  { %v4055_v16 = vmax.f32 %v4053_v4, %v4054_v53  ;;  %v4075_v22 = vrot.slane %v4074_v30, 4  ;;  %v3418_v51 = vpop.f32.mrf.mxu1  ;;  %3657 = vmatmul.mubr.bf16.gmra.mxu1 %v6516_v11  ;;  %v2798_v43 = vadd.f32 %v2797_v10, %v6513_v1 }
 0x365   :  { %v4106_v9 = vmax.f32 %v4105_v37, %v3415_v35  ;;  %v3419_v42 = vadd.f32 %v3418_v51, %v6619_v14  ;;  %v2799_v26 = vpop.f32.mrf.mxu0  ;;  %3666 = vmatprep.mubr.bf16.mxu1 %v7624_v17 }
 0x366   :  { %v4056_v34 = vrot.slane %v4055_v16, 2  ;;  %v4076_v52 = vmax.f32 %v4074_v30, %v4075_v22  ;;  %v2800_v18 = vadd.f32 %v2799_v26, %v6508_v28  ;;  %v3420_v27 = vpop.f32.mrf.mxu1 }
 0x367   :  { %v4086_v29 = vmax.f32 %v4085_v36, %v3419_v42  ;;  %v3421_v25 = vadd.f32 %v3420_v27, %v6626_v55  ;;  %v2801_v48 = vpop.f32.mrf.mxu0 }
 0x368   :  { %v4057_v11 = vmax.f32 %v4055_v16, %v4056_v34  ;;  %v4077_v2 = vrot.slane %v4076_v52, 2  ;;  %v4123_v6 = vmax.f32 %v2796_v3, %v2800_v18  ;;  %v2802_v4 = vadd.f32 %v2801_v48, %v6513_v1  ;;  %v3422_v33 = vpop.f32.mrf.mxu1 }
 0x369   :  { %v4107_v63 = vmax.f32 %v4106_v9, %v3421_v25  ;;  %v3423_v37 = vadd.f32 %v3422_v33, %v6619_v14  ;;  %v2805_v15 = vpop.f32.mrf.mxu0  ;;  %3044 = vmatmul.mubr.bf16.gmra.mxu0 %v6566_v5 }
 0x36a   :  { %v4058_v40 = vrot.slane %v4057_v11, 1  ;;  %v4078_v53 = vmax.f32 %v4076_v52, %v4077_v2  ;;  %v4144_v30 = vmax.f32 %v2798_v43, %v2802_v4  ;;  %v2806_v19 = vadd.f32 %v2805_v15, %v6508_v28  ;;  %v3424_v36 = vpop.f32.mrf.mxu1  ;;  %3053 = vmatprep.mubr.bf16.mxu0 %v7624_v17 }
 0x36b   :  { %v4087_v35 = vmax.f32 %v4086_v29, %v3423_v37  ;;  %v3425_v10 = vadd.f32 %v3424_v36, %v6626_v55  ;;  %v2807_v16 = vpop.f32.mrf.mxu0 }
 0x36c   :  { %v4059_v22 = vmax.f32 %v4057_v11, %v4058_v40  ;;  %v4079_v51 = vrot.slane %v4078_v53, 1  ;;  %v4124_v9 = vmax.f32 %v4123_v6, %v2806_v19  ;;  %v2808_v42 = vadd.f32 %v2807_v16, %v6513_v1  ;;  %v3428_v26 = vpop.f32.mrf.mxu1  ;;  %3667 = vmatmul.mubr.bf16.gmra.mxu1 %v6538_v7 }
 0x36d   :  { %v4108_v34 = vmax.f32 %v4107_v63, %v3425_v10  ;;  %v3429_v52 = vadd.f32 %v3428_v26, %v6619_v14  ;;  %v2809_v3 = vpop.f32.mrf.mxu0  ;;  %3676 = vmatprep.mubr.bf16.mxu1 %v7624_v17 }
 0x36e   :  { %v4471_v18 = vmax.f32 %v4059_v22, 0.0  ;;  %v4080_v27 = vmax.f32 %v4078_v53, %v4079_v51  ;;  %v4145_v43 = vmax.f32 %v4144_v30, %v2808_v42  ;;  %v2810_v29 = vadd.f32 %v2809_v3, %v6508_v28  ;;  %v3430_v25 = vpop.f32.mrf.mxu1 }
 0x36f   :  { %v4088_v48 = vmax.f32 %v4087_v35, %v3429_v52  ;;  %v3431_v11 = vadd.f32 %v3430_v25, %v6626_v55  ;;  %v2811_v2 = vpop.f32.mrf.mxu0 }
 0x370   :  { %v7038_v7 = vsel %vm4527_vm4, %v4471_v18, %v6914_v44  ;;  %v4472_v6 = vmax.f32 %v4080_v27, 0.0  ;;  %v4125_v4 = vmax.f32 %v4124_v9, %v2810_v29  ;;  %v2812_v33 = vadd.f32 %v2811_v2, %v6513_v1  ;;  %v3432_v63 = vpop.f32.mrf.mxu1 }
 0x371   :  { %v4109_v37 = vmax.f32 %v4108_v34, %v3431_v11  ;;  %v3433_v15 = vadd.f32 %v3432_v63, %v6619_v14  ;;  %v2815_v40 = vpop.f32.mrf.mxu0  ;;  %3054 = vmatmul.mubr.bf16.gmra.mxu0 %v6586_v46 }
 0x372   :  { %v7045_v53 = vsel %vm4527_vm4, %v4472_v6, %v6921_v57  ;;  %v4944_v30 = vpack.c.bf16 %v4472_v6, %v4471_v18  ;;  %v4146_v19 = vmax.f32 %v4145_v43, %v2812_v33  ;;  %v2816_v44 = vadd.f32 %v2815_v40, %v6508_v28  ;;  %v3434_v36 = vpop.f32.mrf.mxu1  ;;  %3063 = vmatprep.mubr.bf16.mxu0 %v7624_v17 }
 0x373   :  { %v4089_v35 = vmax.f32 %v4088_v48, %v3433_v15  ;;  %v3435_v10 = vadd.f32 %v3434_v36, %v6626_v55  ;;  %v2817_v16 = vpop.f32.mrf.mxu0 }
 0x374   :  { %v4690_v22 = vunpack.c.l.b16 %v4944_v30  ;;  %v4691_v51 = vunpack.c.h.b16 %v4944_v30  ;;  %v4126_v9 = vmax.f32 %v4125_v4, %v2816_v44  ;;  %v2818_v42 = vadd.f32 %v2817_v16, %v6513_v1  ;;  %v3438_v26 = vpop.f32.mrf.mxu1  ;;  %3677 = vmatmul.mubr.bf16.gmra.mxu1 %v6534_v54 }
 0x375   :  { %v4110_v57 = vmax.f32 %v4109_v37, %v3435_v10  ;;  %v3439_v34 = vadd.f32 %v3438_v26, %v6619_v14  ;;  %v2819_v52 = vpop.f32.mrf.mxu0  ;;  %3686 = vmatprep.mubr.bf16.mxu1 %v7624_v17 }
 0x376   :  { %v7056_v3 = vsel %vm4527_vm4, %v4690_v22, %v6932_v47  ;;  %v7060_v18 = vsel %vm4527_vm4, %v4691_v51, %v6936_v62  ;;  %v4147_v27 = vmax.f32 %v4146_v19, %v2818_v42  ;;  %v2820_v43 = vadd.f32 %v2819_v52, %v6508_v28  ;;  %v3440_v29 = vpop.f32.mrf.mxu1 }
 0x377   :  { %v4090_v25 = vmax.f32 %v4089_v35, %v3439_v34  ;;  %v3441_v54 = vadd.f32 %v3440_v29, %v6626_v55  ;;  %v2821_v48 = vpop.f32.mrf.mxu0 }
 0x378   :  { %v4127_v11 = vmax.f32 %v4126_v9, %v2820_v43  ;;  %v2822_v2 = vadd.f32 %v2821_v48, %v6513_v1  ;;  %v3442_v6 = vpop.f32.mrf.mxu1 }
 0x379   :  { %v4111_v4 = vmax.f32 %v4110_v57, %v3441_v54  ;;  %v3443_v47 = vadd.f32 %v3442_v6, %v6619_v14  ;;  %v2825_v33 = vpop.f32.mrf.mxu0  ;;  %3064 = vmatmul.mubr.bf16.gmra.mxu0 %v6582_v23 }
 0x37a   :  { %v4148_v62 = vmax.f32 %v4147_v27, %v2822_v2  ;;  %v2826_v63 = vadd.f32 %v2825_v33, %v6508_v28  ;;  %v3444_v37 = vpop.f32.mrf.mxu1  ;;  %3073 = vmatprep.mubr.bf16.mxu0 %v7624_v17 }
 0x37b   :  { %v4091_v15 = vmax.f32 %v4090_v25, %v3443_v47  ;;  %v3445_v40 = vadd.f32 %v3444_v37, %v6626_v55  ;;  %v2827_v30 = vpop.f32.mrf.mxu0 }
 0x37c   :  { %v4128_v19 = vmax.f32 %v4127_v11, %v2826_v63  ;;  %v2828_v44 = vadd.f32 %v2827_v30, %v6513_v1  ;;  %v3448_v36 = vpop.f32.mrf.mxu1  ;;  %3687 = vmatmul.mubr.bf16.gmra.mxu1 %v6554_v38 }
 0x37d   :  { %v4112_v35 = vmax.f32 %v4111_v4, %v3445_v40  ;;  %v3449_v10 = vadd.f32 %v3448_v36, %v6619_v14  ;;  %v2829_v16 = vpop.f32.mrf.mxu0  ;;  %3696 = vmatprep.mubr.bf16.mxu1 %v7624_v17 }
 0x37e   :  { %v4149_v22 = vmax.f32 %v4148_v62, %v2828_v44  ;;  %v2830_v51 = vadd.f32 %v2829_v16, %v6508_v28  ;;  %v3450_v9 = vpop.f32.mrf.mxu1 }
 0x37f   :  { %v4092_v42 = vmax.f32 %v4091_v15, %v3449_v10  ;;  %v3451_v26 = vadd.f32 %v3450_v9, %v6626_v55  ;;  %v2831_v57 = vpop.f32.mrf.mxu0 }
 0x380   :  { %v4129_v34 = vmax.f32 %v4128_v19, %v2830_v51  ;;  %v2832_v52 = vadd.f32 %v2831_v57, %v6513_v1  ;;  %v3452_v27 = vpop.f32.mrf.mxu1 }
 0x381   :  { %v4113_v43 = vmax.f32 %v4112_v35, %v3451_v26  ;;  %v3453_v38 = vadd.f32 %v3452_v27, %v6619_v14  ;;  %v2835_v29 = vpop.f32.mrf.mxu0  ;;  %3074 = vmatmul.mubr.bf16.gmra.mxu0 %v6602_v0 }
 0x382   :  { %v4150_v25 = vmax.f32 %v4149_v22, %v2832_v52  ;;  %v2836_v54 = vadd.f32 %v2835_v29, %v6508_v28  ;;  %v3454_v48 = vpop.f32.mrf.mxu1  ;;  %3083 = vmatprep.mubr.bf16.mxu0 %v7624_v17 }
 0x383   :  { %v4093_v11 = vmax.f32 %v4092_v42, %v3453_v38  ;;  %v3455_v2 = vadd.f32 %v3454_v48, %v6626_v55  ;;  %v2837_v6 = vpop.f32.mrf.mxu0 }
 0x384   :  { %v4130_v4 = vmax.f32 %v4129_v34, %v2836_v54  ;;  %v2838_v47 = vadd.f32 %v2837_v6, %v6513_v1  ;;  %v3458_v33 = vpop.f32.mrf.mxu1  ;;  %3697 = vmatmul.mubr.bf16.gmra.mxu1 %v6550_v8 }
 0x385   :  { %v4114_v62 = vmax.f32 %v4113_v43, %v3455_v2  ;;  %v3459_v63 = vadd.f32 %v3458_v33, %v6619_v14  ;;  %v2839_v37 = vpop.f32.mrf.mxu0  ;;  %3706 = vmatprep.mubr.bf16.mxu1 %v7624_v17 }
 0x386   :  { %v4151_v15 = vmax.f32 %v4150_v25, %v2838_v47  ;;  %v2840_v40 = vadd.f32 %v2839_v37, %v6508_v28  ;;  %v3460_v30 = vpop.f32.mrf.mxu1 }
 0x387   :  { %v4094_v19 = vmax.f32 %v4093_v11, %v3459_v63  ;;  %v3461_v44 = vadd.f32 %v3460_v30, %v6626_v55  ;;  %v2841_v36 = vpop.f32.mrf.mxu0 }
 0x388   :  { %v4131_v35 = vmax.f32 %v4130_v4, %v2840_v40  ;;  %v2842_v10 = vadd.f32 %v2841_v36, %v6513_v1  ;;  %v3462_v16 = vpop.f32.mrf.mxu1 }
 0x389   :  { %v4115_v22 = vmax.f32 %v4114_v62, %v3461_v44  ;;  %v3463_v8 = vadd.f32 %v3462_v16, %v6619_v14  ;;  %v2845_v51 = vpop.f32.mrf.mxu0  ;;  %3084 = vmatmul.mubr.bf16.gmra.mxu0 %v6598_v58 }
 0x38a   :  { %v4152_v9 = vmax.f32 %v4151_v15, %v2842_v10  ;;  %v2846_v42 = vadd.f32 %v2845_v51, %v6508_v28  ;;  %v3464_v26 = vpop.f32.mrf.mxu1  ;;  %3093 = vmatprep.mubr.bf16.mxu0 %v7624_v17 }
 0x38b   :  { %v4095_v57 = vmax.f32 %v4094_v19, %v3463_v8  ;;  %v3465_v34 = vadd.f32 %v3464_v26, %v6626_v55  ;;  %v2847_v52 = vpop.f32.mrf.mxu0 }
 0x38c   :  { %v4132_v27 = vmax.f32 %v4131_v35, %v2846_v42  ;;  %v2848_v43 = vadd.f32 %v2847_v52, %v6513_v1  ;;  %v3468_v38 = vpop.f32.mrf.mxu1  ;;  %3707 = vmatmul.mubr.bf16.gmra.mxu1 %v6570_v39 }
 0x38d   :  { %v4096_v29 = vrot.slane %v4095_v57, 4  ;;  %v4116_v25 = vmax.f32 %v4115_v22, %v3465_v34  ;;  %v2849_v54 = vpop.f32.mrf.mxu0  ;;  %3716 = vmatprep.mubr.bf16.mxu1 %v7624_v17  ;;  %v3469_v39 = vadd.f32 %v3468_v38, %v6619_v14 }
 0x38e   :  { %v4153_v48 = vmax.f32 %v4152_v9, %v2848_v43  ;;  %v2850_v11 = vadd.f32 %v2849_v54, %v6508_v28  ;;  %v3470_v2 = vpop.f32.mrf.mxu1 }
 0x38f   :  { %v4097_v6 = vmax.f32 %v4095_v57, %v4096_v29  ;;  %v4117_v4 = vrot.slane %v4116_v25, 4  ;;  %v2851_v47 = vpop.f32.mrf.mxu0  ;;  %v3471_v19 = vadd.f32 %v3470_v2, %v6626_v55 }
 0x390   :  { %v4133_v33 = vmax.f32 %v4132_v27, %v2850_v11  ;;  %v2852_v62 = vadd.f32 %v2851_v47, %v6513_v1  ;;  %v3472_v63 = vpop.f32.mrf.mxu1 }
 0x391   :  { %v4098_v37 = vrot.slane %v4097_v6, 2  ;;  %v4118_v15 = vmax.f32 %v4116_v25, %v4117_v4  ;;  %v3473_v40 = vadd.f32 %v3472_v63, %v6619_v14  ;;  %v2855_v30 = vpop.f32.mrf.mxu0  ;;  %3094 = vmatmul.mubr.bf16.gmra.mxu0 %v6623_v45 }
 0x392   :  { %v4154_v44 = vmax.f32 %v4153_v48, %v2852_v62  ;;  %v2856_v36 = vadd.f32 %v2855_v30, %v6508_v28  ;;  %v3474_v35 = vpop.f32.mrf.mxu1  ;;  %3103 = vmatprep.mubr.bf16.mxu0 %v7624_v17 }
 0x393   :  { %v4099_v10 = vmax.f32 %v4097_v6, %v4098_v37  ;;  %v4119_v16 = vrot.slane %v4118_v15, 2  ;;  %v4165_v22 = vmax.f32 %v3469_v39, %v3473_v40  ;;  %v3475_v8 = vadd.f32 %v3474_v35, %v6626_v55  ;;  %v2857_v51 = vpop.f32.mrf.mxu0 }
 0x394   :  { %v4134_v9 = vmax.f32 %v4133_v33, %v2856_v36  ;;  %v2858_v42 = vadd.f32 %v2857_v51, %v6513_v1  ;;  %v3478_v26 = vpop.f32.mrf.mxu1  ;;  %3717 = vmatmul.mubr.bf16.gmra.mxu1 %v6566_v5 }
 0x395   :  { %v4100_v57 = vrot.slane %v4099_v10, 1  ;;  %v4120_v34 = vmax.f32 %v4118_v15, %v4119_v16  ;;  %v4186_v52 = vmax.f32 %v3471_v19, %v3475_v8  ;;  %v3479_v27 = vadd.f32 %v3478_v26, %v6619_v14  ;;  %v2859_v43 = vpop.f32.mrf.mxu0  ;;  %3726 = vmatprep.mubr.bf16.mxu1 %v7624_v17  ;;  %v7627_v15 = vld [vmem:[#allocation3_spill] sm:$0xff] }
 0x396   :  { %v4155_v38 = vmax.f32 %v4154_v44, %v2858_v42  ;;  %v2860_v29 = vadd.f32 %v2859_v43, %v6508_v28  ;;  %v3480_v25 = vpop.f32.mrf.mxu1 }
 0x397   :  { %v7111_v54 = vmax.f32 %v4099_v10, %v4100_v57  ;;  %v4121_v48 = vrot.slane %v4120_v34, 1  ;;  %v4166_v11 = vmax.f32 %v4165_v22, %v3479_v27  ;;  %v3481_v2 = vadd.f32 %v3480_v25, %v6626_v55  ;;  %v2861_v6 = vpop.f32.mrf.mxu0 }
 0x398   :  { %v4135_v5 = vmax.f32 %v4134_v9, %v2860_v29  ;;  %v2862_v4 = vadd.f32 %v2861_v6, %v6513_v1  ;;  %v3482_v47 = vpop.f32.mrf.mxu1  ;;  %v7628_v6 = vld [vmem:[#allocation2_spill] sm:$0xff] }
 0x399   :  { %v7115_v33 = vmax.f32 %v4120_v34, %v4121_v48  ;;  %v4187_v62 = vmax.f32 %v4186_v52, %v3481_v2  ;;  %v3483_v63 = vadd.f32 %v3482_v47, %v6619_v14  ;;  %v2865_v37 = vpop.f32.mrf.mxu0  ;;  %3104 = vmatmul.mubr.bf16.gmra.mxu0 %v7627_v15  ;;  %v7617_v19 = vmax.f32 %v7111_v54, 0.0 }
 0x39a   :  { %v4156_v39 = vmax.f32 %v4155_v38, %v2862_v4  ;;  %v2866_v40 = vadd.f32 %v2865_v37, %v6508_v28  ;;  %v3484_v30 = vpop.f32.mrf.mxu1  ;;  %3146 = vmatprep.mubr.bf16.mxu0 %v7624_v17 }
 0x39b   :  { %v7612_v44 = vmax.f32 %v7115_v33, 0.0  ;;  %v4167_v36 = vmax.f32 %v4166_v11, %v3483_v63  ;;  %v3485_v35 = vadd.f32 %v3484_v30, %v6626_v55  ;;  %v2867_v10 = vpop.f32.mrf.mxu0 }
 0x39c   :  { %v4136_v16 = vmax.f32 %v4135_v5, %v2866_v40  ;;  %v2868_v22 = vadd.f32 %v2867_v10, %v6513_v1  ;;  %v3488_v8 = vpop.f32.mrf.mxu1  ;;  %3727 = vmatmul.mubr.bf16.gmra.mxu1 %v6586_v46 }
 0x39d   :  { %v7130_v51 = vpack.c.bf16 %v7612_v44, %v7617_v19  ;;  %v4188_v9 = vmax.f32 %v4187_v62, %v3485_v35  ;;  %v3489_v42 = vadd.f32 %v3488_v8, %v6619_v14  ;;  %v2869_v26 = vpop.f32.mrf.mxu0  ;;  %3736 = vmatprep.mubr.bf16.mxu1 %v7624_v17 }
 0x39e   :  { %v4157_v57 = vmax.f32 %v4156_v39, %v2868_v22  ;;  %v2870_v34 = vadd.f32 %v2869_v26, %v6508_v28  ;;  %v3490_v52 = vpop.f32.mrf.mxu1 }
 0x39f   :  { %v4168_v27 = vmax.f32 %v4167_v36, %v3489_v42  ;;  %v3491_v43 = vadd.f32 %v3490_v52, %v6626_v55  ;;  %v2871_v46 = vpop.f32.mrf.mxu0 }
 0x3a0   :  { %v4137_v38 = vmax.f32 %v4136_v16, %v2870_v34  ;;  %v2872_v29 = vadd.f32 %v2871_v46, %v6513_v1  ;;  %v3492_v25 = vpop.f32.mrf.mxu1 }
 0x3a1   :  { %v4189_v48 = vmax.f32 %v4188_v9, %v3491_v43  ;;  %v3493_v11 = vadd.f32 %v3492_v25, %v6619_v14  ;;  %v2875_v2 = vpop.f32.mrf.mxu0  ;;  %3147 = vmatmul.mubr.bf16.vlgmr.msra.gmra.mxu0 %v7628_v6 }
 0x3a2   :  { %v4138_v5 = vrot.slane %v4137_v38, 4  ;;  %v4158_v4 = vmax.f32 %v4157_v57, %v2872_v29  ;;  %v3494_v47 = vpop.f32.mrf.mxu1  ;;  %v2876_v8 = vadd.f32 %v2875_v2, %v6508_v28 }
 0x3a3   :  { %v4169_v62 = vmax.f32 %v4168_v27, %v3493_v11  ;;  %v3495_v63 = vadd.f32 %v3494_v47, %v6626_v55  ;;  %v2877_v37 = vpop.f32.mrf.mxu0 }
 0x3a4   :  { %v4139_v39 = vmax.f32 %v4137_v38, %v4138_v5  ;;  %v4159_v40 = vrot.slane %v4158_v4, 4  ;;  %v3498_v30 = vpop.f32.mrf.mxu1  ;;  %3737 = vmatmul.mubr.bf16.gmra.mxu1 %v6582_v23  ;;  %v2878_v26 = vadd.f32 %v2877_v37, %v6513_v1 }
 0x3a5   :  { %v4190_v36 = vmax.f32 %v4189_v48, %v3495_v63  ;;  %v3499_v35 = vadd.f32 %v3498_v30, %v6619_v14  ;;  %v2879_v10 = vpop.f32.mrf.mxu0  ;;  %3746 = vmatprep.mubr.bf16.mxu1 %v7624_v17 }
 0x3a6   :  { %v4140_v16 = vrot.slane %v4139_v39, 2  ;;  %v4160_v22 = vmax.f32 %v4158_v4, %v4159_v40  ;;  %v2880_v9 = vadd.f32 %v2879_v10, %v6508_v28  ;;  %v3500_v42 = vpop.f32.mrf.mxu1 }
 0x3a7   :  { %v4170_v57 = vmax.f32 %v4169_v62, %v3499_v35  ;;  %v3501_v34 = vadd.f32 %v3500_v42, %v6626_v55  ;;  %v2881_v52 = vpop.f32.mrf.mxu0 }
 0x3a8   :  { %v4141_v23 = vmax.f32 %v4139_v39, %v4140_v16  ;;  %v4161_v27 = vrot.slane %v4160_v22, 2  ;;  %v4207_v43 = vmax.f32 %v2876_v8, %v2880_v9  ;;  %v2882_v46 = vadd.f32 %v2881_v52, %v6513_v1  ;;  %v3502_v38 = vpop.f32.mrf.mxu1 }
 0x3a9   :  { %v4191_v29 = vmax.f32 %v4190_v36, %v3501_v34  ;;  %v3503_v25 = vadd.f32 %v3502_v38, %v6619_v14  ;;  %v2885_v48 = vpop.f32.mrf.mxu0 }
 0x3aa   :  { %v4142_v11 = vrot.slane %v4141_v23, 1  ;;  %v4162_v2 = vmax.f32 %v4160_v22, %v4161_v27  ;;  %v4228_v6 = vmax.f32 %v2878_v26, %v2882_v46  ;;  %v2886_v5 = vadd.f32 %v2885_v48, %v6508_v28  ;;  %v3504_v4 = vpop.f32.mrf.mxu1 }
 0x3ab   :  { %v4171_v47 = vmax.f32 %v4170_v57, %v3503_v25  ;;  %v3505_v62 = vadd.f32 %v3504_v4, %v6626_v55  ;;  %v2887_v63 = vpop.f32.mrf.mxu0 }
 0x3ac   :  { %v4143_v37 = vmax.f32 %v4141_v23, %v4142_v11  ;;  %v4163_v39 = vrot.slane %v4162_v2, 1  ;;  %v4208_v40 = vmax.f32 %v4207_v43, %v2886_v5  ;;  %v2888_v30 = vadd.f32 %v2887_v63, %v6513_v1  ;;  %v3508_v35 = vpop.f32.mrf.mxu1  ;;  %3747 = vmatmul.mubr.bf16.gmra.mxu1 %v6602_v0 }
 0x3ad   :  { %v4192_v36 = vmax.f32 %v4191_v29, %v3505_v62  ;;  %v3509_v10 = vadd.f32 %v3508_v35, %v6619_v14  ;;  %v2889_v16 = vpop.f32.mrf.mxu0  ;;  %3756 = vmatprep.mubr.bf16.mxu1 %v7624_v17 }
 0x3ae   :  { %v4475_v22 = vmax.f32 %v4143_v37, 0.0  ;;  %v4164_v8 = vmax.f32 %v4162_v2, %v4163_v39  ;;  %v4229_v9 = vmax.f32 %v4228_v6, %v2888_v30  ;;  %v2890_v42 = vadd.f32 %v2889_v16, %v6508_v28  ;;  %v3510_v26 = vpop.f32.mrf.mxu1 }
 0x3af   :  { %v4172_v57 = vmax.f32 %v4171_v47, %v3509_v10  ;;  %v3511_v34 = vadd.f32 %v3510_v26, %v6626_v55  ;;  %v2891_v52 = vpop.f32.mrf.mxu0 }
 0x3b0   :  { %v7159_v0 = vsel %vm4529_vm5, %v4475_v22, %v7038_v7  ;;  %v4476_v23 = vmax.f32 %v4164_v8, 0.0  ;;  %v4209_v27 = vmax.f32 %v4208_v40, %v2890_v42  ;;  %v2892_v43 = vadd.f32 %v2891_v52, %v6513_v1  ;;  %v3512_v46 = vpop.f32.mrf.mxu1 }
 0x3b1   :  { %v4193_v38 = vmax.f32 %v4192_v36, %v3511_v34  ;;  %v3513_v29 = vadd.f32 %v3512_v46, %v6619_v14  ;;  %v2895_v25 = vpop.f32.mrf.mxu0 }
 0x3b2   :  { %v7165_v48 = vsel %vm4529_vm5, %v4476_v23, %v7045_v53  ;;  %v4946_v11 = vpack.c.bf16 %v4476_v23, %v4475_v22  ;;  %v4230_v2 = vmax.f32 %v4229_v9, %v2892_v43  ;;  %v2896_v6 = vadd.f32 %v2895_v25, %v6508_v28  ;;  %v3514_v5 = vpop.f32.mrf.mxu1 }
 0x3b3   :  { %v4173_v7 = vmax.f32 %v4172_v57, %v3513_v29  ;;  %v3515_v4 = vadd.f32 %v3514_v5, %v6626_v55  ;;  %v2897_v47 = vpop.f32.mrf.mxu0 }
 0x3b4   :  { %v4694_v62 = vunpack.c.l.b16 %v4946_v11  ;;  %v4695_v63 = vunpack.c.h.b16 %v4946_v11  ;;  %v4210_v37 = vmax.f32 %v4209_v27, %v2896_v6  ;;  %v2898_v39 = vadd.f32 %v2897_v47, %v6513_v1  ;;  %v3518_v40 = vpop.f32.mrf.mxu1  ;;  %3757 = vmatmul.mubr.bf16.gmra.mxu1 %v6598_v58 }
 0x3b5   :  { %v4194_v30 = vmax.f32 %v4193_v38, %v3515_v4  ;;  %v3519_v53 = vadd.f32 %v3518_v40, %v6619_v14  ;;  %v2899_v35 = vpop.f32.mrf.mxu0  ;;  %3766 = vmatprep.mubr.bf16.mxu1 %v7624_v17 }
 0x3b6   :  { %v7175_v36 = vsel %vm4529_vm5, %v4694_v62, %v7056_v3  ;;  %v7179_v10 = vsel %vm4529_vm5, %v4695_v63, %v7060_v18  ;;  %v4231_v16 = vmax.f32 %v4230_v2, %v2898_v39  ;;  %v2900_v22 = vadd.f32 %v2899_v35, %v6508_v28  ;;  %v3520_v8 = vpop.f32.mrf.mxu1 }
 0x3b7   :  { %v4174_v9 = vmax.f32 %v4173_v7, %v3519_v53  ;;  %v3521_v58 = vadd.f32 %v3520_v8, %v6626_v55  ;;  %v2901_v42 = vpop.f32.mrf.mxu0 }
 0x3b8   :  { %v4211_v26 = vmax.f32 %v4210_v37, %v2900_v22  ;;  %v2902_v57 = vadd.f32 %v2901_v42, %v6513_v1  ;;  %v3522_v34 = vpop.f32.mrf.mxu1 }
 0x3b9   :  { %v4195_v52 = vmax.f32 %v4194_v30, %v3521_v58  ;;  %v3523_v3 = vadd.f32 %v3522_v34, %v6619_v14  ;;  %v2905_v23 = vpop.f32.mrf.mxu0 }
 0x3ba   :  { %v4232_v27 = vmax.f32 %v4231_v16, %v2902_v57  ;;  %v2906_v18 = vadd.f32 %v2905_v23, %v6508_v28  ;;  %v3524_v43 = vpop.f32.mrf.mxu1 }
 0x3bb   :  { %v4175_v46 = vmax.f32 %v4174_v9, %v3523_v3  ;;  %v3525_v38 = vadd.f32 %v3524_v43, %v6626_v55  ;;  %v2907_v29 = vpop.f32.mrf.mxu0 }
 0x3bc   :  { %v4212_v25 = vmax.f32 %v4211_v26, %v2906_v18  ;;  %v2908_v11 = vadd.f32 %v2907_v29, %v6513_v1  ;;  %v3528_v2 = vpop.f32.mrf.mxu1  ;;  %3767 = vmatmul.mubr.bf16.gmra.mxu1 %v6623_v45 }
 0x3bd   :  { %v4196_v6 = vmax.f32 %v4195_v52, %v3525_v38  ;;  %v3529_v5 = vadd.f32 %v3528_v2, %v6619_v14  ;;  %v2909_v7 = vpop.f32.mrf.mxu0  ;;  %3776 = vmatprep.mubr.bf16.mxu1 %v7624_v17 }
 0x3be   :  { %v4233_v4 = vmax.f32 %v4232_v27, %v2908_v11  ;;  %v2910_v47 = vadd.f32 %v2909_v7, %v6508_v28  ;;  %v3530_v62 = vpop.f32.mrf.mxu1 }
 0x3bf   :  { %v4176_v63 = vmax.f32 %v4175_v46, %v3529_v5  ;;  %v3531_v37 = vadd.f32 %v3530_v62, %v6626_v55  ;;  %v2911_v39 = vpop.f32.mrf.mxu0 }
 0x3c0   :  { %v4213_v40 = vmax.f32 %v4212_v25, %v2910_v47  ;;  %v2912_v30 = vadd.f32 %v2911_v39, %v6513_v1  ;;  %v3532_v53 = vpop.f32.mrf.mxu1 }
 0x3c1   :  { %v4197_v35 = vmax.f32 %v4196_v6, %v3531_v37  ;;  %v3533_v45 = vadd.f32 %v3532_v53, %v6619_v14  ;;  %v2915_v16 = vpop.f32.mrf.mxu0 }
 0x3c2   :  { %v4234_v22 = vmax.f32 %v4233_v4, %v2912_v30  ;;  %v2916_v8 = vadd.f32 %v2915_v16, %v6508_v28  ;;  %v3534_v17 = vpop.f32.mrf.mxu1 }
 0x3c3   :  { %v4177_v9 = vmax.f32 %v4176_v63, %v3533_v45  ;;  %v3535_v58 = vadd.f32 %v3534_v17, %v6626_v55  ;;  %v2917_v42 = vpop.f32.mrf.mxu0 }
 0x3c4   :  { %v4214_v26 = vmax.f32 %v4213_v40, %v2916_v8  ;;  %v2918_v57 = vadd.f32 %v2917_v42, %v6513_v1  ;;  %v3538_v34 = vpop.f32.mrf.mxu1  ;;  %3777 = vmatmul.mubr.bf16.gmra.mxu1 %v7627_v15 }
 0x3c5   :  { %v4198_v52 = vmax.f32 %v4197_v35, %v3535_v58  ;;  %v3539_v3 = vadd.f32 %v3538_v34, %v6619_v14  ;;  %v2919_v23 = vpop.f32.mrf.mxu0 }
 0x3c6   :  { %v4235_v27 = vmax.f32 %v4234_v22, %v2918_v57  ;;  %v2920_v18 = vadd.f32 %v2919_v23, %v6508_v28  ;;  %v3540_v43 = vpop.f32.mrf.mxu1 }
 0x3c7   :  { %v4178_v46 = vmax.f32 %v4177_v9, %v3539_v3  ;;  %v3541_v38 = vadd.f32 %v3540_v43, %v6626_v55  ;;  %v2921_v29 = vpop.f32.mrf.mxu0 }
 0x3c8   :  { %v4215_v25 = vmax.f32 %v4214_v26, %v2920_v18  ;;  %v2922_v11 = vadd.f32 %v2921_v29, %v6513_v1  ;;  %v3542_v2 = vpop.f32.mrf.mxu1 }
 0x3c9   :  { %v4199_v6 = vmax.f32 %v4198_v52, %v3541_v38  ;;  %v3543_v5 = vadd.f32 %v3542_v2, %v6619_v14  ;;  %v2925_v15 = vpop.f32.mrf.mxu0 }
 0x3ca   :  { %v4236_v7 = vmax.f32 %v4235_v27, %v2922_v11  ;;  %v2926_v4 = vadd.f32 %v2925_v15, %v6508_v28  ;;  %v3544_v47 = vpop.f32.mrf.mxu1 }
 0x3cb   :  { %v4179_v62 = vmax.f32 %v4178_v46, %v3543_v5  ;;  %v3545_v63 = vadd.f32 %v3544_v47, %v6626_v55  ;;  %v2927_v37 = vpop.f32.mrf.mxu0 }
 0x3cc   :  { %v4216_v39 = vmax.f32 %v4215_v25, %v2926_v4  ;;  %v2928_v40 = vadd.f32 %v2927_v37, %v6513_v1  ;;  %v3548_v30 = vpop.f32.mrf.mxu1 }
 0x3cd   :  { %v4180_v53 = vrot.slane %v4179_v62, 4  ;;  %v4200_v35 = vmax.f32 %v4199_v6, %v3545_v63  ;;  %v2929_v45 = vpop.f32.mrf.mxu0  ;;  %v3549_v3 = vadd.f32 %v3548_v30, %v6619_v14 }
 0x3ce   :  { %v4237_v16 = vmax.f32 %v4236_v7, %v2928_v40  ;;  %v2930_v22 = vadd.f32 %v2929_v45, %v6508_v28  ;;  %v3550_v8 = vpop.f32.mrf.mxu1 }
 0x3cf   :  { %v4181_v17 = vmax.f32 %v4179_v62, %v4180_v53  ;;  %v4201_v9 = vrot.slane %v4200_v35, 4  ;;  %v2931_v58 = vpop.f32.mrf.mxu0  ;;  %v3551_v18 = vadd.f32 %v3550_v8, %v6626_v55 }
 0x3d0   :  { %v4217_v42 = vmax.f32 %v4216_v39, %v2930_v22  ;;  %v2932_v26 = vadd.f32 %v2931_v58, %v6513_v1  ;;  %v3552_v57 = vpop.f32.mrf.mxu1 }
 0x3d1   :  { %v4182_v34 = vrot.slane %v4181_v17, 2  ;;  %v4202_v52 = vmax.f32 %v4200_v35, %v4201_v9  ;;  %v3553_v23 = vadd.f32 %v3552_v57, %v6619_v14  ;;  %v2935_v27 = vpop.f32.mrf.mxu0 }
 0x3d2   :  { %v4238_v43 = vmax.f32 %v4237_v16, %v2932_v26  ;;  %v2936_v46 = vadd.f32 %v2935_v27, %v6508_v28  ;;  %v3554_v38 = vpop.f32.mrf.mxu1 }
 0x3d3   :  { %v4183_v29 = vmax.f32 %v4181_v17, %v4182_v34  ;;  %v4203_v25 = vrot.slane %v4202_v52, 2  ;;  %v4249_v11 = vmax.f32 %v3549_v3, %v3553_v23  ;;  %v3555_v2 = vadd.f32 %v3554_v38, %v6626_v55  ;;  %v2937_v6 = vpop.f32.mrf.mxu0 }
 0x3d4   :  { %v4218_v5 = vmax.f32 %v4217_v42, %v2936_v46  ;;  %v2938_v15 = vadd.f32 %v2937_v6, %v6513_v1  ;;  %v3558_v7 = vpop.f32.mrf.mxu1 }
 0x3d5   :  { %v4184_v4 = vrot.slane %v4183_v29, 1  ;;  %v4204_v47 = vmax.f32 %v4202_v52, %v4203_v25  ;;  %v4270_v62 = vmax.f32 %v3551_v18, %v3555_v2  ;;  %v3559_v63 = vadd.f32 %v3558_v7, %v6619_v14  ;;  %v2939_v37 = vpop.f32.mrf.mxu0 }
 0x3d6   :  { %v4239_v39 = vmax.f32 %v4238_v43, %v2938_v15  ;;  %v2940_v40 = vadd.f32 %v2939_v37, %v6508_v28  ;;  %v3560_v30 = vpop.f32.mrf.mxu1 }
 0x3d7   :  { %v7217_v53 = vmax.f32 %v4183_v29, %v4184_v4  ;;  %v4205_v35 = vrot.slane %v4204_v47, 1  ;;  %v4250_v45 = vmax.f32 %v4249_v11, %v3559_v63  ;;  %v3561_v16 = vadd.f32 %v3560_v30, %v6626_v55  ;;  %v2941_v22 = vpop.f32.mrf.mxu0 }
 0x3d8   :  { %v4219_v8 = vmax.f32 %v4218_v5, %v2940_v40  ;;  %v2942_v17 = vadd.f32 %v2941_v22, %v6513_v1  ;;  %v3562_v9 = vpop.f32.mrf.mxu1 }
 0x3d9   :  { %v7221_v58 = vmax.f32 %v4204_v47, %v4205_v35  ;;  %v4271_v42 = vmax.f32 %v4270_v62, %v3561_v16  ;;  %v3563_v26 = vadd.f32 %v3562_v9, %v6619_v14  ;;  %v2945_v57 = vpop.f32.mrf.mxu0  ;;  %v7615_v23 = vmax.f32 %v7217_v53, 0.0 }
 0x3da   :  { %v4240_v34 = vmax.f32 %v4239_v39, %v2942_v17  ;;  %v2946_v52 = vadd.f32 %v2945_v57, %v6508_v28  ;;  %v3564_v3 = vpop.f32.mrf.mxu1 }
 0x3db   :  { %v7611_v27 = vmax.f32 %v7221_v58, 0.0  ;;  %v4251_v18 = vmax.f32 %v4250_v45, %v3563_v26  ;;  %v3565_v43 = vadd.f32 %v3564_v3, %v6626_v55  ;;  %v2947_v46 = vpop.f32.mrf.mxu0 }
 0x3dc   :  { %v4220_v38 = vmax.f32 %v4219_v8, %v2946_v52  ;;  %v2948_v29 = vadd.f32 %v2947_v46, %v6513_v1  ;;  %v3568_v25 = vpop.f32.mrf.mxu1 }
 0x3dd   :  { %v7233_v11 = vpack.c.bf16 %v7611_v27, %v7615_v23  ;;  %v4272_v2 = vmax.f32 %v4271_v42, %v3565_v43  ;;  %v3569_v6 = vadd.f32 %v3568_v25, %v6619_v14  ;;  %v2949_v5 = vpop.f32.mrf.mxu0 }
 0x3de   :  { %v4241_v15 = vmax.f32 %v4240_v34, %v2948_v29  ;;  %v2950_v7 = vadd.f32 %v2949_v5, %v6508_v28  ;;  %v3570_v4 = vpop.f32.mrf.mxu1 }
 0x3df   :  { %v4252_v47 = vmax.f32 %v4251_v18, %v3569_v6  ;;  %v3571_v62 = vadd.f32 %v3570_v4, %v6626_v55  ;;  %v2951_v63 = vpop.f32.mrf.mxu0 }
 0x3e0   :  { %v4221_v37 = vmax.f32 %v4220_v38, %v2950_v7  ;;  %v2952_v39 = vadd.f32 %v2951_v63, %v6513_v1  ;;  %v3572_v40 = vpop.f32.mrf.mxu1 }
 0x3e1   :  { %v4273_v30 = vmax.f32 %v4272_v2, %v3571_v62  ;;  %v3573_v35 = vadd.f32 %v3572_v40, %v6619_v14  ;;  %v2955_v45 = vpop.f32.mrf.mxu0 }
 0x3e2   :  { %v4222_v16 = vrot.slane %v4221_v37, 4  ;;  %v4242_v22 = vmax.f32 %v4241_v15, %v2952_v39  ;;  %v3574_v8 = vpop.f32.mrf.mxu1  ;;  %v2956_v38 = vadd.f32 %v2955_v45, %v6508_v28 }
 0x3e3   :  { %v4253_v17 = vmax.f32 %v4252_v47, %v3573_v35  ;;  %v3575_v9 = vadd.f32 %v3574_v8, %v6626_v55  ;;  %v2957_v42 = vpop.f32.mrf.mxu0 }
 0x3e4   :  { %v4223_v26 = vmax.f32 %v4221_v37, %v4222_v16  ;;  %v4243_v57 = vrot.slane %v4242_v22, 4  ;;  %v3578_v34 = vpop.f32.mrf.mxu1  ;;  %v2958_v2 = vadd.f32 %v2957_v42, %v6513_v1 }
 0x3e5   :  { %v4274_v52 = vmax.f32 %v4273_v30, %v3575_v9  ;;  %v3579_v3 = vadd.f32 %v3578_v34, %v6619_v14  ;;  %v2959_v18 = vpop.f32.mrf.mxu0 }
 0x3e6   :  { %v4224_v43 = vrot.slane %v4223_v26, 2  ;;  %v4244_v46 = vmax.f32 %v4242_v22, %v4243_v57  ;;  %v2960_v29 = vadd.f32 %v2959_v18, %v6508_v28  ;;  %v3580_v25 = vpop.f32.mrf.mxu1 }
 0x3e7   :  { %v4254_v6 = vmax.f32 %v4253_v17, %v3579_v3  ;;  %v3581_v5 = vadd.f32 %v3580_v25, %v6626_v55  ;;  %v2961_v15 = vpop.f32.mrf.mxu0 }
 0x3e8   :  { %v4225_v7 = vmax.f32 %v4223_v26, %v4224_v43  ;;  %v4245_v4 = vrot.slane %v4244_v46, 2  ;;  %v4291_v47 = vmax.f32 %v2956_v38, %v2960_v29  ;;  %v2962_v62 = vadd.f32 %v2961_v15, %v6513_v1  ;;  %v3582_v63 = vpop.f32.mrf.mxu1 }
 0x3e9   :  { %v4275_v37 = vmax.f32 %v4274_v52, %v3581_v5  ;;  %v3583_v39 = vadd.f32 %v3582_v63, %v6619_v14  ;;  %v2965_v40 = vpop.f32.mrf.mxu0 }
 0x3ea   :  { %v4226_v30 = vrot.slane %v4225_v7, 1  ;;  %v4246_v35 = vmax.f32 %v4244_v46, %v4245_v4  ;;  %v4312_v45 = vmax.f32 %v2958_v2, %v2962_v62  ;;  %v2966_v16 = vadd.f32 %v2965_v40, %v6508_v28  ;;  %v3584_v22 = vpop.f32.mrf.mxu1 }
 0x3eb   :  { %v4255_v8 = vmax.f32 %v4254_v6, %v3583_v39  ;;  %v3585_v17 = vadd.f32 %v3584_v22, %v6626_v55  ;;  %v2967_v9 = vpop.f32.mrf.mxu0 }
 0x3ec   :  { %v4227_v42 = vmax.f32 %v4225_v7, %v4226_v30  ;;  %v4247_v26 = vrot.slane %v4246_v35, 1  ;;  %v4292_v57 = vmax.f32 %v4291_v47, %v2966_v16  ;;  %v2968_v34 = vadd.f32 %v2967_v9, %v6513_v1  ;;  %v3588_v3 = vpop.f32.mrf.mxu1 }
 0x3ed   :  { %v4276_v52 = vmax.f32 %v4275_v37, %v3585_v17  ;;  %v3589_v18 = vadd.f32 %v3588_v3, %v6619_v14  ;;  %v2969_v43 = vpop.f32.mrf.mxu0 }
 0x3ee   :  { %v4479_v46 = vmax.f32 %v4227_v42, 0.0  ;;  %v4248_v38 = vmax.f32 %v4246_v35, %v4247_v26  ;;  %v4313_v29 = vmax.f32 %v4312_v45, %v2968_v34  ;;  %v2970_v25 = vadd.f32 %v2969_v43, %v6508_v28  ;;  %v3590_v2 = vpop.f32.mrf.mxu1 }
 0x3ef   :  { %v4256_v6 = vmax.f32 %v4255_v8, %v3589_v18  ;;  %v3591_v5 = vadd.f32 %v3590_v2, %v6626_v55  ;;  %v2971_v15 = vpop.f32.mrf.mxu0 }
 0x3f0   :  { %v7256_v7 = vsel %vm4531_vm6, %v4479_v46, %v7159_v0  ;;  %v4480_v4 = vmax.f32 %v4248_v38, 0.0  ;;  %v4293_v47 = vmax.f32 %v4292_v57, %v2970_v25  ;;  %v2972_v62 = vadd.f32 %v2971_v15, %v6513_v1  ;;  %v3592_v63 = vpop.f32.mrf.mxu1 }
 0x3f1   :  { %v4277_v37 = vmax.f32 %v4276_v52, %v3591_v5  ;;  %v3593_v39 = vadd.f32 %v3592_v63, %v6619_v14  ;;  %v2975_v40 = vpop.f32.mrf.mxu0 }
 0x3f2   :  { %v7262_v30 = vsel %vm4531_vm6, %v4480_v4, %v7165_v48  ;;  %v4948_v35 = vpack.c.bf16 %v4480_v4, %v4479_v46  ;;  %v4314_v45 = vmax.f32 %v4313_v29, %v2972_v62  ;;  %v2976_v16 = vadd.f32 %v2975_v40, %v6508_v28  ;;  %v3594_v22 = vpop.f32.mrf.mxu1 }
 0x3f3   :  { %v4257_v0 = vmax.f32 %v4256_v6, %v3593_v39  ;;  %v3595_v8 = vadd.f32 %v3594_v22, %v6626_v55  ;;  %v2977_v17 = vpop.f32.mrf.mxu0 }
 0x3f4   :  { %v4698_v9 = vunpack.c.l.b16 %v4948_v35  ;;  %v4699_v42 = vunpack.c.h.b16 %v4948_v35  ;;  %v4294_v26 = vmax.f32 %v4293_v47, %v2976_v16  ;;  %v2978_v57 = vadd.f32 %v2977_v17, %v6513_v1  ;;  %v3598_v34 = vpop.f32.mrf.mxu1 }
 0x3f5   :  { %v4278_v3 = vmax.f32 %v4277_v37, %v3595_v8  ;;  %v3599_v52 = vadd.f32 %v3598_v34, %v6619_v14  ;;  %v2979_v48 = vpop.f32.mrf.mxu0 }
 0x3f6   :  { %v7270_v18 = vsel %vm4531_vm6, %v4698_v9, %v7175_v36  ;;  %v7274_v43 = vsel %vm4531_vm6, %v4699_v42, %v7179_v10  ;;  %v4315_v46 = vmax.f32 %v4314_v45, %v2978_v57  ;;  %v2980_v38 = vadd.f32 %v2979_v48, %v6508_v28  ;;  %v3600_v29 = vpop.f32.mrf.mxu1 }
 0x3f7   :  { %v4258_v25 = vmax.f32 %v4257_v0, %v3599_v52  ;;  %v3601_v2 = vadd.f32 %v3600_v29, %v6626_v55  ;;  %v2981_v6 = vpop.f32.mrf.mxu0 }
 0x3f8   :  { %v4295_v5 = vmax.f32 %v4294_v26, %v2980_v38  ;;  %v2982_v15 = vadd.f32 %v2981_v6, %v6513_v1  ;;  %v3602_v4 = vpop.f32.mrf.mxu1 }
 0x3f9   :  { %v4279_v47 = vmax.f32 %v4278_v3, %v3601_v2  ;;  %v3603_v36 = vadd.f32 %v3602_v4, %v6619_v14  ;;  %v2985_v62 = vpop.f32.mrf.mxu0 }
 0x3fa   :  { %v4316_v63 = vmax.f32 %v4315_v46, %v2982_v15  ;;  %v2986_v10 = vadd.f32 %v2985_v62, %v6508_v28  ;;  %v3604_v37 = vpop.f32.mrf.mxu1 }
 0x3fb   :  { %v4259_v39 = vmax.f32 %v4258_v25, %v3603_v36  ;;  %v3605_v40 = vadd.f32 %v3604_v37, %v6626_v55  ;;  %v2987_v35 = vpop.f32.mrf.mxu0 }
 0x3fc   :  { %v4296_v45 = vmax.f32 %v4295_v5, %v2986_v10  ;;  %v2988_v16 = vadd.f32 %v2987_v35, %v6513_v1  ;;  %v3608_v22 = vpop.f32.mrf.mxu1 }
 0x3fd   :  { %v4280_v0 = vmax.f32 %v4279_v47, %v3605_v40  ;;  %v3609_v8 = vadd.f32 %v3608_v22, %v6619_v14  ;;  %v2989_v17 = vpop.f32.mrf.mxu0 }
 0x3fe   :  { %v4317_v9 = vmax.f32 %v4316_v63, %v2988_v16  ;;  %v2990_v42 = vadd.f32 %v2989_v17, %v6508_v28  ;;  %v3610_v26 = vpop.f32.mrf.mxu1 }
 0x3ff   :  { %v4260_v57 = vmax.f32 %v4259_v39, %v3609_v8  ;;  %v3611_v34 = vadd.f32 %v3610_v26, %v6626_v55  ;;  %v2991_v3 = vpop.f32.mrf.mxu0 }
 0x400   :  { %v4297_v52 = vmax.f32 %v4296_v45, %v2990_v42  ;;  %v2992_v48 = vadd.f32 %v2991_v3, %v6513_v1  ;;  %v3612_v46 = vpop.f32.mrf.mxu1 }
 0x401   :  { %v4281_v38 = vmax.f32 %v4280_v0, %v3611_v34  ;;  %v3613_v29 = vadd.f32 %v3612_v46, %v6619_v14  ;;  %v2995_v25 = vpop.f32.mrf.mxu0 }
 0x402   :  { %v4318_v2 = vmax.f32 %v4317_v9, %v2992_v48  ;;  %v2996_v6 = vadd.f32 %v2995_v25, %v6508_v28  ;;  %v3614_v5 = vpop.f32.mrf.mxu1 }
 0x403   :  { %v4261_v15 = vmax.f32 %v4260_v57, %v3613_v29  ;;  %v3615_v4 = vadd.f32 %v3614_v5, %v6626_v55  ;;  %v2997_v47 = vpop.f32.mrf.mxu0 }
 0x404   :  { %v4298_v36 = vmax.f32 %v4297_v52, %v2996_v6  ;;  %v2998_v62 = vadd.f32 %v2997_v47, %v6513_v1  ;;  %v3618_v63 = vpop.f32.mrf.mxu1 }
 0x405   :  { %v4282_v10 = vmax.f32 %v4281_v38, %v3615_v4  ;;  %v3619_v37 = vadd.f32 %v3618_v63, %v6619_v14  ;;  %v2999_v39 = vpop.f32.mrf.mxu0 }
 0x406   :  { %v4319_v40 = vmax.f32 %v4318_v2, %v2998_v62  ;;  %v3000_v35 = vadd.f32 %v2999_v39, %v6508_v28  ;;  %v3620_v45 = vpop.f32.mrf.mxu1 }
 0x407   :  { %v4262_v16 = vmax.f32 %v4261_v15, %v3619_v37  ;;  %v3621_v22 = vadd.f32 %v3620_v45, %v6626_v55  ;;  %v3001_v0 = vpop.f32.mrf.mxu0 }
 0x408   :  { %v4299_v8 = vmax.f32 %v4298_v36, %v3000_v35  ;;  %v3002_v17 = vadd.f32 %v3001_v0, %v6513_v1  ;;  %v3622_v9 = vpop.f32.mrf.mxu1 }
 0x409   :  { %v4283_v42 = vmax.f32 %v4282_v10, %v3621_v22  ;;  %v3623_v26 = vadd.f32 %v3622_v9, %v6619_v14  ;;  %v3005_v57 = vpop.f32.mrf.mxu0 }
 0x40a   :  { %v4320_v34 = vmax.f32 %v4319_v40, %v3002_v17  ;;  %v3006_v3 = vadd.f32 %v3005_v57, %v6508_v28  ;;  %v3624_v52 = vpop.f32.mrf.mxu1 }
 0x40b   :  { %v4263_v48 = vmax.f32 %v4262_v16, %v3623_v26  ;;  %v3625_v46 = vadd.f32 %v3624_v52, %v6626_v55  ;;  %v3007_v38 = vpop.f32.mrf.mxu0 }
 0x40c   :  { %v4300_v29 = vmax.f32 %v4299_v8, %v3006_v3  ;;  %v3008_v25 = vadd.f32 %v3007_v38, %v6513_v1  ;;  %v3628_v2 = vpop.f32.mrf.mxu1 }
 0x40d   :  { %v4264_v6 = vrot.slane %v4263_v48, 4  ;;  %v4284_v5 = vmax.f32 %v4283_v42, %v3625_v46  ;;  %v3009_v15 = vpop.f32.mrf.mxu0  ;;  %v3629_v16 = vadd.f32 %v3628_v2, %v6619_v14 }
 0x40e   :  { %v4321_v4 = vmax.f32 %v4320_v34, %v3008_v25  ;;  %v3010_v47 = vadd.f32 %v3009_v15, %v6508_v28  ;;  %v3630_v36 = vpop.f32.mrf.mxu1 }
 0x40f   :  { %v4265_v62 = vmax.f32 %v4263_v48, %v4264_v6  ;;  %v4285_v63 = vrot.slane %v4284_v5, 4  ;;  %v3011_v10 = vpop.f32.mrf.mxu0  ;;  %v3631_v8 = vadd.f32 %v3630_v36, %v6626_v55 }
 0x410   :  { %v4301_v37 = vmax.f32 %v4300_v29, %v3010_v47  ;;  %v3012_v39 = vadd.f32 %v3011_v10, %v6513_v1  ;;  %v3632_v40 = vpop.f32.mrf.mxu1 }
 0x411   :  { %v4266_v35 = vrot.slane %v4265_v62, 2  ;;  %v4286_v45 = vmax.f32 %v4284_v5, %v4285_v63  ;;  %v3633_v22 = vadd.f32 %v3632_v40, %v6619_v14  ;;  %v3015_v0 = vpop.f32.mrf.mxu0 }
 0x412   :  { %v4322_v17 = vmax.f32 %v4321_v4, %v3012_v39  ;;  %v3016_v9 = vadd.f32 %v3015_v0, %v6508_v28  ;;  %v3634_v42 = vpop.f32.mrf.mxu1 }
 0x413   :  { %v4267_v26 = vmax.f32 %v4265_v62, %v4266_v35  ;;  %v4287_v57 = vrot.slane %v4286_v45, 2  ;;  %v4333_v34 = vmax.f32 %v3629_v16, %v3633_v22  ;;  %v3635_v3 = vadd.f32 %v3634_v42, %v6626_v55  ;;  %v3017_v52 = vpop.f32.mrf.mxu0 }
 0x414   :  { %v4302_v48 = vmax.f32 %v4301_v37, %v3016_v9  ;;  %v3018_v46 = vadd.f32 %v3017_v52, %v6513_v1  ;;  %v3638_v38 = vpop.f32.mrf.mxu1 }
 0x415   :  { %v4268_v29 = vrot.slane %v4267_v26, 1  ;;  %v4288_v25 = vmax.f32 %v4286_v45, %v4287_v57  ;;  %v4354_v2 = vmax.f32 %v3631_v8, %v3635_v3  ;;  %v3639_v6 = vadd.f32 %v3638_v38, %v6619_v14  ;;  %v3019_v5 = vpop.f32.mrf.mxu0 }
 0x416   :  { %v4323_v15 = vmax.f32 %v4322_v17, %v3018_v46  ;;  %v3020_v4 = vadd.f32 %v3019_v5, %v6508_v28  ;;  %v3640_v47 = vpop.f32.mrf.mxu1 }
 0x417   :  { %v7309_v36 = vmax.f32 %v4267_v26, %v4268_v29  ;;  %v4289_v62 = vrot.slane %v4288_v25, 1  ;;  %v4334_v63 = vmax.f32 %v4333_v34, %v3639_v6  ;;  %v3641_v10 = vadd.f32 %v3640_v47, %v6626_v55  ;;  %v3021_v37 = vpop.f32.mrf.mxu0 }
 0x418   :  { %v4303_v39 = vmax.f32 %v4302_v48, %v3020_v4  ;;  %v3022_v40 = vadd.f32 %v3021_v37, %v6513_v1  ;;  %v3642_v35 = vpop.f32.mrf.mxu1 }
 0x419   :  { %v7313_v45 = vmax.f32 %v4288_v25, %v4289_v62  ;;  %v4355_v16 = vmax.f32 %v4354_v2, %v3641_v10  ;;  %v3643_v22 = vadd.f32 %v3642_v35, %v6619_v14  ;;  %v3025_v0 = vpop.f32.mrf.mxu0  ;;  %v7613_v42 = vmax.f32 %v7309_v36, 0.0 }
 0x41a   :  { %v4324_v8 = vmax.f32 %v4323_v15, %v3022_v40  ;;  %v3026_v17 = vadd.f32 %v3025_v0, %v6508_v28  ;;  %v3644_v9 = vpop.f32.mrf.mxu1 }
 0x41b   :  { %v7610_v26 = vmax.f32 %v7313_v45, 0.0  ;;  %v4335_v57 = vmax.f32 %v4334_v63, %v3643_v22  ;;  %v3645_v34 = vadd.f32 %v3644_v9, %v6626_v55  ;;  %v3027_v3 = vpop.f32.mrf.mxu0 }
 0x41c   :  { %v4304_v52 = vmax.f32 %v4303_v39, %v3026_v17  ;;  %v3028_v48 = vadd.f32 %v3027_v3, %v6513_v1  ;;  %v3648_v46 = vpop.f32.mrf.mxu1 }
 0x41d   :  { %v7325_v38 = vpack.c.bf16 %v7610_v26, %v7613_v42  ;;  %v4356_v29 = vmax.f32 %v4355_v16, %v3645_v34  ;;  %v3649_v25 = vadd.f32 %v3648_v46, %v6619_v14  ;;  %v3029_v2 = vpop.f32.mrf.mxu0 }
 0x41e   :  { %v4325_v6 = vmax.f32 %v4324_v8, %v3028_v48  ;;  %v3030_v5 = vadd.f32 %v3029_v2, %v6508_v28  ;;  %v3650_v15 = vpop.f32.mrf.mxu1 }
 0x41f   :  { %v4336_v4 = vmax.f32 %v4335_v57, %v3649_v25  ;;  %v3651_v47 = vadd.f32 %v3650_v15, %v6626_v55  ;;  %v3031_v62 = vpop.f32.mrf.mxu0 }
 0x420   :  { %v4305_v63 = vmax.f32 %v4304_v52, %v3030_v5  ;;  %v3032_v10 = vadd.f32 %v3031_v62, %v6513_v1  ;;  %v3652_v37 = vpop.f32.mrf.mxu1 }
 0x421   :  { %v4357_v39 = vmax.f32 %v4356_v29, %v3651_v47  ;;  %v3653_v40 = vadd.f32 %v3652_v37, %v6619_v14  ;;  %v7332_v35 = vpop.f32.mrf.mxu0 }
 0x422   :  { %v4306_v16 = vrot.slane %v4305_v63, 4  ;;  %v4326_v22 = vmax.f32 %v4325_v6, %v3032_v10  ;;  %v3654_v0 = vpop.f32.mrf.mxu1 }
 0x423   :  { %v4337_v8 = vmax.f32 %v4336_v4, %v3653_v40  ;;  %v3655_v17 = vadd.f32 %v3654_v0, %v6626_v55  ;;  %v7335_v9 = vpop.f32.mrf.mxu0 }
 0x424   :  { %v4307_v57 = vmax.f32 %v4305_v63, %v4306_v16  ;;  %v4327_v34 = vrot.slane %v4326_v22, 4  ;;  %v3658_v3 = vpop.f32.mrf.mxu1 }
 0x425   :  { %v4358_v52 = vmax.f32 %v4357_v39, %v3655_v17  ;;  %v3659_v48 = vadd.f32 %v3658_v3, %v6619_v14  ;;  %v7338_v46 = vpop.f32.mrf.mxu0 }
 0x426   :  { %v4308_v29 = vrot.slane %v4307_v57, 2  ;;  %v4328_v25 = vmax.f32 %v4326_v22, %v4327_v34  ;;  %v3660_v2 = vpop.f32.mrf.mxu1 }
 0x427   :  { %v4338_v5 = vmax.f32 %v4337_v8, %v3659_v48  ;;  %v3661_v6 = vadd.f32 %v3660_v2, %v6626_v55  ;;  %v7341_v15 = vpop.f32.mrf.mxu0 }
 0x428   :  { %v4309_v4 = vmax.f32 %v4307_v57, %v4308_v29  ;;  %v4329_v47 = vrot.slane %v4328_v25, 2  ;;  %v3662_v62 = vpop.f32.mrf.mxu1 }
 0x429   :  { %v4359_v10 = vmax.f32 %v4358_v52, %v3661_v6  ;;  %v3663_v63 = vadd.f32 %v3662_v62, %v6619_v14  ;;  %v7344_v37 = vpop.f32.mrf.mxu0 }
 0x42a   :  { %v4310_v39 = vrot.slane %v4309_v4, 1  ;;  %v4330_v40 = vmax.f32 %v4328_v25, %v4329_v47  ;;  %v3664_v16 = vpop.f32.mrf.mxu1 }
 0x42b   :  { %v4339_v0 = vmax.f32 %v4338_v5, %v3663_v63  ;;  %v3665_v22 = vadd.f32 %v3664_v16, %v6626_v55  ;;  %v7347_v17 = vpop.f32.mrf.mxu0 }
 0x42c   :  { %v4311_v8 = vmax.f32 %v4309_v4, %v4310_v39  ;;  %v4331_v34 = vrot.slane %v4330_v40, 1  ;;  %v3668_v3 = vpop.f32.mrf.mxu1 }
 0x42d   :  { %v4360_v57 = vmax.f32 %v4359_v10, %v3665_v22  ;;  %v3669_v48 = vadd.f32 %v3668_v3, %v6619_v14  ;;  %v3049_v52 = vpop.f32.mrf.mxu0 }
 0x42e   :  { %v4483_v29 = vmax.f32 %v4311_v8, 0.0  ;;  %v4332_v2 = vmax.f32 %v4330_v40, %v4331_v34  ;;  %v3670_v6 = vpop.f32.mrf.mxu1 }
 0x42f   :  { %v4340_v62 = vmax.f32 %v4339_v0, %v3669_v48  ;;  %v3671_v25 = vadd.f32 %v3670_v6, %v6626_v55  ;;  %v7351_v47 = vpop.f32.mrf.mxu0 }
 0x430   :  { %v7355_v5 = vsel %vm4533_vm7, %v4483_v29, %v7256_v7  ;;  %v4484_v4 = vmax.f32 %v4332_v2, 0.0  ;;  %v3672_v63 = vpop.f32.mrf.mxu1 }
 0x431   :  { %v4361_v39 = vmax.f32 %v4360_v57, %v3671_v25  ;;  %v3673_v10 = vadd.f32 %v3672_v63, %v6619_v14  ;;  %v3055_v16 = vpop.f32.mrf.mxu0 }
 0x432   :  { %v7360_v22 = vsel %vm4533_vm7, %v4484_v4, %v7262_v30  ;;  %v4950_v40 = vpack.c.bf16 %v4484_v4, %v4483_v29  ;;  %v3674_v0 = vpop.f32.mrf.mxu1 }
 0x433   :  { %v4341_v8 = vmax.f32 %v4340_v62, %v3673_v10  ;;  %v3675_v34 = vadd.f32 %v3674_v0, %v6626_v55  ;;  %v3057_v3 = vpop.f32.mrf.mxu0 }
 0x434   :  { %v4702_v48 = vunpack.c.l.b16 %v4950_v40  ;;  %v4703_v6 = vunpack.c.h.b16 %v4950_v40  ;;  %v3678_v7 = vpop.f32.mrf.mxu1 }
 0x435   :  { %v4362_v26 = vmax.f32 %v4361_v39, %v3675_v34  ;;  %v3679_v2 = vadd.f32 %v3678_v7, %v6619_v14  ;;  %v3059_v57 = vpop.f32.mrf.mxu0 }
 0x436   :  { %v7366_v25 = vsel %vm4533_vm7, %v4702_v48, %v7270_v18  ;;  %v7370_v30 = vsel %vm4533_vm7, %v4703_v6, %v7274_v43  ;;  %v3680_v29 = vpop.f32.mrf.mxu1 }
 0x437   :  { %v4342_v62 = vmax.f32 %v4341_v8, %v3679_v2  ;;  %v3681_v4 = vadd.f32 %v3680_v29, %v6626_v55  ;;  %v3061_v63 = vpop.f32.mrf.mxu0 }
 0x438   :  { %v3682_v10 = vpop.f32.mrf.mxu1 }
 0x439   :  { %v4363_v40 = vmax.f32 %v4362_v26, %v3681_v4  ;;  %v3683_v39 = vadd.f32 %v3682_v10, %v6619_v14  ;;  %v3065_v0 = vpop.f32.mrf.mxu0  ;;  %v3040_v26 = vadd.f32 %v7338_v46, %v6508_v28 }
 0x43a   :  { %v3684_v34 = vpop.f32.mrf.mxu1 }
 0x43b   :  { %v4343_v7 = vmax.f32 %v4342_v62, %v3683_v39  ;;  %v3685_v27 = vadd.f32 %v3684_v34, %v6626_v55  ;;  %v3067_v18 = vpop.f32.mrf.mxu0  ;;  %v3036_v34 = vadd.f32 %v7332_v35, %v6508_v28  ;;  %v3050_v35 = vadd.f32 %v3049_v52, %v6508_v28 }
 0x43c   :  { %v3688_v48 = vpop.f32.mrf.mxu1  ;;  %v3058_v52 = vadd.f32 %v3057_v3, %v6513_v1 }
 0x43d   :  { %v4364_v44 = vmax.f32 %v4363_v40, %v3685_v27  ;;  %v3689_v43 = vadd.f32 %v3688_v48, %v6619_v14  ;;  %v3069_v6 = vpop.f32.mrf.mxu0  ;;  %v3042_v27 = vadd.f32 %v7341_v15, %v6513_v1  ;;  %v3046_v40 = vadd.f32 %v7344_v37, %v6508_v28 }
 0x43e   :  { %v3690_v42 = vpop.f32.mrf.mxu1  ;;  %v4375_v46 = vmax.f32 %v3036_v34, %v3040_v26 }
 0x43f   :  { %v4344_v8 = vmax.f32 %v4343_v7, %v3689_v43  ;;  %v3691_v2 = vadd.f32 %v3690_v42, %v6626_v55  ;;  %v3071_v29 = vpop.f32.mrf.mxu0 }
 0x440   :  { %v3692_v4 = vpop.f32.mrf.mxu1  ;;  %v4376_v50 = vmax.f32 %v4375_v46, %v3046_v40 }
 0x441   :  { %v4365_v10 = vmax.f32 %v4364_v44, %v3691_v2  ;;  %v3693_v62 = vadd.f32 %v3692_v4, %v6619_v14  ;;  %v3075_v39 = vpop.f32.mrf.mxu0  ;;  %v3038_v44 = vadd.f32 %v7335_v9, %v6513_v1  ;;  %v3048_v2 = vadd.f32 %v7347_v17, %v6513_v1 }
 0x442   :  { %v3694_v7 = vpop.f32.mrf.mxu1  ;;  %v4377_v19 = vmax.f32 %v4376_v50, %v3050_v35 }
 0x443   :  { %v4345_v42 = vmax.f32 %v4344_v8, %v3693_v62  ;;  %v3695_v48 = vadd.f32 %v3694_v7, %v6626_v55  ;;  %v3077_v43 = vpop.f32.mrf.mxu0  ;;  %v4396_v37 = vmax.f32 %v3038_v44, %v3042_v27  ;;  %v3052_v8 = vadd.f32 %v7351_v47, %v6513_v1 }
 0x444   :  { %v3698_v4 = vpop.f32.mrf.mxu1  ;;  %v3056_v62 = vadd.f32 %v3055_v16, %v6508_v28  ;;  %v3062_v16 = vadd.f32 %v3061_v63, %v6513_v1 }
 0x445   :  { %v4366_v56 = vmax.f32 %v4365_v10, %v3695_v48  ;;  %v3699_v15 = vadd.f32 %v3698_v4, %v6619_v14  ;;  %v3079_v23 = vpop.f32.mrf.mxu0  ;;  %v4397_v17 = vmax.f32 %v4396_v37, %v3048_v2  ;;  %v3060_v10 = vadd.f32 %v3059_v57, %v6508_v28 }
 0x446   :  { %v3700_v7 = vpop.f32.mrf.mxu1  ;;  %v4378_v47 = vmax.f32 %v4377_v19, %v3056_v62  ;;  %v3068_v57 = vadd.f32 %v3067_v18, %v6513_v1 }
 0x447   :  { %v4346_v9 = vmax.f32 %v4345_v42, %v3699_v15  ;;  %v3701_v26 = vadd.f32 %v3700_v7, %v6626_v55  ;;  %v3081_v34 = vpop.f32.mrf.mxu0  ;;  %v4398_v44 = vmax.f32 %v4397_v17, %v3052_v8  ;;  %v3066_v42 = vadd.f32 %v3065_v0, %v6508_v28 }
 0x448   :  { %v3702_v48 = vpop.f32.mrf.mxu1  ;;  %v4379_v3 = vmax.f32 %v4378_v47, %v3060_v10  ;;  %v3072_v0 = vadd.f32 %v3071_v29, %v6513_v1 }
 0x449   :  { %v4367_v4 = vmax.f32 %v4366_v56, %v3701_v26  ;;  %v3703_v27 = vadd.f32 %v3702_v48, %v6619_v14  ;;  %v3085_v40 = vpop.f32.mrf.mxu0  ;;  %v4399_v35 = vmax.f32 %v4398_v44, %v3058_v52  ;;  %v3070_v56 = vadd.f32 %v3069_v6, %v6508_v28 }
 0x44a   :  { %v3704_v46 = vpop.f32.mrf.mxu1  ;;  %v4380_v63 = vmax.f32 %v4379_v3, %v3066_v42  ;;  %v3078_v6 = vadd.f32 %v3077_v43, %v6513_v1 }
 0x44b   :  { %v4347_v15 = vmax.f32 %v4346_v9, %v3703_v27  ;;  %v3705_v2 = vadd.f32 %v3704_v46, %v6626_v55  ;;  %v3087_v50 = vpop.f32.mrf.mxu0  ;;  %v4400_v62 = vmax.f32 %v4399_v35, %v3062_v16  ;;  %v3076_v9 = vadd.f32 %v3075_v39, %v6508_v28 }
 0x44c   :  { %v7405_v37 = vpop.f32.mrf.mxu1  ;;  %v4381_v18 = vmax.f32 %v4380_v63, %v3070_v56  ;;  %v3080_v27 = vadd.f32 %v3079_v23, %v6508_v28  ;;  %v3082_v39 = vadd.f32 %v3081_v34, %v6513_v1  ;;  %v3086_v46 = vadd.f32 %v3085_v40, %v6508_v28 }
 0x44d   :  { %v4348_v7 = vrot.slane %v4347_v15, 4  ;;  %v4368_v8 = vmax.f32 %v4367_v4, %v3705_v2  ;;  %v3089_v19 = vpop.f32.mrf.mxu0  ;;  %v4401_v48 = vmax.f32 %v4400_v62, %v3068_v57  ;;  %v3088_v23 = vadd.f32 %v3087_v50, %v6513_v1 }
 0x44e   :  { %v7409_v26 = vpop.f32.mrf.mxu1  ;;  %v4382_v29 = vmax.f32 %v4381_v18, %v3076_v9  ;;  %v3090_v56 = vadd.f32 %v3089_v19, %v6508_v28 }
 0x44f   :  { %v4349_v17 = vmax.f32 %v4347_v15, %v4348_v7  ;;  %v4369_v52 = vrot.slane %v4368_v8, 4  ;;  %v3091_v10 = vpop.f32.mrf.mxu0  ;;  %v4402_v42 = vmax.f32 %v4401_v48, %v3072_v0 }
 0x450   :  { %v7413_v44 = vpop.f32.mrf.mxu1  ;;  %v4383_v43 = vmax.f32 %v4382_v29, %v3080_v27  ;;  %v3092_v40 = vadd.f32 %v3091_v10, %v6513_v1 }
 0x451   :  { %v4350_v4 = vrot.slane %v4349_v17, 2  ;;  %v4370_v47 = vmax.f32 %v4368_v8, %v4369_v52  ;;  %v3095_v16 = vpop.f32.mrf.mxu0  ;;  %v4403_v57 = vmax.f32 %v4402_v42, %v3078_v6 }
 0x452   :  { %v7417_v15 = vpop.f32.mrf.mxu1  ;;  %v4384_v34 = vmax.f32 %v4383_v43, %v3086_v46  ;;  %v3096_v9 = vadd.f32 %v3095_v16, %v6508_v28 }
 0x453   :  { %v4351_v2 = vmax.f32 %v4349_v17, %v4350_v4  ;;  %v4371_v35 = vrot.slane %v4370_v47, 2  ;;  %v3097_v3 = vpop.f32.mrf.mxu0  ;;  %v4404_v0 = vmax.f32 %v4403_v57, %v3082_v39 }
 0x454   :  { %v7421_v7 = vpop.f32.mrf.mxu1  ;;  %v4385_v6 = vmax.f32 %v4384_v34, %v3090_v56  ;;  %v3098_v19 = vadd.f32 %v3097_v3, %v6513_v1 }
 0x455   :  { %v4352_v8 = vrot.slane %v4351_v2, 1  ;;  %v4372_v62 = vmax.f32 %v4370_v47, %v4371_v35  ;;  %v3099_v63 = vpop.f32.mrf.mxu0  ;;  %v4405_v50 = vmax.f32 %v4404_v0, %v3088_v23 }
 0x456   :  { %v7425_v17 = vpop.f32.mrf.mxu1  ;;  %v3100_v27 = vadd.f32 %v3099_v63, %v6508_v28  ;;  %v4386_v29 = vmax.f32 %v4385_v6, %v3096_v9 }
 0x457   :  { %v7427_v52 = vmax.f32 %v4351_v2, %v4352_v8  ;;  %v4373_v48 = vrot.slane %v4372_v62, 1  ;;  %v3101_v18 = vpop.f32.mrf.mxu0  ;;  %v4406_v10 = vmax.f32 %v4405_v50, %v3092_v40 }
 0x458   :  { %v7431_v4 = vpop.f32.mrf.mxu1  ;;  %v3102_v16 = vadd.f32 %v3101_v18, %v6513_v1  ;;  %v4387_v43 = vmax.f32 %v4386_v29, %v3100_v27 }
 0x459   :  { %v7433_v47 = vmax.f32 %v4372_v62, %v4373_v48  ;;  %v3105_v42 = vpop.f32.mrf.mxu0  ;;  %v7619_v2 = vmax.f32 %v7427_v52, 0.0  ;;  %v4407_v3 = vmax.f32 %v4406_v10, %v3098_v19 }
 0x45a   :  { %v3106_v39 = vadd.f32 %v3105_v42, %v6508_v28  ;;  %v3724_v46 = vpop.f32.mrf.mxu1 }
 0x45b   :  { %v7618_v35 = vmax.f32 %v7433_v47, 0.0  ;;  %v3107_v57 = vpop.f32.mrf.mxu0  ;;  %v4408_v63 = vmax.f32 %v4407_v3, %v3102_v16 }
 0x45c   :  { %v3108_v23 = vadd.f32 %v3107_v57, %v6513_v1  ;;  %v3728_v56 = vpop.f32.mrf.mxu1  ;;  %v4388_v0 = vmax.f32 %v4387_v43, %v3106_v39 }
 0x45d   :  { %v7444_v8 = vpack.c.bf16 %v7618_v35, %v7619_v2  ;;  %v3109_v62 = vpop.f32.mrf.mxu0 }
 0x45e   :  { %v3110_v34 = vadd.f32 %v3109_v62, %v6508_v28  ;;  %v3730_v40 = vpop.f32.mrf.mxu1  ;;  %v4409_v48 = vmax.f32 %v4408_v63, %v3108_v23 }
 0x45f   :  { %v3111_v9 = vpop.f32.mrf.mxu0 }
 0x460   :  { %v4389_v18 = vmax.f32 %v4388_v0, %v3110_v34  ;;  %v3112_v50 = vadd.f32 %v3111_v9, %v6513_v1  ;;  %v3732_v6 = vpop.f32.mrf.mxu1  ;;  %v3713_v34 = vadd.f32 %v7413_v44, %v6619_v14  ;;  %v3715_v9 = vadd.f32 %v7417_v15, %v6626_v55 }
 0x461   :  { %v3148_v19 = vpop.f32.mrf.mxu0  ;;  %v3719_v44 = vadd.f32 %v7421_v7, %v6619_v14  ;;  %v3721_v15 = vadd.f32 %v7425_v17, %v6626_v55  ;;  %v7630_v17 = vmax.f32 %v6717_v20, %v6728_v61 }
 0x462   :  { %v4390_v27 = vrot.slane %v4389_v18, 4  ;;  %v4410_v42 = vmax.f32 %v4409_v48, %v3112_v50  ;;  %v3734_v10 = vpop.f32.mrf.mxu1  ;;  %v3149_v62 = vadd.f32 %v3148_v19, %v6619_v14  ;;  %v3709_v19 = vadd.f32 %v7405_v37, %v6619_v14 }
 0x463   :  { %v3150_v29 = vpop.f32.mrf.mxu0  ;;  %v3723_v37 = vadd.f32 %v7431_v4, %v6619_v14 }
 0x464   :  { %v4391_v57 = vmax.f32 %v4389_v18, %v4390_v27  ;;  %v4411_v35 = vrot.slane %v4410_v42, 4  ;;  %v3738_v2 = vpop.f32.mrf.mxu1  ;;  %v3151_v48 = vadd.f32 %v3150_v29, %v6626_v55 }
 0x465   :  { %v3152_v43 = vpop.f32.mrf.mxu0 }
 0x466   :  { %v4392_v23 = vrot.slane %v4391_v57, 2  ;;  %v4412_v1 = vmax.f32 %v4410_v42, %v4411_v35  ;;  %v3153_v63 = vadd.f32 %v3152_v43, %v6619_v14  ;;  %v3740_v0 = vpop.f32.mrf.mxu1  ;;  %v3711_v43 = vadd.f32 %v7409_v26, %v6626_v55 }
 0x467   :  { %v3154_v18 = vpop.f32.mrf.mxu0  ;;  %v3725_v26 = vadd.f32 %v3724_v46, %v6626_v55 }
 0x468   :  { %v4393_v50 = vmax.f32 %v4391_v57, %v4392_v23  ;;  %v4413_v27 = vrot.slane %v4412_v1, 2  ;;  %v3829_v3 = vmax.f32 %v3149_v62, %v3153_v63  ;;  %v3155_v35 = vadd.f32 %v3154_v18, %v6626_v55  ;;  %v3742_v42 = vpop.f32.mrf.mxu1 }
 0x469   :  { %v7629_v57 = vmax.f32 %v6713_v60, %v6720_v32  ;;  %v4417_v18 = vmax.f32 %v3709_v19, %v3713_v34  ;;  %v4438_v39 = vmax.f32 %v3711_v43, %v3715_v9  ;;  %v3729_v32 = vadd.f32 %v3728_v56, %v6619_v14 }
 0x46a   :  { %v4394_v29 = vrot.slane %v4393_v50, 1  ;;  %v4414_v28 = vmax.f32 %v4412_v1, %v4413_v27  ;;  %v3850_v62 = vmax.f32 %v3151_v48, %v3155_v35  ;;  %v3744_v63 = vpop.f32.mrf.mxu1  ;;  %v3733_v19 = vadd.f32 %v3732_v6, %v6619_v14 }
 0x46b   :  { %v3843_v23 = vmax.f32 %v7629_v57, %v3829_v3  ;;  %v4418_v21 = vmax.f32 %v4417_v18, %v3719_v44  ;;  %v4439_v60 = vmax.f32 %v4438_v39, %v3721_v15  ;;  %v3731_v3 = vadd.f32 %v3730_v40, %v6626_v55 }
 0x46c   :  { %v4395_v16 = vmax.f32 %v4393_v50, %v4394_v29  ;;  %v4415_v7 = vrot.slane %v4414_v28, 1  ;;  %v3864_v1 = vmax.f32 %v7630_v17, %v3850_v62  ;;  %v3748_v27 = vpop.f32.mrf.mxu1  ;;  %v3735_v43 = vadd.f32 %v3734_v10, %v6626_v55 }
 0x46d   :  { %v3844_v24 = vrot.slane %v3843_v23, 4  ;;  %v4419_v46 = vmax.f32 %v4418_v21, %v3723_v37  ;;  %v4440_v50 = vmax.f32 %v4439_v60, %v3725_v26  ;;  %v3739_v21 = vadd.f32 %v3738_v2, %v6619_v14 }
 0x46e   :  { %v4487_v34 = vmax.f32 %v4395_v16, 0.0  ;;  %v4416_v9 = vmax.f32 %v4414_v28, %v4415_v7  ;;  %v3865_v4 = vrot.slane %v3864_v1, 4  ;;  %v3750_v35 = vpop.f32.mrf.mxu1  ;;  %v3741_v40 = vadd.f32 %v3740_v0, %v6626_v55 }
 0x46f   :  { %v3845_v48 = vmax.f32 %v3843_v23, %v3844_v24  ;;  %v4420_v15 = vmax.f32 %v4419_v46, %v3729_v32  ;;  %v4441_v24 = vmax.f32 %v4440_v50, %v3731_v3  ;;  %v3743_v23 = vadd.f32 %v3742_v42, %v6619_v14 }
 0x470   :  { %v4536_v20 = vsel %vm4535_vm8, %v4487_v34, %v7355_v5  ;;  %v4488_v61 = vmax.f32 %v4416_v9, 0.0  ;;  %v3866_v44 = vmax.f32 %v3864_v1, %v3865_v4  ;;  %v3752_v56 = vpop.f32.mrf.mxu1  ;;  %v3745_v62 = vadd.f32 %v3744_v63, %v6626_v55 }
 0x471   :  { %v3846_v39 = vrot.slane %v3845_v48, 2  ;;  %4562 = vst [vmem:[%s7602_s7] sm:$0xff] %v4536_v20  ;;  %v4421_v29 = vmax.f32 %v4420_v15, %v3733_v19  ;;  %v4442_v57 = vmax.f32 %v4441_v24, %v3735_v43  ;;  %v3749_v17 = vadd.f32 %v3748_v27, %v6619_v14 }
 0x472   :  { %v4543_v6 = vsel %vm4535_vm8, %v4488_v61, %v7360_v22  ;;  %v4952_v10 = vpack.c.bf16 %v4488_v61, %v4487_v34  ;;  %v3867_v16 = vrot.slane %v3866_v44, 2  ;;  %v3754_v5 = vpop.f32.mrf.mxu1  ;;  %v3751_v1 = vadd.f32 %v3750_v35, %v6626_v55 }
 0x473   :  { %v3847_v28 = vmax.f32 %v3845_v48, %v3846_v39  ;;  %4563 = vst [vmem:[%s7602_s7 + $0x8] sm:$0xff] %v4543_v6  ;;  %v4422_v22 = vmax.f32 %v4421_v29, %v3739_v21  ;;  %v4443_v7 = vmax.f32 %v4442_v57, %v3741_v40  ;;  %v4692_v34 = vunpack.c.l.b16 %v7130_v51 }
 0x474   :  { %v4706_v2 = vunpack.c.l.b16 %v4952_v10  ;;  %v4707_v18 = vunpack.c.h.b16 %v4952_v10  ;;  %v3758_v0 = vpop.f32.mrf.mxu1  ;;  %v3868_v26 = vmax.f32 %v3866_v44, %v3867_v16  ;;  %v3753_v4 = vadd.f32 %v3752_v56, %v6619_v14 }
 0x475   :  { %v3848_v37 = vrot.slane %v3847_v28, 1  ;;  %v4423_v48 = vmax.f32 %v4422_v22, %v3743_v23  ;;  %v4444_v46 = vmax.f32 %v4443_v7, %v3745_v62  ;;  %v3755_v27 = vadd.f32 %v3754_v5, %v6626_v55 }
 0x476   :  { %v4716_v60 = vsel %vm4535_vm8, %v4706_v2, %v7366_v25  ;;  %v4723_v32 = vsel %vm4535_vm8, %v4707_v18, %v7370_v30  ;;  %v3760_v42 = vpop.f32.mrf.mxu1  ;;  %v3869_v63 = vrot.slane %v3868_v26, 1  ;;  %v4693_v25 = vunpack.c.h.b16 %v7130_v51 }
 0x477   :  { %v3849_v3 = vmax.f32 %v3847_v28, %v3848_v37  ;;  %v4738_v9 = vpack.c.b16 %v4723_v32, %v4716_v60  ;;  %v4696_v43 = vunpack.c.l.b16 %v7233_v11  ;;  %v4697_v30 = vunpack.c.h.b16 %v7233_v11 }
 0x478   :  { %v3762_v50 = vpop.f32.mrf.mxu1  ;;  %v3870_v19 = vmax.f32 %v3868_v26, %v3869_v63  ;;  %v4424_v20 = vmax.f32 %v4423_v48, %v3749_v17  ;;  %v4700_v61 = vunpack.c.l.b16 %v7325_v38  ;;  %v4445_v39 = vmax.f32 %v4444_v46, %v3751_v1 }
 0x479   :  { %v4461_v35 = vmax.f32 %v3849_v3, 0.0  ;;  %4742 = vst [vmem:[%s7603_s8] sm:$0xff] %v4738_v9  ;;  %v7631_v56 = vmax.f32 %v6863_v31, 0.0  ;;  %v4701_v51 = vunpack.c.h.b16 %v7325_v38  ;;  %v3759_v40 = vadd.f32 %v3758_v0, %v6619_v14 }
 0x47a   :  { %v3764_v44 = vpop.f32.mrf.mxu1  ;;  %v4462_v24 = vmax.f32 %v3870_v19, 0.0  ;;  %v4425_v21 = vmax.f32 %v4424_v20, %v3753_v4  ;;  %v7632_v11 = vmax.f32 %v6987_v49, 0.0  ;;  %v4446_v10 = vmax.f32 %v4445_v39, %v3755_v27 }
 0x47b   :  { %v4544_v15 = vsel %vm4523_vm2, %v7631_v56, %v4461_v35  ;;  %v7633_v5 = vmax.f32 %v7111_v54, 0.0  ;;  %v7634_v31 = vmax.f32 %v6867_v13, 0.0  ;;  %v3761_v38 = vadd.f32 %v3760_v42, %v6626_v55 }
 0x47c   :  { %v4545_v6 = vsel %vm4525_vm3, %v7632_v11, %v4544_v15  ;;  %v3768_v16 = vpop.f32.mrf.mxu1  ;;  %v4939_v57 = vpack.c.bf16 %v4462_v24, %v4461_v35  ;;  %v3763_v23 = vadd.f32 %v3762_v50, %v6619_v14  ;;  %v7635_v62 = vmax.f32 %v7217_v53, 0.0 }
 0x47d   :  { %v4546_v28 = vsel %vm4527_vm4, %v7633_v5, %v4545_v6  ;;  %v4551_v29 = vsel %vm4523_vm2, %v7634_v31, %v4462_v24  ;;  %v7636_v2 = vmax.f32 %v6991_v59, 0.0  ;;  %v7637_v0 = vmax.f32 %v7309_v36, 0.0 }
 0x47e   :  { %v4547_v49 = vsel %vm4529_vm5, %v7635_v62, %v4546_v28  ;;  %v3770_v54 = vpop.f32.mrf.mxu1  ;;  %v7638_v37 = vmax.f32 %v7115_v33, 0.0  ;;  %v4680_v22 = vunpack.c.l.b16 %v4939_v57  ;;  %v4681_v7 = vunpack.c.h.b16 %v4939_v57 }
 0x47f   :  { %v4552_v18 = vsel %vm4525_vm3, %v7636_v2, %v4551_v29  ;;  %v4548_v13 = vsel %vm4531_vm6, %v7637_v0, %v4547_v49  ;;  %v4426_v17 = vmax.f32 %v4425_v21, %v3759_v40  ;;  %v3765_v53 = vadd.f32 %v3764_v44, %v6626_v55 }
 0x480   :  { %v4553_v26 = vsel %vm4527_vm4, %v7638_v37, %v4552_v18  ;;  %v7639_v1 = vmax.f32 %v7427_v52, 0.0  ;;  %v7640_v60 = vmax.f32 %v7221_v58, 0.0  ;;  %v3769_v36 = vadd.f32 %v3768_v16, %v6619_v14  ;;  %v3772_v42 = vpop.f32.mrf.mxu1 }
 0x481   :  { %v7641_v33 = vmax.f32 %v7313_v45, 0.0  ;;  %v7642_v63 = vunpack.c.l.b16 %v6882_v41  ;;  %v7643_v48 = vunpack.c.h.b16 %v6882_v41  ;;  %v4704_v4 = vunpack.c.l.b16 %v7444_v8 }
 0x482   :  { %v4549_v59 = vsel %vm4533_vm7, %v7639_v1, %v4548_v13  ;;  %v4554_v32 = vsel %vm4529_vm5, %v7640_v60, %v4553_v26  ;;  %v4705_v58 = vunpack.c.h.b16 %v7444_v8  ;;  %v7644_v46 = vmax.f32 %v7433_v47, 0.0  ;;  %v3774_v20 = vpop.f32.mrf.mxu1 }
 0x483   :  { %v4555_v3 = vsel %vm4531_vm6, %v7641_v33, %v4554_v32  ;;  %v4724_v9 = vsel %vm4523_vm2, %v7642_v63, %v4680_v22  ;;  %v4731_v52 = vsel %vm4523_vm2, %v7643_v48, %v4681_v7  ;;  %v7645_v45 = vunpack.c.l.b16 %v7006_v12 }
 0x484   :  { %v4556_v27 = vsel %vm4533_vm7, %v7644_v46, %v4555_v3  ;;  %v4447_v35 = vmax.f32 %v4446_v10, %v3761_v38  ;;  %v4427_v19 = vmax.f32 %v4426_v17, %v3763_v23  ;;  %v7646_v41 = vunpack.c.h.b16 %v7006_v12  ;;  %v3778_v40 = vpop.f32.mrf.mxu1 }
 0x485   :  { %v4725_v50 = vsel %vm4525_vm3, %v7645_v45, %v4724_v9  ;;  %v3771_v56 = vadd.f32 %v3770_v54, %v6626_v55  ;;  %v3773_v8 = vadd.f32 %v3772_v42, %v6619_v14  ;;  %v3779_v12 = vadd.f32 %v3778_v40, %v6619_v14 }
 0x486   :  { %v4726_v39 = vsel %vm4527_vm4, %v4692_v34, %v4725_v50  ;;  %v4732_v44 = vsel %vm4525_vm3, %v7646_v41, %v4731_v52  ;;  %v4448_v24 = vmax.f32 %v4447_v35, %v3765_v53  ;;  %v4428_v21 = vmax.f32 %v4427_v19, %v3769_v36  ;;  %v3780_v5 = vpop.f32.mrf.mxu1 }
 0x487   :  { %v4727_v47 = vsel %vm4529_vm5, %v4696_v43, %v4726_v39  ;;  %v4733_v15 = vsel %vm4527_vm4, %v4693_v25, %v4732_v44  ;;  %v3775_v34 = vadd.f32 %v3774_v20, %v6626_v55  ;;  %v3781_v31 = vadd.f32 %v3780_v5, %v6626_v55 }
 0x488   :  { %v4728_v11 = vsel %vm4531_vm6, %v4700_v61, %v4727_v47  ;;  %v4734_v6 = vsel %vm4529_vm5, %v4697_v30, %v4733_v15  ;;  %v4449_v28 = vmax.f32 %v4448_v24, %v3771_v56  ;;  %v4429_v25 = vmax.f32 %v4428_v21, %v3773_v8  ;;  %v3782_v29 = vpop.f32.mrf.mxu1 }
 0x489   :  { %v4729_v10 = vsel %vm4533_vm7, %v4704_v4, %v4728_v11  ;;  %v4735_v16 = vsel %vm4531_vm6, %v4701_v51, %v4734_v6  ;;  %v3783_v30 = vadd.f32 %v3782_v29, %v6619_v14 }
 0x48a   :  { %v4736_v43 = vsel %vm4533_vm7, %v4705_v58, %v4735_v16  ;;  %v4450_v57 = vmax.f32 %v4449_v28, %v3775_v34  ;;  %v4430_v61 = vmax.f32 %v4429_v25, %v3779_v12  ;;  %v3784_v38 = vpop.f32.mrf.mxu1 }
 0x48b   :  { %v3785_v49 = vadd.f32 %v3784_v38, %v6626_v55 }
 0x48c   :  { %v4451_v23 = vmax.f32 %v4450_v57, %v3781_v31  ;;  %v4431_v62 = vmax.f32 %v4430_v61, %v3783_v30 }
 0x48e   :  { %v4432_v2 = vrot.slane %v4431_v62, 4  ;;  %v4452_v18 = vmax.f32 %v4451_v23, %v3785_v49 }
 0x490   :  { %v4433_v51 = vmax.f32 %v4431_v62, %v4432_v2  ;;  %v4453_v54 = vrot.slane %v4452_v18, 4 }
 0x492   :  { %v4434_v0 = vrot.slane %v4433_v51, 2  ;;  %v4454_v13 = vmax.f32 %v4452_v18, %v4453_v54 }
 0x494   :  { %v4435_v37 = vmax.f32 %v4433_v51, %v4434_v0  ;;  %v4455_v26 = vrot.slane %v4454_v13, 2 }
 0x496   :  { %v4436_v22 = vrot.slane %v4435_v37, 1  ;;  %v4456_v7 = vmax.f32 %v4454_v13, %v4455_v26 }
 0x498   :  { %v4437_v17 = vmax.f32 %v4435_v37, %v4436_v22  ;;  %v4457_v53 = vrot.slane %v4456_v7, 1 }
 0x49a   :  { %v4489_v1 = vmax.f32 %v4437_v17, 0.0  ;;  %v4458_v60 = vmax.f32 %v4456_v7, %v4457_v53 }
 0x49c   :  { %v4550_v14 = vsel %vm4535_vm8, %v4489_v1, %v4549_v59  ;;  %v4490_v32 = vmax.f32 %v4458_v60, 0.0 }
 0x49d   :  { %4564 = vst [vmem:[%s7602_s7 + $0x10] sm:$0xff] %v4550_v14 }
 0x49e   :  { %v4557_v55 = vsel %vm4535_vm8, %v4490_v32, %v4556_v27  ;;  %v4953_v36 = vpack.c.bf16 %v4490_v32, %v4489_v1 }
 0x49f   :  { %4565 = vst [vmem:[%s7602_s7 + $0x18] sm:$0xff] %v4557_v55 }
 0x4a0   :  { %v4708_v42 = vunpack.c.l.b16 %v4953_v36  ;;  %v4709_v33 = vunpack.c.h.b16 %v4953_v36 }
 0x4a2   :  { %v4730_v3 = vsel %vm4535_vm8, %v4708_v42, %v4729_v10  ;;  %v4737_v63 = vsel %vm4535_vm8, %v4709_v33, %v4736_v43 }
 0x4a3   :  { %v4739_v9 = vpack.c.b16 %v4737_v63, %v4730_v3 }
 0x4a5   :  { %4743 = vst [vmem:[%s7603_s8 + $0x8] sm:$0xff] %v4739_v9 }

// kernel: dr_fr_forward.3
= control target key start
LH: loop header
LB: loop body
LE: loop exit
PB: predicated region body
PF: predicated region fallthrough
CT: control target
= control target key end

     0   :  { %12 = vsyncpa [#allocation3], 0  ;;  %s6432_s0 = inlined_call_operand.vmem [shape: bf16[8,512], index: 0, kind: input, shape index: {}]   ;;  %s6433_s1 = inlined_call_operand.hbm [shape: bf16[512,1024], index: 1, kind: input, shape index: {}]   ;;  %s6434_s2 = inlined_call_operand.vmem [shape: f32[1,1024], index: 2, kind: input, shape index: {}]   ;;  %s6435_s3 = inlined_call_operand.hbm [shape: bf16[1024,512], index: 3, kind: input, shape index: {}]   ;;  %s6436_s4 = inlined_call_operand.vmem [shape: f32[1,512], index: 4, kind: input, shape index: {}]   ;;  %s6437_s5 = inlined_call_operand.vmem [shape: bf16[512,384], index: 5, kind: input, shape index: {}]   ;;  %s6438_s6 = inlined_call_operand.vmem [shape: f32[1,384], index: 6, kind: input, shape index: {}]   ;;  %s6439_s7 = inlined_call_operand.vmem [shape: f32[8,384], index: 7, kind: output, shape index: {}]  }
   0x1   :  { %13 = vsyncpa [#allocation5], 0  ;;  %s5937_s24 = smov [#allocation2]  }
   0x2   :  { %s21_s25 = sshll.u32 %s5937_s24, 4  ;;  %s22_s25 = int_to_ptr.vmem [resolvable:$true] %s21_s25 }
   0x3   :  { %s5901_s26 = scalar_lea.vmem %s22_s25, 32768  ;;  %p5906_p1 = scmp.lt.s32.totalorder %s22_s25, %s22_s25 }
   0x4   :  { %p5902_p0 = scmp.ne.s32.totalorder %s22_s25, %s5901_s26  ;;  %p5907_p2 = scmp.lt.s32.totalorder %s5901_s26, %s5901_s26 }
   0x6   :  { %p5908_p3 = por %p5907_p2, %p5906_p1 }
   0x8   :  { %p5909_p4 = pnand %p5908_p3, %p5902_p0 }
   0xa   :  { %5912 = shalt.err (!%p5909_p4)
}
   0xb   :  { %s5938_s27 = smov 512   ;;  %s5939_s28 = smov 32  }
   0xc   :  { %27 = dma.hbm_to_vmem [thread:$0]  %s6433_s1, 32768, %s22_s25, [#allocation3], %s5938_s27, %s5938_s27, %s5939_s28  }
   0xd   :  { %s5940_s8 = smov [#allocation4]  }
   0xe   :  { %s35_s9 = sshll.u32 %s5940_s8, 4  ;;  %s36_s9 = int_to_ptr.vmem [resolvable:$true] %s35_s9 }
   0xf   :  { %s5921_s10 = scalar_lea.vmem %s36_s9, 32768  ;;  %p5926_p6 = scmp.lt.s32.totalorder %s36_s9, %s36_s9 }
  0x10   :  { %p5922_p5 = scmp.ne.s32.totalorder %s36_s9, %s5921_s10  ;;  %p5927_p7 = scmp.lt.s32.totalorder %s5921_s10, %s5921_s10 }
  0x12   :  { %p5928_p8 = por %p5927_p7, %p5926_p6 }
  0x14   :  { %p5929_p9 = pnand %p5928_p8, %p5922_p5 }
  0x16   :  { %5932 = shalt.err (!%p5929_p9)
}
  0x17   :  { %s5941_s11 = smov 256   ;;  %s5942_s12 = smov 16  }
  0x18   :  { %41 = dma.hbm_to_vmem [thread:$0]  %s6435_s3, 32768, %s36_s9, [#allocation5], %s5941_s11, %s5941_s11, %s5942_s12  }
  0x19   :  { %5933 = dma.done.wait [#allocation3], 32768  }
  0x1a   :  { %5934 = vsyncadd [#allocation3], 4294934528 }
  0x1b   :  { %5935 = dma.done.wait [#allocation5], 32768  }
  0x1c   :  { %5936 = vsyncadd [#allocation5], 4294934528  ;;  %v113_v0 = vld [vmem:[#allocation2 + $0x1c0] sm:$0xff]  ;;  %v5997_v54 = vld [vmem:[%s6432_s0 + $0x8] sm:$0xff] }
  0x1d   :  { %v117_v1 = vld [vmem:[#allocation2 + $0x1e0] sm:$0xff]  ;;  %v6005_v59 = vcombine.high %v5997_v54, %v5997_v54 }
  0x1e   :  { %v241_v2 = vld [vmem:[#allocation2 + $0x5c0] sm:$0xff]  ;;  %v4776_v3 = vcombine.high %v113_v0, %v117_v1  ;;  %v4775_v5 = vcombine.low %v113_v0, %v117_v1 }
  0x1f   :  { %v245_v4 = vld [vmem:[#allocation2 + $0x5e0] sm:$0xff]  ;;  %1722 = vmatprep.mubr.bf16.mxu1 %v6005_v59 }
  0x20   :  { %v105_v6 = vld [vmem:[#allocation2 + $0x180] sm:$0xff]  ;;  %v4904_v8 = vcombine.high %v241_v2, %v245_v4  ;;  %v4903_v9 = vcombine.low %v241_v2, %v245_v4  ;;  %1649 = vmatprep.subr.bf16.mxu0 %v4776_v3 }
  0x21   :  { %v109_v7 = vld [vmem:[#allocation2 + $0x1a0] sm:$0xff]  ;;  %1650 = vmatpush1.bf16.msra.mxu0 %v4775_v5 }
  0x22   :  { %v4768_v10 = vcombine.high %v105_v6, %v109_v7  ;;  %v233_v11 = vld [vmem:[#allocation2 + $0x580] sm:$0xff]  ;;  %1690 = vmatprep.subr.bf16.mxu1 %v4904_v8  ;;  %v4767_v18 = vcombine.low %v105_v6, %v109_v7 }
  0x23   :  { %v237_v12 = vld [vmem:[#allocation2 + $0x5a0] sm:$0xff]  ;;  %1691 = vmatpush1.bf16.msra.mxu1 %v4903_v9 }
  0x24   :  { %v97_v13 = vld [vmem:[#allocation2 + $0x140] sm:$0xff]  ;;  %v4896_v14 = vcombine.high %v233_v11, %v237_v12  ;;  %1651 = vmatprep.subr.bf16.mxu0 %v4768_v10  ;;  %v4895_v19 = vcombine.low %v233_v11, %v237_v12 }
  0x25   :  { %v101_v15 = vld [vmem:[#allocation2 + $0x160] sm:$0xff]  ;;  %1652 = vmatpush1.bf16.msra.mxu0 %v4767_v18 }
  0x26   :  { %v225_v16 = vld [vmem:[#allocation2 + $0x540] sm:$0xff]  ;;  %v4760_v20 = vcombine.high %v97_v13, %v101_v15  ;;  %1692 = vmatprep.subr.bf16.mxu1 %v4896_v14  ;;  %v4759_v26 = vcombine.low %v97_v13, %v101_v15 }
  0x27   :  { %v229_v17 = vld [vmem:[#allocation2 + $0x560] sm:$0xff]  ;;  %1693 = vmatpush1.bf16.msra.mxu1 %v4895_v19 }
  0x28   :  { %v4888_v21 = vcombine.high %v225_v16, %v229_v17  ;;  %v89_v22 = vld [vmem:[#allocation2 + $0x100] sm:$0xff]  ;;  %1653 = vmatprep.subr.bf16.mxu0 %v4760_v20  ;;  %v4887_v27 = vcombine.low %v225_v16, %v229_v17 }
  0x29   :  { %v93_v23 = vld [vmem:[#allocation2 + $0x120] sm:$0xff]  ;;  %1654 = vmatpush1.bf16.msra.mxu0 %v4759_v26 }
  0x2a   :  { %v217_v24 = vld [vmem:[#allocation2 + $0x500] sm:$0xff]  ;;  %v4752_v28 = vcombine.high %v89_v22, %v93_v23  ;;  %1694 = vmatprep.subr.bf16.mxu1 %v4888_v21  ;;  %v4751_v34 = vcombine.low %v89_v22, %v93_v23 }
  0x2b   :  { %v221_v25 = vld [vmem:[#allocation2 + $0x520] sm:$0xff]  ;;  %1695 = vmatpush1.bf16.msra.mxu1 %v4887_v27 }
  0x2c   :  { %v4880_v29 = vcombine.high %v217_v24, %v221_v25  ;;  %v81_v30 = vld [vmem:[#allocation2 + $0xc0] sm:$0xff]  ;;  %1655 = vmatprep.subr.bf16.mxu0 %v4752_v28  ;;  %v4879_v35 = vcombine.low %v217_v24, %v221_v25 }
  0x2d   :  { %v85_v31 = vld [vmem:[#allocation2 + $0xe0] sm:$0xff]  ;;  %1656 = vmatpush1.bf16.msra.mxu0 %v4751_v34 }
  0x2e   :  { %v209_v32 = vld [vmem:[#allocation2 + $0x4c0] sm:$0xff]  ;;  %v4744_v36 = vcombine.high %v81_v30, %v85_v31  ;;  %1696 = vmatprep.subr.bf16.mxu1 %v4880_v29  ;;  %v4743_v42 = vcombine.low %v81_v30, %v85_v31 }
  0x2f   :  { %v213_v33 = vld [vmem:[#allocation2 + $0x4e0] sm:$0xff]  ;;  %1697 = vmatpush1.bf16.msra.mxu1 %v4879_v35 }
  0x30   :  { %v4872_v37 = vcombine.high %v209_v32, %v213_v33  ;;  %v73_v38 = vld [vmem:[#allocation2 + $0x80] sm:$0xff]  ;;  %1657 = vmatprep.subr.bf16.mxu0 %v4744_v36  ;;  %v4871_v43 = vcombine.low %v209_v32, %v213_v33 }
  0x31   :  { %v77_v39 = vld [vmem:[#allocation2 + $0xa0] sm:$0xff]  ;;  %1658 = vmatpush1.bf16.msra.mxu0 %v4743_v42 }
  0x32   :  { %v201_v40 = vld [vmem:[#allocation2 + $0x480] sm:$0xff]  ;;  %v4736_v44 = vcombine.high %v73_v38, %v77_v39  ;;  %1698 = vmatprep.subr.bf16.mxu1 %v4872_v37  ;;  %v4735_v50 = vcombine.low %v73_v38, %v77_v39 }
  0x33   :  { %v205_v41 = vld [vmem:[#allocation2 + $0x4a0] sm:$0xff]  ;;  %1699 = vmatpush1.bf16.msra.mxu1 %v4871_v43 }
  0x34   :  { %v4864_v45 = vcombine.high %v201_v40, %v205_v41  ;;  %v65_v46 = vld [vmem:[#allocation2 + $0x40] sm:$0xff]  ;;  %1659 = vmatprep.subr.bf16.mxu0 %v4736_v44  ;;  %v4863_v51 = vcombine.low %v201_v40, %v205_v41 }
  0x35   :  { %v69_v47 = vld [vmem:[#allocation2 + $0x60] sm:$0xff]  ;;  %1660 = vmatpush1.bf16.msra.mxu0 %v4735_v50 }
  0x36   :  { %v193_v48 = vld [vmem:[#allocation2 + $0x440] sm:$0xff]  ;;  %v4728_v52 = vcombine.high %v65_v46, %v69_v47  ;;  %1700 = vmatprep.subr.bf16.mxu1 %v4864_v45  ;;  %v4727_v62 = vcombine.low %v65_v46, %v69_v47 }
  0x37   :  { %v197_v49 = vld [vmem:[#allocation2 + $0x460] sm:$0xff]  ;;  %1701 = vmatpush1.bf16.msra.mxu1 %v4863_v51 }
  0x38   :  { %v5992_v53 = vld [vmem:[%s6432_s0] sm:$0xff]  ;;  %v4856_v55 = vcombine.high %v193_v48, %v197_v49  ;;  %1661 = vmatprep.subr.bf16.mxu0 %v4728_v52  ;;  %v4855_v63 = vcombine.low %v193_v48, %v197_v49 }
  0x39   :  { %v57_v56 = vld [vmem:[#allocation2] sm:$0xff]  ;;  %v6001_v58 = vcombine.high %v5992_v53, %v5992_v53  ;;  %1662 = vmatpush1.bf16.msra.mxu0 %v4727_v62 }
  0x3a   :  { %v61_v57 = vld [vmem:[#allocation2 + $0x20] sm:$0xff]  ;;  %1702 = vmatprep.subr.bf16.mxu1 %v4856_v55 }
  0x3b   :  { %v185_v60 = vld [vmem:[#allocation2 + $0x400] sm:$0xff]  ;;  %1681 = vmatprep.mubr.bf16.mxu0 %v6001_v58  ;;  %v4720_v0 = vcombine.high %v57_v56, %v61_v57  ;;  %v4719_v6 = vcombine.low %v57_v56, %v61_v57  ;;  %1703 = vmatpush1.bf16.msra.mxu1 %v4855_v63 }
  0x3c   :  { %v189_v61 = vld [vmem:[#allocation2 + $0x420] sm:$0xff] }
  0x3d   :  { %v4848_v1 = vcombine.high %v185_v60, %v189_v61  ;;  %v177_v2 = vld [vmem:[#allocation2 + $0x3c0] sm:$0xff]  ;;  %1663 = vmatprep.subr.bf16.mxu0 %v4720_v0  ;;  %v4847_v7 = vcombine.low %v185_v60, %v189_v61 }
  0x3e   :  { %v181_v3 = vld [vmem:[#allocation2 + $0x3e0] sm:$0xff]  ;;  %1664 = vmatpush1.bf16.msra.mxu0 %v4719_v6  ;;  %v114_v6 = vld [vmem:[#allocation2 + $0x1c8] sm:$0xff] }
  0x3f   :  { %v305_v4 = vld [vmem:[#allocation2 + $0x7c0] sm:$0xff]  ;;  %v4840_v8 = vcombine.high %v177_v2, %v181_v3  ;;  %1704 = vmatprep.subr.bf16.mxu1 %v4848_v1  ;;  %v4839_v14 = vcombine.low %v177_v2, %v181_v3 }
  0x40   :  { %v309_v5 = vld [vmem:[#allocation2 + $0x7e0] sm:$0xff]  ;;  %1705 = vmatpush1.bf16.msra.mxu1 %v4847_v7  ;;  %v118_v7 = vld [vmem:[#allocation2 + $0x1e8] sm:$0xff] }
  0x41   :  { %v4968_v9 = vcombine.high %v305_v4, %v309_v5  ;;  %v169_v10 = vld [vmem:[#allocation2 + $0x380] sm:$0xff]  ;;  %1665 = vmatprep.subr.bf16.mxu0 %v4840_v8  ;;  %v4967_v15 = vcombine.low %v305_v4, %v309_v5  ;;  %v242_v8 = vld [vmem:[#allocation2 + $0x5c8] sm:$0xff] }
  0x42   :  { %v173_v11 = vld [vmem:[#allocation2 + $0x3a0] sm:$0xff]  ;;  %1666 = vmatpush2.bf16.msra.mxu0 %v4839_v14  ;;  %v106_v14 = vld [vmem:[#allocation2 + $0x188] sm:$0xff] }
  0x43   :  { %v297_v12 = vld [vmem:[#allocation2 + $0x780] sm:$0xff]  ;;  %v4832_v16 = vcombine.high %v169_v10, %v173_v11  ;;  %1706 = vmatprep.subr.bf16.mxu1 %v4968_v9  ;;  %v4831_v22 = vcombine.low %v169_v10, %v173_v11  ;;  %v246_v9 = vld [vmem:[#allocation2 + $0x5e8] sm:$0xff] }
  0x44   :  { %v301_v13 = vld [vmem:[#allocation2 + $0x7a0] sm:$0xff]  ;;  %1707 = vmatpush2.bf16.msra.mxu1 %v4967_v15  ;;  %v110_v15 = vld [vmem:[#allocation2 + $0x1a8] sm:$0xff] }
  0x45   :  { %v4960_v17 = vcombine.high %v297_v12, %v301_v13  ;;  %v161_v18 = vld [vmem:[#allocation2 + $0x340] sm:$0xff]  ;;  %1667 = vmatprep.subr.bf16.mxu0 %v4832_v16  ;;  %v4959_v23 = vcombine.low %v297_v12, %v301_v13  ;;  %v4778_v12 = vcombine.high %v114_v6, %v118_v7  ;;  %v4906_v13 = vcombine.high %v242_v8, %v246_v9 }
  0x46   :  { %v165_v19 = vld [vmem:[#allocation2 + $0x360] sm:$0xff]  ;;  %1668 = vmatpush2.bf16.msra.mxu0 %v4831_v22  ;;  %v6011_v16 = vcombine.low %v5992_v53, %v5992_v53  ;;  %v4770_v22 = vcombine.high %v106_v14, %v110_v15  ;;  %v4769_v53 = vcombine.low %v106_v14, %v110_v15 }
  0x47   :  { %v289_v20 = vld [vmem:[#allocation2 + $0x740] sm:$0xff]  ;;  %v4824_v24 = vcombine.high %v161_v18, %v165_v19  ;;  %1708 = vmatprep.subr.bf16.mxu1 %v4960_v17  ;;  %v4823_v30 = vcombine.low %v161_v18, %v165_v19  ;;  %v234_v17 = vld [vmem:[#allocation2 + $0x588] sm:$0xff]  ;;  %v6015_v19 = vcombine.low %v5997_v54, %v5997_v54 }
  0x48   :  { %v293_v21 = vld [vmem:[#allocation2 + $0x760] sm:$0xff]  ;;  %1709 = vmatpush2.bf16.msra.mxu1 %v4959_v23  ;;  %v238_v18 = vld [vmem:[#allocation2 + $0x5a8] sm:$0xff] }
  0x49   :  { %v4952_v25 = vcombine.high %v289_v20, %v293_v21  ;;  %v153_v26 = vld [vmem:[#allocation2 + $0x300] sm:$0xff]  ;;  %1669 = vmatprep.subr.bf16.mxu0 %v4824_v24  ;;  %v4951_v31 = vcombine.low %v289_v20, %v293_v21  ;;  %v4777_v20 = vcombine.low %v114_v6, %v118_v7  ;;  %v4905_v21 = vcombine.low %v242_v8, %v246_v9  ;;  %v98_v23 = vld [vmem:[#allocation2 + $0x148] sm:$0xff] }
  0x4a   :  { %v157_v27 = vld [vmem:[#allocation2 + $0x320] sm:$0xff]  ;;  %1670 = vmatpush2.bf16.msra.mxu0 %v4823_v30  ;;  %v102_v24 = vld [vmem:[#allocation2 + $0x168] sm:$0xff]  ;;  %v4897_v54 = vcombine.low %v234_v17, %v238_v18 }
  0x4b   :  { %v281_v28 = vld [vmem:[#allocation2 + $0x700] sm:$0xff]  ;;  %v4816_v32 = vcombine.high %v153_v26, %v157_v27  ;;  %1710 = vmatprep.subr.bf16.mxu1 %v4952_v25  ;;  %v4815_v38 = vcombine.low %v153_v26, %v157_v27  ;;  %v226_v25 = vld [vmem:[#allocation2 + $0x548] sm:$0xff]  ;;  %v4898_v26 = vcombine.high %v234_v17, %v238_v18 }
  0x4c   :  { %v285_v29 = vld [vmem:[#allocation2 + $0x720] sm:$0xff]  ;;  %1711 = vmatpush2.bf16.msra.mxu1 %v4951_v31  ;;  %v230_v27 = vld [vmem:[#allocation2 + $0x568] sm:$0xff] }
  0x4d   :  { %v4944_v33 = vcombine.high %v281_v28, %v285_v29  ;;  %v145_v34 = vld [vmem:[#allocation2 + $0x2c0] sm:$0xff]  ;;  %1671 = vmatprep.subr.bf16.mxu0 %v4816_v32  ;;  %v4943_v39 = vcombine.low %v281_v28, %v285_v29  ;;  %v4762_v28 = vcombine.high %v98_v23, %v102_v24  ;;  %v90_v29 = vld [vmem:[#allocation2 + $0x108] sm:$0xff]  ;;  %v4890_v32 = vcombine.high %v226_v25, %v230_v27 }
  0x4e   :  { %v149_v35 = vld [vmem:[#allocation2 + $0x2e0] sm:$0xff]  ;;  %1672 = vmatpush2.bf16.msra.mxu0 %v4815_v38  ;;  %v94_v30 = vld [vmem:[#allocation2 + $0x128] sm:$0xff] }
  0x4f   :  { %v273_v36 = vld [vmem:[#allocation2 + $0x6c0] sm:$0xff]  ;;  %v4808_v40 = vcombine.high %v145_v34, %v149_v35  ;;  %1712 = vmatprep.subr.bf16.mxu1 %v4944_v33  ;;  %v4807_v46 = vcombine.low %v145_v34, %v149_v35  ;;  %v218_v31 = vld [vmem:[#allocation2 + $0x508] sm:$0xff]  ;;  %v4761_v34 = vcombine.low %v98_v23, %v102_v24  ;;  %v4889_v35 = vcombine.low %v226_v25, %v230_v27 }
  0x50   :  { %v277_v37 = vld [vmem:[#allocation2 + $0x6e0] sm:$0xff]  ;;  %1713 = vmatpush2.bf16.msra.mxu1 %v4943_v39  ;;  %v222_v33 = vld [vmem:[#allocation2 + $0x528] sm:$0xff] }
  0x51   :  { %v4936_v41 = vcombine.high %v273_v36, %v277_v37  ;;  %v137_v42 = vld [vmem:[#allocation2 + $0x280] sm:$0xff]  ;;  %1673 = vmatprep.subr.bf16.mxu0 %v4808_v40  ;;  %v4935_v47 = vcombine.low %v273_v36, %v277_v37  ;;  %v4754_v36 = vcombine.high %v90_v29, %v94_v30  ;;  %v82_v37 = vld [vmem:[#allocation2 + $0xc8] sm:$0xff]  ;;  %v4882_v40 = vcombine.high %v218_v31, %v222_v33 }
  0x52   :  { %v141_v43 = vld [vmem:[#allocation2 + $0x2a0] sm:$0xff]  ;;  %1674 = vmatpush2.bf16.msra.mxu0 %v4807_v46  ;;  %v86_v38 = vld [vmem:[#allocation2 + $0xe8] sm:$0xff] }
  0x53   :  { %v265_v44 = vld [vmem:[#allocation2 + $0x680] sm:$0xff]  ;;  %v4800_v48 = vcombine.high %v137_v42, %v141_v43  ;;  %1714 = vmatprep.subr.bf16.mxu1 %v4936_v41  ;;  %v4799_v56 = vcombine.low %v137_v42, %v141_v43  ;;  %v210_v39 = vld [vmem:[#allocation2 + $0x4c8] sm:$0xff]  ;;  %v4753_v42 = vcombine.low %v90_v29, %v94_v30  ;;  %v4881_v43 = vcombine.low %v218_v31, %v222_v33 }
  0x54   :  { %v269_v45 = vld [vmem:[#allocation2 + $0x6a0] sm:$0xff]  ;;  %1715 = vmatpush2.bf16.msra.mxu1 %v4935_v47  ;;  %v214_v41 = vld [vmem:[#allocation2 + $0x4e8] sm:$0xff] }
  0x55   :  { %v4928_v49 = vcombine.high %v265_v44, %v269_v45  ;;  %v129_v50 = vld [vmem:[#allocation2 + $0x240] sm:$0xff]  ;;  %1675 = vmatprep.subr.bf16.mxu0 %v4800_v48  ;;  %v4927_v57 = vcombine.low %v265_v44, %v269_v45  ;;  %v4746_v44 = vcombine.high %v82_v37, %v86_v38  ;;  %v74_v45 = vld [vmem:[#allocation2 + $0x88] sm:$0xff]  ;;  %v4874_v48 = vcombine.high %v210_v39, %v214_v41 }
  0x56   :  { %v133_v51 = vld [vmem:[#allocation2 + $0x260] sm:$0xff]  ;;  %1676 = vmatpush2.bf16.msra.mxu0 %v4799_v56  ;;  %v78_v46 = vld [vmem:[#allocation2 + $0xa8] sm:$0xff] }
  0x57   :  { %v257_v52 = vld [vmem:[#allocation2 + $0x640] sm:$0xff]  ;;  %v4792_v60 = vcombine.high %v129_v50, %v133_v51  ;;  %1716 = vmatprep.subr.bf16.mxu1 %v4928_v49  ;;  %v4791_v2 = vcombine.low %v129_v50, %v133_v51  ;;  %v202_v47 = vld [vmem:[#allocation2 + $0x488] sm:$0xff]  ;;  %v4745_v50 = vcombine.low %v82_v37, %v86_v38  ;;  %v4873_v51 = vcombine.low %v210_v39, %v214_v41 }
  0x58   :  { %v261_v55 = vld [vmem:[#allocation2 + $0x660] sm:$0xff]  ;;  %1717 = vmatpush2.bf16.msra.mxu1 %v4927_v57  ;;  %v206_v49 = vld [vmem:[#allocation2 + $0x4a8] sm:$0xff] }
  0x59   :  { %v4920_v61 = vcombine.high %v257_v52, %v261_v55  ;;  %v121_v62 = vld [vmem:[#allocation2 + $0x200] sm:$0xff]  ;;  %1677 = vmatprep.subr.bf16.mxu0 %v4792_v60  ;;  %v4919_v3 = vcombine.low %v257_v52, %v261_v55  ;;  %v4738_v52 = vcombine.high %v74_v45, %v78_v46  ;;  %v66_v55 = vld [vmem:[#allocation2 + $0x48] sm:$0xff]  ;;  %v4866_v60 = vcombine.high %v202_v47, %v206_v49 }
  0x5a   :  { %v125_v63 = vld [vmem:[#allocation2 + $0x220] sm:$0xff]  ;;  %1678 = vmatpush2.bf16.msra.mxu0 %v4791_v2  ;;  %v70_v56 = vld [vmem:[#allocation2 + $0x68] sm:$0xff] }
  0x5b   :  { %v249_v0 = vld [vmem:[#allocation2 + $0x600] sm:$0xff]  ;;  %v4784_v4 = vcombine.high %v121_v62, %v125_v63  ;;  %1718 = vmatprep.subr.bf16.mxu1 %v4920_v61  ;;  %v4783_v10 = vcombine.low %v121_v62, %v125_v63  ;;  %v194_v57 = vld [vmem:[#allocation2 + $0x448] sm:$0xff]  ;;  %v4737_v62 = vcombine.low %v74_v45, %v78_v46  ;;  %v4865_v63 = vcombine.low %v202_v47, %v206_v49 }
  0x5c   :  { %v253_v1 = vld [vmem:[#allocation2 + $0x620] sm:$0xff]  ;;  %1719 = vmatpush2.bf16.msra.mxu1 %v4919_v3  ;;  %v198_v61 = vld [vmem:[#allocation2 + $0x468] sm:$0xff]  ;;  %v4729_v6 = vcombine.low %v66_v55, %v70_v56 }
  0x5d   :  { %v4912_v5 = vcombine.high %v249_v0, %v253_v1  ;;  %1679 = vmatprep.subr.bf16.mxu0 %v4784_v4  ;;  %v4911_v11 = vcombine.low %v249_v0, %v253_v1  ;;  %v4730_v0 = vcombine.high %v66_v55, %v70_v56  ;;  %v58_v1 = vld [vmem:[#allocation2 + $0x8] sm:$0xff]  ;;  %v4858_v4 = vcombine.high %v194_v57, %v198_v61 }
  0x5e   :  { %1680 = vmatpush2.bf16.msra.mxu0 %v4783_v10  ;;  %v62_v2 = vld [vmem:[#allocation2 + $0x28] sm:$0xff]  ;;  %v4857_v7 = vcombine.low %v194_v57, %v198_v61 }
  0x5f   :  { %1720 = vmatprep.subr.bf16.mxu1 %v4912_v5  ;;  %1731 = vmatprep.subr.bf16.mxu0 %v4778_v12  ;;  %v186_v3 = vld [vmem:[#allocation2 + $0x408] sm:$0xff]  ;;  %v4722_v8 = vcombine.high %v58_v1, %v62_v2  ;;  %v4721_v14 = vcombine.low %v58_v1, %v62_v2 }
  0x60   :  { %1721 = vmatpush2.bf16.msra.mxu1 %v4911_v11  ;;  %v190_v5 = vld [vmem:[#allocation2 + $0x428] sm:$0xff] }
  0x61   :  { %1772 = vmatprep.subr.bf16.mxu1 %v4906_v13  ;;  %1682 = vmatmul.mubr.bf16.vlgmr.msra.gmra.mxu0 %v6011_v16  ;;  %v178_v9 = vld [vmem:[#allocation2 + $0x3c8] sm:$0xff]  ;;  %v4850_v12 = vcombine.high %v186_v3, %v190_v5  ;;  %v4849_v15 = vcombine.low %v186_v3, %v190_v5 }
  0x62   :  { %1732 = vmatpush1.bf16.msra.mxu0 %v4777_v20  ;;  %1763 = vmatprep.mubr.bf16.mxu0 %v6001_v58  ;;  %v182_v10 = vld [vmem:[#allocation2 + $0x3e8] sm:$0xff] }
  0x63   :  { %1723 = vmatmul.mubr.bf16.vlgmr.msra.gmra.mxu1 %v6015_v19  ;;  %1733 = vmatprep.subr.bf16.mxu0 %v4770_v22  ;;  %v306_v11 = vld [vmem:[#allocation2 + $0x7c8] sm:$0xff]  ;;  %v4842_v17 = vcombine.high %v178_v9, %v182_v10  ;;  %v4841_v24 = vcombine.low %v178_v9, %v182_v10 }
  0x64   :  { %1773 = vmatpush1.bf16.msra.mxu1 %v4905_v21  ;;  %1804 = vmatprep.mubr.bf16.mxu1 %v6005_v59  ;;  %v310_v13 = vld [vmem:[#allocation2 + $0x7e8] sm:$0xff] }
  0x65   :  { %1774 = vmatprep.subr.bf16.mxu1 %v4898_v26  ;;  %v170_v18 = vld [vmem:[#allocation2 + $0x388] sm:$0xff]  ;;  %v4970_v22 = vcombine.high %v306_v11, %v310_v13  ;;  %v4969_v25 = vcombine.low %v306_v11, %v310_v13  ;;  %v115_v13 = vld [vmem:[#allocation2 + $0x1d0] sm:$0xff] }
  0x66   :  { %1734 = vmatpush1.bf16.msra.mxu0 %v4769_v53  ;;  %v174_v20 = vld [vmem:[#allocation2 + $0x3a8] sm:$0xff] }
  0x67   :  { %1735 = vmatprep.subr.bf16.mxu0 %v4762_v28  ;;  %v298_v21 = vld [vmem:[#allocation2 + $0x788] sm:$0xff]  ;;  %v4834_v26 = vcombine.high %v170_v18, %v174_v20  ;;  %v4833_v30 = vcombine.low %v170_v18, %v174_v20  ;;  %v247_v18 = vld [vmem:[#allocation2 + $0x5f0] sm:$0xff] }
  0x68   :  { %1775 = vmatpush1.bf16.msra.mxu1 %v4897_v54  ;;  %v302_v23 = vld [vmem:[#allocation2 + $0x7a8] sm:$0xff] }
  0x69   :  { %1776 = vmatprep.subr.bf16.mxu1 %v4890_v32  ;;  %v162_v27 = vld [vmem:[#allocation2 + $0x348] sm:$0xff]  ;;  %v4962_v28 = vcombine.high %v298_v21, %v302_v23  ;;  %v4961_v31 = vcombine.low %v298_v21, %v302_v23  ;;  %v107_v23 = vld [vmem:[#allocation2 + $0x190] sm:$0xff] }
  0x6a   :  { %1736 = vmatpush1.bf16.msra.mxu0 %v4761_v34  ;;  %v166_v53 = vld [vmem:[#allocation2 + $0x368] sm:$0xff] }
  0x6b   :  { %1737 = vmatprep.subr.bf16.mxu0 %v4754_v36  ;;  %v290_v54 = vld [vmem:[#allocation2 + $0x748] sm:$0xff]  ;;  %v4826_v32 = vcombine.high %v162_v27, %v166_v53  ;;  %v4825_v38 = vcombine.low %v162_v27, %v166_v53  ;;  %v239_v27 = vld [vmem:[#allocation2 + $0x5b0] sm:$0xff] }
  0x6c   :  { %1777 = vmatpush1.bf16.msra.mxu1 %v4889_v35  ;;  %v294_v29 = vld [vmem:[#allocation2 + $0x768] sm:$0xff] }
  0x6d   :  { %1778 = vmatprep.subr.bf16.mxu1 %v4882_v40  ;;  %v154_v33 = vld [vmem:[#allocation2 + $0x308] sm:$0xff]  ;;  %v4954_v36 = vcombine.high %v290_v54, %v294_v29  ;;  %v4953_v39 = vcombine.low %v290_v54, %v294_v29  ;;  %v99_v54 = vld [vmem:[#allocation2 + $0x150] sm:$0xff] }
  0x6e   :  { %1738 = vmatpush1.bf16.msra.mxu0 %v4753_v42  ;;  %v158_v34 = vld [vmem:[#allocation2 + $0x328] sm:$0xff] }
  0x6f   :  { %1739 = vmatprep.subr.bf16.mxu0 %v4746_v44  ;;  %v282_v35 = vld [vmem:[#allocation2 + $0x708] sm:$0xff]  ;;  %v4818_v40 = vcombine.high %v154_v33, %v158_v34  ;;  %v4817_v46 = vcombine.low %v154_v33, %v158_v34  ;;  %v231_v33 = vld [vmem:[#allocation2 + $0x570] sm:$0xff] }
  0x70   :  { %1779 = vmatpush1.bf16.msra.mxu1 %v4881_v43  ;;  %v286_v37 = vld [vmem:[#allocation2 + $0x728] sm:$0xff] }
  0x71   :  { %1780 = vmatprep.subr.bf16.mxu1 %v4874_v48  ;;  %v146_v41 = vld [vmem:[#allocation2 + $0x2c8] sm:$0xff]  ;;  %v4946_v44 = vcombine.high %v282_v35, %v286_v37  ;;  %v4945_v47 = vcombine.low %v282_v35, %v286_v37  ;;  %v91_v35 = vld [vmem:[#allocation2 + $0x110] sm:$0xff] }
  0x72   :  { %1740 = vmatpush1.bf16.msra.mxu0 %v4745_v50  ;;  %v150_v42 = vld [vmem:[#allocation2 + $0x2e8] sm:$0xff] }
  0x73   :  { %1741 = vmatprep.subr.bf16.mxu0 %v4738_v52  ;;  %v274_v43 = vld [vmem:[#allocation2 + $0x6c8] sm:$0xff]  ;;  %v4810_v48 = vcombine.high %v146_v41, %v150_v42  ;;  %v4809_v56 = vcombine.low %v146_v41, %v150_v42  ;;  %v223_v41 = vld [vmem:[#allocation2 + $0x530] sm:$0xff] }
  0x74   :  { %1781 = vmatpush1.bf16.msra.mxu1 %v4873_v51  ;;  %v278_v45 = vld [vmem:[#allocation2 + $0x6e8] sm:$0xff] }
  0x75   :  { %1782 = vmatprep.subr.bf16.mxu1 %v4866_v60  ;;  %v138_v49 = vld [vmem:[#allocation2 + $0x288] sm:$0xff]  ;;  %v4938_v52 = vcombine.high %v274_v43, %v278_v45  ;;  %v4937_v57 = vcombine.low %v274_v43, %v278_v45  ;;  %v83_v43 = vld [vmem:[#allocation2 + $0xd0] sm:$0xff] }
  0x76   :  { %1742 = vmatpush1.bf16.msra.mxu0 %v4737_v62  ;;  %v142_v50 = vld [vmem:[#allocation2 + $0x2a8] sm:$0xff] }
  0x77   :  { %1743 = vmatprep.subr.bf16.mxu0 %v4730_v0  ;;  %v266_v51 = vld [vmem:[#allocation2 + $0x688] sm:$0xff]  ;;  %v4802_v60 = vcombine.high %v138_v49, %v142_v50  ;;  %v4801_v2 = vcombine.low %v138_v49, %v142_v50  ;;  %v215_v49 = vld [vmem:[#allocation2 + $0x4f0] sm:$0xff] }
  0x78   :  { %1783 = vmatpush1.bf16.msra.mxu1 %v4865_v63  ;;  %v270_v55 = vld [vmem:[#allocation2 + $0x6a8] sm:$0xff] }
  0x79   :  { %1784 = vmatprep.subr.bf16.mxu1 %v4858_v4  ;;  %v130_v61 = vld [vmem:[#allocation2 + $0x248] sm:$0xff]  ;;  %v4930_v0 = vcombine.high %v266_v51, %v270_v55  ;;  %v4929_v3 = vcombine.low %v266_v51, %v270_v55 }
  0x7a   :  { %1744 = vmatpush1.bf16.msra.mxu0 %v4729_v6  ;;  %v134_v62 = vld [vmem:[#allocation2 + $0x268] sm:$0xff] }
  0x7b   :  { %1745 = vmatprep.subr.bf16.mxu0 %v4722_v8  ;;  %v258_v63 = vld [vmem:[#allocation2 + $0x648] sm:$0xff]  ;;  %v4794_v4 = vcombine.high %v130_v61, %v134_v62  ;;  %v4793_v10 = vcombine.low %v130_v61, %v134_v62  ;;  %v207_v61 = vld [vmem:[#allocation2 + $0x4b0] sm:$0xff] }
  0x7c   :  { %1785 = vmatpush1.bf16.msra.mxu1 %v4857_v7  ;;  %v262_v1 = vld [vmem:[#allocation2 + $0x668] sm:$0xff] }
  0x7d   :  { %1786 = vmatprep.subr.bf16.mxu1 %v4850_v12  ;;  %v122_v5 = vld [vmem:[#allocation2 + $0x208] sm:$0xff]  ;;  %v4922_v8 = vcombine.high %v258_v63, %v262_v1  ;;  %v4921_v11 = vcombine.low %v258_v63, %v262_v1  ;;  %v67_v63 = vld [vmem:[#allocation2 + $0x50] sm:$0xff] }
  0x7e   :  { %1746 = vmatpush1.bf16.msra.mxu0 %v4721_v14  ;;  %v126_v6 = vld [vmem:[#allocation2 + $0x228] sm:$0xff]  ;;  %v119_v14 = vld [vmem:[#allocation2 + $0x1f0] sm:$0xff] }
  0x7f   :  { %1747 = vmatprep.subr.bf16.mxu0 %v4842_v17  ;;  %v250_v7 = vld [vmem:[#allocation2 + $0x608] sm:$0xff]  ;;  %v4786_v12 = vcombine.high %v122_v5, %v126_v6  ;;  %v4785_v20 = vcombine.low %v122_v5, %v126_v6  ;;  %v4779_v53 = vcombine.low %v115_v13, %v119_v14 }
  0x80   :  { %1787 = vmatpush1.bf16.msra.mxu1 %v4849_v15  ;;  %v254_v9 = vld [vmem:[#allocation2 + $0x628] sm:$0xff]  ;;  %v243_v15 = vld [vmem:[#allocation2 + $0x5d0] sm:$0xff] }
  0x81   :  { %1788 = vmatprep.subr.bf16.mxu1 %v4970_v22  ;;  %v4914_v17 = vcombine.high %v250_v7, %v254_v9  ;;  %v4913_v21 = vcombine.low %v250_v7, %v254_v9  ;;  %v4780_v22 = vcombine.high %v115_v13, %v119_v14  ;;  %v59_v7 = vld [vmem:[#allocation2 + $0x10] sm:$0xff] }
  0x82   :  { %1748 = vmatpush2.bf16.msra.mxu0 %v4841_v24  ;;  %v111_v24 = vld [vmem:[#allocation2 + $0x1b0] sm:$0xff] }
  0x83   :  { %1749 = vmatprep.subr.bf16.mxu0 %v4834_v26  ;;  %v4908_v26 = vcombine.high %v243_v15, %v247_v18  ;;  %v4772_v29 = vcombine.high %v107_v23, %v111_v24  ;;  %v4771_v34 = vcombine.low %v107_v23, %v111_v24 }
  0x84   :  { %1789 = vmatpush2.bf16.msra.mxu1 %v4969_v25  ;;  %v235_v25 = vld [vmem:[#allocation2 + $0x590] sm:$0xff] }
  0x85   :  { %1790 = vmatprep.subr.bf16.mxu1 %v4962_v28  ;;  %v4907_v28 = vcombine.low %v243_v15, %v247_v18  ;;  %v4899_v37 = vcombine.low %v235_v25, %v239_v27  ;;  %v179_v15 = vld [vmem:[#allocation2 + $0x3d0] sm:$0xff] }
  0x86   :  { %1750 = vmatpush2.bf16.msra.mxu0 %v4833_v30  ;;  %v103_v30 = vld [vmem:[#allocation2 + $0x170] sm:$0xff] }
  0x87   :  { %1751 = vmatprep.subr.bf16.mxu0 %v4826_v32  ;;  %v227_v32 = vld [vmem:[#allocation2 + $0x550] sm:$0xff]  ;;  %v4763_v42 = vcombine.low %v99_v54, %v103_v30 }
  0x88   :  { %1791 = vmatpush2.bf16.msra.mxu1 %v4961_v31  ;;  %v4900_v31 = vcombine.high %v235_v25, %v239_v27  ;;  %v4891_v45 = vcombine.low %v227_v32, %v231_v33  ;;  %v171_v25 = vld [vmem:[#allocation2 + $0x390] sm:$0xff] }
  0x89   :  { %1792 = vmatprep.subr.bf16.mxu1 %v4954_v36  ;;  %v95_v36 = vld [vmem:[#allocation2 + $0x130] sm:$0xff] }
  0x8a   :  { %1752 = vmatpush2.bf16.msra.mxu0 %v4825_v38  ;;  %v4764_v38 = vcombine.high %v99_v54, %v103_v30  ;;  %v4755_v50 = vcombine.low %v91_v35, %v95_v36  ;;  %v299_v54 = vld [vmem:[#allocation2 + $0x790] sm:$0xff] }
  0x8b   :  { %1753 = vmatprep.subr.bf16.mxu0 %v4818_v40  ;;  %v219_v40 = vld [vmem:[#allocation2 + $0x510] sm:$0xff] }
  0x8c   :  { %1793 = vmatpush2.bf16.msra.mxu1 %v4953_v39  ;;  %v4892_v39 = vcombine.high %v227_v32, %v231_v33  ;;  %v4883_v51 = vcombine.low %v219_v40, %v223_v41  ;;  %v167_v32 = vld [vmem:[#allocation2 + $0x370] sm:$0xff] }
  0x8d   :  { %1794 = vmatprep.subr.bf16.mxu1 %v4946_v44  ;;  %v87_v44 = vld [vmem:[#allocation2 + $0xf0] sm:$0xff] }
  0x8e   :  { %1754 = vmatpush2.bf16.msra.mxu0 %v4817_v46  ;;  %v4756_v46 = vcombine.high %v91_v35, %v95_v36  ;;  %v4747_v62 = vcombine.low %v83_v43, %v87_v44  ;;  %v291_v35 = vld [vmem:[#allocation2 + $0x750] sm:$0xff] }
  0x8f   :  { %1755 = vmatprep.subr.bf16.mxu0 %v4810_v48  ;;  %v211_v48 = vld [vmem:[#allocation2 + $0x4d0] sm:$0xff] }
  0x90   :  { %1795 = vmatpush2.bf16.msra.mxu1 %v4945_v47  ;;  %v4884_v47 = vcombine.high %v219_v40, %v223_v41  ;;  %v4876_v55 = vcombine.high %v211_v48, %v215_v49  ;;  %v4875_v1 = vcombine.low %v211_v48, %v215_v49  ;;  %v295_v36 = vld [vmem:[#allocation2 + $0x770] sm:$0xff] }
  0x91   :  { %1796 = vmatprep.subr.bf16.mxu1 %v4938_v52  ;;  %v4748_v52 = vcombine.high %v83_v43, %v87_v44  ;;  %v159_v40 = vld [vmem:[#allocation2 + $0x330] sm:$0xff]  ;;  %v4955_v49 = vcombine.low %v291_v35, %v295_v36 }
  0x92   :  { %1756 = vmatpush2.bf16.msra.mxu0 %v4809_v56  ;;  %v75_v56 = vld [vmem:[#allocation2 + $0x90] sm:$0xff] }
  0x93   :  { %1757 = vmatprep.subr.bf16.mxu0 %v4802_v60  ;;  %v203_v60 = vld [vmem:[#allocation2 + $0x490] sm:$0xff] }
  0x94   :  { %1797 = vmatpush2.bf16.msra.mxu1 %v4937_v57  ;;  %v79_v57 = vld [vmem:[#allocation2 + $0xb0] sm:$0xff]  ;;  %v4868_v5 = vcombine.high %v203_v60, %v207_v61  ;;  %v4867_v9 = vcombine.low %v203_v60, %v207_v61 }
  0x95   :  { %1798 = vmatprep.subr.bf16.mxu1 %v4930_v0  ;;  %v71_v0 = vld [vmem:[#allocation2 + $0x70] sm:$0xff]  ;;  %v4739_v6 = vcombine.low %v75_v56, %v79_v57 }
  0x96   :  { %1758 = vmatpush2.bf16.msra.mxu0 %v4801_v2  ;;  %v4740_v2 = vcombine.high %v75_v56, %v79_v57  ;;  %v4731_v14 = vcombine.low %v67_v63, %v71_v0  ;;  %v283_v43 = vld [vmem:[#allocation2 + $0x710] sm:$0xff] }
  0x97   :  { %1759 = vmatprep.subr.bf16.mxu0 %v4794_v4  ;;  %v199_v4 = vld [vmem:[#allocation2 + $0x470] sm:$0xff] }
  0x98   :  { %1799 = vmatpush2.bf16.msra.mxu1 %v4929_v3  ;;  %v195_v3 = vld [vmem:[#allocation2 + $0x450] sm:$0xff] }
  0x99   :  { %1800 = vmatprep.subr.bf16.mxu1 %v4922_v8  ;;  %v63_v8 = vld [vmem:[#allocation2 + $0x30] sm:$0xff]  ;;  %v4860_v13 = vcombine.high %v195_v3, %v199_v4  ;;  %v4859_v18 = vcombine.low %v195_v3, %v199_v4 }
  0x9a   :  { %1760 = vmatpush2.bf16.msra.mxu0 %v4793_v10  ;;  %v4732_v10 = vcombine.high %v67_v63, %v71_v0  ;;  %v4723_v24 = vcombine.low %v59_v7, %v63_v8  ;;  %v287_v44 = vld [vmem:[#allocation2 + $0x730] sm:$0xff] }
  0x9b   :  { %1761 = vmatprep.subr.bf16.mxu0 %v4786_v12  ;;  %v191_v12 = vld [vmem:[#allocation2 + $0x430] sm:$0xff]  ;;  %v4947_v61 = vcombine.low %v283_v43, %v287_v44 }
  0x9c   :  { %1801 = vmatpush2.bf16.msra.mxu1 %v4921_v11  ;;  %v187_v11 = vld [vmem:[#allocation2 + $0x410] sm:$0xff] }
  0x9d   :  { %1802 = vmatprep.subr.bf16.mxu1 %v4914_v17  ;;  %v183_v17 = vld [vmem:[#allocation2 + $0x3f0] sm:$0xff]  ;;  %v4852_v23 = vcombine.high %v187_v11, %v191_v12  ;;  %v4851_v27 = vcombine.low %v187_v11, %v191_v12 }
  0x9e   :  { %1762 = vmatpush2.bf16.msra.mxu0 %v4785_v20  ;;  %v4724_v20 = vcombine.high %v59_v7, %v63_v8  ;;  %v4843_v30 = vcombine.low %v179_v15, %v183_v17  ;;  %v151_v48 = vld [vmem:[#allocation2 + $0x2f0] sm:$0xff] }
  0x9f   :  { %1813 = vmatprep.subr.bf16.mxu0 %v4780_v22  ;;  %v311_v22 = vld [vmem:[#allocation2 + $0x7f0] sm:$0xff] }
  0xa0   :  { %1803 = vmatpush2.bf16.msra.mxu1 %v4913_v21  ;;  %v307_v21 = vld [vmem:[#allocation2 + $0x7d0] sm:$0xff] }
  0xa1   :  { %1854 = vmatprep.subr.bf16.mxu1 %v4908_v26  ;;  %1764 = vmatmul.mubr.bf16.vlgmr.msra.gmra.mxu0 %v6011_v16  ;;  %v175_v26 = vld [vmem:[#allocation2 + $0x3b0] sm:$0xff]  ;;  %v4971_v33 = vcombine.low %v307_v21, %v311_v22 }
  0xa2   :  { %1814 = vmatpush1.bf16.msra.mxu0 %v4779_v53  ;;  %1845 = vmatprep.mubr.bf16.mxu0 %v6001_v58  ;;  %v4844_v53 = vcombine.high %v179_v15, %v183_v17  ;;  %v139_v57 = vld [vmem:[#allocation2 + $0x290] sm:$0xff] }
  0xa3   :  { %1805 = vmatmul.mubr.bf16.vlgmr.msra.gmra.mxu1 %v6015_v19  ;;  %1815 = vmatprep.subr.bf16.mxu0 %v4772_v29  ;;  %v4972_v29 = vcombine.high %v307_v21, %v311_v22  ;;  %v143_v60 = vld [vmem:[#allocation2 + $0x2b0] sm:$0xff]  ;;  %v116_v21 = vld [vmem:[#allocation2 + $0x1d8] sm:$0xff] }
  0xa4   :  { %1855 = vmatpush1.bf16.msra.mxu1 %v4907_v28  ;;  %1886 = vmatprep.mubr.bf16.mxu1 %v6005_v59  ;;  %v303_v28 = vld [vmem:[#allocation2 + $0x7b0] sm:$0xff]  ;;  %v120_v22 = vld [vmem:[#allocation2 + $0x1f8] sm:$0xff] }
  0xa5   :  { %1856 = vmatprep.subr.bf16.mxu1 %v4900_v31  ;;  %v163_v31 = vld [vmem:[#allocation2 + $0x350] sm:$0xff]  ;;  %v4963_v41 = vcombine.low %v299_v54, %v303_v28 }
  0xa6   :  { %1816 = vmatpush1.bf16.msra.mxu0 %v4771_v34  ;;  %v4836_v34 = vcombine.high %v171_v25, %v175_v26  ;;  %v267_v63 = vld [vmem:[#allocation2 + $0x690] sm:$0xff] }
  0xa7   :  { %1817 = vmatprep.subr.bf16.mxu0 %v4764_v38  ;;  %v4835_v38 = vcombine.low %v171_v25, %v175_v26  ;;  %v271_v0 = vld [vmem:[#allocation2 + $0x6b0] sm:$0xff]  ;;  %v244_v25 = vld [vmem:[#allocation2 + $0x5d8] sm:$0xff] }
  0xa8   :  { %1857 = vmatpush1.bf16.msra.mxu1 %v4899_v37  ;;  %v4964_v37 = vcombine.high %v299_v54, %v303_v28  ;;  %v131_v3 = vld [vmem:[#allocation2 + $0x250] sm:$0xff]  ;;  %v248_v26 = vld [vmem:[#allocation2 + $0x5f8] sm:$0xff] }
  0xa9   :  { %1858 = vmatprep.subr.bf16.mxu1 %v4892_v39  ;;  %v155_v39 = vld [vmem:[#allocation2 + $0x310] sm:$0xff]  ;;  %v108_v54 = vld [vmem:[#allocation2 + $0x198] sm:$0xff] }
  0xaa   :  { %1818 = vmatpush1.bf16.msra.mxu0 %v4763_v42  ;;  %v4828_v42 = vcombine.high %v163_v31, %v167_v32  ;;  %v4819_v56 = vcombine.low %v155_v39, %v159_v40  ;;  %v135_v4 = vld [vmem:[#allocation2 + $0x270] sm:$0xff]  ;;  %v112_v28 = vld [vmem:[#allocation2 + $0x1b8] sm:$0xff] }
  0xab   :  { %1819 = vmatprep.subr.bf16.mxu0 %v4756_v46  ;;  %v4827_v46 = vcombine.low %v163_v31, %v167_v32  ;;  %v259_v7 = vld [vmem:[#allocation2 + $0x650] sm:$0xff]  ;;  %v236_v31 = vld [vmem:[#allocation2 + $0x598] sm:$0xff] }
  0xac   :  { %1859 = vmatpush1.bf16.msra.mxu1 %v4891_v45  ;;  %v4956_v45 = vcombine.high %v291_v35, %v295_v36  ;;  %v263_v8 = vld [vmem:[#allocation2 + $0x670] sm:$0xff]  ;;  %v240_v32 = vld [vmem:[#allocation2 + $0x5b8] sm:$0xff] }
  0xad   :  { %1860 = vmatprep.subr.bf16.mxu1 %v4884_v47  ;;  %v147_v47 = vld [vmem:[#allocation2 + $0x2d0] sm:$0xff]  ;;  %v100_v35 = vld [vmem:[#allocation2 + $0x158] sm:$0xff] }
  0xae   :  { %1820 = vmatpush1.bf16.msra.mxu0 %v4755_v50  ;;  %v4820_v50 = vcombine.high %v155_v39, %v159_v40  ;;  %v123_v11 = vld [vmem:[#allocation2 + $0x210] sm:$0xff]  ;;  %v104_v36 = vld [vmem:[#allocation2 + $0x178] sm:$0xff]  ;;  %v4902_v39 = vcombine.high %v236_v31, %v240_v32 }
  0xaf   :  { %1821 = vmatprep.subr.bf16.mxu0 %v4748_v52  ;;  %v279_v52 = vld [vmem:[#allocation2 + $0x6f0] sm:$0xff]  ;;  %v228_v40 = vld [vmem:[#allocation2 + $0x558] sm:$0xff] }
  0xb0   :  { %1861 = vmatpush1.bf16.msra.mxu1 %v4883_v51  ;;  %v275_v51 = vld [vmem:[#allocation2 + $0x6d0] sm:$0xff] }
  0xb1   :  { %1862 = vmatprep.subr.bf16.mxu1 %v4876_v55  ;;  %v4948_v55 = vcombine.high %v283_v43, %v287_v44  ;;  %v127_v12 = vld [vmem:[#allocation2 + $0x230] sm:$0xff]  ;;  %v92_v43 = vld [vmem:[#allocation2 + $0x118] sm:$0xff] }
  0xb2   :  { %1822 = vmatpush1.bf16.msra.mxu0 %v4747_v62  ;;  %v4812_v62 = vcombine.high %v147_v47, %v151_v48  ;;  %v251_v15 = vld [vmem:[#allocation2 + $0x610] sm:$0xff]  ;;  %v96_v44 = vld [vmem:[#allocation2 + $0x138] sm:$0xff] }
  0xb3   :  { %1823 = vmatprep.subr.bf16.mxu0 %v4740_v2  ;;  %v4811_v2 = vcombine.low %v147_v47, %v151_v48  ;;  %v255_v17 = vld [vmem:[#allocation2 + $0x630] sm:$0xff]  ;;  %v220_v48 = vld [vmem:[#allocation2 + $0x518] sm:$0xff] }
  0xb4   :  { %1863 = vmatpush1.bf16.msra.mxu1 %v4875_v1  ;;  %v4940_v1 = vcombine.high %v275_v51, %v279_v52 }
  0xb5   :  { %1864 = vmatprep.subr.bf16.mxu1 %v4868_v5  ;;  %v4939_v5 = vcombine.low %v275_v51, %v279_v52  ;;  %v84_v51 = vld [vmem:[#allocation2 + $0xd8] sm:$0xff] }
  0xb6   :  { %1824 = vmatpush1.bf16.msra.mxu0 %v4739_v6  ;;  %v4804_v6 = vcombine.high %v139_v57, %v143_v60  ;;  %v88_v52 = vld [vmem:[#allocation2 + $0xf8] sm:$0xff] }
  0xb7   :  { %1825 = vmatprep.subr.bf16.mxu0 %v4732_v10  ;;  %v4803_v10 = vcombine.low %v139_v57, %v143_v60  ;;  %v212_v60 = vld [vmem:[#allocation2 + $0x4d8] sm:$0xff] }
  0xb8   :  { %1865 = vmatpush1.bf16.msra.mxu1 %v4867_v9  ;;  %v4932_v9 = vcombine.high %v267_v63, %v271_v0 }
  0xb9   :  { %1866 = vmatprep.subr.bf16.mxu1 %v4860_v13  ;;  %v4931_v13 = vcombine.low %v267_v63, %v271_v0  ;;  %v4750_v63 = vcombine.high %v84_v51, %v88_v52  ;;  %v76_v0 = vld [vmem:[#allocation2 + $0x98] sm:$0xff] }
  0xba   :  { %1826 = vmatpush1.bf16.msra.mxu0 %v4731_v14  ;;  %v4796_v14 = vcombine.high %v131_v3, %v135_v4 }
  0xbb   :  { %1827 = vmatprep.subr.bf16.mxu0 %v4724_v20  ;;  %v4795_v20 = vcombine.low %v131_v3, %v135_v4  ;;  %v208_v3 = vld [vmem:[#allocation2 + $0x4b8] sm:$0xff]  ;;  %v4749_v4 = vcombine.low %v84_v51, %v88_v52 }
  0xbc   :  { %1867 = vmatpush1.bf16.msra.mxu1 %v4859_v18  ;;  %v4924_v18 = vcombine.high %v259_v7, %v263_v8 }
  0xbd   :  { %1868 = vmatprep.subr.bf16.mxu1 %v4852_v23  ;;  %v4923_v23 = vcombine.low %v259_v7, %v263_v8 }
  0xbe   :  { %1828 = vmatpush1.bf16.msra.mxu0 %v4723_v24  ;;  %v4788_v24 = vcombine.high %v123_v11, %v127_v12 }
  0xbf   :  { %1829 = vmatprep.subr.bf16.mxu0 %v4844_v53  ;;  %v4787_v53 = vcombine.low %v123_v11, %v127_v12 }
  0xc0   :  { %1869 = vmatpush1.bf16.msra.mxu1 %v4851_v27  ;;  %v4916_v27 = vcombine.high %v251_v15, %v255_v17 }
  0xc1   :  { %1870 = vmatprep.subr.bf16.mxu1 %v4972_v29  ;;  %v4915_v29 = vcombine.low %v251_v15, %v255_v17 }
  0xc2   :  { %1830 = vmatpush2.bf16.msra.mxu0 %v4843_v30  ;;  %v4782_v30 = vcombine.high %v116_v21, %v120_v22 }
  0xc3   :  { %1831 = vmatprep.subr.bf16.mxu0 %v4836_v34  ;;  %v4781_v34 = vcombine.low %v116_v21, %v120_v22 }
  0xc4   :  { %1871 = vmatpush2.bf16.msra.mxu1 %v4971_v33  ;;  %v4910_v33 = vcombine.high %v244_v25, %v248_v26 }
  0xc5   :  { %1872 = vmatprep.subr.bf16.mxu1 %v4964_v37  ;;  %v4909_v37 = vcombine.low %v244_v25, %v248_v26 }
  0xc6   :  { %1832 = vmatpush2.bf16.msra.mxu0 %v4835_v38  ;;  %v4774_v38 = vcombine.high %v108_v54, %v112_v28 }
  0xc7   :  { %1833 = vmatprep.subr.bf16.mxu0 %v4828_v42  ;;  %v4773_v42 = vcombine.low %v108_v54, %v112_v28 }
  0xc8   :  { %1873 = vmatpush2.bf16.msra.mxu1 %v4963_v41  ;;  %v232_v41 = vld [vmem:[#allocation2 + $0x578] sm:$0xff] }
  0xc9   :  { %1874 = vmatprep.subr.bf16.mxu1 %v4956_v45  ;;  %v4901_v45 = vcombine.low %v236_v31, %v240_v32  ;;  %v4894_v47 = vcombine.high %v228_v40, %v232_v41 }
  0xca   :  { %1834 = vmatpush2.bf16.msra.mxu0 %v4827_v46  ;;  %v4766_v46 = vcombine.high %v100_v35, %v104_v36 }
  0xcb   :  { %1835 = vmatprep.subr.bf16.mxu0 %v4820_v50  ;;  %v4765_v50 = vcombine.low %v100_v35, %v104_v36 }
  0xcc   :  { %1875 = vmatpush2.bf16.msra.mxu1 %v4955_v49  ;;  %v224_v49 = vld [vmem:[#allocation2 + $0x538] sm:$0xff] }
  0xcd   :  { %1876 = vmatprep.subr.bf16.mxu1 %v4948_v55  ;;  %v4893_v55 = vcombine.low %v228_v40, %v232_v41  ;;  %v4886_v57 = vcombine.high %v220_v48, %v224_v49  ;;  %v292_v41 = vld [vmem:[#allocation2 + $0x758] sm:$0xff] }
  0xce   :  { %1836 = vmatpush2.bf16.msra.mxu0 %v4819_v56  ;;  %v4758_v56 = vcombine.high %v92_v43, %v96_v44 }
  0xcf   :  { %1837 = vmatprep.subr.bf16.mxu0 %v4812_v62  ;;  %v4757_v62 = vcombine.low %v92_v43, %v96_v44 }
  0xd0   :  { %1877 = vmatpush2.bf16.msra.mxu1 %v4947_v61  ;;  %v216_v61 = vld [vmem:[#allocation2 + $0x4f8] sm:$0xff] }
  0xd1   :  { %1878 = vmatprep.subr.bf16.mxu1 %v4940_v1  ;;  %v80_v1 = vld [vmem:[#allocation2 + $0xb8] sm:$0xff]  ;;  %v4877_v7 = vcombine.low %v212_v60, %v216_v61 }
  0xd2   :  { %1838 = vmatpush2.bf16.msra.mxu0 %v4811_v2  ;;  %v204_v2 = vld [vmem:[#allocation2 + $0x498] sm:$0xff]  ;;  %v4742_v8 = vcombine.high %v76_v0, %v80_v1  ;;  %v4741_v12 = vcombine.low %v76_v0, %v80_v1 }
  0xd3   :  { %1839 = vmatprep.subr.bf16.mxu0 %v4804_v6  ;;  %v72_v6 = vld [vmem:[#allocation2 + $0x78] sm:$0xff]  ;;  %v4870_v11 = vcombine.high %v204_v2, %v208_v3  ;;  %v4869_v15 = vcombine.low %v204_v2, %v208_v3 }
  0xd4   :  { %1879 = vmatpush2.bf16.msra.mxu1 %v4939_v5  ;;  %v68_v5 = vld [vmem:[#allocation2 + $0x58] sm:$0xff] }
  0xd5   :  { %1880 = vmatprep.subr.bf16.mxu1 %v4932_v9  ;;  %v196_v9 = vld [vmem:[#allocation2 + $0x458] sm:$0xff]  ;;  %v4734_v17 = vcombine.high %v68_v5, %v72_v6  ;;  %v4733_v22 = vcombine.low %v68_v5, %v72_v6 }
  0xd6   :  { %1840 = vmatpush2.bf16.msra.mxu0 %v4803_v10  ;;  %v200_v10 = vld [vmem:[#allocation2 + $0x478] sm:$0xff] }
  0xd7   :  { %1841 = vmatprep.subr.bf16.mxu0 %v4796_v14  ;;  %v64_v14 = vld [vmem:[#allocation2 + $0x38] sm:$0xff]  ;;  %v4862_v21 = vcombine.high %v196_v9, %v200_v10  ;;  %v4861_v25 = vcombine.low %v196_v9, %v200_v10 }
  0xd8   :  { %1881 = vmatpush2.bf16.msra.mxu1 %v4931_v13  ;;  %v60_v13 = vld [vmem:[#allocation2 + $0x18] sm:$0xff] }
  0xd9   :  { %1882 = vmatprep.subr.bf16.mxu1 %v4924_v18  ;;  %v188_v18 = vld [vmem:[#allocation2 + $0x418] sm:$0xff]  ;;  %v4726_v26 = vcombine.high %v60_v13, %v64_v14  ;;  %v4725_v28 = vcombine.low %v60_v13, %v64_v14 }
  0xda   :  { %1842 = vmatpush2.bf16.msra.mxu0 %v4795_v20  ;;  %v192_v20 = vld [vmem:[#allocation2 + $0x438] sm:$0xff] }
  0xdb   :  { %1843 = vmatprep.subr.bf16.mxu0 %v4788_v24  ;;  %v184_v24 = vld [vmem:[#allocation2 + $0x3f8] sm:$0xff]  ;;  %v4854_v54 = vcombine.high %v188_v18, %v192_v20  ;;  %v4853_v31 = vcombine.low %v188_v18, %v192_v20 }
  0xdc   :  { %1883 = vmatpush2.bf16.msra.mxu1 %v4923_v23  ;;  %v180_v23 = vld [vmem:[#allocation2 + $0x3d8] sm:$0xff] }
  0xdd   :  { %1884 = vmatprep.subr.bf16.mxu1 %v4916_v27  ;;  %v308_v27 = vld [vmem:[#allocation2 + $0x7d8] sm:$0xff]  ;;  %v4846_v32 = vcombine.high %v180_v23, %v184_v24  ;;  %v4845_v36 = vcombine.low %v180_v23, %v184_v24 }
  0xde   :  { %1844 = vmatpush2.bf16.msra.mxu0 %v4787_v53  ;;  %v312_v53 = vld [vmem:[#allocation2 + $0x7f8] sm:$0xff] }
  0xdf   :  { %1895 = vmatprep.subr.bf16.mxu0 %v4782_v30  ;;  %v176_v30 = vld [vmem:[#allocation2 + $0x3b8] sm:$0xff]  ;;  %v4974_v35 = vcombine.high %v308_v27, %v312_v53 }
  0xe0   :  { %1885 = vmatpush2.bf16.msra.mxu1 %v4915_v29  ;;  %v172_v29 = vld [vmem:[#allocation2 + $0x398] sm:$0xff] }
  0xe1   :  { %1936 = vmatprep.subr.bf16.mxu1 %v4910_v33  ;;  %1846 = vmatmul.mubr.bf16.vlgmr.msra.gmra.mxu0 %v6011_v16  ;;  %v300_v33 = vld [vmem:[#allocation2 + $0x798] sm:$0xff]  ;;  %v4838_v40 = vcombine.high %v172_v29, %v176_v30  ;;  %v4837_v44 = vcombine.low %v172_v29, %v176_v30  ;;  %v5383_v30 = vld [vmem:[#allocation4 + $0xe4] ss:$16 sps:$4 sm:$0xff]  }
  0xe2   :  { %1896 = vmatpush1.bf16.msra.mxu0 %v4781_v34  ;;  %1927 = vmatprep.mubr.bf16.mxu0 %v6001_v58  ;;  %v4885_v58 = vcombine.low %v220_v48, %v224_v49  ;;  %v304_v34 = vld [vmem:[#allocation2 + $0x7b8] sm:$0xff] }
  0xe3   :  { %1887 = vmatmul.mubr.bf16.vlgmr.msra.gmra.mxu1 %v6015_v19  ;;  %1897 = vmatprep.subr.bf16.mxu0 %v4774_v38  ;;  %v168_v38 = vld [vmem:[#allocation2 + $0x378] sm:$0xff]  ;;  %v4966_v43 = vcombine.high %v300_v33, %v304_v34 }
  0xe4   :  { %1937 = vmatpush1.bf16.msra.mxu1 %v4909_v37  ;;  %1968 = vmatprep.mubr.bf16.mxu1 %v6005_v59  ;;  %v4878_v59 = vcombine.high %v212_v60, %v216_v61  ;;  %v164_v37 = vld [vmem:[#allocation2 + $0x358] sm:$0xff] }
  0xe5   :  { %1938 = vmatprep.subr.bf16.mxu1 %v4902_v39  ;;  %v4973_v39 = vcombine.low %v308_v27, %v312_v53  ;;  %v4830_v48 = vcombine.high %v164_v37, %v168_v38  ;;  %v284_v49 = vld [vmem:[#allocation2 + $0x718] sm:$0xff]  ;;  %v4829_v52 = vcombine.low %v164_v37, %v168_v38  ;;  %v5401_v38 = vld [vmem:[#allocation4 + $0x2c4] ss:$16 sps:$4 sm:$0xff]  }
  0xe6   :  { %1898 = vmatpush1.bf16.msra.mxu0 %v4773_v42  ;;  %v296_v42 = vld [vmem:[#allocation2 + $0x778] sm:$0xff] }
  0xe7   :  { %1899 = vmatprep.subr.bf16.mxu0 %v4766_v46  ;;  %v160_v46 = vld [vmem:[#allocation2 + $0x338] sm:$0xff]  ;;  %v4958_v51 = vcombine.high %v292_v41, %v296_v42 }
  0xe8   :  { %1939 = vmatpush1.bf16.msra.mxu1 %v4901_v45  ;;  %v156_v45 = vld [vmem:[#allocation2 + $0x318] sm:$0xff] }
  0xe9   :  { %1940 = vmatprep.subr.bf16.mxu1 %v4894_v47  ;;  %v4965_v47 = vcombine.low %v300_v33, %v304_v34  ;;  %v4822_v60 = vcombine.high %v156_v45, %v160_v46  ;;  %v276_v61 = vld [vmem:[#allocation2 + $0x6d8] sm:$0xff]  ;;  %v6037_v33 = vld [vmem:[%s6434_s2] sm:$0xff] }
  0xea   :  { %1900 = vmatpush1.bf16.msra.mxu0 %v4765_v50  ;;  %v288_v50 = vld [vmem:[#allocation2 + $0x738] sm:$0xff]  ;;  %v5381_v34 = vld [vmem:[#allocation4 + $0xe0] ss:$16 sps:$4 sm:$0xff]  }
  0xeb   :  { %1901 = vmatprep.subr.bf16.mxu0 %v4758_v56  ;;  %v152_v56 = vld [vmem:[#allocation2 + $0x2f8] sm:$0xff]  ;;  %v4949_v1 = vcombine.low %v284_v49, %v288_v50 }
  0xec   :  { %1941 = vmatpush1.bf16.msra.mxu1 %v4893_v55  ;;  %v148_v55 = vld [vmem:[#allocation2 + $0x2d8] sm:$0xff] }
  0xed   :  { %1942 = vmatprep.subr.bf16.mxu1 %v4886_v57  ;;  %v4957_v57 = vcombine.low %v292_v41, %v296_v42  ;;  %v140_v0 = vld [vmem:[#allocation2 + $0x298] sm:$0xff]  ;;  %v4814_v2 = vcombine.high %v148_v55, %v152_v56  ;;  %v4813_v6 = vcombine.low %v148_v55, %v152_v56  ;;  %v5384_v41 = vld [vmem:[#allocation4 + $0xc0] ss:$16 sps:$4 sm:$0xff]  }
  0xee   :  { %1902 = vmatpush1.bf16.msra.mxu0 %v4757_v62  ;;  %v280_v62 = vld [vmem:[#allocation2 + $0x6f8] sm:$0xff] }
  0xef   :  { %1903 = vmatprep.subr.bf16.mxu0 %v4750_v63  ;;  %v4821_v63 = vcombine.low %v156_v45, %v160_v46  ;;  %v268_v3 = vld [vmem:[#allocation2 + $0x698] sm:$0xff]  ;;  %v4942_v5 = vcombine.high %v276_v61, %v280_v62  ;;  %v4941_v9 = vcombine.low %v276_v61, %v280_v62  ;;  %v5390_v61 = vld [vmem:[#allocation4 + $0x80] ss:$16 sps:$4 sm:$0xff]   ;;  %v5398_v62 = vld [vmem:[#allocation4 + $0x64] ss:$16 sps:$4 sm:$0xff]  }
  0xf0   :  { %1943 = vmatpush1.bf16.msra.mxu1 %v4885_v58  ;;  %v4950_v58 = vcombine.high %v284_v49, %v288_v50  ;;  %v124_v20 = vld [vmem:[#allocation2 + $0x218] sm:$0xff] }
  0xf1   :  { %1944 = vmatprep.subr.bf16.mxu1 %v4878_v59  ;;  %v144_v59 = vld [vmem:[#allocation2 + $0x2b8] sm:$0xff] }
  0xf2   :  { %1904 = vmatpush1.bf16.msra.mxu0 %v4749_v4  ;;  %v272_v4 = vld [vmem:[#allocation2 + $0x6b8] sm:$0xff]  ;;  %v4806_v10 = vcombine.high %v140_v0, %v144_v59  ;;  %v4805_v14 = vcombine.low %v140_v0, %v144_v59  ;;  %v5396_v0 = vld [vmem:[#allocation4 + $0x60] ss:$16 sps:$4 sm:$0xff]   ;;  %v5404_v59 = vld [vmem:[#allocation4 + $0x44] ss:$16 sps:$4 sm:$0xff]  }
  0xf3   :  { %1905 = vmatprep.subr.bf16.mxu0 %v4742_v8  ;;  %v136_v8 = vld [vmem:[#allocation2 + $0x278] sm:$0xff]  ;;  %v4934_v13 = vcombine.high %v268_v3, %v272_v4 }
  0xf4   :  { %1945 = vmatpush1.bf16.msra.mxu1 %v4877_v7  ;;  %v132_v7 = vld [vmem:[#allocation2 + $0x258] sm:$0xff] }
  0xf5   :  { %1946 = vmatprep.subr.bf16.mxu1 %v4870_v11  ;;  %v260_v11 = vld [vmem:[#allocation2 + $0x658] sm:$0xff] }
  0xf6   :  { %1906 = vmatpush1.bf16.msra.mxu0 %v4741_v12  ;;  %v264_v12 = vld [vmem:[#allocation2 + $0x678] sm:$0xff] }
  0xf7   :  { %1907 = vmatprep.subr.bf16.mxu0 %v4734_v17  ;;  %v4798_v17 = vcombine.high %v132_v7, %v136_v8  ;;  %v4926_v18 = vcombine.high %v260_v11, %v264_v12  ;;  %v252_v23 = vld [vmem:[#allocation2 + $0x618] sm:$0xff] }
  0xf8   :  { %1947 = vmatpush1.bf16.msra.mxu1 %v4869_v15  ;;  %v4933_v15 = vcombine.low %v268_v3, %v272_v4  ;;  %v256_v24 = vld [vmem:[#allocation2 + $0x638] sm:$0xff]  ;;  %v5402_v3 = vld [vmem:[#allocation4 + $0x40] ss:$16 sps:$4 sm:$0xff]   ;;  %v5410_v4 = vld [vmem:[#allocation4 + $0x24] ss:$16 sps:$4 sm:$0xff]  }
  0xf9   :  { %1948 = vmatprep.subr.bf16.mxu1 %v4862_v21  ;;  %v128_v21 = vld [vmem:[#allocation2 + $0x238] sm:$0xff]  ;;  %v4918_v53 = vcombine.high %v252_v23, %v256_v24  ;;  %v4917_v29 = vcombine.low %v252_v23, %v256_v24  ;;  %v5447_v23 = vld [vmem:[#allocation4 + $0x3c0] ss:$16 sps:$4 sm:$0xff]   ;;  %v5455_v24 = vld [vmem:[#allocation4 + $0x3a4] ss:$16 sps:$4 sm:$0xff]  }
  0xfa   :  { %1908 = vmatpush1.bf16.msra.mxu0 %v4733_v22  ;;  %v315_v22 = vlaneseq  ;;  %v4790_v27 = vcombine.high %v124_v20, %v128_v21 }
  0xfb   :  { %1909 = vmatprep.subr.bf16.mxu0 %v4726_v26  ;;  %v4925_v26 = vcombine.low %v260_v11, %v264_v12  ;;  %v5414_v11 = vld [vmem:[#allocation4] ss:$16 sps:$4 sm:$0xff]   ;;  %v5422_v12 = vld [vmem:[#allocation4 + $0x1e4] ss:$16 sps:$4 sm:$0xff]  }
  0xfc   :  { %1949 = vmatpush1.bf16.msra.mxu1 %v4861_v25  ;;  %v4797_v25 = vcombine.low %v132_v7, %v136_v8  ;;  %v5408_v7 = vld [vmem:[#allocation4 + $0x20] ss:$16 sps:$4 sm:$0xff]   ;;  %v5416_v8 = vld [vmem:[#allocation4 + $0x4] ss:$16 sps:$4 sm:$0xff]  }
  0xfd   :  { %1950 = vmatprep.subr.bf16.mxu1 %v4854_v54  ;;  %v6029_v54 = vshrl.u32 %v315_v22, 7  ;;  %v5434_v22 = vld [vmem:[#allocation4 + $0x1a4] ss:$16 sps:$4 sm:$0xff]  }
  0xfe   :  { %1910 = vmatpush1.bf16.msra.mxu0 %v4725_v28  ;;  %v4789_v28 = vcombine.low %v124_v20, %v128_v21  ;;  %v5449_v20 = vld [vmem:[#allocation4 + $0x3c4] ss:$16 sps:$4 sm:$0xff]   ;;  %v5426_v21 = vld [vmem:[#allocation4 + $0x1c0] ss:$16 sps:$4 sm:$0xff]  }
  0xff   :  { %1911 = vmatprep.subr.bf16.mxu0 %v4846_v32  ;;  %v5395_v32 = vld [vmem:[#allocation4 + $0x2e4] ss:$16 sps:$4 sm:$0xff]  }
 0x100   :  { %1951 = vmatpush1.bf16.msra.mxu1 %v4853_v31  ;;  %v6032_v31 = vsub.s32 1, %v6029_v54 }
 0x101   :  { %1952 = vmatprep.subr.bf16.mxu1 %v4974_v35  ;;  %v5386_v35 = vld [vmem:[#allocation4 + $0xc4] ss:$16 sps:$4 sm:$0xff]  }
 0x102   :  { %1912 = vmatpush2.bf16.msra.mxu0 %v4845_v36  ;;  %v5393_v36 = vld [vmem:[#allocation4 + $0x2e0] ss:$16 sps:$4 sm:$0xff]   ;;  %v322_v37 = vrot.slane %v6037_v33, %v6032_v31 }
 0x103   :  { %1913 = vmatprep.subr.bf16.mxu0 %v4838_v40 }
 0x104   :  { %1953 = vmatpush2.bf16.msra.mxu1 %v4973_v39 }
 0x105   :  { %1954 = vmatprep.subr.bf16.mxu1 %v4966_v43  ;;  %v5389_v43 = vld [vmem:[#allocation4 + $0xa4] ss:$16 sps:$4 sm:$0xff]  }
 0x106   :  { %1914 = vmatpush2.bf16.msra.mxu0 %v4837_v44  ;;  %v5399_v44 = vld [vmem:[#allocation4 + $0x2c0] ss:$16 sps:$4 sm:$0xff]  }
 0x107   :  { %1915 = vmatprep.subr.bf16.mxu0 %v4830_v48 }
 0x108   :  { %1955 = vmatpush2.bf16.msra.mxu1 %v4965_v47  ;;  %v5407_v47 = vld [vmem:[#allocation4 + $0x2a4] ss:$16 sps:$4 sm:$0xff]  }
 0x109   :  { %1956 = vmatprep.subr.bf16.mxu1 %v4958_v51 }
 0x10a   :  { %1916 = vmatpush2.bf16.msra.mxu0 %v4829_v52  ;;  %v5392_v52 = vld [vmem:[#allocation4 + $0x84] ss:$16 sps:$4 sm:$0xff]  }
 0x10b   :  { %1917 = vmatprep.subr.bf16.mxu0 %v4822_v60 }
 0x10c   :  { %1957 = vmatpush2.bf16.msra.mxu1 %v4957_v57  ;;  %v5413_v57 = vld [vmem:[#allocation4 + $0x284] ss:$16 sps:$4 sm:$0xff]  }
 0x10d   :  { %1958 = vmatprep.subr.bf16.mxu1 %v4950_v58  ;;  %v5411_v58 = vld [vmem:[#allocation4 + $0x280] ss:$16 sps:$4 sm:$0xff]  }
 0x10e   :  { %1918 = vmatpush2.bf16.msra.mxu0 %v4821_v63  ;;  %v5419_v63 = vld [vmem:[#allocation4 + $0x264] ss:$16 sps:$4 sm:$0xff]  }
 0x10f   :  { %1919 = vmatprep.subr.bf16.mxu0 %v4814_v2  ;;  %v5425_v2 = vld [vmem:[#allocation4 + $0x244] ss:$16 sps:$4 sm:$0xff]  }
 0x110   :  { %1959 = vmatpush2.bf16.msra.mxu1 %v4949_v1  ;;  %v5417_v1 = vld [vmem:[#allocation4 + $0x260] ss:$16 sps:$4 sm:$0xff]  }
 0x111   :  { %1960 = vmatprep.subr.bf16.mxu1 %v4942_v5  ;;  %v5423_v5 = vld [vmem:[#allocation4 + $0x240] ss:$16 sps:$4 sm:$0xff]  }
 0x112   :  { %1920 = vmatpush2.bf16.msra.mxu0 %v4813_v6  ;;  %v5431_v6 = vld [vmem:[#allocation4 + $0x224] ss:$16 sps:$4 sm:$0xff]  }
 0x113   :  { %1921 = vmatprep.subr.bf16.mxu0 %v4806_v10  ;;  %v5437_v10 = vld [vmem:[#allocation4 + $0x204] ss:$16 sps:$4 sm:$0xff]  }
 0x114   :  { %1961 = vmatpush2.bf16.msra.mxu1 %v4941_v9  ;;  %v5429_v9 = vld [vmem:[#allocation4 + $0x220] ss:$16 sps:$4 sm:$0xff]  }
 0x115   :  { %1962 = vmatprep.subr.bf16.mxu1 %v4934_v13  ;;  %v5435_v13 = vld [vmem:[#allocation4 + $0x200] ss:$16 sps:$4 sm:$0xff]  }
 0x116   :  { %1922 = vmatpush2.bf16.msra.mxu0 %v4805_v14  ;;  %v5443_v14 = vld [vmem:[#allocation4 + $0x3e4] ss:$16 sps:$4 sm:$0xff]  }
 0x117   :  { %1923 = vmatprep.subr.bf16.mxu0 %v4798_v17  ;;  %v5428_v17 = vld [vmem:[#allocation4 + $0x1c4] ss:$16 sps:$4 sm:$0xff]  }
 0x118   :  { %1963 = vmatpush2.bf16.msra.mxu1 %v4933_v15  ;;  %v5420_v15 = vld [vmem:[#allocation4 + $0x1e0] ss:$16 sps:$4 sm:$0xff]  }
 0x119   :  { %1964 = vmatprep.subr.bf16.mxu1 %v4926_v18  ;;  %v5441_v18 = vld [vmem:[#allocation4 + $0x3e0] ss:$16 sps:$4 sm:$0xff]  }
 0x11a   :  { %1924 = vmatpush2.bf16.msra.mxu0 %v4797_v25  ;;  %v5432_v25 = vld [vmem:[#allocation4 + $0x1a0] ss:$16 sps:$4 sm:$0xff]  }
 0x11b   :  { %1925 = vmatprep.subr.bf16.mxu0 %v4790_v27  ;;  %v5453_v27 = vld [vmem:[#allocation4 + $0x3a0] ss:$16 sps:$4 sm:$0xff]  }
 0x11c   :  { %1965 = vmatpush2.bf16.msra.mxu1 %v4925_v26  ;;  %v5440_v26 = vld [vmem:[#allocation4 + $0x184] ss:$16 sps:$4 sm:$0xff]  }
 0x11d   :  { %1966 = vmatprep.subr.bf16.mxu1 %v4918_v53  ;;  %v5461_v53 = vld [vmem:[#allocation4 + $0x384] ss:$16 sps:$4 sm:$0xff]  }
 0x11e   :  { %1926 = vmatpush2.bf16.msra.mxu0 %v4789_v28  ;;  %v5438_v28 = vld [vmem:[#allocation4 + $0x180] ss:$16 sps:$4 sm:$0xff]  }
 0x11f   :  { %3551 = vmatprep.subr.bf16.mxu0 %v5383_v30  ;;  %v5446_v30 = vld [vmem:[#allocation4 + $0x164] ss:$16 sps:$4 sm:$0xff]  }
 0x120   :  { %1967 = vmatpush2.bf16.msra.mxu1 %v4917_v29  ;;  %v6051_v29 = vsub.s32 0, %v6029_v54 }
 0x121   :  { %3592 = vmatprep.subr.bf16.mxu1 %v5395_v32  ;;  %v6041_v39 = vpop.f32.mrf.mxu0  ;;  %1928 = vmatmul.mubr.bf16.vlgmr.msra.gmra.mxu0 %v6011_v16  ;;  %v5387_v16 = vld [vmem:[#allocation4 + $0xa0] ss:$16 sps:$4 sm:$0xff]  }
 0x122   :  { %3552 = vmatpush1.bf16.msra.mxu0 %v5381_v34  ;;  %v5459_v32 = vld [vmem:[#allocation4 + $0x380] ss:$16 sps:$4 sm:$0xff]   ;;  %v5467_v34 = vld [vmem:[#allocation4 + $0x364] ss:$16 sps:$4 sm:$0xff]  }
 0x123   :  { %v6044_v40 = vpop.f32.mrf.mxu1  ;;  %1969 = vmatmul.mubr.bf16.vlgmr.msra.gmra.mxu1 %v6015_v19  ;;  %v1685_v42 = vpop.f32.mrf.mxu0  ;;  %3553 = vmatprep.subr.bf16.mxu0 %v5386_v35  ;;  %v5405_v19 = vld [vmem:[#allocation4 + $0x2a0] ss:$16 sps:$4 sm:$0xff]  }
 0x124   :  { %3593 = vmatpush1.bf16.msra.mxu1 %v5393_v36  ;;  %v1686_v45 = vadd.f32 %v1685_v42, %v322_v37  ;;  %v5444_v35 = vld [vmem:[#allocation4 + $0x160] ss:$16 sps:$4 sm:$0xff]   ;;  %v318_v36 = vrot.slane %v6037_v33, %v6051_v29  ;;  %v5452_v37 = vld [vmem:[#allocation4 + $0x144] ss:$16 sps:$4 sm:$0xff]  }
 0x125   :  { %v1726_v46 = vpop.f32.mrf.mxu1  ;;  %3594 = vmatprep.subr.bf16.mxu1 %v5401_v38  ;;  %v1687_v48 = vpop.f32.mrf.mxu0  ;;  %v5465_v38 = vld [vmem:[#allocation4 + $0x360] ss:$16 sps:$4 sm:$0xff]  }
 0x126   :  { %v1727_v49 = vadd.f32 %v1726_v46, %v1686_v45  ;;  %3554 = vmatpush1.bf16.msra.mxu0 %v5384_v41  ;;  %v5470_v41 = vld [vmem:[#allocation4 + $0x344] ss:$16 sps:$4 sm:$0xff]   ;;  %v5450_v42 = vld [vmem:[#allocation4 + $0x140] ss:$16 sps:$4 sm:$0xff]  }
 0x127   :  { %v1728_v50 = vpop.f32.mrf.mxu1  ;;  %v1688_v51 = vpop.f32.mrf.mxu0  ;;  %3555 = vmatprep.subr.bf16.mxu0 %v5389_v43  ;;  %v1684_v43 = vadd.f32 %v6041_v39, %v318_v36  ;;  %v5468_v45 = vld [vmem:[#allocation4 + $0x340] ss:$16 sps:$4 sm:$0xff]   ;;  %v5473_v46 = vld [vmem:[#allocation4 + $0x324] ss:$16 sps:$4 sm:$0xff]   ;;  %v6058_v39 = vsub.s32 2, %v6029_v54 }
 0x128   :  { %3595 = vmatpush1.bf16.msra.mxu1 %v5399_v44  ;;  %v1978_v55 = vmax.f32 %v1727_v49, 0.0  ;;  %v5458_v44 = vld [vmem:[#allocation4 + $0x124] ss:$16 sps:$4 sm:$0xff]   ;;  %v5471_v50 = vld [vmem:[#allocation4 + $0x320] ss:$16 sps:$4 sm:$0xff]  }
 0x129   :  { %v1729_v56 = vpop.f32.mrf.mxu1  ;;  %3596 = vmatprep.subr.bf16.mxu1 %v5407_v47  ;;  %v5456_v47 = vld [vmem:[#allocation4 + $0x120] ss:$16 sps:$4 sm:$0xff]   ;;  %v1725_v48 = vadd.f32 %v6044_v40, %v1684_v43  ;;  %v5464_v49 = vld [vmem:[#allocation4 + $0x104] ss:$16 sps:$4 sm:$0xff]  }
 0x12a   :  { %v6047_v60 = vpack.c.bf16 %v1978_v55, %v1978_v55  ;;  %3556 = vmatpush1.bf16.msra.mxu0 %v5387_v16  ;;  %v5476_v16 = vld [vmem:[#allocation4 + $0x304] ss:$16 sps:$4 sm:$0xff]   ;;  %v5462_v51 = vld [vmem:[#allocation4 + $0x100] ss:$16 sps:$4 sm:$0xff]   ;;  %v329_v56 = vsub.s32 3, %v6029_v54 }
 0x12b   :  { %3557 = vmatprep.subr.bf16.mxu0 %v5392_v52  ;;  %v1977_v52 = vmax.f32 %v1725_v48, 0.0  ;;  %v5479_v55 = vld [vmem:[#allocation4 + $0x4e4] ss:$16 sps:$4 sm:$0xff]   ;;  %v5543_v36 = vld [vmem:[#allocation4 + $0x680] ss:$16 sps:$4 sm:$0xff]  }
 0x12c   :  { %3597 = vmatpush1.bf16.msra.mxu1 %v5405_v19  ;;  %3583 = vmatprep.mubr.bf16.mxu0 %v6047_v60  ;;  %v5474_v19 = vld [vmem:[#allocation4 + $0x300] ss:$16 sps:$4 sm:$0xff]   ;;  %v5527_v40 = vld [vmem:[#allocation4 + $0x6e4] ss:$16 sps:$4 sm:$0xff]  }
 0x12d   :  { %3598 = vmatprep.subr.bf16.mxu1 %v5413_v57  ;;  %v326_v57 = vrot.slane %v6037_v33, %v6058_v39  ;;  %v5503_v43 = vld [vmem:[#allocation4 + $0x5e4] ss:$16 sps:$4 sm:$0xff]  }
 0x12e   :  { %3558 = vmatpush1.bf16.msra.mxu0 %v5390_v61  ;;  %v5477_v61 = vld [vmem:[#allocation4 + $0x4e0] ss:$16 sps:$4 sm:$0xff]   ;;  %v5563_v48 = vld [vmem:[#allocation4 + $0x624] ss:$16 sps:$4 sm:$0xff]  }
 0x12f   :  { %3559 = vmatprep.subr.bf16.mxu0 %v5398_v62  ;;  %v6063_v62 = vpack.c.bf16 %v1977_v52, %v1977_v52  ;;  %v5507_v52 = vld [vmem:[#allocation4 + $0x5a0] ss:$16 sps:$4 sm:$0xff]  }
 0x130   :  { %3599 = vmatpush1.bf16.msra.mxu1 %v5411_v58  ;;  %v5482_v58 = vld [vmem:[#allocation4 + $0x4c4] ss:$16 sps:$4 sm:$0xff]  }
 0x131   :  { %3600 = vmatprep.subr.bf16.mxu1 %v5419_v63  ;;  %v330_v63 = vrot.slane %v6037_v33, %v329_v56 }
 0x132   :  { %3560 = vmatpush1.bf16.msra.mxu0 %v5396_v0 }
 0x133   :  { %3561 = vmatprep.subr.bf16.mxu0 %v5404_v59 }
 0x134   :  { %3601 = vmatpush1.bf16.msra.mxu1 %v5417_v1 }
 0x135   :  { %3602 = vmatprep.subr.bf16.mxu1 %v5425_v2  ;;  %v5480_v2 = vld [vmem:[#allocation4 + $0x4c0] ss:$16 sps:$4 sm:$0xff]  }
 0x136   :  { %3562 = vmatpush1.bf16.msra.mxu0 %v5402_v3 }
 0x137   :  { %3563 = vmatprep.subr.bf16.mxu0 %v5410_v4  ;;  %v5485_v4 = vld [vmem:[#allocation4 + $0x4a4] ss:$16 sps:$4 sm:$0xff]  }
 0x138   :  { %3603 = vmatpush1.bf16.msra.mxu1 %v5423_v5 }
 0x139   :  { %3604 = vmatprep.subr.bf16.mxu1 %v5431_v6 }
 0x13a   :  { %3564 = vmatpush1.bf16.msra.mxu0 %v5408_v7 }
 0x13b   :  { %3565 = vmatprep.subr.bf16.mxu0 %v5416_v8 }
 0x13c   :  { %3605 = vmatpush1.bf16.msra.mxu1 %v5429_v9 }
 0x13d   :  { %3606 = vmatprep.subr.bf16.mxu1 %v5437_v10 }
 0x13e   :  { %3566 = vmatpush1.bf16.msra.mxu0 %v5414_v11  ;;  %v5483_v11 = vld [vmem:[#allocation4 + $0x4a0] ss:$16 sps:$4 sm:$0xff]  }
 0x13f   :  { %3567 = vmatprep.subr.bf16.mxu0 %v5422_v12 }
 0x140   :  { %3607 = vmatpush1.bf16.msra.mxu1 %v5435_v13 }
 0x141   :  { %3608 = vmatprep.subr.bf16.mxu1 %v5443_v14  ;;  %v5488_v14 = vld [vmem:[#allocation4 + $0x484] ss:$16 sps:$4 sm:$0xff]  }
 0x142   :  { %3568 = vmatpush2.bf16.msra.mxu0 %v5420_v15 }
 0x143   :  { %3569 = vmatprep.subr.bf16.mxu0 %v5428_v17 }
 0x144   :  { %3609 = vmatpush2.bf16.msra.mxu1 %v5441_v18 }
 0x145   :  { %3610 = vmatprep.subr.bf16.mxu1 %v5449_v20  ;;  %v5486_v20 = vld [vmem:[#allocation4 + $0x480] ss:$16 sps:$4 sm:$0xff]  }
 0x146   :  { %3570 = vmatpush2.bf16.msra.mxu0 %v5426_v21  ;;  %v5525_v21 = vld [vmem:[#allocation4 + $0x6e0] ss:$16 sps:$4 sm:$0xff]  }
 0x147   :  { %3571 = vmatprep.subr.bf16.mxu0 %v5434_v22 }
 0x148   :  { %3611 = vmatpush2.bf16.msra.mxu1 %v5447_v23  ;;  %v5491_v23 = vld [vmem:[#allocation4 + $0x464] ss:$16 sps:$4 sm:$0xff]  }
 0x149   :  { %3612 = vmatprep.subr.bf16.mxu1 %v5455_v24  ;;  %v5533_v24 = vld [vmem:[#allocation4 + $0x6c4] ss:$16 sps:$4 sm:$0xff]  }
 0x14a   :  { %3572 = vmatpush2.bf16.msra.mxu0 %v5432_v25  ;;  %v5489_v25 = vld [vmem:[#allocation4 + $0x460] ss:$16 sps:$4 sm:$0xff]  }
 0x14b   :  { %3573 = vmatprep.subr.bf16.mxu0 %v5440_v26  ;;  %v5531_v26 = vld [vmem:[#allocation4 + $0x6c0] ss:$16 sps:$4 sm:$0xff]  }
 0x14c   :  { %3613 = vmatpush2.bf16.msra.mxu1 %v5453_v27  ;;  %v5494_v27 = vld [vmem:[#allocation4 + $0x444] ss:$16 sps:$4 sm:$0xff]  }
 0x14d   :  { %3614 = vmatprep.subr.bf16.mxu1 %v5461_v53  ;;  %v5539_v53 = vld [vmem:[#allocation4 + $0x6a4] ss:$16 sps:$4 sm:$0xff]  }
 0x14e   :  { %3574 = vmatpush2.bf16.msra.mxu0 %v5438_v28  ;;  %v5492_v28 = vld [vmem:[#allocation4 + $0x440] ss:$16 sps:$4 sm:$0xff]  }
 0x14f   :  { %3575 = vmatprep.subr.bf16.mxu0 %v5446_v30  ;;  %v5537_v30 = vld [vmem:[#allocation4 + $0x6a0] ss:$16 sps:$4 sm:$0xff]  }
 0x150   :  { %3615 = vmatpush2.bf16.msra.mxu1 %v5459_v32  ;;  %v5497_v32 = vld [vmem:[#allocation4 + $0x424] ss:$16 sps:$4 sm:$0xff]  }
 0x151   :  { %3616 = vmatprep.subr.bf16.mxu1 %v5467_v34  ;;  %v5545_v34 = vld [vmem:[#allocation4 + $0x684] ss:$16 sps:$4 sm:$0xff]  }
 0x152   :  { %3576 = vmatpush2.bf16.msra.mxu0 %v5444_v35  ;;  %v5495_v35 = vld [vmem:[#allocation4 + $0x420] ss:$16 sps:$4 sm:$0xff]  }
 0x153   :  { %3577 = vmatprep.subr.bf16.mxu0 %v5452_v37  ;;  %v5500_v37 = vld [vmem:[#allocation4 + $0x404] ss:$16 sps:$4 sm:$0xff]  }
 0x154   :  { %3617 = vmatpush2.bf16.msra.mxu1 %v5465_v38  ;;  %v5551_v38 = vld [vmem:[#allocation4 + $0x664] ss:$16 sps:$4 sm:$0xff]  }
 0x155   :  { %3618 = vmatprep.subr.bf16.mxu1 %v5470_v41  ;;  %v5498_v41 = vld [vmem:[#allocation4 + $0x400] ss:$16 sps:$4 sm:$0xff]  }
 0x156   :  { %3578 = vmatpush2.bf16.msra.mxu0 %v5450_v42  ;;  %v5549_v42 = vld [vmem:[#allocation4 + $0x660] ss:$16 sps:$4 sm:$0xff]  }
 0x157   :  { %3579 = vmatprep.subr.bf16.mxu0 %v5458_v44  ;;  %v5557_v44 = vld [vmem:[#allocation4 + $0x644] ss:$16 sps:$4 sm:$0xff]  }
 0x158   :  { %3619 = vmatpush2.bf16.msra.mxu1 %v5468_v45  ;;  %v5501_v45 = vld [vmem:[#allocation4 + $0x5e0] ss:$16 sps:$4 sm:$0xff]  }
 0x159   :  { %3620 = vmatprep.subr.bf16.mxu1 %v5473_v46  ;;  %v5555_v46 = vld [vmem:[#allocation4 + $0x640] ss:$16 sps:$4 sm:$0xff]  }
 0x15a   :  { %3580 = vmatpush2.bf16.msra.mxu0 %v5456_v47  ;;  %v5506_v47 = vld [vmem:[#allocation4 + $0x5c4] ss:$16 sps:$4 sm:$0xff]  }
 0x15b   :  { %3581 = vmatprep.subr.bf16.mxu0 %v5464_v49  ;;  %v5504_v49 = vld [vmem:[#allocation4 + $0x5c0] ss:$16 sps:$4 sm:$0xff]  }
 0x15c   :  { %3621 = vmatpush2.bf16.msra.mxu1 %v5471_v50  ;;  %v5561_v50 = vld [vmem:[#allocation4 + $0x620] ss:$16 sps:$4 sm:$0xff]  }
 0x15d   :  { %3622 = vmatprep.subr.bf16.mxu1 %v5476_v16  ;;  %v5509_v16 = vld [vmem:[#allocation4 + $0x5a4] ss:$16 sps:$4 sm:$0xff]  }
 0x15e   :  { %3582 = vmatpush2.bf16.msra.mxu0 %v5462_v51  ;;  %v5569_v51 = vld [vmem:[#allocation4 + $0x604] ss:$16 sps:$4 sm:$0xff]  }
 0x15f   :  { %3633 = vmatprep.subr.bf16.mxu0 %v5479_v55  ;;  %v5512_v55 = vld [vmem:[#allocation4 + $0x584] ss:$16 sps:$4 sm:$0xff]  }
 0x160   :  { %3623 = vmatpush2.bf16.msra.mxu1 %v5474_v19  ;;  %v5567_v19 = vld [vmem:[#allocation4 + $0x600] ss:$16 sps:$4 sm:$0xff]  }
 0x161   :  { %3674 = vmatprep.subr.bf16.mxu1 %v5527_v40  ;;  %v1765_v0 = vpop.f32.mrf.mxu0  ;;  %3584 = vmatmul.mubr.bf16.vlgmr.msra.gmra.mxu0 %v6063_v62  ;;  %v5575_v40 = vld [vmem:[#allocation4 + $0x7e4] ss:$16 sps:$4 sm:$0xff]  }
 0x162   :  { %v1766_v59 = vadd.f32 %v1765_v0, %v326_v57  ;;  %3634 = vmatpush1.bf16.msra.mxu0 %v5477_v61  ;;  %v5510_v57 = vld [vmem:[#allocation4 + $0x580] ss:$16 sps:$4 sm:$0xff]  }
 0x163   :  { %v1806_v1 = vpop.f32.mrf.mxu1  ;;  %v1767_v3 = vpop.f32.mrf.mxu0  ;;  %3635 = vmatprep.subr.bf16.mxu0 %v5482_v58  ;;  %v5573_v61 = vld [vmem:[#allocation4 + $0x7e0] ss:$16 sps:$4 sm:$0xff]   ;;  %v5515_v58 = vld [vmem:[#allocation4 + $0x564] ss:$16 sps:$4 sm:$0xff]  }
 0x164   :  { %v1807_v5 = vadd.f32 %v1806_v1, %v1766_v59  ;;  %v1768_v6 = vadd.f32 %v1767_v3, %v330_v63  ;;  %v5581_v63 = vld [vmem:[#allocation4 + $0x7c4] ss:$16 sps:$4 sm:$0xff]   ;;  %v5513_v0 = vld [vmem:[#allocation4 + $0x560] ss:$16 sps:$4 sm:$0xff]  }
 0x165   :  { %v1808_v7 = vpop.f32.mrf.mxu1  ;;  %v1769_v8 = vpop.f32.mrf.mxu0  ;;  %v5579_v59 = vld [vmem:[#allocation4 + $0x7c0] ss:$16 sps:$4 sm:$0xff]   ;;  %v5518_v1 = vld [vmem:[#allocation4 + $0x544] ss:$16 sps:$4 sm:$0xff]  }
 0x166   :  { %v1809_v9 = vadd.f32 %v1808_v7, %v1768_v6  ;;  %3636 = vmatpush1.bf16.msra.mxu0 %v5480_v2  ;;  %v1979_v12 = vmax.f32 %v1807_v5, 0.0  ;;  %v5587_v2 = vld [vmem:[#allocation4 + $0x7a4] ss:$16 sps:$4 sm:$0xff]   ;;  %v5516_v3 = vld [vmem:[#allocation4 + $0x540] ss:$16 sps:$4 sm:$0xff]  }
 0x167   :  { %v1810_v10 = vpop.f32.mrf.mxu1  ;;  %v1770_v13 = vpop.f32.mrf.mxu0  ;;  %3637 = vmatprep.subr.bf16.mxu0 %v5485_v4  ;;  %v5585_v4 = vld [vmem:[#allocation4 + $0x7a0] ss:$16 sps:$4 sm:$0xff]   ;;  %v5521_v5 = vld [vmem:[#allocation4 + $0x524] ss:$16 sps:$4 sm:$0xff]  }
 0x168   :  { %v1980_v15 = vmax.f32 %v1809_v9, 0.0  ;;  %v6071_v22 = vpack.c.bf16 %v1979_v12, %v1979_v12  ;;  %v5593_v6 = vld [vmem:[#allocation4 + $0x784] ss:$16 sps:$4 sm:$0xff]   ;;  %v5519_v7 = vld [vmem:[#allocation4 + $0x520] ss:$16 sps:$4 sm:$0xff]  }
 0x169   :  { %v1811_v17 = vpop.f32.mrf.mxu1  ;;  %v5591_v8 = vld [vmem:[#allocation4 + $0x780] ss:$16 sps:$4 sm:$0xff]   ;;  %v5524_v9 = vld [vmem:[#allocation4 + $0x504] ss:$16 sps:$4 sm:$0xff]  }
 0x16a   :  { %v6069_v18 = vpack.c.bf16 %v1980_v15, %v1980_v15  ;;  %3638 = vmatpush1.bf16.msra.mxu0 %v5483_v11  ;;  %v5599_v10 = vld [vmem:[#allocation4 + $0x764] ss:$16 sps:$4 sm:$0xff]   ;;  %v333_v11 = vsub.s32 4, %v6029_v54  ;;  %v5522_v12 = vld [vmem:[#allocation4 + $0x500] ss:$16 sps:$4 sm:$0xff]   ;;  %v337_v17 = vsub.s32 5, %v6029_v54 }
 0x16b   :  { %3639 = vmatprep.subr.bf16.mxu0 %v5488_v14  ;;  %v5597_v13 = vld [vmem:[#allocation4 + $0x760] ss:$16 sps:$4 sm:$0xff]   ;;  %v5530_v14 = vld [vmem:[#allocation4 + $0xec] ss:$16 sps:$4 sm:$0xff]   ;;  %v5605_v15 = vld [vmem:[#allocation4 + $0x744] ss:$16 sps:$4 sm:$0xff]  }
 0x16c   :  { %3624 = vmatprep.mubr.bf16.mxu1 %v6069_v18 }
 0x16d   :  { %3625 = vmatmul.mubr.bf16.vlgmr.msra.gmra.mxu1 %v6071_v22 }
 0x16e   :  { %3640 = vmatpush1.bf16.msra.mxu0 %v5486_v20  ;;  %3675 = vmatpush1.bf16.msra.mxu1 %v5525_v21  ;;  %v334_v20 = vrot.slane %v6037_v33, %v333_v11  ;;  %v5603_v21 = vld [vmem:[#allocation4 + $0x740] ss:$16 sps:$4 sm:$0xff]   ;;  %v341_v11 = vsub.s32 6, %v6029_v54 }
 0x16f   :  { %3641 = vmatprep.subr.bf16.mxu0 %v5491_v23  ;;  %3676 = vmatprep.subr.bf16.mxu1 %v5533_v24  ;;  %v5611_v23 = vld [vmem:[#allocation4 + $0x724] ss:$16 sps:$4 sm:$0xff]   ;;  %v338_v24 = vrot.slane %v6037_v33, %v337_v17  ;;  %v5614_v17 = vld [vmem:[#allocation4 + $0x12c] ss:$16 sps:$4 sm:$0xff]  }
 0x172   :  { %3642 = vmatpush1.bf16.msra.mxu0 %v5489_v25  ;;  %3677 = vmatpush1.bf16.msra.mxu1 %v5531_v26 }
 0x173   :  { %3643 = vmatprep.subr.bf16.mxu0 %v5494_v27  ;;  %3678 = vmatprep.subr.bf16.mxu1 %v5539_v53  ;;  %v5609_v53 = vld [vmem:[#allocation4 + $0x720] ss:$16 sps:$4 sm:$0xff]  }
 0x176   :  { %3644 = vmatpush1.bf16.msra.mxu0 %v5492_v28  ;;  %3679 = vmatpush1.bf16.msra.mxu1 %v5537_v30  ;;  %v5617_v30 = vld [vmem:[#allocation4 + $0x704] ss:$16 sps:$4 sm:$0xff]  }
 0x177   :  { %3645 = vmatprep.subr.bf16.mxu0 %v5497_v32  ;;  %3680 = vmatprep.subr.bf16.mxu1 %v5545_v34 }
 0x17a   :  { %3646 = vmatpush1.bf16.msra.mxu0 %v5495_v35  ;;  %3681 = vmatpush1.bf16.msra.mxu1 %v5543_v36 }
 0x17b   :  { %3647 = vmatprep.subr.bf16.mxu0 %v5500_v37  ;;  %3682 = vmatprep.subr.bf16.mxu1 %v5551_v38 }
 0x17e   :  { %3648 = vmatpush1.bf16.msra.mxu0 %v5498_v41  ;;  %3683 = vmatpush1.bf16.msra.mxu1 %v5549_v42  ;;  %v5615_v41 = vld [vmem:[#allocation4 + $0x700] ss:$16 sps:$4 sm:$0xff]  }
 0x17f   :  { %3649 = vmatprep.subr.bf16.mxu0 %v5503_v43  ;;  %3684 = vmatprep.subr.bf16.mxu1 %v5557_v44  ;;  %v5623_v44 = vld [vmem:[#allocation4 + $0x2ec] ss:$16 sps:$4 sm:$0xff]  }
 0x182   :  { %3650 = vmatpush2.bf16.msra.mxu0 %v5501_v45  ;;  %3685 = vmatpush1.bf16.msra.mxu1 %v5555_v46 }
 0x183   :  { %3651 = vmatprep.subr.bf16.mxu0 %v5506_v47  ;;  %3686 = vmatprep.subr.bf16.mxu1 %v5563_v48  ;;  %v5528_v48 = vld [vmem:[#allocation4 + $0xe8] ss:$16 sps:$4 sm:$0xff]  }
 0x186   :  { %3652 = vmatpush2.bf16.msra.mxu0 %v5504_v49  ;;  %3687 = vmatpush1.bf16.msra.mxu1 %v5561_v50  ;;  %v5536_v50 = vld [vmem:[#allocation4 + $0xcc] ss:$16 sps:$4 sm:$0xff]  }
 0x187   :  { %3653 = vmatprep.subr.bf16.mxu0 %v5509_v16  ;;  %3688 = vmatprep.subr.bf16.mxu1 %v5569_v51  ;;  %v5534_v16 = vld [vmem:[#allocation4 + $0xc8] ss:$16 sps:$4 sm:$0xff]   ;;  %v5542_v51 = vld [vmem:[#allocation4 + $0xac] ss:$16 sps:$4 sm:$0xff]  }
 0x18a   :  { %3654 = vmatpush2.bf16.msra.mxu0 %v5507_v52  ;;  %3689 = vmatpush1.bf16.msra.mxu1 %v5567_v19  ;;  %v5540_v52 = vld [vmem:[#allocation4 + $0xa8] ss:$16 sps:$4 sm:$0xff]   ;;  %v5548_v19 = vld [vmem:[#allocation4 + $0x8c] ss:$16 sps:$4 sm:$0xff]  }
 0x18b   :  { %3655 = vmatprep.subr.bf16.mxu0 %v5512_v55  ;;  %3690 = vmatprep.subr.bf16.mxu1 %v5575_v40  ;;  %v5546_v55 = vld [vmem:[#allocation4 + $0x88] ss:$16 sps:$4 sm:$0xff]   ;;  %v5554_v40 = vld [vmem:[#allocation4 + $0x6c] ss:$16 sps:$4 sm:$0xff]  }
 0x18e   :  { %3656 = vmatpush2.bf16.msra.mxu0 %v5510_v57  ;;  %3691 = vmatpush2.bf16.msra.mxu1 %v5573_v61  ;;  %v5552_v57 = vld [vmem:[#allocation4 + $0x68] ss:$16 sps:$4 sm:$0xff]   ;;  %v5560_v61 = vld [vmem:[#allocation4 + $0x4c] ss:$16 sps:$4 sm:$0xff]  }
 0x18f   :  { %3657 = vmatprep.subr.bf16.mxu0 %v5515_v58  ;;  %3692 = vmatprep.subr.bf16.mxu1 %v5581_v63  ;;  %v5558_v58 = vld [vmem:[#allocation4 + $0x48] ss:$16 sps:$4 sm:$0xff]   ;;  %v5566_v63 = vld [vmem:[#allocation4 + $0x2c] ss:$16 sps:$4 sm:$0xff]  }
 0x192   :  { %3658 = vmatpush2.bf16.msra.mxu0 %v5513_v0  ;;  %3693 = vmatpush2.bf16.msra.mxu1 %v5579_v59  ;;  %v5572_v0 = vld [vmem:[#allocation4 + $0xc] ss:$16 sps:$4 sm:$0xff]   ;;  %v5570_v59 = vld [vmem:[#allocation4 + $0x8] ss:$16 sps:$4 sm:$0xff]  }
 0x193   :  { %3659 = vmatprep.subr.bf16.mxu0 %v5518_v1  ;;  %3694 = vmatprep.subr.bf16.mxu1 %v5587_v2  ;;  %v5578_v1 = vld [vmem:[#allocation4 + $0x1ec] ss:$16 sps:$4 sm:$0xff]   ;;  %v5576_v2 = vld [vmem:[#allocation4 + $0x1e8] ss:$16 sps:$4 sm:$0xff]  }
 0x196   :  { %3660 = vmatpush2.bf16.msra.mxu0 %v5516_v3  ;;  %3695 = vmatpush2.bf16.msra.mxu1 %v5585_v4  ;;  %v5584_v3 = vld [vmem:[#allocation4 + $0x1cc] ss:$16 sps:$4 sm:$0xff]   ;;  %v5582_v4 = vld [vmem:[#allocation4 + $0x1c8] ss:$16 sps:$4 sm:$0xff]  }
 0x197   :  { %3661 = vmatprep.subr.bf16.mxu0 %v5521_v5  ;;  %3696 = vmatprep.subr.bf16.mxu1 %v5593_v6  ;;  %v5590_v5 = vld [vmem:[#allocation4 + $0x1ac] ss:$16 sps:$4 sm:$0xff]   ;;  %v5588_v6 = vld [vmem:[#allocation4 + $0x1a8] ss:$16 sps:$4 sm:$0xff]  }
 0x19a   :  { %3662 = vmatpush2.bf16.msra.mxu0 %v5519_v7  ;;  %3697 = vmatpush2.bf16.msra.mxu1 %v5591_v8  ;;  %v5596_v7 = vld [vmem:[#allocation4 + $0x18c] ss:$16 sps:$4 sm:$0xff]   ;;  %v5594_v8 = vld [vmem:[#allocation4 + $0x188] ss:$16 sps:$4 sm:$0xff]  }
 0x19b   :  { %3663 = vmatprep.subr.bf16.mxu0 %v5524_v9  ;;  %3698 = vmatprep.subr.bf16.mxu1 %v5599_v10  ;;  %v5602_v9 = vld [vmem:[#allocation4 + $0x16c] ss:$16 sps:$4 sm:$0xff]   ;;  %v5600_v10 = vld [vmem:[#allocation4 + $0x168] ss:$16 sps:$4 sm:$0xff]  }
 0x19e   :  { %3664 = vmatpush2.bf16.msra.mxu0 %v5522_v12  ;;  %3699 = vmatpush2.bf16.msra.mxu1 %v5597_v13  ;;  %v5608_v12 = vld [vmem:[#allocation4 + $0x14c] ss:$16 sps:$4 sm:$0xff]   ;;  %v345_v13 = vsub.s32 7, %v6029_v54 }
 0x19f   :  { %3715 = vmatprep.subr.bf16.mxu0 %v5530_v14  ;;  %3700 = vmatprep.subr.bf16.mxu1 %v5605_v15  ;;  %v5606_v14 = vld [vmem:[#allocation4 + $0x148] ss:$16 sps:$4 sm:$0xff]   ;;  %v342_v15 = vrot.slane %v6037_v33, %v341_v11  ;;  %v5671_v11 = vld [vmem:[#allocation4 + $0x3ec] ss:$16 sps:$4 sm:$0xff]  }
 0x1a1   :  { %v1847_v25 = vpop.f32.mrf.mxu0 }
 0x1a2   :  { %v1848_v26 = vadd.f32 %v1847_v25, %v334_v20  ;;  %3701 = vmatpush2.bf16.msra.mxu1 %v5603_v21  ;;  %v346_v20 = vrot.slane %v6037_v33, %v345_v13  ;;  %v5612_v25 = vld [vmem:[#allocation4 + $0x128] ss:$16 sps:$4 sm:$0xff]   ;;  %v5626_v33 = vld [vmem:[#allocation4 + $0x4ec] ss:$16 sps:$4 sm:$0xff]  }
 0x1a3   :  { %v1888_v27 = vpop.f32.mrf.mxu1  ;;  %v1849_v28 = vpop.f32.mrf.mxu0  ;;  %3702 = vmatprep.subr.bf16.mxu1 %v5611_v23  ;;  %v5669_v13 = vld [vmem:[#allocation4 + $0x3e8] ss:$16 sps:$4 sm:$0xff]  }
 0x1a4   :  { %v1889_v32 = vadd.f32 %v1888_v27, %v1848_v26  ;;  %v1850_v34 = vadd.f32 %v1849_v28, %v338_v24  ;;  %v5620_v27 = vld [vmem:[#allocation4 + $0x10c] ss:$16 sps:$4 sm:$0xff]  }
 0x1a5   :  { %v1890_v35 = vpop.f32.mrf.mxu1  ;;  %v1851_v36 = vpop.f32.mrf.mxu0 }
 0x1a6   :  { %v1891_v37 = vadd.f32 %v1890_v35, %v1850_v34  ;;  %3703 = vmatpush2.bf16.msra.mxu1 %v5609_v53  ;;  %v1981_v42 = vmax.f32 %v1889_v32, 0.0  ;;  %v5618_v36 = vld [vmem:[#allocation4 + $0x108] ss:$16 sps:$4 sm:$0xff]  }
 0x1a7   :  { %v1892_v38 = vpop.f32.mrf.mxu1  ;;  %v1852_v43 = vpop.f32.mrf.mxu0  ;;  %3704 = vmatprep.subr.bf16.mxu1 %v5617_v30 }
 0x1a8   :  { %v1982_v45 = vmax.f32 %v1891_v37, 0.0  ;;  %v6081_v49 = vpack.c.bf16 %v1981_v42, %v1981_v42 }
 0x1a9   :  { %v1893_v46 = vpop.f32.mrf.mxu1 }
 0x1aa   :  { %v6079_v47 = vpack.c.bf16 %v1982_v45, %v1982_v45  ;;  %3705 = vmatpush2.bf16.msra.mxu1 %v5615_v41  ;;  %v5624_v45 = vld [vmem:[#allocation4 + $0x4e8] ss:$16 sps:$4 sm:$0xff]  }
 0x1ab   :  { %3756 = vmatprep.subr.bf16.mxu1 %v5623_v44  ;;  %v5621_v44 = vld [vmem:[#allocation4 + $0x2e8] ss:$16 sps:$4 sm:$0xff]  }
 0x1ac   :  { %3665 = vmatprep.mubr.bf16.mxu0 %v6079_v47 }
 0x1ad   :  { %3666 = vmatmul.mubr.bf16.vlgmr.msra.gmra.mxu0 %v6081_v49 }
 0x1ae   :  { %3716 = vmatpush1.bf16.msra.mxu0 %v5528_v48  ;;  %3747 = vmatprep.mubr.bf16.mxu0 %v6047_v60  ;;  %v5564_v60 = vld [vmem:[#allocation4 + $0x28] ss:$16 sps:$4 sm:$0xff]   ;;  %v5629_v48 = vld [vmem:[#allocation4 + $0x2cc] ss:$16 sps:$4 sm:$0xff]  }
 0x1af   :  { %3717 = vmatprep.subr.bf16.mxu0 %v5536_v50  ;;  %v5632_v50 = vld [vmem:[#allocation4 + $0x4cc] ss:$16 sps:$4 sm:$0xff]  }
 0x1b2   :  { %3718 = vmatpush1.bf16.msra.mxu0 %v5534_v16  ;;  %v5627_v16 = vld [vmem:[#allocation4 + $0x2c8] ss:$16 sps:$4 sm:$0xff]  }
 0x1b3   :  { %3719 = vmatprep.subr.bf16.mxu0 %v5542_v51  ;;  %v5630_v51 = vld [vmem:[#allocation4 + $0x4c8] ss:$16 sps:$4 sm:$0xff]  }
 0x1b6   :  { %3720 = vmatpush1.bf16.msra.mxu0 %v5540_v52  ;;  %v5635_v52 = vld [vmem:[#allocation4 + $0x2ac] ss:$16 sps:$4 sm:$0xff]  }
 0x1b7   :  { %3721 = vmatprep.subr.bf16.mxu0 %v5548_v19  ;;  %v5638_v19 = vld [vmem:[#allocation4 + $0x4ac] ss:$16 sps:$4 sm:$0xff]  }
 0x1ba   :  { %3722 = vmatpush1.bf16.msra.mxu0 %v5546_v55  ;;  %v5633_v55 = vld [vmem:[#allocation4 + $0x2a8] ss:$16 sps:$4 sm:$0xff]  }
 0x1bb   :  { %3723 = vmatprep.subr.bf16.mxu0 %v5554_v40  ;;  %v5636_v40 = vld [vmem:[#allocation4 + $0x4a8] ss:$16 sps:$4 sm:$0xff]  }
 0x1be   :  { %3724 = vmatpush1.bf16.msra.mxu0 %v5552_v57  ;;  %v5644_v57 = vld [vmem:[#allocation4 + $0x48c] ss:$16 sps:$4 sm:$0xff]  }
 0x1bf   :  { %3725 = vmatprep.subr.bf16.mxu0 %v5560_v61  ;;  %v5639_v61 = vld [vmem:[#allocation4 + $0x288] ss:$16 sps:$4 sm:$0xff]  }
 0x1c2   :  { %3726 = vmatpush1.bf16.msra.mxu0 %v5558_v58  ;;  %v5642_v58 = vld [vmem:[#allocation4 + $0x488] ss:$16 sps:$4 sm:$0xff]  }
 0x1c3   :  { %3727 = vmatprep.subr.bf16.mxu0 %v5566_v63  ;;  %v5645_v63 = vld [vmem:[#allocation4 + $0x268] ss:$16 sps:$4 sm:$0xff]  }
 0x1c6   :  { %3728 = vmatpush1.bf16.msra.mxu0 %v5564_v60  ;;  %v5648_v60 = vld [vmem:[#allocation4 + $0x468] ss:$16 sps:$4 sm:$0xff]  }
 0x1c7   :  { %3729 = vmatprep.subr.bf16.mxu0 %v5572_v0  ;;  %v5653_v0 = vld [vmem:[#allocation4 + $0x24c] ss:$16 sps:$4 sm:$0xff]  }
 0x1ca   :  { %3730 = vmatpush1.bf16.msra.mxu0 %v5570_v59  ;;  %v5656_v59 = vld [vmem:[#allocation4 + $0x44c] ss:$16 sps:$4 sm:$0xff]  }
 0x1cb   :  { %3731 = vmatprep.subr.bf16.mxu0 %v5578_v1  ;;  %v5651_v1 = vld [vmem:[#allocation4 + $0x248] ss:$16 sps:$4 sm:$0xff]  }
 0x1ce   :  { %3732 = vmatpush2.bf16.msra.mxu0 %v5576_v2  ;;  %v5654_v2 = vld [vmem:[#allocation4 + $0x448] ss:$16 sps:$4 sm:$0xff]  }
 0x1cf   :  { %3733 = vmatprep.subr.bf16.mxu0 %v5584_v3  ;;  %v5659_v3 = vld [vmem:[#allocation4 + $0x22c] ss:$16 sps:$4 sm:$0xff]  }
 0x1d2   :  { %3734 = vmatpush2.bf16.msra.mxu0 %v5582_v4  ;;  %v5662_v4 = vld [vmem:[#allocation4 + $0x42c] ss:$16 sps:$4 sm:$0xff]  }
 0x1d3   :  { %3735 = vmatprep.subr.bf16.mxu0 %v5590_v5  ;;  %v5657_v5 = vld [vmem:[#allocation4 + $0x228] ss:$16 sps:$4 sm:$0xff]  }
 0x1d6   :  { %3736 = vmatpush2.bf16.msra.mxu0 %v5588_v6  ;;  %v5660_v6 = vld [vmem:[#allocation4 + $0x428] ss:$16 sps:$4 sm:$0xff]  }
 0x1d7   :  { %3737 = vmatprep.subr.bf16.mxu0 %v5596_v7  ;;  %v5665_v7 = vld [vmem:[#allocation4 + $0x20c] ss:$16 sps:$4 sm:$0xff]  }
 0x1da   :  { %3738 = vmatpush2.bf16.msra.mxu0 %v5594_v8  ;;  %v5668_v8 = vld [vmem:[#allocation4 + $0x40c] ss:$16 sps:$4 sm:$0xff]  }
 0x1db   :  { %3739 = vmatprep.subr.bf16.mxu0 %v5602_v9  ;;  %v5663_v9 = vld [vmem:[#allocation4 + $0x208] ss:$16 sps:$4 sm:$0xff]  }
 0x1de   :  { %3740 = vmatpush2.bf16.msra.mxu0 %v5600_v10  ;;  %v5666_v10 = vld [vmem:[#allocation4 + $0x408] ss:$16 sps:$4 sm:$0xff]  }
 0x1df   :  { %3741 = vmatprep.subr.bf16.mxu0 %v5608_v12  ;;  %v5674_v12 = vld [vmem:[#allocation4 + $0x5ec] ss:$16 sps:$4 sm:$0xff]  }
 0x1e1   :  { %v1929_v21 = vpop.f32.mrf.mxu0 }
 0x1e2   :  { %v1930_v23 = vadd.f32 %v1929_v21, %v342_v15  ;;  %3742 = vmatpush2.bf16.msra.mxu0 %v5606_v14  ;;  %v5672_v14 = vld [vmem:[#allocation4 + $0x5e8] ss:$16 sps:$4 sm:$0xff]   ;;  %v5677_v15 = vld [vmem:[#allocation4 + $0x3cc] ss:$16 sps:$4 sm:$0xff]  }
 0x1e3   :  { %v1970_v24 = vpop.f32.mrf.mxu1  ;;  %v1931_v26 = vpop.f32.mrf.mxu0  ;;  %3743 = vmatprep.subr.bf16.mxu0 %v5614_v17  ;;  %v5680_v17 = vld [vmem:[#allocation4 + $0x5cc] ss:$16 sps:$4 sm:$0xff]   ;;  %v5678_v21 = vld [vmem:[#allocation4 + $0x5c8] ss:$16 sps:$4 sm:$0xff]  }
 0x1e4   :  { %v1971_v53 = vadd.f32 %v1970_v24, %v1930_v23  ;;  %v1932_v28 = vadd.f32 %v1931_v26, %v346_v20  ;;  %v5675_v20 = vld [vmem:[#allocation4 + $0x3c8] ss:$16 sps:$4 sm:$0xff]   ;;  %v5683_v23 = vld [vmem:[#allocation4 + $0x3ac] ss:$16 sps:$4 sm:$0xff]  }
 0x1e5   :  { %v1972_v30 = vpop.f32.mrf.mxu1  ;;  %v1933_v32 = vpop.f32.mrf.mxu0  ;;  %v5686_v24 = vld [vmem:[#allocation4 + $0x5ac] ss:$16 sps:$4 sm:$0xff]   ;;  %v5684_v26 = vld [vmem:[#allocation4 + $0x5a8] ss:$16 sps:$4 sm:$0xff]  }
 0x1e6   :  { %v1973_v34 = vadd.f32 %v1972_v30, %v1932_v28  ;;  %3744 = vmatpush2.bf16.msra.mxu0 %v5612_v25  ;;  %v1983_v37 = vmax.f32 %v1971_v53, 0.0  ;;  %v5681_v25 = vld [vmem:[#allocation4 + $0x3a8] ss:$16 sps:$4 sm:$0xff]   ;;  %v5692_v53 = vld [vmem:[#allocation4 + $0x58c] ss:$16 sps:$4 sm:$0xff]  }
 0x1e7   :  { %v1974_v35 = vpop.f32.mrf.mxu1  ;;  %v1934_v38 = vpop.f32.mrf.mxu0  ;;  %3745 = vmatprep.subr.bf16.mxu0 %v5620_v27  ;;  %v5689_v27 = vld [vmem:[#allocation4 + $0x38c] ss:$16 sps:$4 sm:$0xff]   ;;  %v5687_v28 = vld [vmem:[#allocation4 + $0x388] ss:$16 sps:$4 sm:$0xff]  }
 0x1e8   :  { %v1984_v41 = vmax.f32 %v1973_v34, 0.0  ;;  %v6092_v46 = vpack.c.bf16 %v1983_v37, %v1983_v37  ;;  %v5690_v30 = vld [vmem:[#allocation4 + $0x588] ss:$16 sps:$4 sm:$0xff]   ;;  %v5695_v32 = vld [vmem:[#allocation4 + $0x36c] ss:$16 sps:$4 sm:$0xff]  }
 0x1e9   :  { %v1975_v42 = vpop.f32.mrf.mxu1  ;;  %v5698_v34 = vld [vmem:[#allocation4 + $0x56c] ss:$16 sps:$4 sm:$0xff]   ;;  %v5693_v35 = vld [vmem:[#allocation4 + $0x368] ss:$16 sps:$4 sm:$0xff]  }
 0x1ea   :  { %v6090_v43 = vpack.c.bf16 %v1984_v41, %v1984_v41  ;;  %3746 = vmatpush2.bf16.msra.mxu0 %v5618_v36  ;;  %v5696_v36 = vld [vmem:[#allocation4 + $0x568] ss:$16 sps:$4 sm:$0xff]   ;;  %v5701_v37 = vld [vmem:[#allocation4 + $0x34c] ss:$16 sps:$4 sm:$0xff]  }
 0x1eb   :  { %3797 = vmatprep.subr.bf16.mxu0 %v5626_v33  ;;  %v5704_v38 = vld [vmem:[#allocation4 + $0x54c] ss:$16 sps:$4 sm:$0xff]   ;;  %v5699_v33 = vld [vmem:[#allocation4 + $0x348] ss:$16 sps:$4 sm:$0xff]  }
 0x1ec   :  { %3706 = vmatprep.mubr.bf16.mxu1 %v6090_v43  ;;  %v5702_v41 = vld [vmem:[#allocation4 + $0x548] ss:$16 sps:$4 sm:$0xff]   ;;  %v5707_v42 = vld [vmem:[#allocation4 + $0x32c] ss:$16 sps:$4 sm:$0xff]  }
 0x1ed   :  { %3748 = vmatmul.mubr.bf16.vlgmr.msra.gmra.mxu0 %v6063_v62  ;;  %3707 = vmatmul.mubr.bf16.vlgmr.msra.gmra.mxu1 %v6092_v46  ;;  %v5641_v62 = vld [vmem:[#allocation4 + $0x28c] ss:$16 sps:$4 sm:$0xff]  }
 0x1ee   :  { %3757 = vmatpush1.bf16.msra.mxu1 %v5621_v44  ;;  %3798 = vmatpush1.bf16.msra.mxu0 %v5624_v45  ;;  %v5710_v44 = vld [vmem:[#allocation4 + $0x52c] ss:$16 sps:$4 sm:$0xff]  }
 0x1ef   :  { %3829 = vmatprep.mubr.bf16.mxu0 %v6079_v47  ;;  %3788 = vmatprep.mubr.bf16.mxu1 %v6069_v18  ;;  %v5647_v47 = vld [vmem:[#allocation4 + $0x26c] ss:$16 sps:$4 sm:$0xff]  }
 0x1f0   :  { %3758 = vmatprep.subr.bf16.mxu1 %v5629_v48  ;;  %3799 = vmatprep.subr.bf16.mxu0 %v5632_v50  ;;  %v5650_v18 = vld [vmem:[#allocation4 + $0x46c] ss:$16 sps:$4 sm:$0xff]   ;;  %v5705_v48 = vld [vmem:[#allocation4 + $0x328] ss:$16 sps:$4 sm:$0xff]  }
 0x1f1   :  { %v5708_v50 = vld [vmem:[#allocation4 + $0x528] ss:$16 sps:$4 sm:$0xff]  }
 0x1f2   :  { %3759 = vmatpush1.bf16.msra.mxu1 %v5627_v16  ;;  %3800 = vmatpush1.bf16.msra.mxu0 %v5630_v51  ;;  %v5713_v51 = vld [vmem:[#allocation4 + $0x30c] ss:$16 sps:$4 sm:$0xff]  }
 0x1f3   :  { %3760 = vmatprep.subr.bf16.mxu1 %v5635_v52  ;;  %3801 = vmatprep.subr.bf16.mxu0 %v5638_v19  ;;  %v5716_v52 = vld [vmem:[#allocation4 + $0x50c] ss:$16 sps:$4 sm:$0xff]   ;;  %v6102_v19 = vld [vmem:[%s6436_s4] sm:$0xf] }
 0x1f6   :  { %3761 = vmatpush1.bf16.msra.mxu1 %v5633_v55  ;;  %3802 = vmatpush1.bf16.msra.mxu0 %v5636_v40  ;;  %v5711_v40 = vld [vmem:[#allocation4 + $0x308] ss:$16 sps:$4 sm:$0xff]  }
 0x1f7   :  { %3762 = vmatprep.subr.bf16.mxu1 %v5641_v62  ;;  %3803 = vmatprep.subr.bf16.mxu0 %v5644_v57  ;;  %v5714_v62 = vld [vmem:[#allocation4 + $0x508] ss:$16 sps:$4 sm:$0xff]  }
 0x1fa   :  { %3763 = vmatpush1.bf16.msra.mxu1 %v5639_v61  ;;  %3804 = vmatpush1.bf16.msra.mxu0 %v5642_v58  ;;  %v5719_v61 = vld [vmem:[#allocation4 + $0x6ec] ss:$16 sps:$4 sm:$0xff]  }
 0x1fb   :  { %3764 = vmatprep.subr.bf16.mxu1 %v5647_v47  ;;  %3805 = vmatprep.subr.bf16.mxu0 %v5650_v18  ;;  %v5767_v58 = vld [vmem:[%s6437_s5 + $0xac] ss:$12 sps:$4 sm:$0xff]   ;;  %v2254_v47 = vrot.slane %v6102_v19, %v6051_v29  ;;  %v2258_v18 = vrot.slane %v6102_v19, %v6032_v31 }
 0x1fe   :  { %3765 = vmatpush1.bf16.msra.mxu1 %v5645_v63  ;;  %3806 = vmatpush1.bf16.msra.mxu0 %v5648_v60  ;;  %v5717_v63 = vld [vmem:[#allocation4 + $0x6e8] ss:$16 sps:$4 sm:$0xff]   ;;  %v5722_v60 = vld [vmem:[#allocation4 + $0x6cc] ss:$16 sps:$4 sm:$0xff]  }
 0x1ff   :  { %3766 = vmatprep.subr.bf16.mxu1 %v5653_v0  ;;  %3807 = vmatprep.subr.bf16.mxu0 %v5656_v59  ;;  %v5765_v0 = vld [vmem:[%s6437_s5 + $0xa8] ss:$12 sps:$4 sm:$0xff]  }
 0x202   :  { %3767 = vmatpush1.bf16.msra.mxu1 %v5651_v1  ;;  %3808 = vmatpush1.bf16.msra.mxu0 %v5654_v2  ;;  %v5770_v1 = vld [vmem:[%s6437_s5 + $0x94] ss:$12 sps:$4 sm:$0xff]  }
 0x203   :  { %3768 = vmatprep.subr.bf16.mxu1 %v5659_v3  ;;  %3809 = vmatprep.subr.bf16.mxu0 %v5662_v4 }
 0x206   :  { %3769 = vmatpush1.bf16.msra.mxu1 %v5657_v5  ;;  %3810 = vmatpush1.bf16.msra.mxu0 %v5660_v6  ;;  %v5720_v5 = vld [vmem:[#allocation4 + $0x6c8] ss:$16 sps:$4 sm:$0xff]  }
 0x207   :  { %3770 = vmatprep.subr.bf16.mxu1 %v5665_v7  ;;  %3811 = vmatprep.subr.bf16.mxu0 %v5668_v8  ;;  %v5725_v7 = vld [vmem:[#allocation4 + $0x6ac] ss:$16 sps:$4 sm:$0xff]  }
 0x208   :  { %v5768_v8 = vld [vmem:[%s6437_s5 + $0x90] ss:$12 sps:$4 sm:$0xff]  }
 0x20a   :  { %3771 = vmatpush1.bf16.msra.mxu1 %v5663_v9  ;;  %3812 = vmatpush1.bf16.msra.mxu0 %v5666_v10  ;;  %v5723_v10 = vld [vmem:[#allocation4 + $0x6a8] ss:$16 sps:$4 sm:$0xff]  }
 0x20b   :  { %3772 = vmatprep.subr.bf16.mxu1 %v5671_v11  ;;  %3813 = vmatprep.subr.bf16.mxu0 %v5674_v12  ;;  %v5728_v11 = vld [vmem:[#allocation4 + $0x68c] ss:$16 sps:$4 sm:$0xff]   ;;  %v5771_v12 = vld [vmem:[%s6437_s5 + $0x78] ss:$12 sps:$4 sm:$0xff]  }
 0x20e   :  { %3773 = vmatpush2.bf16.msra.mxu1 %v5669_v13  ;;  %3814 = vmatpush2.bf16.msra.mxu0 %v5672_v14  ;;  %v5776_v13 = vld [vmem:[%s6437_s5 + $0x64] ss:$12 sps:$4 sm:$0xff]   ;;  %v5726_v14 = vld [vmem:[#allocation4 + $0x688] ss:$16 sps:$4 sm:$0xff]  }
 0x20f   :  { %3774 = vmatprep.subr.bf16.mxu1 %v5677_v15  ;;  %3815 = vmatprep.subr.bf16.mxu0 %v5680_v17  ;;  %v5731_v15 = vld [vmem:[#allocation4 + $0x66c] ss:$16 sps:$4 sm:$0xff]  }
 0x210   :  { %v5774_v17 = vld [vmem:[%s6437_s5 + $0x60] ss:$12 sps:$4 sm:$0xff]  }
 0x212   :  { %3775 = vmatpush2.bf16.msra.mxu1 %v5675_v20  ;;  %3816 = vmatpush2.bf16.msra.mxu0 %v5678_v21  ;;  %v5779_v20 = vld [vmem:[%s6437_s5 + $0x4c] ss:$12 sps:$4 sm:$0xff]  }
 0x213   :  { %3776 = vmatprep.subr.bf16.mxu1 %v5683_v23  ;;  %3817 = vmatprep.subr.bf16.mxu0 %v5686_v24  ;;  %v5729_v21 = vld [vmem:[#allocation4 + $0x668] ss:$16 sps:$4 sm:$0xff]   ;;  %v5734_v23 = vld [vmem:[#allocation4 + $0x64c] ss:$16 sps:$4 sm:$0xff]  }
 0x214   :  { %v5777_v24 = vld [vmem:[%s6437_s5 + $0x48] ss:$12 sps:$4 sm:$0xff]  }
 0x216   :  { %3777 = vmatpush2.bf16.msra.mxu1 %v5681_v25  ;;  %3818 = vmatpush2.bf16.msra.mxu0 %v5684_v26  ;;  %v5782_v25 = vld [vmem:[%s6437_s5 + $0x34] ss:$12 sps:$4 sm:$0xff]   ;;  %v5732_v26 = vld [vmem:[#allocation4 + $0x648] ss:$16 sps:$4 sm:$0xff]  }
 0x217   :  { %3778 = vmatprep.subr.bf16.mxu1 %v5689_v27  ;;  %3819 = vmatprep.subr.bf16.mxu0 %v5692_v53  ;;  %v5737_v27 = vld [vmem:[#allocation4 + $0x62c] ss:$16 sps:$4 sm:$0xff]  }
 0x218   :  { %v5780_v53 = vld [vmem:[%s6437_s5 + $0x30] ss:$12 sps:$4 sm:$0xff]  }
 0x21a   :  { %3779 = vmatpush2.bf16.msra.mxu1 %v5687_v28  ;;  %3820 = vmatpush2.bf16.msra.mxu0 %v5690_v30  ;;  %v5785_v28 = vld [vmem:[%s6437_s5 + $0x1c] ss:$12 sps:$4 sm:$0xff]  }
 0x21b   :  { %3780 = vmatprep.subr.bf16.mxu1 %v5695_v32  ;;  %3821 = vmatprep.subr.bf16.mxu0 %v5698_v34  ;;  %v5735_v30 = vld [vmem:[#allocation4 + $0x628] ss:$16 sps:$4 sm:$0xff]   ;;  %v5740_v32 = vld [vmem:[#allocation4 + $0x60c] ss:$16 sps:$4 sm:$0xff]  }
 0x21c   :  { %v5783_v34 = vld [vmem:[%s6437_s5 + $0x18] ss:$12 sps:$4 sm:$0xff]  }
 0x21e   :  { %3781 = vmatpush2.bf16.msra.mxu1 %v5693_v35  ;;  %3822 = vmatpush2.bf16.msra.mxu0 %v5696_v36  ;;  %v5788_v35 = vld [vmem:[%s6437_s5 + $0x4] ss:$12 sps:$4 sm:$0xff]   ;;  %v5738_v36 = vld [vmem:[#allocation4 + $0x608] ss:$16 sps:$4 sm:$0xff]  }
 0x21f   :  { %3782 = vmatprep.subr.bf16.mxu1 %v5701_v37  ;;  %3823 = vmatprep.subr.bf16.mxu0 %v5704_v38  ;;  %v5743_v37 = vld [vmem:[#allocation4 + $0x7ec] ss:$16 sps:$4 sm:$0xff]  }
 0x220   :  { %v5786_v38 = vld [vmem:[%s6437_s5] ss:$12 sps:$4 sm:$0xff]  }
 0x221   :  { %v3585_v45 = vpop.f32.mrf.mxu0 }
 0x222   :  { %3783 = vmatpush2.bf16.msra.mxu1 %v5699_v33  ;;  %3824 = vmatpush2.bf16.msra.mxu0 %v5702_v41  ;;  %v3586_v59 = vadd.f32 %v3585_v45, %v2254_v47  ;;  %v5791_v33 = vld [vmem:[%s6437_s5 + $0x16c] ss:$12 sps:$4 sm:$0xff]   ;;  %v5794_v45 = vld [vmem:[%s6437_s5 + $0x154] ss:$12 sps:$4 sm:$0xff]  }
 0x223   :  { %v3587_v16 = vpop.f32.mrf.mxu0  ;;  %3784 = vmatprep.subr.bf16.mxu1 %v5707_v42  ;;  %3825 = vmatprep.subr.bf16.mxu0 %v5710_v44  ;;  %v5741_v41 = vld [vmem:[#allocation4 + $0x7e8] ss:$16 sps:$4 sm:$0xff]   ;;  %v5746_v42 = vld [vmem:[#allocation4 + $0x7cc] ss:$16 sps:$4 sm:$0xff]  }
 0x224   :  { %v3588_v3 = vadd.f32 %v3587_v16, %v2258_v18  ;;  %v5789_v44 = vld [vmem:[%s6437_s5 + $0x168] ss:$12 sps:$4 sm:$0xff]   ;;  %v5792_v16 = vld [vmem:[%s6437_s5 + $0x150] ss:$12 sps:$4 sm:$0xff]   ;;  %v5803_v47 = vld [vmem:[%s6437_s5 + $0x10c] ss:$12 sps:$4 sm:$0xff]  }
 0x225   :  { %v3589_v55 = vpop.f32.mrf.mxu0  ;;  %v5753_v18 = vld [vmem:[#allocation4 + $0x768] ss:$16 sps:$4 sm:$0xff]  }
 0x226   :  { %3785 = vmatpush2.bf16.msra.mxu1 %v5705_v48  ;;  %3826 = vmatpush2.bf16.msra.mxu0 %v5708_v50  ;;  %v5744_v48 = vld [vmem:[#allocation4 + $0x7c8] ss:$16 sps:$4 sm:$0xff]   ;;  %v5749_v50 = vld [vmem:[#allocation4 + $0x7ac] ss:$16 sps:$4 sm:$0xff]  }
 0x227   :  { %v3590_v57 = vpop.f32.mrf.mxu0  ;;  %3786 = vmatprep.subr.bf16.mxu1 %v5713_v51  ;;  %3827 = vmatprep.subr.bf16.mxu0 %v5716_v52  ;;  %v5797_v51 = vld [vmem:[%s6437_s5 + $0x13c] ss:$12 sps:$4 sm:$0xff]  }
 0x228   :  { %v5747_v52 = vld [vmem:[#allocation4 + $0x7a8] ss:$16 sps:$4 sm:$0xff]   ;;  %v5752_v55 = vld [vmem:[#allocation4 + $0x78c] ss:$16 sps:$4 sm:$0xff]  }
 0x229   :  { %v5750_v57 = vld [vmem:[#allocation4 + $0x788] ss:$16 sps:$4 sm:$0xff]  }
 0x22a   :  { %3787 = vmatpush2.bf16.msra.mxu1 %v5711_v40  ;;  %3828 = vmatpush2.bf16.msra.mxu0 %v5714_v62  ;;  %v5795_v40 = vld [vmem:[%s6437_s5 + $0x138] ss:$12 sps:$4 sm:$0xff]  }
 0x22b   :  { %3838 = vmatprep.subr.bf16.mxu1 %v5719_v61  ;;  %4544 = vmatprep.subr.bf16.mxu0 %v5767_v58  ;;  %v5800_v62 = vld [vmem:[%s6437_s5 + $0x124] ss:$12 sps:$4 sm:$0xff]   ;;  %v5755_v61 = vld [vmem:[#allocation4 + $0x76c] ss:$16 sps:$4 sm:$0xff]  }
 0x22c   :  { %v5798_v58 = vld [vmem:[%s6437_s5 + $0x120] ss:$12 sps:$4 sm:$0xff]  }
 0x22d   :  { %3789 = vmatmul.mubr.bf16.vlgmr.msra.gmra.mxu1 %v6071_v22  ;;  %3830 = vmatmul.mubr.bf16.vlgmr.msra.gmra.mxu0 %v6081_v49  ;;  %v3626_v2 = vpop.f32.mrf.mxu1  ;;  %v5773_v22 = vld [vmem:[%s6437_s5 + $0x7c] ss:$12 sps:$4 sm:$0xff]  }
 0x22e   :  { %v6119_v4 = vadd.f32 %v3626_v2, %v3586_v59  ;;  %3839 = vmatpush1.bf16.msra.mxu1 %v5717_v63  ;;  %3870 = vmatprep.mubr.bf16.mxu1 %v6090_v43  ;;  %v5758_v63 = vld [vmem:[#allocation4 + $0x74c] ss:$16 sps:$4 sm:$0xff]   ;;  %v5756_v59 = vld [vmem:[#allocation4 + $0x748] ss:$16 sps:$4 sm:$0xff]  }
 0x22f   :  { %v3628_v6 = vpop.f32.mrf.mxu1  ;;  %3840 = vmatprep.subr.bf16.mxu1 %v5722_v60  ;;  %4545 = vmatpush1.bf16.msra.mxu0 %v5765_v0  ;;  %v5801_v60 = vld [vmem:[%s6437_s5 + $0x108] ss:$12 sps:$4 sm:$0xff]   ;;  %v5804_v2 = vld [vmem:[%s6437_s5 + $0xf0] ss:$12 sps:$4 sm:$0xff]  }
 0x230   :  { %v6125_v9 = vadd.f32 %v3628_v6, %v3588_v3  ;;  %4546 = vmatprep.subr.bf16.mxu0 %v5770_v1  ;;  %v5806_v0 = vld [vmem:[%s6437_s5 + $0xf4] ss:$12 sps:$4 sm:$0xff]   ;;  %v5761_v1 = vld [vmem:[#allocation4 + $0x72c] ss:$16 sps:$4 sm:$0xff]  }
 0x231   :  { %v3630_v49 = vpop.f32.mrf.mxu1  ;;  %v5809_v3 = vld [vmem:[%s6437_s5 + $0xdc] ss:$12 sps:$4 sm:$0xff]  }
 0x232   :  { %3841 = vmatpush1.bf16.msra.mxu1 %v5720_v5  ;;  %v5759_v5 = vld [vmem:[#allocation4 + $0x728] ss:$16 sps:$4 sm:$0xff]   ;;  %v5764_v6 = vld [vmem:[#allocation4 + $0x70c] ss:$16 sps:$4 sm:$0xff]  }
 0x233   :  { %v3631_v43 = vpop.f32.mrf.mxu1  ;;  %3842 = vmatprep.subr.bf16.mxu1 %v5725_v7  ;;  %4547 = vmatpush1.bf16.msra.mxu0 %v5768_v8  ;;  %v5807_v7 = vld [vmem:[%s6437_s5 + $0xd8] ss:$12 sps:$4 sm:$0xff]   ;;  %v5810_v49 = vld [vmem:[%s6437_s5 + $0xc0] ss:$12 sps:$4 sm:$0xff]  }
 0x234   :  { %4548 = vmatprep.subr.bf16.mxu0 %v5773_v22  ;;  %v5812_v8 = vld [vmem:[%s6437_s5 + $0xc4] ss:$12 sps:$4 sm:$0xff]   ;;  %v5762_v22 = vld [vmem:[#allocation4 + $0x708] ss:$16 sps:$4 sm:$0xff]  }
 0x236   :  { %3843 = vmatpush1.bf16.msra.mxu1 %v5723_v10  ;;  %v5813_v10 = vld [vmem:[%s6437_s5 + $0x170] ss:$12 sps:$4 sm:$0xff]  }
 0x237   :  { %3844 = vmatprep.subr.bf16.mxu1 %v5728_v11  ;;  %4549 = vmatpush1.bf16.msra.mxu0 %v5771_v12 }
 0x238   :  { %4550 = vmatprep.subr.bf16.mxu0 %v5776_v13 }
 0x23a   :  { %3845 = vmatpush1.bf16.msra.mxu1 %v5726_v14 }
 0x23b   :  { %3846 = vmatprep.subr.bf16.mxu1 %v5731_v15  ;;  %4551 = vmatpush1.bf16.msra.mxu0 %v5774_v17  ;;  %v5829_v15 = vld [vmem:[%s6437_s5 + $0x228] ss:$12 sps:$4 sm:$0xff]   ;;  %v5831_v17 = vld [vmem:[%s6437_s5 + $0x22c] ss:$12 sps:$4 sm:$0xff]  }
 0x23c   :  { %4552 = vmatprep.subr.bf16.mxu0 %v5779_v20  ;;  %v5834_v20 = vld [vmem:[%s6437_s5 + $0x214] ss:$12 sps:$4 sm:$0xff]  }
 0x23e   :  { %3847 = vmatpush1.bf16.msra.mxu1 %v5729_v21  ;;  %v5835_v21 = vld [vmem:[%s6437_s5 + $0x1f8] ss:$12 sps:$4 sm:$0xff]  }
 0x23f   :  { %3848 = vmatprep.subr.bf16.mxu1 %v5734_v23  ;;  %4553 = vmatpush1.bf16.msra.mxu0 %v5777_v24  ;;  %v5840_v23 = vld [vmem:[%s6437_s5 + $0x1e4] ss:$12 sps:$4 sm:$0xff]   ;;  %v5838_v24 = vld [vmem:[%s6437_s5 + $0x1e0] ss:$12 sps:$4 sm:$0xff]  }
 0x240   :  { %4554 = vmatprep.subr.bf16.mxu0 %v5782_v25  ;;  %v5843_v25 = vld [vmem:[%s6437_s5 + $0x1cc] ss:$12 sps:$4 sm:$0xff]  }
 0x242   :  { %3849 = vmatpush1.bf16.msra.mxu1 %v5732_v26  ;;  %v5841_v26 = vld [vmem:[%s6437_s5 + $0x1c8] ss:$12 sps:$4 sm:$0xff]  }
 0x243   :  { %3850 = vmatprep.subr.bf16.mxu1 %v5737_v27  ;;  %4555 = vmatpush1.bf16.msra.mxu0 %v5780_v53  ;;  %v5846_v27 = vld [vmem:[%s6437_s5 + $0x1b4] ss:$12 sps:$4 sm:$0xff]   ;;  %v5844_v53 = vld [vmem:[%s6437_s5 + $0x1b0] ss:$12 sps:$4 sm:$0xff]  }
 0x244   :  { %4556 = vmatprep.subr.bf16.mxu0 %v5785_v28  ;;  %v5849_v28 = vld [vmem:[%s6437_s5 + $0x19c] ss:$12 sps:$4 sm:$0xff]  }
 0x246   :  { %3851 = vmatpush1.bf16.msra.mxu1 %v5735_v30  ;;  %v5847_v30 = vld [vmem:[%s6437_s5 + $0x198] ss:$12 sps:$4 sm:$0xff]  }
 0x247   :  { %3852 = vmatprep.subr.bf16.mxu1 %v5740_v32  ;;  %4557 = vmatpush1.bf16.msra.mxu0 %v5783_v34  ;;  %v5852_v32 = vld [vmem:[%s6437_s5 + $0x184] ss:$12 sps:$4 sm:$0xff]   ;;  %v5850_v34 = vld [vmem:[%s6437_s5 + $0x180] ss:$12 sps:$4 sm:$0xff]  }
 0x248   :  { %4558 = vmatprep.subr.bf16.mxu0 %v5788_v35  ;;  %v5855_v35 = vld [vmem:[%s6437_s5 + $0x2ec] ss:$12 sps:$4 sm:$0xff]  }
 0x24a   :  { %3853 = vmatpush1.bf16.msra.mxu1 %v5738_v36  ;;  %v5853_v36 = vld [vmem:[%s6437_s5 + $0x2e8] ss:$12 sps:$4 sm:$0xff]  }
 0x24b   :  { %3854 = vmatprep.subr.bf16.mxu1 %v5743_v37  ;;  %4559 = vmatpush1.bf16.msra.mxu0 %v5786_v38  ;;  %v5858_v37 = vld [vmem:[%s6437_s5 + $0x2d4] ss:$12 sps:$4 sm:$0xff]   ;;  %v5856_v38 = vld [vmem:[%s6437_s5 + $0x2d0] ss:$12 sps:$4 sm:$0xff]  }
 0x24c   :  { %4560 = vmatprep.subr.bf16.mxu0 %v5791_v33  ;;  %v5861_v33 = vld [vmem:[%s6437_s5 + $0x2bc] ss:$12 sps:$4 sm:$0xff]  }
 0x24e   :  { %3855 = vmatpush2.bf16.msra.mxu1 %v5741_v41  ;;  %v5859_v41 = vld [vmem:[%s6437_s5 + $0x2b8] ss:$12 sps:$4 sm:$0xff]  }
 0x24f   :  { %3856 = vmatprep.subr.bf16.mxu1 %v5746_v42  ;;  %4561 = vmatpush2.bf16.msra.mxu0 %v5789_v44  ;;  %v5864_v42 = vld [vmem:[%s6437_s5 + $0x2a4] ss:$12 sps:$4 sm:$0xff]   ;;  %v5862_v44 = vld [vmem:[%s6437_s5 + $0x2a0] ss:$12 sps:$4 sm:$0xff]  }
 0x250   :  { %4562 = vmatprep.subr.bf16.mxu0 %v5794_v45  ;;  %v5867_v45 = vld [vmem:[%s6437_s5 + $0x28c] ss:$12 sps:$4 sm:$0xff]  }
 0x252   :  { %3857 = vmatpush2.bf16.msra.mxu1 %v5744_v48  ;;  %v5865_v48 = vld [vmem:[%s6437_s5 + $0x288] ss:$12 sps:$4 sm:$0xff]  }
 0x253   :  { %3858 = vmatprep.subr.bf16.mxu1 %v5749_v50  ;;  %4563 = vmatpush2.bf16.msra.mxu0 %v5792_v16  ;;  %v5870_v50 = vld [vmem:[%s6437_s5 + $0x274] ss:$12 sps:$4 sm:$0xff]   ;;  %v5868_v16 = vld [vmem:[%s6437_s5 + $0x270] ss:$12 sps:$4 sm:$0xff]  }
 0x254   :  { %4564 = vmatprep.subr.bf16.mxu0 %v5797_v51 }
 0x256   :  { %3859 = vmatpush2.bf16.msra.mxu1 %v5747_v52 }
 0x257   :  { %3860 = vmatprep.subr.bf16.mxu1 %v5752_v55  ;;  %4565 = vmatpush2.bf16.msra.mxu0 %v5795_v40  ;;  %v5873_v55 = vld [vmem:[%s6437_s5 + $0x25c] ss:$12 sps:$4 sm:$0xff]  }
 0x258   :  { %4566 = vmatprep.subr.bf16.mxu0 %v5800_v62 }
 0x25a   :  { %3861 = vmatpush2.bf16.msra.mxu1 %v5750_v57  ;;  %v5871_v57 = vld [vmem:[%s6437_s5 + $0x258] ss:$12 sps:$4 sm:$0xff]  }
 0x25b   :  { %3862 = vmatprep.subr.bf16.mxu1 %v5755_v61  ;;  %4567 = vmatpush2.bf16.msra.mxu0 %v5798_v58 }
 0x25c   :  { %4568 = vmatprep.subr.bf16.mxu0 %v5803_v47 }
 0x25e   :  { %3863 = vmatpush2.bf16.msra.mxu1 %v5753_v18 }
 0x25f   :  { %3864 = vmatprep.subr.bf16.mxu1 %v5758_v63  ;;  %4569 = vmatpush2.bf16.msra.mxu0 %v5801_v60 }
 0x260   :  { %4570 = vmatprep.subr.bf16.mxu0 %v5806_v0  ;;  %v5876_v0 = vld [vmem:[%s6437_s5 + $0x244] ss:$12 sps:$4 sm:$0xff]  }
 0x262   :  { %3865 = vmatpush2.bf16.msra.mxu1 %v5756_v59  ;;  %v5874_v59 = vld [vmem:[%s6437_s5 + $0x240] ss:$12 sps:$4 sm:$0xff]  }
 0x263   :  { %3866 = vmatprep.subr.bf16.mxu1 %v5761_v1  ;;  %4571 = vmatpush2.bf16.msra.mxu0 %v5804_v2 }
 0x264   :  { %4572 = vmatprep.subr.bf16.mxu0 %v5809_v3 }
 0x266   :  { %3867 = vmatpush2.bf16.msra.mxu1 %v5759_v5  ;;  %v5814_v5 = vld [vmem:[%s6437_s5 + $0xb0] ss:$12 sps:$4 sm:$0xff]  }
 0x267   :  { %3868 = vmatprep.subr.bf16.mxu1 %v5764_v6  ;;  %4573 = vmatpush2.bf16.msra.mxu0 %v5807_v7  ;;  %v5815_v7 = vld [vmem:[%s6437_s5 + $0x158] ss:$12 sps:$4 sm:$0xff]  }
 0x268   :  { %4574 = vmatprep.subr.bf16.mxu0 %v5812_v8  ;;  %v5877_v8 = vld [vmem:[%s6437_s5 + $0x2f0] ss:$12 sps:$4 sm:$0xff]  }
 0x26a   :  { %3869 = vmatpush2.bf16.msra.mxu1 %v5762_v22  ;;  %v5816_v22 = vld [vmem:[%s6437_s5 + $0x98] ss:$12 sps:$4 sm:$0xff]  }
 0x26b   :  { %4575 = vmatpush2.bf16.msra.mxu0 %v5810_v49  ;;  %4585 = vmatprep.subr.bf16.mxu1 %v5831_v17  ;;  %v5817_v49 = vld [vmem:[%s6437_s5 + $0x140] ss:$12 sps:$4 sm:$0xff]  }
 0x26c   :  { %5327 = vmatprep.subr.bf16.mxu0 %v5813_v10  ;;  %v5818_v10 = vld [vmem:[%s6437_s5 + $0x80] ss:$12 sps:$4 sm:$0xff]  }
 0x26d   :  { %3871 = vmatmul.mubr.bf16.vlgmr.msra.gmra.mxu1 %v6092_v46  ;;  %v3667_v43 = vpop.f32.mrf.mxu0  ;;  %v5832_v46 = vld [vmem:[%s6437_s5 + $0x210] ss:$12 sps:$4 sm:$0xff]   ;;  %v5825_v17 = vld [vmem:[%s6437_s5 + $0xe0] ss:$12 sps:$4 sm:$0xff]  }
 0x26e   :  { %v6216_v11 = vadd.f32 %v3667_v43, %v6119_v4  ;;  %4586 = vmatpush1.bf16.msra.mxu1 %v5829_v15  ;;  %v5837_v4 = vld [vmem:[%s6437_s5 + $0x1fc] ss:$12 sps:$4 sm:$0xff]   ;;  %v5824_v15 = vld [vmem:[%s6437_s5 + $0x38] ss:$12 sps:$4 sm:$0xff]  }
 0x26f   :  { %v3669_v12 = vpop.f32.mrf.mxu0  ;;  %4587 = vmatprep.subr.bf16.mxu1 %v5834_v20  ;;  %v5819_v43 = vld [vmem:[%s6437_s5 + $0x128] ss:$12 sps:$4 sm:$0xff]   ;;  %v5826_v20 = vld [vmem:[%s6437_s5 + $0x20] ss:$12 sps:$4 sm:$0xff]  }
 0x270   :  { %v3670_v40 = vadd.f32 %v3669_v12, %v6125_v9  ;;  %v5821_v12 = vld [vmem:[%s6437_s5 + $0x110] ss:$12 sps:$4 sm:$0xff]  }
 0x271   :  { %v3671_v13 = vpop.f32.mrf.mxu0 }
 0x272   :  { %4588 = vmatpush1.bf16.msra.mxu1 %v5832_v46  ;;  %v5822_v13 = vld [vmem:[%s6437_s5 + $0x50] ss:$12 sps:$4 sm:$0xff]   ;;  %v5827_v46 = vld [vmem:[%s6437_s5 + $0xc8] ss:$12 sps:$4 sm:$0xff]  }
 0x273   :  { %v3672_v14 = vpop.f32.mrf.mxu0  ;;  %4589 = vmatprep.subr.bf16.mxu1 %v5837_v4  ;;  %v5828_v4 = vld [vmem:[%s6437_s5 + $0x8] ss:$12 sps:$4 sm:$0xff]  }
 0x274   :  { %v5823_v14 = vld [vmem:[%s6437_s5 + $0xf8] ss:$12 sps:$4 sm:$0xff]  }
 0x276   :  { %4590 = vmatpush1.bf16.msra.mxu1 %v5835_v21  ;;  %v2262_v21 = vrot.slane %v6102_v19, %v6058_v39 }
 0x277   :  { %4591 = vmatprep.subr.bf16.mxu1 %v5840_v23 }
 0x27a   :  { %4592 = vmatpush1.bf16.msra.mxu1 %v5838_v24 }
 0x27b   :  { %4593 = vmatprep.subr.bf16.mxu1 %v5843_v25 }
 0x27e   :  { %4594 = vmatpush1.bf16.msra.mxu1 %v5841_v26 }
 0x27f   :  { %4595 = vmatprep.subr.bf16.mxu1 %v5846_v27 }
 0x282   :  { %4596 = vmatpush1.bf16.msra.mxu1 %v5844_v53 }
 0x283   :  { %4597 = vmatprep.subr.bf16.mxu1 %v5849_v28 }
 0x286   :  { %4598 = vmatpush1.bf16.msra.mxu1 %v5847_v30 }
 0x287   :  { %4599 = vmatprep.subr.bf16.mxu1 %v5852_v32 }
 0x28a   :  { %4600 = vmatpush1.bf16.msra.mxu1 %v5850_v34 }
 0x28b   :  { %4601 = vmatprep.subr.bf16.mxu1 %v5855_v35 }
 0x28e   :  { %4602 = vmatpush2.bf16.msra.mxu1 %v5853_v36  ;;  %v2266_v36 = vrot.slane %v6102_v19, %v329_v56  ;;  %v5879_v56 = vld [vmem:[%s6437_s5 + $0x2d8] ss:$12 sps:$4 sm:$0xff]  }
 0x28f   :  { %4603 = vmatprep.subr.bf16.mxu1 %v5858_v37  ;;  %v5880_v19 = vld [vmem:[%s6437_s5 + $0x218] ss:$12 sps:$4 sm:$0xff]  }
 0x292   :  { %4604 = vmatpush2.bf16.msra.mxu1 %v5856_v38 }
 0x293   :  { %4605 = vmatprep.subr.bf16.mxu1 %v5861_v33 }
 0x296   :  { %4606 = vmatpush2.bf16.msra.mxu1 %v5859_v41 }
 0x297   :  { %4607 = vmatprep.subr.bf16.mxu1 %v5864_v42 }
 0x29a   :  { %4608 = vmatpush2.bf16.msra.mxu1 %v5862_v44 }
 0x29b   :  { %4609 = vmatprep.subr.bf16.mxu1 %v5867_v45 }
 0x29e   :  { %4610 = vmatpush2.bf16.msra.mxu1 %v5865_v48 }
 0x29f   :  { %4611 = vmatprep.subr.bf16.mxu1 %v5870_v50 }
 0x2a2   :  { %4612 = vmatpush2.bf16.msra.mxu1 %v5868_v16 }
 0x2a3   :  { %4613 = vmatprep.subr.bf16.mxu1 %v5873_v55  ;;  %v5878_v55 = vld [vmem:[%s6437_s5 + $0x230] ss:$12 sps:$4 sm:$0xff]  }
 0x2a6   :  { %4614 = vmatpush2.bf16.msra.mxu1 %v5871_v57  ;;  %v5883_v57 = vld [vmem:[%s6437_s5 + $0x2a8] ss:$12 sps:$4 sm:$0xff]  }
 0x2a7   :  { %4615 = vmatprep.subr.bf16.mxu1 %v5876_v0  ;;  %v5890_v0 = vld [vmem:[%s6437_s5 + $0x1a0] ss:$12 sps:$4 sm:$0xff]  }
 0x2aa   :  { %4616 = vmatpush2.bf16.msra.mxu1 %v5874_v59  ;;  %v5892_v59 = vld [vmem:[%s6437_s5 + $0x188] ss:$12 sps:$4 sm:$0xff]  }
 0x2ab   :  { %5349 = vmatprep.subr.bf16.mxu1 %v5877_v8 }
 0x2ad   :  { %v3749_v51 = vpop.f32.mrf.mxu0  ;;  %v3708_v52 = vpop.f32.mrf.mxu1 }
 0x2ae   :  { %v3709_v62 = vadd.f32 %v3708_v52, %v6216_v11  ;;  %v5820_v11 = vld [vmem:[%s6437_s5 + $0x68] ss:$12 sps:$4 sm:$0xff]   ;;  %v3750_v23 = vadd.f32 %v3749_v51, %v2262_v21 }
 0x2af   :  { %v6310_v61 = vpop.f32.mrf.mxu0  ;;  %v3710_v58 = vpop.f32.mrf.mxu1 }
 0x2b0   :  { %v3711_v47 = vadd.f32 %v3710_v58, %v3670_v40  ;;  %v3879_v18 = vmax.f32 %v3709_v62, 0.0  ;;  %v3752_v37 = vadd.f32 %v6310_v61, %v2266_v36  ;;  %v5881_v40 = vld [vmem:[%s6437_s5 + $0x2c0] ss:$12 sps:$4 sm:$0xff]   ;;  %v5884_v61 = vld [vmem:[%s6437_s5 + $0x1e8] ss:$12 sps:$4 sm:$0xff]  }
 0x2b1   :  { %v3753_v63 = vpop.f32.mrf.mxu0  ;;  %v3712_v60 = vpop.f32.mrf.mxu1  ;;  %v5882_v62 = vld [vmem:[%s6437_s5 + $0x200] ss:$12 sps:$4 sm:$0xff]   ;;  %v5885_v58 = vld [vmem:[%s6437_s5 + $0x290] ss:$12 sps:$4 sm:$0xff]  }
 0x2b2   :  { %v3880_v9 = vmax.f32 %v3711_v47, 0.0  ;;  %v3883_v6 = vpack.c.bf16 %v3879_v18, %v3879_v18  ;;  %v5886_v47 = vld [vmem:[%s6437_s5 + $0x1d0] ss:$12 sps:$4 sm:$0xff]   ;;  %v5887_v18 = vld [vmem:[%s6437_s5 + $0x278] ss:$12 sps:$4 sm:$0xff]  }
 0x2b3   :  { %v3754_v1 = vpop.f32.mrf.mxu0  ;;  %v3713_v2 = vpop.f32.mrf.mxu1  ;;  %v5888_v63 = vld [vmem:[%s6437_s5 + $0x1b8] ss:$12 sps:$4 sm:$0xff]   ;;  %v5889_v60 = vld [vmem:[%s6437_s5 + $0x260] ss:$12 sps:$4 sm:$0xff]  }
 0x2b4   :  { %v3884_v3 = vpack.c.bf16 %v3880_v9, %v3880_v9  ;;  %v5891_v9 = vld [vmem:[%s6437_s5 + $0x248] ss:$12 sps:$4 sm:$0xff]  }
 0x2b6   :  { %4576 = vmatprep.mubr.bf16.mxu0 %v3884_v3 }
 0x2b7   :  { %4577 = vmatmul.mubr.bf16.vlgmr.msra.gmra.mxu0 %v3883_v6 }
 0x2b8   :  { %5328 = vmatpush3.bf16.msra.mxu0 %v5814_v5  ;;  %4658 = vmatprep.mubr.bf16.mxu0 %v3884_v3 }
 0x2b9   :  { %5329 = vmatprep.subr.bf16.mxu0 %v5815_v7 }
 0x2bc   :  { %5330 = vmatpush3.bf16.msra.mxu0 %v5816_v22 }
 0x2bd   :  { %5331 = vmatprep.subr.bf16.mxu0 %v5817_v49 }
 0x2c0   :  { %5332 = vmatpush3.bf16.msra.mxu0 %v5818_v10  ;;  %v4015_v10 = vld [vmem:[%s6438_s6] sm:$0x7] }
 0x2c1   :  { %5333 = vmatprep.subr.bf16.mxu0 %v5819_v43  ;;  %v4020_v43 = vrot.slane %v4015_v10, %v6051_v29  ;;  %v4028_v29 = vrot.slane %v4015_v10, %v6058_v39 }
 0x2c4   :  { %5334 = vmatpush3.bf16.msra.mxu0 %v5820_v11  ;;  %v4024_v11 = vrot.slane %v4015_v10, %v6032_v31 }
 0x2c5   :  { %5335 = vmatprep.subr.bf16.mxu0 %v5821_v12 }
 0x2c8   :  { %5336 = vmatpush3.bf16.msra.mxu0 %v5822_v13 }
 0x2c9   :  { %5337 = vmatprep.subr.bf16.mxu0 %v5823_v14 }
 0x2cc   :  { %5338 = vmatpush3.bf16.msra.mxu0 %v5824_v15 }
 0x2cd   :  { %5339 = vmatprep.subr.bf16.mxu0 %v5825_v17 }
 0x2d0   :  { %5340 = vmatpush3.bf16.msra.mxu0 %v5826_v20 }
 0x2d1   :  { %5341 = vmatprep.subr.bf16.mxu0 %v5827_v46 }
 0x2d4   :  { %5342 = vmatpush3.bf16.msra.mxu0 %v5828_v4 }
 0x2d7   :  { %4659 = vmatmul.mubr.bf16.vlgmr.msra.gmra.mxu0 %v3883_v6 }
 0x2ed   :  { %v3790_v24 = vpop.f32.mrf.mxu1  ;;  %v3831_v25 = vpop.f32.mrf.mxu0 }
 0x2ee   :  { %v3791_v26 = vadd.f32 %v3790_v24, %v3750_v23 }
 0x2ef   :  { %v3792_v27 = vpop.f32.mrf.mxu1  ;;  %v3833_v53 = vpop.f32.mrf.mxu0 }
 0x2f0   :  { %v3832_v28 = vadd.f32 %v3831_v25, %v3791_v26  ;;  %v3793_v38 = vadd.f32 %v3792_v27, %v3752_v37 }
 0x2f1   :  { %v3794_v30 = vpop.f32.mrf.mxu1  ;;  %v3835_v32 = vpop.f32.mrf.mxu0 }
 0x2f2   :  { %v3834_v41 = vadd.f32 %v3833_v53, %v3793_v38 }
 0x2f3   :  { %v3795_v34 = vpop.f32.mrf.mxu1  ;;  %v3836_v35 = vpop.f32.mrf.mxu0 }
 0x32d   :  { %v3872_v33 = vpop.f32.mrf.mxu1 }
 0x32e   :  { %v3873_v42 = vadd.f32 %v3872_v33, %v3832_v28 }
 0x32f   :  { %v3874_v44 = vpop.f32.mrf.mxu1 }
 0x330   :  { %v3875_v45 = vadd.f32 %v3874_v44, %v3834_v41  ;;  %v3881_v48 = vmax.f32 %v3873_v42, 0.0 }
 0x331   :  { %v3876_v50 = vpop.f32.mrf.mxu1 }
 0x332   :  { %v3882_v16 = vmax.f32 %v3875_v45, 0.0  ;;  %v3885_v54 = vpack.c.bf16 %v3881_v48, %v3881_v48 }
 0x333   :  { %v3877_v51 = vpop.f32.mrf.mxu1 }
 0x334   :  { %v3886_v52 = vpack.c.bf16 %v3882_v16, %v3882_v16 }
 0x336   :  { %4617 = vmatprep.mubr.bf16.mxu1 %v3886_v52 }
 0x337   :  { %4618 = vmatmul.mubr.bf16.vlgmr.msra.gmra.mxu1 %v3885_v54 }
 0x338   :  { %5350 = vmatpush3.bf16.msra.mxu1 %v5878_v55  ;;  %4698 = vmatprep.mubr.bf16.mxu1 %v3886_v52 }
 0x339   :  { %5351 = vmatprep.subr.bf16.mxu1 %v5879_v56 }
 0x33c   :  { %5352 = vmatpush3.bf16.msra.mxu1 %v5880_v19 }
 0x33d   :  { %5353 = vmatprep.subr.bf16.mxu1 %v5881_v40 }
 0x340   :  { %5354 = vmatpush3.bf16.msra.mxu1 %v5882_v62 }
 0x341   :  { %5355 = vmatprep.subr.bf16.mxu1 %v5883_v57 }
 0x344   :  { %5356 = vmatpush3.bf16.msra.mxu1 %v5884_v61 }
 0x345   :  { %5357 = vmatprep.subr.bf16.mxu1 %v5885_v58 }
 0x348   :  { %5358 = vmatpush3.bf16.msra.mxu1 %v5886_v47 }
 0x349   :  { %5359 = vmatprep.subr.bf16.mxu1 %v5887_v18 }
 0x34c   :  { %5360 = vmatpush3.bf16.msra.mxu1 %v5888_v63 }
 0x34d   :  { %5361 = vmatprep.subr.bf16.mxu1 %v5889_v60 }
 0x350   :  { %5362 = vmatpush3.bf16.msra.mxu1 %v5890_v0 }
 0x351   :  { %5363 = vmatprep.subr.bf16.mxu1 %v5891_v9 }
 0x354   :  { %5364 = vmatpush3.bf16.msra.mxu1 %v5892_v59 }
 0x357   :  { %4699 = vmatmul.mubr.bf16.vlgmr.msra.gmra.mxu1 %v3885_v54 }
 0x377   :  { %v4578_v1 = vpop.f32.mrf.mxu0 }
 0x378   :  { %v4579_v12 = vadd.f32 %v4578_v1, %v4020_v43 }
 0x379   :  { %v4580_v2 = vpop.f32.mrf.mxu0 }
 0x37a   :  { %v4581_v14 = vadd.f32 %v4580_v2, %v4024_v11 }
 0x37b   :  { %v4582_v3 = vpop.f32.mrf.mxu0 }
 0x37d   :  { %v4583_v5 = vpop.f32.mrf.mxu0 }
 0x397   :  { %v5343_v6 = vpop.f32.mrf.mxu0 }
 0x399   :  { %v5344_v7 = vpop.f32.mrf.mxu0 }
 0x39a   :  { %v5345_v8 = vadd.f32 %v5344_v7, %v5343_v6 }
 0x39b   :  { %v5346_v22 = vpop.f32.mrf.mxu0 }
 0x39c   :  { %v4661_v23 = vadd.f32 %v5345_v8, %v4028_v29 }
 0x39d   :  { %v5347_v49 = vpop.f32.mrf.mxu0 }
 0x3f7   :  { %v4619_v13 = vpop.f32.mrf.mxu1 }
 0x3f8   :  { %v4620_v15 = vadd.f32 %v4619_v13, %v4579_v12 }
 0x3f9   :  { %v4621_v17 = vpop.f32.mrf.mxu1 }
 0x3fa   :  { %4706 = vst [vmem:[%s6439_s7] sm:$0xff] %v4620_v15  ;;  %v4622_v20 = vadd.f32 %v4621_v17, %v4581_v14 }
 0x3fb   :  { %v4623_v46 = vpop.f32.mrf.mxu1 }
 0x3fc   :  { %4707 = vst [vmem:[%s6439_s7 + $0x8] sm:$0xff] %v4622_v20 }
 0x3fd   :  { %v4624_v4 = vpop.f32.mrf.mxu1 }
 0x417   :  { %v5365_v21 = vpop.f32.mrf.mxu1 }
 0x419   :  { %v5366_v31 = vpop.f32.mrf.mxu1 }
 0x41a   :  { %v5367_v24 = vadd.f32 %v5366_v31, %v5365_v21 }
 0x41b   :  { %v5368_v25 = vpop.f32.mrf.mxu1 }
 0x41c   :  { %v4701_v26 = vadd.f32 %v5367_v24, %v4661_v23 }
 0x41d   :  { %v5369_v27 = vpop.f32.mrf.mxu1 }
 0x41e   :  { %4708 = vst [vmem:[%s6439_s7 + $0x10] sm:$0xff] %v4701_v26 }
 0x41f   :  { %4713 = vsyncpa [#allocation3], 1 }
 0x420   :  { %4714 = vsyncpa [#allocation5], 1 }

</bundles_post_ra>
